<compile_context>
chip_gen: v5e
topology: v5e:2x2
jax: 0.10.0
libtpu: 0.0.40
codegen_flags: <defaults>
</compile_context>

<pallas_src>
import jax
import jax.numpy as jnp
from jax.experimental import pallas as pl
from jax.experimental.pallas import tpu as pltpu

_CLF_PAD = 128  # classifier output padded to a full lane width


# --------------------------------------------------------------------------
# Fused whole-network Pallas kernel (one image per grid step)
# --------------------------------------------------------------------------
def _make_dacnn_kernel(n_blocks, H0, W0, C):
    def kernel(xcol_ref, w1_ref, s1_ref, b1_ref, wg_ref, bs_ref, bb_ref,
               wc_ref, bc_ref, o_ref, pad_ref):
        # ---- conv_1 + bn_1 + relu : one im2col matmul (H0*W0, 27) x (27, C)
        acc = jnp.dot(xcol_ref[0], w1_ref[...],
                      preferred_element_type=jnp.float32)          # (H0*W0, C) f32
        h = jnp.maximum(acc * s1_ref[...] + b1_ref[...], 0.0)
        H, W = H0, W0
        h = h.reshape(H, W, C)                                      # f32 activation

        # ---- n_blocks x (SmallBlock + 2x2 max-pool), fully fused in VMEM
        for i in range(n_blocks):
            # zero-padded conv input lives in a VMEM scratch (halo = zeros)
            pad_ref[...] = jnp.zeros_like(pad_ref)
            pad_ref[1:H + 1, 1:W + 1, :] = h
            # 3x3 "same" conv as 9 shifted (H*W,C)x(C,C) MXU matmuls,
            # bf16 operands / f32 accumulation.
            acc = jnp.zeros((H * W, C), jnp.float32)
            for dy in range(3):
                for dx in range(3):
                    patch = pad_ref[dy:dy + H, dx:dx + W, :]
                    patch = patch.reshape(H * W, C).astype(jnp.bfloat16)
                    acc = acc + jnp.dot(patch, wg_ref[dy * 3 + dx],
                                        preferred_element_type=jnp.float32)
            # bn2 (folded scale/bias) + residual (in-register h) + relu
            y = acc * bs_ref[i:i + 1, :] + bb_ref[i:i + 1, :]
            y = jnp.maximum(y.reshape(H, W, C) + h, 0.0)
            # fused 2x2 max-pool, stride 2 (lane dim stays at C=128)
            y4 = y.reshape(H // 2, 2, W, C)
            y = jnp.maximum(y4[:, 0], y4[:, 1])                     # pool H
            y4 = y.reshape(H // 2, W // 2, 2, C)
            y = jnp.maximum(y4[:, :, 0, :], y4[:, :, 1, :])         # pool W
            H, W = H // 2, W // 2
            h = y

        # ---- classifier (lane-dense 128-wide output, sliced in the wrapper)
        feat = h.reshape(H * W, C).astype(jnp.bfloat16)             # (1, C)
        out = jnp.dot(feat, wc_ref[...],
                      preferred_element_type=jnp.float32) + bc_ref[...]
        o_ref[0] = out

    return kernel


# --------------------------------------------------------------------------
# Glue code (wrapper): layout plumbing, bf16 casts, pallas_call
# --------------------------------------------------------------------------
def im2col_3x3(x):
    """(N, H, W, Cin) -> (N, H*W, 9*Cin) patches of a 3x3 'SAME' conv."""
    N, H, W, Cin = x.shape
    xp = jnp.pad(x, ((0, 0), (1, 1), (1, 1), (0, 0)))
    cols = [xp[:, dy:dy + H, dx:dx + W, :] for dy in range(3) for dx in range(3)]
    return jnp.concatenate(cols, axis=-1).reshape(N, H * W, 9 * Cin)


def dacnn_res_forward(x_nchw, params):
    x = jnp.transpose(x_nchw, (0, 2, 3, 1)).astype(jnp.float32)     # NCHW -> NHWC
    N, H0, W0, Cin = x.shape
    C = params["wg"].shape[-1]
    n_blocks = len(params["blocks"])
    classes = params["wc"].shape[1]
    assert H0 % (2 ** n_blocks) == 0 and W0 % (2 ** n_blocks) == 0
    assert (H0 // 2 ** n_blocks) * (W0 // 2 ** n_blocks) == 1, (
        "feature map must pool to 1x1 to match .view(-1, 128)")
    assert classes <= _CLF_PAD

    # im2col the tiny 3-channel input; bf16 weights for the MXU
    x_cols = im2col_3x3(x).astype(jnp.bfloat16)                     # (N, H0*W0, 27)
    w1 = params["w1"].reshape(9 * Cin, C).astype(jnp.bfloat16)      # (27, C)
    wg = params["wg"].reshape(9, C, C).astype(jnp.bfloat16)         # shared conv_global
    s1 = params["bn1_scale"].reshape(1, C)
    b1 = params["bn1_bias"].reshape(1, C)
    bs = jnp.stack([blk["scale"] for blk in params["blocks"]])      # (n_blocks, C)
    bb = jnp.stack([blk["bias"] for blk in params["blocks"]])
    wc = jnp.zeros((C, _CLF_PAD), jnp.float32).at[:, :classes].set(params["wc"])
    wc = wc.astype(jnp.bfloat16)
    bc = jnp.zeros((1, _CLF_PAD), jnp.float32).at[:, :classes].set(
        params["bc"][None, :])

    kernel = _make_dacnn_kernel(n_blocks, H0, W0, C)
    out = pl.pallas_call(
        kernel,
        out_shape=jax.ShapeDtypeStruct((N, 1, _CLF_PAD), jnp.float32),
        grid=(N,),
        in_specs=[
            pl.BlockSpec((1, H0 * W0, 9 * Cin), lambda n: (n, 0, 0)),  # im2col input
            pl.BlockSpec((9 * Cin, C), lambda n: (0, 0)),              # w1
            pl.BlockSpec((1, C), lambda n: (0, 0)),                    # bn_1 scale
            pl.BlockSpec((1, C), lambda n: (0, 0)),                    # bn_1 bias
            pl.BlockSpec((9, C, C), lambda n: (0, 0, 0)),              # conv_global (resident)
            pl.BlockSpec((n_blocks, C), lambda n: (0, 0)),             # per-block bn2 scale
            pl.BlockSpec((n_blocks, C), lambda n: (0, 0)),             # per-block bn2 bias
            pl.BlockSpec((C, _CLF_PAD), lambda n: (0, 0)),             # clf weight (padded)
            pl.BlockSpec((1, _CLF_PAD), lambda n: (0, 0)),             # clf bias (padded)
        ],
        out_specs=pl.BlockSpec((1, 1, _CLF_PAD), lambda n: (n, 0, 0)),
        scratch_shapes=[pltpu.VMEM((H0 + 2, W0 + 2, C), jnp.float32)],
        compiler_params=pltpu.CompilerParams(
            dimension_semantics=("parallel",)),
    )(x_cols, w1, s1, b1, wg, bs, bb, wc, bc)
    return out.reshape(N, _CLF_PAD)[:, :classes]


# --------------------------------------------------------------------------
# Parameters (deterministic synthetic init)
# --------------------------------------------------------------------------
def init_params(key, classes, blocks, channels=128, eps=1e-5):
    n_blocks = sum(blocks)
    ks = list(jax.random.split(key, 8 + 4 * n_blocks))
    it = iter(ks)

    def nrm(shape, std):
        return std * jax.random.normal(next(it), shape, jnp.float32)

    def bn_fold():  # folded eval-mode BN -> per-channel scale/bias
        g = 1.0 + 0.1 * jax.random.normal(next(it), (channels,), jnp.float32)
        b = 0.1 * jax.random.normal(next(it), (channels,), jnp.float32)
        m = 0.1 * jax.random.normal(next(it), (channels,), jnp.float32)
        v = jax.random.uniform(next(it), (channels,), jnp.float32, 0.5, 1.5)
        s = g / jnp.sqrt(v + eps)
        return s, b - m * s

    w1 = nrm((3, 3, 3, channels), 1.0 / (3.0 * 3.0 ** 0.5))              # conv_1 (HWIO)
    wg = nrm((3, 3, channels, channels), 1.0 / (3.0 * channels ** 0.5))  # conv_global
    bn1_scale, bn1_bias = bn_fold()                                      # bn_1
    block_params = []
    for _ in range(n_blocks):                                            # each block's bn2
        s, sh = bn_fold()
        block_params.append({"scale": s, "bias": sh})
    wc = nrm((channels, classes), 1.0 / channels ** 0.5)                 # clf
    bc = 0.1 * jax.random.normal(next(it), (classes,), jnp.float32)
    return {"w1": w1, "wg": wg, "bn1_scale": bn1_scale, "bn1_bias": bn1_bias,
            "blocks": block_params, "wc": wc, "bc": bc}


# --------------------------------------------------------------------------
# Pure-JAX reference (same bf16-operand / f32-accumulate numerics)
# --------------------------------------------------------------------------
def _conv3x3_ref(x, w):
    return jax.lax.conv_general_dilated(
        x.astype(jnp.bfloat16), w.astype(jnp.bfloat16),
        window_strides=(1, 1), padding="SAME",
        dimension_numbers=("NHWC", "HWIO", "NHWC"),
        preferred_element_type=jnp.float32)


def forward_ref(x_nchw, params):
    x = jnp.transpose(x_nchw, (0, 2, 3, 1))
    h = jnp.maximum(_conv3x3_ref(x, params["w1"]) * params["bn1_scale"]
                    + params["bn1_bias"], 0.0)
    for blk in params["blocks"]:
        y = _conv3x3_ref(h, params["wg"]) * blk["scale"] + blk["bias"] + h
        y = jnp.maximum(y, 0.0)
        h = jax.lax.reduce_window(y, -jnp.inf, jax.lax.max,
                                  (1, 2, 2, 1), (1, 2, 2, 1), "VALID")
    feat = h.reshape(h.shape[0], -1)
    return jnp.dot(feat.astype(jnp.bfloat16), params["wc"].astype(jnp.bfloat16),
                   preferred_element_type=jnp.float32) + params["bc"]


# --------------------------------------------------------------------------
if __name__ == "__main__":
    key = jax.random.PRNGKey(0)
    pkey, xkey = jax.random.split(key)

    classes = 10
    blocks = [1, 1, 1, 1]   # reduced from [3,4,6,3] so a 16x16 input pools to 1x1
    params = init_params(pkey, classes=classes, blocks=blocks)

    x = jax.random.normal(xkey, (2, 3, 16, 16), jnp.float32)  # NCHW, like PyTorch

    out = jax.jit(dacnn_res_forward)(x, params)
    out = jax.block_until_ready(out)

    ref = forward_ref(x, params)
    assert out.shape == (2, classes), out.shape
    err = float(jnp.max(jnp.abs(out - ref)))
    assert jnp.allclose(out, ref, atol=1e-2, rtol=1e-2), err

    print("KERNEL_OK")
</pallas_src>

<mosaic_0001>
module attributes {stable_mosaic.version = 11 : i64} {
  func.func @kernel(%arg0: i32, %arg1: memref<1x256x27xbf16, #tpu.memory_space<vmem>>, %arg2: memref<27x128xbf16, #tpu.memory_space<vmem>>, %arg3: memref<1x128xf32, #tpu.memory_space<vmem>>, %arg4: memref<1x128xf32, #tpu.memory_space<vmem>>, %arg5: memref<9x128x128xbf16, #tpu.memory_space<vmem>>, %arg6: memref<4x128xf32, #tpu.memory_space<vmem>>, %arg7: memref<4x128xf32, #tpu.memory_space<vmem>>, %arg8: memref<128x128xbf16, #tpu.memory_space<vmem>>, %arg9: memref<1x128xf32, #tpu.memory_space<vmem>>, %arg10: memref<1x1x128xf32, #tpu.memory_space<vmem>>, %arg11: memref<18x18x128xf32, #tpu.memory_space<vmem>>) attributes {dimension_semantics = [#tpu.dimension_semantics<parallel>], iteration_bounds = array<i64: 2>, scalar_prefetch = 0 : i64, scratch_operands = 1 : i64, tpu.core_type = #tpu.core_type<tc>, window_params = [{transform_indices = @transform_0, window_bounds = array<i64: 1, 256, 27>}, {pipeline_mode = #tpu.pipeline_mode<synchronous>, transform_indices = @transform_1, window_bounds = array<i64: 27, 128>}, {pipeline_mode = #tpu.pipeline_mode<synchronous>, transform_indices = @transform_2, window_bounds = array<i64: 1, 128>}, {pipeline_mode = #tpu.pipeline_mode<synchronous>, transform_indices = @transform_3, window_bounds = array<i64: 1, 128>}, {pipeline_mode = #tpu.pipeline_mode<synchronous>, transform_indices = @transform_4, window_bounds = array<i64: 9, 128, 128>}, {pipeline_mode = #tpu.pipeline_mode<synchronous>, transform_indices = @transform_5, window_bounds = array<i64: 4, 128>}, {pipeline_mode = #tpu.pipeline_mode<synchronous>, transform_indices = @transform_6, window_bounds = array<i64: 4, 128>}, {pipeline_mode = #tpu.pipeline_mode<synchronous>, transform_indices = @transform_7, window_bounds = array<i64: 128, 128>}, {pipeline_mode = #tpu.pipeline_mode<synchronous>, transform_indices = @transform_8, window_bounds = array<i64: 1, 128>}, {transform_indices = @transform_9, window_bounds = array<i64: 1, 1, 128>}]} {
    %c0 = arith.constant 0 : index
    %c0_0 = arith.constant 0 : index
    %c0_1 = arith.constant 0 : index
    %0 = vector.load %arg1[%c0, %c0_0, %c0_1] : memref<1x256x27xbf16, #tpu.memory_space<vmem>>, vector<1x256x27xbf16>
    %1 = vector.shape_cast %0 : vector<1x256x27xbf16> to vector<256x27xbf16>
    %c0_2 = arith.constant 0 : index
    %c0_3 = arith.constant 0 : index
    %2 = vector.load %arg2[%c0_2, %c0_3] : memref<27x128xbf16, #tpu.memory_space<vmem>>, vector<27x128xbf16>
    %cst = arith.constant dense<0.000000e+00> : vector<256x128xf32>
    %3 = tpu.matmul %1, %2, %cst {dimension_numbers = #tpu.dot_dimension_numbers<[1], [0], [0], [1], [0, 0, 1, 1], [], []>} : vector<256x27xbf16>, vector<27x128xbf16>, vector<256x128xf32> -> vector<256x128xf32>
    %c0_4 = arith.constant 0 : index
    %c0_5 = arith.constant 0 : index
    %4 = vector.load %arg3[%c0_4, %c0_5] : memref<1x128xf32, #tpu.memory_space<vmem>>, vector<1x128xf32>
    %5 = vector.broadcast %4 : vector<1x128xf32> to vector<256x128xf32>
    %6 = arith.mulf %3, %5 : vector<256x128xf32>
    %c0_6 = arith.constant 0 : index
    %c0_7 = arith.constant 0 : index
    %7 = vector.load %arg4[%c0_6, %c0_7] : memref<1x128xf32, #tpu.memory_space<vmem>>, vector<1x128xf32>
    %8 = vector.broadcast %7 : vector<1x128xf32> to vector<256x128xf32>
    %9 = arith.addf %6, %8 : vector<256x128xf32>
    %cst_8 = arith.constant 0.000000e+00 : f32
    %10 = vector.broadcast %cst_8 : f32 to vector<256x128xf32>
    %11 = arith.maximumf %9, %10 : vector<256x128xf32>
    %12 = vector.shape_cast %11 : vector<256x128xf32> to vector<16x16x128xf32>
    %cst_9 = arith.constant 0.000000e+00 : f32
    %13 = vector.broadcast %cst_9 : f32 to vector<18x18x128xf32>
    %c0_10 = arith.constant 0 : index
    %c0_11 = arith.constant 0 : index
    %c0_12 = arith.constant 0 : index
    %14 = vector.load %arg11[%c0_10, %c0_11, %c0_12] : memref<18x18x128xf32, #tpu.memory_space<vmem>>, vector<18x18x128xf32>
    tpu.vector_store %arg11[%c0_10, %c0_11, %c0_12], %13 {strides = array<i32>} : memref<18x18x128xf32, #tpu.memory_space<vmem>>, vector<18x18x128xf32>,
    %c1 = arith.constant 1 : index
    %c1_13 = arith.constant 1 : index
    %c0_14 = arith.constant 0 : index
    %15 = vector.load %arg11[%c1, %c1_13, %c0_14] : memref<18x18x128xf32, #tpu.memory_space<vmem>>, vector<16x16x128xf32>
    tpu.vector_store %arg11[%c1, %c1_13, %c0_14], %12 {strides = array<i32>} : memref<18x18x128xf32, #tpu.memory_space<vmem>>, vector<16x16x128xf32>,
    %cst_15 = arith.constant 0.000000e+00 : f32
    %16 = vector.broadcast %cst_15 : f32 to vector<256x128xf32>
    %c0_16 = arith.constant 0 : index
    %c0_17 = arith.constant 0 : index
    %c0_18 = arith.constant 0 : index
    %17 = vector.load %arg11[%c0_16, %c0_17, %c0_18] : memref<18x18x128xf32, #tpu.memory_space<vmem>>, vector<16x16x128xf32>
    %18 = vector.shape_cast %17 : vector<16x16x128xf32> to vector<256x128xf32>
    %19 = arith.truncf %18 : vector<256x128xf32> to vector<256x128xbf16>
    %c0_19 = arith.constant 0 : index
    %c0_20 = arith.constant 0 : index
    %c0_21 = arith.constant 0 : index
    %20 = vector.load %arg5[%c0_19, %c0_20, %c0_21] : memref<9x128x128xbf16, #tpu.memory_space<vmem>>, vector<1x128x128xbf16>
    %21 = vector.shape_cast %20 : vector<1x128x128xbf16> to vector<128x128xbf16>
    %cst_22 = arith.constant dense<0.000000e+00> : vector<256x128xf32>
    %22 = tpu.matmul %19, %21, %cst_22 {dimension_numbers = #tpu.dot_dimension_numbers<[1], [0], [0], [1], [0, 0, 1, 1], [], []>} : vector<256x128xbf16>, vector<128x128xbf16>, vector<256x128xf32> -> vector<256x128xf32>
    %23 = arith.addf %16, %22 : vector<256x128xf32>
    %c0_23 = arith.constant 0 : index
    %c1_24 = arith.constant 1 : index
    %c0_25 = arith.constant 0 : index
    %24 = vector.load %arg11[%c0_23, %c1_24, %c0_25] : memref<18x18x128xf32, #tpu.memory_space<vmem>>, vector<16x16x128xf32>
    %25 = vector.shape_cast %24 : vector<16x16x128xf32> to vector<256x128xf32>
    %26 = arith.truncf %25 : vector<256x128xf32> to vector<256x128xbf16>
    %c1_26 = arith.constant 1 : index
    %c0_27 = arith.constant 0 : index
    %c0_28 = arith.constant 0 : index
    %27 = vector.load %arg5[%c1_26, %c0_27, %c0_28] : memref<9x128x128xbf16, #tpu.memory_space<vmem>>, vector<1x128x128xbf16>
    %28 = vector.shape_cast %27 : vector<1x128x128xbf16> to vector<128x128xbf16>
    %cst_29 = arith.constant dense<0.000000e+00> : vector<256x128xf32>
    %29 = tpu.matmul %26, %28, %cst_29 {dimension_numbers = #tpu.dot_dimension_numbers<[1], [0], [0], [1], [0, 0, 1, 1], [], []>} : vector<256x128xbf16>, vector<128x128xbf16>, vector<256x128xf32> -> vector<256x128xf32>
    %30 = arith.addf %23, %29 : vector<256x128xf32>
    %c0_30 = arith.constant 0 : index
    %c2 = arith.constant 2 : index
    %c0_31 = arith.constant 0 : index
    %31 = vector.load %arg11[%c0_30, %c2, %c0_31] : memref<18x18x128xf32, #tpu.memory_space<vmem>>, vector<16x16x128xf32>
    %32 = vector.shape_cast %31 : vector<16x16x128xf32> to vector<256x128xf32>
    %33 = arith.truncf %32 : vector<256x128xf32> to vector<256x128xbf16>
    %c2_32 = arith.constant 2 : index
    %c0_33 = arith.constant 0 : index
    %c0_34 = arith.constant 0 : index
    %34 = vector.load %arg5[%c2_32, %c0_33, %c0_34] : memref<9x128x128xbf16, #tpu.memory_space<vmem>>, vector<1x128x128xbf16>
    %35 = vector.shape_cast %34 : vector<1x128x128xbf16> to vector<128x128xbf16>
    %cst_35 = arith.constant dense<0.000000e+00> : vector<256x128xf32>
    %36 = tpu.matmul %33, %35, %cst_35 {dimension_numbers = #tpu.dot_dimension_numbers<[1], [0], [0], [1], [0, 0, 1, 1], [], []>} : vector<256x128xbf16>, vector<128x128xbf16>, vector<256x128xf32> -> vector<256x128xf32>
    %37 = arith.addf %30, %36 : vector<256x128xf32>
    %c1_36 = arith.constant 1 : index
    %c0_37 = arith.constant 0 : index
    %c0_38 = arith.constant 0 : index
    %38 = vector.load %arg11[%c1_36, %c0_37, %c0_38] : memref<18x18x128xf32, #tpu.memory_space<vmem>>, vector<16x16x128xf32>
    %39 = vector.shape_cast %38 : vector<16x16x128xf32> to vector<256x128xf32>
    %40 = arith.truncf %39 : vector<256x128xf32> to vector<256x128xbf16>
    %c3 = arith.constant 3 : index
    %c0_39 = arith.constant 0 : index
    %c0_40 = arith.constant 0 : index
    %41 = vector.load %arg5[%c3, %c0_39, %c0_40] : memref<9x128x128xbf16, #tpu.memory_space<vmem>>, vector<1x128x128xbf16>
    %42 = vector.shape_cast %41 : vector<1x128x128xbf16> to vector<128x128xbf16>
    %cst_41 = arith.constant dense<0.000000e+00> : vector<256x128xf32>
    %43 = tpu.matmul %40, %42, %cst_41 {dimension_numbers = #tpu.dot_dimension_numbers<[1], [0], [0], [1], [0, 0, 1, 1], [], []>} : vector<256x128xbf16>, vector<128x128xbf16>, vector<256x128xf32> -> vector<256x128xf32>
    %44 = arith.addf %37, %43 : vector<256x128xf32>
    %c1_42 = arith.constant 1 : index
    %c1_43 = arith.constant 1 : index
    %c0_44 = arith.constant 0 : index
    %45 = vector.load %arg11[%c1_42, %c1_43, %c0_44] : memref<18x18x128xf32, #tpu.memory_space<vmem>>, vector<16x16x128xf32>
    %46 = vector.shape_cast %45 : vector<16x16x128xf32> to vector<256x128xf32>
    %47 = arith.truncf %46 : vector<256x128xf32> to vector<256x128xbf16>
    %c4 = arith.constant 4 : index
    %c0_45 = arith.constant 0 : index
    %c0_46 = arith.constant 0 : index
    %48 = vector.load %arg5[%c4, %c0_45, %c0_46] : memref<9x128x128xbf16, #tpu.memory_space<vmem>>, vector<1x128x128xbf16>
    %49 = vector.shape_cast %48 : vector<1x128x128xbf16> to vector<128x128xbf16>
    %cst_47 = arith.constant dense<0.000000e+00> : vector<256x128xf32>
    %50 = tpu.matmul %47, %49, %cst_47 {dimension_numbers = #tpu.dot_dimension_numbers<[1], [0], [0], [1], [0, 0, 1, 1], [], []>} : vector<256x128xbf16>, vector<128x128xbf16>, vector<256x128xf32> -> vector<256x128xf32>
    %51 = arith.addf %44, %50 : vector<256x128xf32>
    %c1_48 = arith.constant 1 : index
    %c2_49 = arith.constant 2 : index
    %c0_50 = arith.constant 0 : index
    %52 = vector.load %arg11[%c1_48, %c2_49, %c0_50] : memref<18x18x128xf32, #tpu.memory_space<vmem>>, vector<16x16x128xf32>
    %53 = vector.shape_cast %52 : vector<16x16x128xf32> to vector<256x128xf32>
    %54 = arith.truncf %53 : vector<256x128xf32> to vector<256x128xbf16>
    %c5 = arith.constant 5 : index
    %c0_51 = arith.constant 0 : index
    %c0_52 = arith.constant 0 : index
    %55 = vector.load %arg5[%c5, %c0_51, %c0_52] : memref<9x128x128xbf16, #tpu.memory_space<vmem>>, vector<1x128x128xbf16>
    %56 = vector.shape_cast %55 : vector<1x128x128xbf16> to vector<128x128xbf16>
    %cst_53 = arith.constant dense<0.000000e+00> : vector<256x128xf32>
    %57 = tpu.matmul %54, %56, %cst_53 {dimension_numbers = #tpu.dot_dimension_numbers<[1], [0], [0], [1], [0, 0, 1, 1], [], []>} : vector<256x128xbf16>, vector<128x128xbf16>, vector<256x128xf32> -> vector<256x128xf32>
    %58 = arith.addf %51, %57 : vector<256x128xf32>
    %c2_54 = arith.constant 2 : index
    %c0_55 = arith.constant 0 : index
    %c0_56 = arith.constant 0 : index
    %59 = vector.load %arg11[%c2_54, %c0_55, %c0_56] : memref<18x18x128xf32, #tpu.memory_space<vmem>>, vector<16x16x128xf32>
    %60 = vector.shape_cast %59 : vector<16x16x128xf32> to vector<256x128xf32>
    %61 = arith.truncf %60 : vector<256x128xf32> to vector<256x128xbf16>
    %c6 = arith.constant 6 : index
    %c0_57 = arith.constant 0 : index
    %c0_58 = arith.constant 0 : index
    %62 = vector.load %arg5[%c6, %c0_57, %c0_58] : memref<9x128x128xbf16, #tpu.memory_space<vmem>>, vector<1x128x128xbf16>
    %63 = vector.shape_cast %62 : vector<1x128x128xbf16> to vector<128x128xbf16>
    %cst_59 = arith.constant dense<0.000000e+00> : vector<256x128xf32>
    %64 = tpu.matmul %61, %63, %cst_59 {dimension_numbers = #tpu.dot_dimension_numbers<[1], [0], [0], [1], [0, 0, 1, 1], [], []>} : vector<256x128xbf16>, vector<128x128xbf16>, vector<256x128xf32> -> vector<256x128xf32>
    %65 = arith.addf %58, %64 : vector<256x128xf32>
    %c2_60 = arith.constant 2 : index
    %c1_61 = arith.constant 1 : index
    %c0_62 = arith.constant 0 : index
    %66 = vector.load %arg11[%c2_60, %c1_61, %c0_62] : memref<18x18x128xf32, #tpu.memory_space<vmem>>, vector<16x16x128xf32>
    %67 = vector.shape_cast %66 : vector<16x16x128xf32> to vector<256x128xf32>
    %68 = arith.truncf %67 : vector<256x128xf32> to vector<256x128xbf16>
    %c7 = arith.constant 7 : index
    %c0_63 = arith.constant 0 : index
    %c0_64 = arith.constant 0 : index
    %69 = vector.load %arg5[%c7, %c0_63, %c0_64] : memref<9x128x128xbf16, #tpu.memory_space<vmem>>, vector<1x128x128xbf16>
    %70 = vector.shape_cast %69 : vector<1x128x128xbf16> to vector<128x128xbf16>
    %cst_65 = arith.constant dense<0.000000e+00> : vector<256x128xf32>
    %71 = tpu.matmul %68, %70, %cst_65 {dimension_numbers = #tpu.dot_dimension_numbers<[1], [0], [0], [1], [0, 0, 1, 1], [], []>} : vector<256x128xbf16>, vector<128x128xbf16>, vector<256x128xf32> -> vector<256x128xf32>
    %72 = arith.addf %65, %71 : vector<256x128xf32>
    %c2_66 = arith.constant 2 : index
    %c2_67 = arith.constant 2 : index
    %c0_68 = arith.constant 0 : index
    %73 = vector.load %arg11[%c2_66, %c2_67, %c0_68] : memref<18x18x128xf32, #tpu.memory_space<vmem>>, vector<16x16x128xf32>
    %74 = vector.shape_cast %73 : vector<16x16x128xf32> to vector<256x128xf32>
    %75 = arith.truncf %74 : vector<256x128xf32> to vector<256x128xbf16>
    %c8 = arith.constant 8 : index
    %c0_69 = arith.constant 0 : index
    %c0_70 = arith.constant 0 : index
    %76 = vector.load %arg5[%c8, %c0_69, %c0_70] : memref<9x128x128xbf16, #tpu.memory_space<vmem>>, vector<1x128x128xbf16>
    %77 = vector.shape_cast %76 : vector<1x128x128xbf16> to vector<128x128xbf16>
    %cst_71 = arith.constant dense<0.000000e+00> : vector<256x128xf32>
    %78 = tpu.matmul %75, %77, %cst_71 {dimension_numbers = #tpu.dot_dimension_numbers<[1], [0], [0], [1], [0, 0, 1, 1], [], []>} : vector<256x128xbf16>, vector<128x128xbf16>, vector<256x128xf32> -> vector<256x128xf32>
    %79 = arith.addf %72, %78 : vector<256x128xf32>
    %c0_72 = arith.constant 0 : index
    %c0_73 = arith.constant 0 : index
    %80 = vector.load %arg6[%c0_72, %c0_73] : memref<4x128xf32, #tpu.memory_space<vmem>>, vector<1x128xf32>
    %81 = vector.broadcast %80 : vector<1x128xf32> to vector<256x128xf32>
    %82 = arith.mulf %79, %81 : vector<256x128xf32>
    %c0_74 = arith.constant 0 : index
    %c0_75 = arith.constant 0 : index
    %83 = vector.load %arg7[%c0_74, %c0_75] : memref<4x128xf32, #tpu.memory_space<vmem>>, vector<1x128xf32>
    %84 = vector.broadcast %83 : vector<1x128xf32> to vector<256x128xf32>
    %85 = arith.addf %82, %84 : vector<256x128xf32>
    %86 = vector.shape_cast %85 : vector<256x128xf32> to vector<16x16x128xf32>
    %87 = arith.addf %86, %12 : vector<16x16x128xf32>
    %cst_76 = arith.constant 0.000000e+00 : f32
    %88 = vector.broadcast %cst_76 : f32 to vector<16x16x128xf32>
    %89 = arith.maximumf %87, %88 : vector<16x16x128xf32>
    %90 = vector.shape_cast %89 : vector<16x16x128xf32> to vector<8x2x16x128xf32>
    %91 = vector.extract_strided_slice %90 {offsets = [0, 0, 0, 0], sizes = [8, 1, 16, 128], strides = [1, 1, 1, 1]} : vector<8x2x16x128xf32> to vector<8x1x16x128xf32>
    %92 = vector.shape_cast %91 : vector<8x1x16x128xf32> to vector<8x16x128xf32>
    %93 = vector.extract_strided_slice %90 {offsets = [0, 1, 0, 0], sizes = [8, 1, 16, 128], strides = [1, 1, 1, 1]} : vector<8x2x16x128xf32> to vector<8x1x16x128xf32>
    %94 = vector.shape_cast %93 : vector<8x1x16x128xf32> to vector<8x16x128xf32>
    %95 = arith.maximumf %92, %94 : vector<8x16x128xf32>
    %96 = vector.shape_cast %95 : vector<8x16x128xf32> to vector<8x8x2x128xf32>
    %97 = vector.extract_strided_slice %96 {offsets = [0, 0, 0, 0], sizes = [8, 8, 1, 128], strides = [1, 1, 1, 1]} : vector<8x8x2x128xf32> to vector<8x8x1x128xf32>
    %98 = vector.shape_cast %97 : vector<8x8x1x128xf32> to vector<8x8x128xf32>
    %99 = vector.extract_strided_slice %96 {offsets = [0, 0, 1, 0], sizes = [8, 8, 1, 128], strides = [1, 1, 1, 1]} : vector<8x8x2x128xf32> to vector<8x8x1x128xf32>
    %100 = vector.shape_cast %99 : vector<8x8x1x128xf32> to vector<8x8x128xf32>
    %101 = arith.maximumf %98, %100 : vector<8x8x128xf32>
    %cst_77 = arith.constant 0.000000e+00 : f32
    %102 = vector.broadcast %cst_77 : f32 to vector<18x18x128xf32>
    %c0_78 = arith.constant 0 : index
    %c0_79 = arith.constant 0 : index
    %c0_80 = arith.constant 0 : index
    %103 = vector.load %arg11[%c0_78, %c0_79, %c0_80] : memref<18x18x128xf32, #tpu.memory_space<vmem>>, vector<18x18x128xf32>
    tpu.vector_store %arg11[%c0_78, %c0_79, %c0_80], %102 {strides = array<i32>} : memref<18x18x128xf32, #tpu.memory_space<vmem>>, vector<18x18x128xf32>,
    %c1_81 = arith.constant 1 : index
    %c1_82 = arith.constant 1 : index
    %c0_83 = arith.constant 0 : index
    %104 = vector.load %arg11[%c1_81, %c1_82, %c0_83] : memref<18x18x128xf32, #tpu.memory_space<vmem>>, vector<8x8x128xf32>
    tpu.vector_store %arg11[%c1_81, %c1_82, %c0_83], %101 {strides = array<i32>} : memref<18x18x128xf32, #tpu.memory_space<vmem>>, vector<8x8x128xf32>,
    %cst_84 = arith.constant 0.000000e+00 : f32
    %105 = vector.broadcast %cst_84 : f32 to vector<64x128xf32>
    %c0_85 = arith.constant 0 : index
    %c0_86 = arith.constant 0 : index
    %c0_87 = arith.constant 0 : index
    %106 = vector.load %arg11[%c0_85, %c0_86, %c0_87] : memref<18x18x128xf32, #tpu.memory_space<vmem>>, vector<8x8x128xf32>
    %107 = vector.shape_cast %106 : vector<8x8x128xf32> to vector<64x128xf32>
    %108 = arith.truncf %107 : vector<64x128xf32> to vector<64x128xbf16>
    %c0_88 = arith.constant 0 : index
    %c0_89 = arith.constant 0 : index
    %c0_90 = arith.constant 0 : index
    %109 = vector.load %arg5[%c0_88, %c0_89, %c0_90] : memref<9x128x128xbf16, #tpu.memory_space<vmem>>, vector<1x128x128xbf16>
    %110 = vector.shape_cast %109 : vector<1x128x128xbf16> to vector<128x128xbf16>
    %cst_91 = arith.constant dense<0.000000e+00> : vector<64x128xf32>
    %111 = tpu.matmul %108, %110, %cst_91 {dimension_numbers = #tpu.dot_dimension_numbers<[1], [0], [0], [1], [0, 0, 1, 1], [], []>} : vector<64x128xbf16>, vector<128x128xbf16>, vector<64x128xf32> -> vector<64x128xf32>
    %112 = arith.addf %105, %111 : vector<64x128xf32>
    %c0_92 = arith.constant 0 : index
    %c1_93 = arith.constant 1 : index
    %c0_94 = arith.constant 0 : index
    %113 = vector.load %arg11[%c0_92, %c1_93, %c0_94] : memref<18x18x128xf32, #tpu.memory_space<vmem>>, vector<8x8x128xf32>
    %114 = vector.shape_cast %113 : vector<8x8x128xf32> to vector<64x128xf32>
    %115 = arith.truncf %114 : vector<64x128xf32> to vector<64x128xbf16>
    %c1_95 = arith.constant 1 : index
    %c0_96 = arith.constant 0 : index
    %c0_97 = arith.constant 0 : index
    %116 = vector.load %arg5[%c1_95, %c0_96, %c0_97] : memref<9x128x128xbf16, #tpu.memory_space<vmem>>, vector<1x128x128xbf16>
    %117 = vector.shape_cast %116 : vector<1x128x128xbf16> to vector<128x128xbf16>
    %cst_98 = arith.constant dense<0.000000e+00> : vector<64x128xf32>
    %118 = tpu.matmul %115, %117, %cst_98 {dimension_numbers = #tpu.dot_dimension_numbers<[1], [0], [0], [1], [0, 0, 1, 1], [], []>} : vector<64x128xbf16>, vector<128x128xbf16>, vector<64x128xf32> -> vector<64x128xf32>
    %119 = arith.addf %112, %118 : vector<64x128xf32>
    %c0_99 = arith.constant 0 : index
    %c2_100 = arith.constant 2 : index
    %c0_101 = arith.constant 0 : index
    %120 = vector.load %arg11[%c0_99, %c2_100, %c0_101] : memref<18x18x128xf32, #tpu.memory_space<vmem>>, vector<8x8x128xf32>
    %121 = vector.shape_cast %120 : vector<8x8x128xf32> to vector<64x128xf32>
    %122 = arith.truncf %121 : vector<64x128xf32> to vector<64x128xbf16>
    %c2_102 = arith.constant 2 : index
    %c0_103 = arith.constant 0 : index
    %c0_104 = arith.constant 0 : index
    %123 = vector.load %arg5[%c2_102, %c0_103, %c0_104] : memref<9x128x128xbf16, #tpu.memory_space<vmem>>, vector<1x128x128xbf16>
    %124 = vector.shape_cast %123 : vector<1x128x128xbf16> to vector<128x128xbf16>
    %cst_105 = arith.constant dense<0.000000e+00> : vector<64x128xf32>
    %125 = tpu.matmul %122, %124, %cst_105 {dimension_numbers = #tpu.dot_dimension_numbers<[1], [0], [0], [1], [0, 0, 1, 1], [], []>} : vector<64x128xbf16>, vector<128x128xbf16>, vector<64x128xf32> -> vector<64x128xf32>
    %126 = arith.addf %119, %125 : vector<64x128xf32>
    %c1_106 = arith.constant 1 : index
    %c0_107 = arith.constant 0 : index
    %c0_108 = arith.constant 0 : index
    %127 = vector.load %arg11[%c1_106, %c0_107, %c0_108] : memref<18x18x128xf32, #tpu.memory_space<vmem>>, vector<8x8x128xf32>
    %128 = vector.shape_cast %127 : vector<8x8x128xf32> to vector<64x128xf32>
    %129 = arith.truncf %128 : vector<64x128xf32> to vector<64x128xbf16>
    %c3_109 = arith.constant 3 : index
    %c0_110 = arith.constant 0 : index
    %c0_111 = arith.constant 0 : index
    %130 = vector.load %arg5[%c3_109, %c0_110, %c0_111] : memref<9x128x128xbf16, #tpu.memory_space<vmem>>, vector<1x128x128xbf16>
    %131 = vector.shape_cast %130 : vector<1x128x128xbf16> to vector<128x128xbf16>
    %cst_112 = arith.constant dense<0.000000e+00> : vector<64x128xf32>
    %132 = tpu.matmul %129, %131, %cst_112 {dimension_numbers = #tpu.dot_dimension_numbers<[1], [0], [0], [1], [0, 0, 1, 1], [], []>} : vector<64x128xbf16>, vector<128x128xbf16>, vector<64x128xf32> -> vector<64x128xf32>
    %133 = arith.addf %126, %132 : vector<64x128xf32>
    %c1_113 = arith.constant 1 : index
    %c1_114 = arith.constant 1 : index
    %c0_115 = arith.constant 0 : index
    %134 = vector.load %arg11[%c1_113, %c1_114, %c0_115] : memref<18x18x128xf32, #tpu.memory_space<vmem>>, vector<8x8x128xf32>
    %135 = vector.shape_cast %134 : vector<8x8x128xf32> to vector<64x128xf32>
    %136 = arith.truncf %135 : vector<64x128xf32> to vector<64x128xbf16>
    %c4_116 = arith.constant 4 : index
    %c0_117 = arith.constant 0 : index
    %c0_118 = arith.constant 0 : index
    %137 = vector.load %arg5[%c4_116, %c0_117, %c0_118] : memref<9x128x128xbf16, #tpu.memory_space<vmem>>, vector<1x128x128xbf16>
    %138 = vector.shape_cast %137 : vector<1x128x128xbf16> to vector<128x128xbf16>
    %cst_119 = arith.constant dense<0.000000e+00> : vector<64x128xf32>
    %139 = tpu.matmul %136, %138, %cst_119 {dimension_numbers = #tpu.dot_dimension_numbers<[1], [0], [0], [1], [0, 0, 1, 1], [], []>} : vector<64x128xbf16>, vector<128x128xbf16>, vector<64x128xf32> -> vector<64x128xf32>
    %140 = arith.addf %133, %139 : vector<64x128xf32>
    %c1_120 = arith.constant 1 : index
    %c2_121 = arith.constant 2 : index
    %c0_122 = arith.constant 0 : index
    %141 = vector.load %arg11[%c1_120, %c2_121, %c0_122] : memref<18x18x128xf32, #tpu.memory_space<vmem>>, vector<8x8x128xf32>
    %142 = vector.shape_cast %141 : vector<8x8x128xf32> to vector<64x128xf32>
    %143 = arith.truncf %142 : vector<64x128xf32> to vector<64x128xbf16>
    %c5_123 = arith.constant 5 : index
    %c0_124 = arith.constant 0 : index
    %c0_125 = arith.constant 0 : index
    %144 = vector.load %arg5[%c5_123, %c0_124, %c0_125] : memref<9x128x128xbf16, #tpu.memory_space<vmem>>, vector<1x128x128xbf16>
    %145 = vector.shape_cast %144 : vector<1x128x128xbf16> to vector<128x128xbf16>
    %cst_126 = arith.constant dense<0.000000e+00> : vector<64x128xf32>
    %146 = tpu.matmul %143, %145, %cst_126 {dimension_numbers = #tpu.dot_dimension_numbers<[1], [0], [0], [1], [0, 0, 1, 1], [], []>} : vector<64x128xbf16>, vector<128x128xbf16>, vector<64x128xf32> -> vector<64x128xf32>
    %147 = arith.addf %140, %146 : vector<64x128xf32>
    %c2_127 = arith.constant 2 : index
    %c0_128 = arith.constant 0 : index
    %c0_129 = arith.constant 0 : index
    %148 = vector.load %arg11[%c2_127, %c0_128, %c0_129] : memref<18x18x128xf32, #tpu.memory_space<vmem>>, vector<8x8x128xf32>
    %149 = vector.shape_cast %148 : vector<8x8x128xf32> to vector<64x128xf32>
    %150 = arith.truncf %149 : vector<64x128xf32> to vector<64x128xbf16>
    %c6_130 = arith.constant 6 : index
    %c0_131 = arith.constant 0 : index
    %c0_132 = arith.constant 0 : index
    %151 = vector.load %arg5[%c6_130, %c0_131, %c0_132] : memref<9x128x128xbf16, #tpu.memory_space<vmem>>, vector<1x128x128xbf16>
    %152 = vector.shape_cast %151 : vector<1x128x128xbf16> to vector<128x128xbf16>
    %cst_133 = arith.constant dense<0.000000e+00> : vector<64x128xf32>
    %153 = tpu.matmul %150, %152, %cst_133 {dimension_numbers = #tpu.dot_dimension_numbers<[1], [0], [0], [1], [0, 0, 1, 1], [], []>} : vector<64x128xbf16>, vector<128x128xbf16>, vector<64x128xf32> -> vector<64x128xf32>
    %154 = arith.addf %147, %153 : vector<64x128xf32>
    %c2_134 = arith.constant 2 : index
    %c1_135 = arith.constant 1 : index
    %c0_136 = arith.constant 0 : index
    %155 = vector.load %arg11[%c2_134, %c1_135, %c0_136] : memref<18x18x128xf32, #tpu.memory_space<vmem>>, vector<8x8x128xf32>
    %156 = vector.shape_cast %155 : vector<8x8x128xf32> to vector<64x128xf32>
    %157 = arith.truncf %156 : vector<64x128xf32> to vector<64x128xbf16>
    %c7_137 = arith.constant 7 : index
    %c0_138 = arith.constant 0 : index
    %c0_139 = arith.constant 0 : index
    %158 = vector.load %arg5[%c7_137, %c0_138, %c0_139] : memref<9x128x128xbf16, #tpu.memory_space<vmem>>, vector<1x128x128xbf16>
    %159 = vector.shape_cast %158 : vector<1x128x128xbf16> to vector<128x128xbf16>
    %cst_140 = arith.constant dense<0.000000e+00> : vector<64x128xf32>
    %160 = tpu.matmul %157, %159, %cst_140 {dimension_numbers = #tpu.dot_dimension_numbers<[1], [0], [0], [1], [0, 0, 1, 1], [], []>} : vector<64x128xbf16>, vector<128x128xbf16>, vector<64x128xf32> -> vector<64x128xf32>
    %161 = arith.addf %154, %160 : vector<64x128xf32>
    %c2_141 = arith.constant 2 : index
    %c2_142 = arith.constant 2 : index
    %c0_143 = arith.constant 0 : index
    %162 = vector.load %arg11[%c2_141, %c2_142, %c0_143] : memref<18x18x128xf32, #tpu.memory_space<vmem>>, vector<8x8x128xf32>
    %163 = vector.shape_cast %162 : vector<8x8x128xf32> to vector<64x128xf32>
    %164 = arith.truncf %163 : vector<64x128xf32> to vector<64x128xbf16>
    %c8_144 = arith.constant 8 : index
    %c0_145 = arith.constant 0 : index
    %c0_146 = arith.constant 0 : index
    %165 = vector.load %arg5[%c8_144, %c0_145, %c0_146] : memref<9x128x128xbf16, #tpu.memory_space<vmem>>, vector<1x128x128xbf16>
    %166 = vector.shape_cast %165 : vector<1x128x128xbf16> to vector<128x128xbf16>
    %cst_147 = arith.constant dense<0.000000e+00> : vector<64x128xf32>
    %167 = tpu.matmul %164, %166, %cst_147 {dimension_numbers = #tpu.dot_dimension_numbers<[1], [0], [0], [1], [0, 0, 1, 1], [], []>} : vector<64x128xbf16>, vector<128x128xbf16>, vector<64x128xf32> -> vector<64x128xf32>
    %168 = arith.addf %161, %167 : vector<64x128xf32>
    %c1_148 = arith.constant 1 : index
    %c0_149 = arith.constant 0 : index
    %169 = vector.load %arg6[%c1_148, %c0_149] : memref<4x128xf32, #tpu.memory_space<vmem>>, vector<1x128xf32>
    %170 = vector.broadcast %169 : vector<1x128xf32> to vector<64x128xf32>
    %171 = arith.mulf %168, %170 : vector<64x128xf32>
    %c1_150 = arith.constant 1 : index
    %c0_151 = arith.constant 0 : index
    %172 = vector.load %arg7[%c1_150, %c0_151] : memref<4x128xf32, #tpu.memory_space<vmem>>, vector<1x128xf32>
    %173 = vector.broadcast %172 : vector<1x128xf32> to vector<64x128xf32>
    %174 = arith.addf %171, %173 : vector<64x128xf32>
    %175 = vector.shape_cast %174 : vector<64x128xf32> to vector<8x8x128xf32>
    %176 = arith.addf %175, %101 : vector<8x8x128xf32>
    %cst_152 = arith.constant 0.000000e+00 : f32
    %177 = vector.broadcast %cst_152 : f32 to vector<8x8x128xf32>
    %178 = arith.maximumf %176, %177 : vector<8x8x128xf32>
    %179 = vector.shape_cast %178 : vector<8x8x128xf32> to vector<4x2x8x128xf32>
    %180 = vector.extract_strided_slice %179 {offsets = [0, 0, 0, 0], sizes = [4, 1, 8, 128], strides = [1, 1, 1, 1]} : vector<4x2x8x128xf32> to vector<4x1x8x128xf32>
    %181 = vector.shape_cast %180 : vector<4x1x8x128xf32> to vector<4x8x128xf32>
    %182 = vector.extract_strided_slice %179 {offsets = [0, 1, 0, 0], sizes = [4, 1, 8, 128], strides = [1, 1, 1, 1]} : vector<4x2x8x128xf32> to vector<4x1x8x128xf32>
    %183 = vector.shape_cast %182 : vector<4x1x8x128xf32> to vector<4x8x128xf32>
    %184 = arith.maximumf %181, %183 : vector<4x8x128xf32>
    %185 = vector.shape_cast %184 : vector<4x8x128xf32> to vector<4x4x2x128xf32>
    %186 = vector.extract_strided_slice %185 {offsets = [0, 0, 0, 0], sizes = [4, 4, 1, 128], strides = [1, 1, 1, 1]} : vector<4x4x2x128xf32> to vector<4x4x1x128xf32>
    %187 = vector.shape_cast %186 : vector<4x4x1x128xf32> to vector<4x4x128xf32>
    %188 = vector.extract_strided_slice %185 {offsets = [0, 0, 1, 0], sizes = [4, 4, 1, 128], strides = [1, 1, 1, 1]} : vector<4x4x2x128xf32> to vector<4x4x1x128xf32>
    %189 = vector.shape_cast %188 : vector<4x4x1x128xf32> to vector<4x4x128xf32>
    %190 = arith.maximumf %187, %189 : vector<4x4x128xf32>
    %cst_153 = arith.constant 0.000000e+00 : f32
    %191 = vector.broadcast %cst_153 : f32 to vector<18x18x128xf32>
    %c0_154 = arith.constant 0 : index
    %c0_155 = arith.constant 0 : index
    %c0_156 = arith.constant 0 : index
    %192 = vector.load %arg11[%c0_154, %c0_155, %c0_156] : memref<18x18x128xf32, #tpu.memory_space<vmem>>, vector<18x18x128xf32>
    tpu.vector_store %arg11[%c0_154, %c0_155, %c0_156], %191 {strides = array<i32>} : memref<18x18x128xf32, #tpu.memory_space<vmem>>, vector<18x18x128xf32>,
    %c1_157 = arith.constant 1 : index
    %c1_158 = arith.constant 1 : index
    %c0_159 = arith.constant 0 : index
    %193 = vector.load %arg11[%c1_157, %c1_158, %c0_159] : memref<18x18x128xf32, #tpu.memory_space<vmem>>, vector<4x4x128xf32>
    tpu.vector_store %arg11[%c1_157, %c1_158, %c0_159], %190 {strides = array<i32>} : memref<18x18x128xf32, #tpu.memory_space<vmem>>, vector<4x4x128xf32>,
    %cst_160 = arith.constant 0.000000e+00 : f32
    %194 = vector.broadcast %cst_160 : f32 to vector<16x128xf32>
    %c0_161 = arith.constant 0 : index
    %c0_162 = arith.constant 0 : index
    %c0_163 = arith.constant 0 : index
    %195 = vector.load %arg11[%c0_161, %c0_162, %c0_163] : memref<18x18x128xf32, #tpu.memory_space<vmem>>, vector<4x4x128xf32>
    %196 = vector.shape_cast %195 : vector<4x4x128xf32> to vector<16x128xf32>
    %197 = arith.truncf %196 : vector<16x128xf32> to vector<16x128xbf16>
    %c0_164 = arith.constant 0 : index
    %c0_165 = arith.constant 0 : index
    %c0_166 = arith.constant 0 : index
    %198 = vector.load %arg5[%c0_164, %c0_165, %c0_166] : memref<9x128x128xbf16, #tpu.memory_space<vmem>>, vector<1x128x128xbf16>
    %199 = vector.shape_cast %198 : vector<1x128x128xbf16> to vector<128x128xbf16>
    %cst_167 = arith.constant dense<0.000000e+00> : vector<16x128xf32>
    %200 = tpu.matmul %197, %199, %cst_167 {dimension_numbers = #tpu.dot_dimension_numbers<[1], [0], [0], [1], [0, 0, 1, 1], [], []>} : vector<16x128xbf16>, vector<128x128xbf16>, vector<16x128xf32> -> vector<16x128xf32>
    %201 = arith.addf %194, %200 : vector<16x128xf32>
    %c0_168 = arith.constant 0 : index
    %c1_169 = arith.constant 1 : index
    %c0_170 = arith.constant 0 : index
    %202 = vector.load %arg11[%c0_168, %c1_169, %c0_170] : memref<18x18x128xf32, #tpu.memory_space<vmem>>, vector<4x4x128xf32>
    %203 = vector.shape_cast %202 : vector<4x4x128xf32> to vector<16x128xf32>
    %204 = arith.truncf %203 : vector<16x128xf32> to vector<16x128xbf16>
    %c1_171 = arith.constant 1 : index
    %c0_172 = arith.constant 0 : index
    %c0_173 = arith.constant 0 : index
    %205 = vector.load %arg5[%c1_171, %c0_172, %c0_173] : memref<9x128x128xbf16, #tpu.memory_space<vmem>>, vector<1x128x128xbf16>
    %206 = vector.shape_cast %205 : vector<1x128x128xbf16> to vector<128x128xbf16>
    %cst_174 = arith.constant dense<0.000000e+00> : vector<16x128xf32>
    %207 = tpu.matmul %204, %206, %cst_174 {dimension_numbers = #tpu.dot_dimension_numbers<[1], [0], [0], [1], [0, 0, 1, 1], [], []>} : vector<16x128xbf16>, vector<128x128xbf16>, vector<16x128xf32> -> vector<16x128xf32>
    %208 = arith.addf %201, %207 : vector<16x128xf32>
    %c0_175 = arith.constant 0 : index
    %c2_176 = arith.constant 2 : index
    %c0_177 = arith.constant 0 : index
    %209 = vector.load %arg11[%c0_175, %c2_176, %c0_177] : memref<18x18x128xf32, #tpu.memory_space<vmem>>, vector<4x4x128xf32>
    %210 = vector.shape_cast %209 : vector<4x4x128xf32> to vector<16x128xf32>
    %211 = arith.truncf %210 : vector<16x128xf32> to vector<16x128xbf16>
    %c2_178 = arith.constant 2 : index
    %c0_179 = arith.constant 0 : index
    %c0_180 = arith.constant 0 : index
    %212 = vector.load %arg5[%c2_178, %c0_179, %c0_180] : memref<9x128x128xbf16, #tpu.memory_space<vmem>>, vector<1x128x128xbf16>
    %213 = vector.shape_cast %212 : vector<1x128x128xbf16> to vector<128x128xbf16>
    %cst_181 = arith.constant dense<0.000000e+00> : vector<16x128xf32>
    %214 = tpu.matmul %211, %213, %cst_181 {dimension_numbers = #tpu.dot_dimension_numbers<[1], [0], [0], [1], [0, 0, 1, 1], [], []>} : vector<16x128xbf16>, vector<128x128xbf16>, vector<16x128xf32> -> vector<16x128xf32>
    %215 = arith.addf %208, %214 : vector<16x128xf32>
    %c1_182 = arith.constant 1 : index
    %c0_183 = arith.constant 0 : index
    %c0_184 = arith.constant 0 : index
    %216 = vector.load %arg11[%c1_182, %c0_183, %c0_184] : memref<18x18x128xf32, #tpu.memory_space<vmem>>, vector<4x4x128xf32>
    %217 = vector.shape_cast %216 : vector<4x4x128xf32> to vector<16x128xf32>
    %218 = arith.truncf %217 : vector<16x128xf32> to vector<16x128xbf16>
    %c3_185 = arith.constant 3 : index
    %c0_186 = arith.constant 0 : index
    %c0_187 = arith.constant 0 : index
    %219 = vector.load %arg5[%c3_185, %c0_186, %c0_187] : memref<9x128x128xbf16, #tpu.memory_space<vmem>>, vector<1x128x128xbf16>
    %220 = vector.shape_cast %219 : vector<1x128x128xbf16> to vector<128x128xbf16>
    %cst_188 = arith.constant dense<0.000000e+00> : vector<16x128xf32>
    %221 = tpu.matmul %218, %220, %cst_188 {dimension_numbers = #tpu.dot_dimension_numbers<[1], [0], [0], [1], [0, 0, 1, 1], [], []>} : vector<16x128xbf16>, vector<128x128xbf16>, vector<16x128xf32> -> vector<16x128xf32>
    %222 = arith.addf %215, %221 : vector<16x128xf32>
    %c1_189 = arith.constant 1 : index
    %c1_190 = arith.constant 1 : index
    %c0_191 = arith.constant 0 : index
    %223 = vector.load %arg11[%c1_189, %c1_190, %c0_191] : memref<18x18x128xf32, #tpu.memory_space<vmem>>, vector<4x4x128xf32>
    %224 = vector.shape_cast %223 : vector<4x4x128xf32> to vector<16x128xf32>
    %225 = arith.truncf %224 : vector<16x128xf32> to vector<16x128xbf16>
    %c4_192 = arith.constant 4 : index
    %c0_193 = arith.constant 0 : index
    %c0_194 = arith.constant 0 : index
    %226 = vector.load %arg5[%c4_192, %c0_193, %c0_194] : memref<9x128x128xbf16, #tpu.memory_space<vmem>>, vector<1x128x128xbf16>
    %227 = vector.shape_cast %226 : vector<1x128x128xbf16> to vector<128x128xbf16>
    %cst_195 = arith.constant dense<0.000000e+00> : vector<16x128xf32>
    %228 = tpu.matmul %225, %227, %cst_195 {dimension_numbers = #tpu.dot_dimension_numbers<[1], [0], [0], [1], [0, 0, 1, 1], [], []>} : vector<16x128xbf16>, vector<128x128xbf16>, vector<16x128xf32> -> vector<16x128xf32>
    %229 = arith.addf %222, %228 : vector<16x128xf32>
    %c1_196 = arith.constant 1 : index
    %c2_197 = arith.constant 2 : index
    %c0_198 = arith.constant 0 : index
    %230 = vector.load %arg11[%c1_196, %c2_197, %c0_198] : memref<18x18x128xf32, #tpu.memory_space<vmem>>, vector<4x4x128xf32>
    %231 = vector.shape_cast %230 : vector<4x4x128xf32> to vector<16x128xf32>
    %232 = arith.truncf %231 : vector<16x128xf32> to vector<16x128xbf16>
    %c5_199 = arith.constant 5 : index
    %c0_200 = arith.constant 0 : index
    %c0_201 = arith.constant 0 : index
    %233 = vector.load %arg5[%c5_199, %c0_200, %c0_201] : memref<9x128x128xbf16, #tpu.memory_space<vmem>>, vector<1x128x128xbf16>
    %234 = vector.shape_cast %233 : vector<1x128x128xbf16> to vector<128x128xbf16>
    %cst_202 = arith.constant dense<0.000000e+00> : vector<16x128xf32>
    %235 = tpu.matmul %232, %234, %cst_202 {dimension_numbers = #tpu.dot_dimension_numbers<[1], [0], [0], [1], [0, 0, 1, 1], [], []>} : vector<16x128xbf16>, vector<128x128xbf16>, vector<16x128xf32> -> vector<16x128xf32>
    %236 = arith.addf %229, %235 : vector<16x128xf32>
    %c2_203 = arith.constant 2 : index
    %c0_204 = arith.constant 0 : index
    %c0_205 = arith.constant 0 : index
    %237 = vector.load %arg11[%c2_203, %c0_204, %c0_205] : memref<18x18x128xf32, #tpu.memory_space<vmem>>, vector<4x4x128xf32>
    %238 = vector.shape_cast %237 : vector<4x4x128xf32> to vector<16x128xf32>
    %239 = arith.truncf %238 : vector<16x128xf32> to vector<16x128xbf16>
    %c6_206 = arith.constant 6 : index
    %c0_207 = arith.constant 0 : index
    %c0_208 = arith.constant 0 : index
    %240 = vector.load %arg5[%c6_206, %c0_207, %c0_208] : memref<9x128x128xbf16, #tpu.memory_space<vmem>>, vector<1x128x128xbf16>
    %241 = vector.shape_cast %240 : vector<1x128x128xbf16> to vector<128x128xbf16>
    %cst_209 = arith.constant dense<0.000000e+00> : vector<16x128xf32>
    %242 = tpu.matmul %239, %241, %cst_209 {dimension_numbers = #tpu.dot_dimension_numbers<[1], [0], [0], [1], [0, 0, 1, 1], [], []>} : vector<16x128xbf16>, vector<128x128xbf16>, vector<16x128xf32> -> vector<16x128xf32>
    %243 = arith.addf %236, %242 : vector<16x128xf32>
    %c2_210 = arith.constant 2 : index
    %c1_211 = arith.constant 1 : index
    %c0_212 = arith.constant 0 : index
    %244 = vector.load %arg11[%c2_210, %c1_211, %c0_212] : memref<18x18x128xf32, #tpu.memory_space<vmem>>, vector<4x4x128xf32>
    %245 = vector.shape_cast %244 : vector<4x4x128xf32> to vector<16x128xf32>
    %246 = arith.truncf %245 : vector<16x128xf32> to vector<16x128xbf16>
    %c7_213 = arith.constant 7 : index
    %c0_214 = arith.constant 0 : index
    %c0_215 = arith.constant 0 : index
    %247 = vector.load %arg5[%c7_213, %c0_214, %c0_215] : memref<9x128x128xbf16, #tpu.memory_space<vmem>>, vector<1x128x128xbf16>
    %248 = vector.shape_cast %247 : vector<1x128x128xbf16> to vector<128x128xbf16>
    %cst_216 = arith.constant dense<0.000000e+00> : vector<16x128xf32>
    %249 = tpu.matmul %246, %248, %cst_216 {dimension_numbers = #tpu.dot_dimension_numbers<[1], [0], [0], [1], [0, 0, 1, 1], [], []>} : vector<16x128xbf16>, vector<128x128xbf16>, vector<16x128xf32> -> vector<16x128xf32>
    %250 = arith.addf %243, %249 : vector<16x128xf32>
    %c2_217 = arith.constant 2 : index
    %c2_218 = arith.constant 2 : index
    %c0_219 = arith.constant 0 : index
    %251 = vector.load %arg11[%c2_217, %c2_218, %c0_219] : memref<18x18x128xf32, #tpu.memory_space<vmem>>, vector<4x4x128xf32>
    %252 = vector.shape_cast %251 : vector<4x4x128xf32> to vector<16x128xf32>
    %253 = arith.truncf %252 : vector<16x128xf32> to vector<16x128xbf16>
    %c8_220 = arith.constant 8 : index
    %c0_221 = arith.constant 0 : index
    %c0_222 = arith.constant 0 : index
    %254 = vector.load %arg5[%c8_220, %c0_221, %c0_222] : memref<9x128x128xbf16, #tpu.memory_space<vmem>>, vector<1x128x128xbf16>
    %255 = vector.shape_cast %254 : vector<1x128x128xbf16> to vector<128x128xbf16>
    %cst_223 = arith.constant dense<0.000000e+00> : vector<16x128xf32>
    %256 = tpu.matmul %253, %255, %cst_223 {dimension_numbers = #tpu.dot_dimension_numbers<[1], [0], [0], [1], [0, 0, 1, 1], [], []>} : vector<16x128xbf16>, vector<128x128xbf16>, vector<16x128xf32> -> vector<16x128xf32>
    %257 = arith.addf %250, %256 : vector<16x128xf32>
    %c2_224 = arith.constant 2 : index
    %c0_225 = arith.constant 0 : index
    %258 = vector.load %arg6[%c2_224, %c0_225] : memref<4x128xf32, #tpu.memory_space<vmem>>, vector<1x128xf32>
    %259 = vector.broadcast %258 : vector<1x128xf32> to vector<16x128xf32>
    %260 = arith.mulf %257, %259 : vector<16x128xf32>
    %c2_226 = arith.constant 2 : index
    %c0_227 = arith.constant 0 : index
    %261 = vector.load %arg7[%c2_226, %c0_227] : memref<4x128xf32, #tpu.memory_space<vmem>>, vector<1x128xf32>
    %262 = vector.broadcast %261 : vector<1x128xf32> to vector<16x128xf32>
    %263 = arith.addf %260, %262 : vector<16x128xf32>
    %264 = vector.shape_cast %263 : vector<16x128xf32> to vector<4x4x128xf32>
    %265 = arith.addf %264, %190 : vector<4x4x128xf32>
    %cst_228 = arith.constant 0.000000e+00 : f32
    %266 = vector.broadcast %cst_228 : f32 to vector<4x4x128xf32>
    %267 = arith.maximumf %265, %266 : vector<4x4x128xf32>
    %268 = vector.shape_cast %267 : vector<4x4x128xf32> to vector<2x2x4x128xf32>
    %269 = vector.extract_strided_slice %268 {offsets = [0, 0, 0, 0], sizes = [2, 1, 4, 128], strides = [1, 1, 1, 1]} : vector<2x2x4x128xf32> to vector<2x1x4x128xf32>
    %270 = vector.shape_cast %269 : vector<2x1x4x128xf32> to vector<2x4x128xf32>
    %271 = vector.extract_strided_slice %268 {offsets = [0, 1, 0, 0], sizes = [2, 1, 4, 128], strides = [1, 1, 1, 1]} : vector<2x2x4x128xf32> to vector<2x1x4x128xf32>
    %272 = vector.shape_cast %271 : vector<2x1x4x128xf32> to vector<2x4x128xf32>
    %273 = arith.maximumf %270, %272 : vector<2x4x128xf32>
    %274 = vector.shape_cast %273 : vector<2x4x128xf32> to vector<2x2x2x128xf32>
    %275 = vector.extract_strided_slice %274 {offsets = [0, 0, 0, 0], sizes = [2, 2, 1, 128], strides = [1, 1, 1, 1]} : vector<2x2x2x128xf32> to vector<2x2x1x128xf32>
    %276 = vector.shape_cast %275 : vector<2x2x1x128xf32> to vector<2x2x128xf32>
    %277 = vector.extract_strided_slice %274 {offsets = [0, 0, 1, 0], sizes = [2, 2, 1, 128], strides = [1, 1, 1, 1]} : vector<2x2x2x128xf32> to vector<2x2x1x128xf32>
    %278 = vector.shape_cast %277 : vector<2x2x1x128xf32> to vector<2x2x128xf32>
    %279 = arith.maximumf %276, %278 : vector<2x2x128xf32>
    %cst_229 = arith.constant 0.000000e+00 : f32
    %280 = vector.broadcast %cst_229 : f32 to vector<18x18x128xf32>
    %c0_230 = arith.constant 0 : index
    %c0_231 = arith.constant 0 : index
    %c0_232 = arith.constant 0 : index
    %281 = vector.load %arg11[%c0_230, %c0_231, %c0_232] : memref<18x18x128xf32, #tpu.memory_space<vmem>>, vector<18x18x128xf32>
    tpu.vector_store %arg11[%c0_230, %c0_231, %c0_232], %280 {strides = array<i32>} : memref<18x18x128xf32, #tpu.memory_space<vmem>>, vector<18x18x128xf32>,
    %c1_233 = arith.constant 1 : index
    %c1_234 = arith.constant 1 : index
    %c0_235 = arith.constant 0 : index
    %282 = vector.load %arg11[%c1_233, %c1_234, %c0_235] : memref<18x18x128xf32, #tpu.memory_space<vmem>>, vector<2x2x128xf32>
    tpu.vector_store %arg11[%c1_233, %c1_234, %c0_235], %279 {strides = array<i32>} : memref<18x18x128xf32, #tpu.memory_space<vmem>>, vector<2x2x128xf32>,
    %cst_236 = arith.constant 0.000000e+00 : f32
    %283 = vector.broadcast %cst_236 : f32 to vector<4x128xf32>
    %c0_237 = arith.constant 0 : index
    %c0_238 = arith.constant 0 : index
    %c0_239 = arith.constant 0 : index
    %284 = vector.load %arg11[%c0_237, %c0_238, %c0_239] : memref<18x18x128xf32, #tpu.memory_space<vmem>>, vector<2x2x128xf32>
    %285 = vector.shape_cast %284 : vector<2x2x128xf32> to vector<4x128xf32>
    %286 = arith.truncf %285 : vector<4x128xf32> to vector<4x128xbf16>
    %c0_240 = arith.constant 0 : index
    %c0_241 = arith.constant 0 : index
    %c0_242 = arith.constant 0 : index
    %287 = vector.load %arg5[%c0_240, %c0_241, %c0_242] : memref<9x128x128xbf16, #tpu.memory_space<vmem>>, vector<1x128x128xbf16>
    %288 = vector.shape_cast %287 : vector<1x128x128xbf16> to vector<128x128xbf16>
    %cst_243 = arith.constant dense<0.000000e+00> : vector<4x128xf32>
    %289 = tpu.matmul %286, %288, %cst_243 {dimension_numbers = #tpu.dot_dimension_numbers<[1], [0], [0], [1], [0, 0, 1, 1], [], []>} : vector<4x128xbf16>, vector<128x128xbf16>, vector<4x128xf32> -> vector<4x128xf32>
    %290 = arith.addf %283, %289 : vector<4x128xf32>
    %c0_244 = arith.constant 0 : index
    %c1_245 = arith.constant 1 : index
    %c0_246 = arith.constant 0 : index
    %291 = vector.load %arg11[%c0_244, %c1_245, %c0_246] : memref<18x18x128xf32, #tpu.memory_space<vmem>>, vector<2x2x128xf32>
    %292 = vector.shape_cast %291 : vector<2x2x128xf32> to vector<4x128xf32>
    %293 = arith.truncf %292 : vector<4x128xf32> to vector<4x128xbf16>
    %c1_247 = arith.constant 1 : index
    %c0_248 = arith.constant 0 : index
    %c0_249 = arith.constant 0 : index
    %294 = vector.load %arg5[%c1_247, %c0_248, %c0_249] : memref<9x128x128xbf16, #tpu.memory_space<vmem>>, vector<1x128x128xbf16>
    %295 = vector.shape_cast %294 : vector<1x128x128xbf16> to vector<128x128xbf16>
    %cst_250 = arith.constant dense<0.000000e+00> : vector<4x128xf32>
    %296 = tpu.matmul %293, %295, %cst_250 {dimension_numbers = #tpu.dot_dimension_numbers<[1], [0], [0], [1], [0, 0, 1, 1], [], []>} : vector<4x128xbf16>, vector<128x128xbf16>, vector<4x128xf32> -> vector<4x128xf32>
    %297 = arith.addf %290, %296 : vector<4x128xf32>
    %c0_251 = arith.constant 0 : index
    %c2_252 = arith.constant 2 : index
    %c0_253 = arith.constant 0 : index
    %298 = vector.load %arg11[%c0_251, %c2_252, %c0_253] : memref<18x18x128xf32, #tpu.memory_space<vmem>>, vector<2x2x128xf32>
    %299 = vector.shape_cast %298 : vector<2x2x128xf32> to vector<4x128xf32>
    %300 = arith.truncf %299 : vector<4x128xf32> to vector<4x128xbf16>
    %c2_254 = arith.constant 2 : index
    %c0_255 = arith.constant 0 : index
    %c0_256 = arith.constant 0 : index
    %301 = vector.load %arg5[%c2_254, %c0_255, %c0_256] : memref<9x128x128xbf16, #tpu.memory_space<vmem>>, vector<1x128x128xbf16>
    %302 = vector.shape_cast %301 : vector<1x128x128xbf16> to vector<128x128xbf16>
    %cst_257 = arith.constant dense<0.000000e+00> : vector<4x128xf32>
    %303 = tpu.matmul %300, %302, %cst_257 {dimension_numbers = #tpu.dot_dimension_numbers<[1], [0], [0], [1], [0, 0, 1, 1], [], []>} : vector<4x128xbf16>, vector<128x128xbf16>, vector<4x128xf32> -> vector<4x128xf32>
    %304 = arith.addf %297, %303 : vector<4x128xf32>
    %c1_258 = arith.constant 1 : index
    %c0_259 = arith.constant 0 : index
    %c0_260 = arith.constant 0 : index
    %305 = vector.load %arg11[%c1_258, %c0_259, %c0_260] : memref<18x18x128xf32, #tpu.memory_space<vmem>>, vector<2x2x128xf32>
    %306 = vector.shape_cast %305 : vector<2x2x128xf32> to vector<4x128xf32>
    %307 = arith.truncf %306 : vector<4x128xf32> to vector<4x128xbf16>
    %c3_261 = arith.constant 3 : index
    %c0_262 = arith.constant 0 : index
    %c0_263 = arith.constant 0 : index
    %308 = vector.load %arg5[%c3_261, %c0_262, %c0_263] : memref<9x128x128xbf16, #tpu.memory_space<vmem>>, vector<1x128x128xbf16>
    %309 = vector.shape_cast %308 : vector<1x128x128xbf16> to vector<128x128xbf16>
    %cst_264 = arith.constant dense<0.000000e+00> : vector<4x128xf32>
    %310 = tpu.matmul %307, %309, %cst_264 {dimension_numbers = #tpu.dot_dimension_numbers<[1], [0], [0], [1], [0, 0, 1, 1], [], []>} : vector<4x128xbf16>, vector<128x128xbf16>, vector<4x128xf32> -> vector<4x128xf32>
    %311 = arith.addf %304, %310 : vector<4x128xf32>
    %c1_265 = arith.constant 1 : index
    %c1_266 = arith.constant 1 : index
    %c0_267 = arith.constant 0 : index
    %312 = vector.load %arg11[%c1_265, %c1_266, %c0_267] : memref<18x18x128xf32, #tpu.memory_space<vmem>>, vector<2x2x128xf32>
    %313 = vector.shape_cast %312 : vector<2x2x128xf32> to vector<4x128xf32>
    %314 = arith.truncf %313 : vector<4x128xf32> to vector<4x128xbf16>
    %c4_268 = arith.constant 4 : index
    %c0_269 = arith.constant 0 : index
    %c0_270 = arith.constant 0 : index
    %315 = vector.load %arg5[%c4_268, %c0_269, %c0_270] : memref<9x128x128xbf16, #tpu.memory_space<vmem>>, vector<1x128x128xbf16>
    %316 = vector.shape_cast %315 : vector<1x128x128xbf16> to vector<128x128xbf16>
    %cst_271 = arith.constant dense<0.000000e+00> : vector<4x128xf32>
    %317 = tpu.matmul %314, %316, %cst_271 {dimension_numbers = #tpu.dot_dimension_numbers<[1], [0], [0], [1], [0, 0, 1, 1], [], []>} : vector<4x128xbf16>, vector<128x128xbf16>, vector<4x128xf32> -> vector<4x128xf32>
    %318 = arith.addf %311, %317 : vector<4x128xf32>
    %c1_272 = arith.constant 1 : index
    %c2_273 = arith.constant 2 : index
    %c0_274 = arith.constant 0 : index
    %319 = vector.load %arg11[%c1_272, %c2_273, %c0_274] : memref<18x18x128xf32, #tpu.memory_space<vmem>>, vector<2x2x128xf32>
    %320 = vector.shape_cast %319 : vector<2x2x128xf32> to vector<4x128xf32>
    %321 = arith.truncf %320 : vector<4x128xf32> to vector<4x128xbf16>
    %c5_275 = arith.constant 5 : index
    %c0_276 = arith.constant 0 : index
    %c0_277 = arith.constant 0 : index
    %322 = vector.load %arg5[%c5_275, %c0_276, %c0_277] : memref<9x128x128xbf16, #tpu.memory_space<vmem>>, vector<1x128x128xbf16>
    %323 = vector.shape_cast %322 : vector<1x128x128xbf16> to vector<128x128xbf16>
    %cst_278 = arith.constant dense<0.000000e+00> : vector<4x128xf32>
    %324 = tpu.matmul %321, %323, %cst_278 {dimension_numbers = #tpu.dot_dimension_numbers<[1], [0], [0], [1], [0, 0, 1, 1], [], []>} : vector<4x128xbf16>, vector<128x128xbf16>, vector<4x128xf32> -> vector<4x128xf32>
    %325 = arith.addf %318, %324 : vector<4x128xf32>
    %c2_279 = arith.constant 2 : index
    %c0_280 = arith.constant 0 : index
    %c0_281 = arith.constant 0 : index
    %326 = vector.load %arg11[%c2_279, %c0_280, %c0_281] : memref<18x18x128xf32, #tpu.memory_space<vmem>>, vector<2x2x128xf32>
    %327 = vector.shape_cast %326 : vector<2x2x128xf32> to vector<4x128xf32>
    %328 = arith.truncf %327 : vector<4x128xf32> to vector<4x128xbf16>
    %c6_282 = arith.constant 6 : index
    %c0_283 = arith.constant 0 : index
    %c0_284 = arith.constant 0 : index
    %329 = vector.load %arg5[%c6_282, %c0_283, %c0_284] : memref<9x128x128xbf16, #tpu.memory_space<vmem>>, vector<1x128x128xbf16>
    %330 = vector.shape_cast %329 : vector<1x128x128xbf16> to vector<128x128xbf16>
    %cst_285 = arith.constant dense<0.000000e+00> : vector<4x128xf32>
    %331 = tpu.matmul %328, %330, %cst_285 {dimension_numbers = #tpu.dot_dimension_numbers<[1], [0], [0], [1], [0, 0, 1, 1], [], []>} : vector<4x128xbf16>, vector<128x128xbf16>, vector<4x128xf32> -> vector<4x128xf32>
    %332 = arith.addf %325, %331 : vector<4x128xf32>
    %c2_286 = arith.constant 2 : index
    %c1_287 = arith.constant 1 : index
    %c0_288 = arith.constant 0 : index
    %333 = vector.load %arg11[%c2_286, %c1_287, %c0_288] : memref<18x18x128xf32, #tpu.memory_space<vmem>>, vector<2x2x128xf32>
    %334 = vector.shape_cast %333 : vector<2x2x128xf32> to vector<4x128xf32>
    %335 = arith.truncf %334 : vector<4x128xf32> to vector<4x128xbf16>
    %c7_289 = arith.constant 7 : index
    %c0_290 = arith.constant 0 : index
    %c0_291 = arith.constant 0 : index
    %336 = vector.load %arg5[%c7_289, %c0_290, %c0_291] : memref<9x128x128xbf16, #tpu.memory_space<vmem>>, vector<1x128x128xbf16>
    %337 = vector.shape_cast %336 : vector<1x128x128xbf16> to vector<128x128xbf16>
    %cst_292 = arith.constant dense<0.000000e+00> : vector<4x128xf32>
    %338 = tpu.matmul %335, %337, %cst_292 {dimension_numbers = #tpu.dot_dimension_numbers<[1], [0], [0], [1], [0, 0, 1, 1], [], []>} : vector<4x128xbf16>, vector<128x128xbf16>, vector<4x128xf32> -> vector<4x128xf32>
    %339 = arith.addf %332, %338 : vector<4x128xf32>
    %c2_293 = arith.constant 2 : index
    %c2_294 = arith.constant 2 : index
    %c0_295 = arith.constant 0 : index
    %340 = vector.load %arg11[%c2_293, %c2_294, %c0_295] : memref<18x18x128xf32, #tpu.memory_space<vmem>>, vector<2x2x128xf32>
    %341 = vector.shape_cast %340 : vector<2x2x128xf32> to vector<4x128xf32>
    %342 = arith.truncf %341 : vector<4x128xf32> to vector<4x128xbf16>
    %c8_296 = arith.constant 8 : index
    %c0_297 = arith.constant 0 : index
    %c0_298 = arith.constant 0 : index
    %343 = vector.load %arg5[%c8_296, %c0_297, %c0_298] : memref<9x128x128xbf16, #tpu.memory_space<vmem>>, vector<1x128x128xbf16>
    %344 = vector.shape_cast %343 : vector<1x128x128xbf16> to vector<128x128xbf16>
    %cst_299 = arith.constant dense<0.000000e+00> : vector<4x128xf32>
    %345 = tpu.matmul %342, %344, %cst_299 {dimension_numbers = #tpu.dot_dimension_numbers<[1], [0], [0], [1], [0, 0, 1, 1], [], []>} : vector<4x128xbf16>, vector<128x128xbf16>, vector<4x128xf32> -> vector<4x128xf32>
    %346 = arith.addf %339, %345 : vector<4x128xf32>
    %c3_300 = arith.constant 3 : index
    %c0_301 = arith.constant 0 : index
    %347 = vector.load %arg6[%c3_300, %c0_301] : memref<4x128xf32, #tpu.memory_space<vmem>>, vector<1x128xf32>
    %348 = vector.broadcast %347 : vector<1x128xf32> to vector<4x128xf32>
    %349 = arith.mulf %346, %348 : vector<4x128xf32>
    %c3_302 = arith.constant 3 : index
    %c0_303 = arith.constant 0 : index
    %350 = vector.load %arg7[%c3_302, %c0_303] : memref<4x128xf32, #tpu.memory_space<vmem>>, vector<1x128xf32>
    %351 = vector.broadcast %350 : vector<1x128xf32> to vector<4x128xf32>
    %352 = arith.addf %349, %351 : vector<4x128xf32>
    %353 = vector.shape_cast %352 : vector<4x128xf32> to vector<2x2x128xf32>
    %354 = arith.addf %353, %279 : vector<2x2x128xf32>
    %cst_304 = arith.constant 0.000000e+00 : f32
    %355 = vector.broadcast %cst_304 : f32 to vector<2x2x128xf32>
    %356 = arith.maximumf %354, %355 : vector<2x2x128xf32>
    %357 = vector.shape_cast %356 : vector<2x2x128xf32> to vector<1x2x2x128xf32>
    %358 = vector.extract_strided_slice %357 {offsets = [0, 0, 0, 0], sizes = [1, 1, 2, 128], strides = [1, 1, 1, 1]} : vector<1x2x2x128xf32> to vector<1x1x2x128xf32>
    %359 = vector.shape_cast %358 : vector<1x1x2x128xf32> to vector<1x2x128xf32>
    %360 = vector.extract_strided_slice %357 {offsets = [0, 1, 0, 0], sizes = [1, 1, 2, 128], strides = [1, 1, 1, 1]} : vector<1x2x2x128xf32> to vector<1x1x2x128xf32>
    %361 = vector.shape_cast %360 : vector<1x1x2x128xf32> to vector<1x2x128xf32>
    %362 = arith.maximumf %359, %361 : vector<1x2x128xf32>
    %363 = vector.shape_cast %362 : vector<1x2x128xf32> to vector<1x1x2x128xf32>
    %364 = vector.extract_strided_slice %363 {offsets = [0, 0, 0, 0], sizes = [1, 1, 1, 128], strides = [1, 1, 1, 1]} : vector<1x1x2x128xf32> to vector<1x1x1x128xf32>
    %365 = vector.shape_cast %364 : vector<1x1x1x128xf32> to vector<1x1x128xf32>
    %366 = vector.extract_strided_slice %363 {offsets = [0, 0, 1, 0], sizes = [1, 1, 1, 128], strides = [1, 1, 1, 1]} : vector<1x1x2x128xf32> to vector<1x1x1x128xf32>
    %367 = vector.shape_cast %366 : vector<1x1x1x128xf32> to vector<1x1x128xf32>
    %368 = arith.maximumf %365, %367 : vector<1x1x128xf32>
    %369 = vector.shape_cast %368 : vector<1x1x128xf32> to vector<1x128xf32>
    %370 = arith.truncf %369 : vector<1x128xf32> to vector<1x128xbf16>
    %c0_305 = arith.constant 0 : index
    %c0_306 = arith.constant 0 : index
    %371 = vector.load %arg8[%c0_305, %c0_306] : memref<128x128xbf16, #tpu.memory_space<vmem>>, vector<128x128xbf16>
    %cst_307 = arith.constant dense<0.000000e+00> : vector<1x128xf32>
    %372 = tpu.matmul %370, %371, %cst_307 {dimension_numbers = #tpu.dot_dimension_numbers<[1], [0], [0], [1], [0, 0, 1, 1], [], []>} : vector<1x128xbf16>, vector<128x128xbf16>, vector<1x128xf32> -> vector<1x128xf32>
    %c0_308 = arith.constant 0 : index
    %c0_309 = arith.constant 0 : index
    %373 = vector.load %arg9[%c0_308, %c0_309] : memref<1x128xf32, #tpu.memory_space<vmem>>, vector<1x128xf32>
    %374 = arith.addf %372, %373 : vector<1x128xf32>
    %c0_310 = arith.constant 0 : index
    %c0_311 = arith.constant 0 : index
    %c0_312 = arith.constant 0 : index
    %375 = vector.load %arg10[%c0_310, %c0_311, %c0_312] : memref<1x1x128xf32, #tpu.memory_space<vmem>>, vector<1x1x128xf32>
    %376 = vector.shape_cast %375 : vector<1x1x128xf32> to vector<1x128xf32>
    %377 = vector.shape_cast %374 : vector<1x128xf32> to vector<1x1x128xf32>
    tpu.vector_store %arg10[%c0_310, %c0_311, %c0_312], %377 {strides = array<i32>} : memref<1x1x128xf32, #tpu.memory_space<vmem>>, vector<1x1x128xf32>,
    return
  }
  func.func @transform_0(%arg0: i32) -> (i32, i32, i32) {
    %c0_i32 = arith.constant 0 : i32
    %c0_i32_0 = arith.constant 0 : i32
    %c0_i32_1 = arith.constant 0 : i32
    return %arg0, %c0_i32, %c0_i32_0 : i32, i32, i32
  }
  func.func @transform_1(%arg0: i32) -> (i32, i32) {
    %c0_i32 = arith.constant 0 : i32
    %c0_i32_0 = arith.constant 0 : i32
    %c0_i32_1 = arith.constant 0 : i32
    return %c0_i32, %c0_i32_0 : i32, i32
  }
  func.func @transform_2(%arg0: i32) -> (i32, i32) {
    %c0_i32 = arith.constant 0 : i32
    %c0_i32_0 = arith.constant 0 : i32
    %c0_i32_1 = arith.constant 0 : i32
    return %c0_i32, %c0_i32_0 : i32, i32
  }
  func.func @transform_3(%arg0: i32) -> (i32, i32) {
    %c0_i32 = arith.constant 0 : i32
    %c0_i32_0 = arith.constant 0 : i32
    %c0_i32_1 = arith.constant 0 : i32
    return %c0_i32, %c0_i32_0 : i32, i32
  }
  func.func @transform_4(%arg0: i32) -> (i32, i32, i32) {
    %c0_i32 = arith.constant 0 : i32
    %c0_i32_0 = arith.constant 0 : i32
    %c0_i32_1 = arith.constant 0 : i32
    %c0_i32_2 = arith.constant 0 : i32
    return %c0_i32, %c0_i32_0, %c0_i32_1 : i32, i32, i32
  }
  func.func @transform_5(%arg0: i32) -> (i32, i32) {
    %c0_i32 = arith.constant 0 : i32
    %c0_i32_0 = arith.constant 0 : i32
    %c0_i32_1 = arith.constant 0 : i32
    return %c0_i32, %c0_i32_0 : i32, i32
  }
  func.func @transform_6(%arg0: i32) -> (i32, i32) {
    %c0_i32 = arith.constant 0 : i32
    %c0_i32_0 = arith.constant 0 : i32
    %c0_i32_1 = arith.constant 0 : i32
    return %c0_i32, %c0_i32_0 : i32, i32
  }
  func.func @transform_7(%arg0: i32) -> (i32, i32) {
    %c0_i32 = arith.constant 0 : i32
    %c0_i32_0 = arith.constant 0 : i32
    %c0_i32_1 = arith.constant 0 : i32
    return %c0_i32, %c0_i32_0 : i32, i32
  }
  func.func @transform_8(%arg0: i32) -> (i32, i32) {
    %c0_i32 = arith.constant 0 : i32
    %c0_i32_0 = arith.constant 0 : i32
    %c0_i32_1 = arith.constant 0 : i32
    return %c0_i32, %c0_i32_0 : i32, i32
  }
  func.func @transform_9(%arg0: i32) -> (i32, i32, i32) {
    %c0_i32 = arith.constant 0 : i32
    %c0_i32_0 = arith.constant 0 : i32
    %c0_i32_1 = arith.constant 0 : i32
    return %arg0, %c0_i32, %c0_i32_0 : i32, i32, i32
  }
}

</mosaic_0001>

<bundles_post_ra>
// kernel: dacnn_res_forward.1
= control target key start
LH: loop header
LB: loop body
LE: loop exit
PB: predicated region body
PF: predicated region fallthrough
CT: control target
= control target key end

     0   :  { %14 = vsyncpa [#allocation4], 0  ;;  %s12392_s0 = inlined_call_operand.vmem [shape: bf16[2,256,27], index: 0, kind: input, shape index: {}]   ;;  %s12393_s1 = inlined_call_operand.vmem [shape: bf16[27,128], index: 1, kind: input, shape index: {}]   ;;  %s12394_s2 = inlined_call_operand.vmem [shape: f32[1,128], index: 2, kind: input, shape index: {}]   ;;  %s12395_s3 = inlined_call_operand.vmem [shape: f32[1,128], index: 3, kind: input, shape index: {}]   ;;  %s12396_s4 = inlined_call_operand.vmem [shape: bf16[9,128,128], index: 4, kind: input, shape index: {}]   ;;  %s12397_s5 = inlined_call_operand.vmem [shape: f32[4,128], index: 5, kind: input, shape index: {}]   ;;  %s12398_s6 = inlined_call_operand.vmem [shape: f32[4,128], index: 6, kind: input, shape index: {}]   ;;  %s12399_s7 = inlined_call_operand.vmem [shape: bf16[128,128], index: 7, kind: input, shape index: {}]   ;;  %s12400_s8 = inlined_call_operand.vmem [shape: f32[1,128], index: 8, kind: input, shape index: {}]   ;;  %s12401_s9 = inlined_call_operand.hbm [shape: f32[2,1,128], index: 9, kind: output, shape index: {}]  }
   0x1   :  { %16 = vsyncpa [#allocation4 + $0x1], 0  ;;  %s9307_s30 = smov 0   ;;  %s9309_s10 = smov 0  }
   0x2   :  { %s9311_s11 = smov 0   ;;  %s9313_s12 = smov 0  }
   0x3 LB: > { %s9328_s13 = sadd.s32 4294967295, %s9251_s12   ;;  %s6937_s14 = sadd.s32 4294967294, %s9251_s12   ;;  %s9251_s12 = sphi %s9313_s12, %s12823_s12   ;;  %s9247_s11 = sphi %s9311_s11, %s12822_s11   ;;  %s9243_s10 = sphi %s9309_s10, %s12821_s10   ;;  %s9239_s30 = sphi %s9307_s30, %s12820_s30  }
   0x4   : > { %s9332_s15 = sadd.s32 1, %s9251_s12   ;;  %s223_s16 = sadd.s32 1, %s9247_s11 }
   0x5   : > { %s220_s17 = ssub.s32 %s9251_s12, %s9332_s15  ;;  %p233_p0 = scmp.ne.s32.totalorder %s9247_s11, %s9243_s10 }
   0x6   : > { %p221_p1 = scmp.eq.s32.totalorder %s220_s17, 0  ;;  %p234_p2 = scmp.eq.s32.totalorder %s9328_s13, 1 }
   0x7   : > { %p239_p3 = scmp.ne.s32.totalorder %s9243_s10, %s9239_s30  ;;  %p240_p4 = scmp.eq.s32.totalorder %s6937_s14, 1 }
   0x8   : > { %s9343_s18 = scalar_select %p221_p1, %s9247_s11, %s223_s16  }
   0x9   : > { %p9345_p5 = por %p234_p2, %p233_p0  ;;  %p9349_p6 = por %p240_p4, %p239_p3 }
   0xa   : > { %p6940_p7 = scmp.ge.s32.totalorder %s9251_s12, 1  ;;  %p290_p8 = scmp.lt.s32.totalorder %s9251_s12, 3 }
   0xc   : > { %p291_p9 = pnand %p6940_p7, %p290_p8 }
   0xe   : > { %294 = sbr.rel (%p291_p9) target bundleno = 2062 (0x80e), region = 56 }
  0x13   : > { %v7013_v0 = vld [vmem:[%s12393_s1 + $0x8] sm:$0xf]  ;;  %v8832_v1 = vld [vmem:[%s12393_s1 + $0x8] sm:$0x30]  ;;  %vm507_vm0 = vcmask 1044480   ;;  %vm508_vm1 = vcmask 1045504  }
  0x14   : > { %v7014_v2 = vor.u32 %v8832_v1, %v7013_v0  ;;  %p325_p10 = scmp.lt.s32.totalorder %s9328_s13, 1  ;;  %v9253_v3 = vmov 65535   ;;  %v8831_v7 = vld [vmem:[%s12393_s1] sm:$0xff]  ;;  %vm458_vm2 = vcmask 220160   ;;  %v8840_v12 = vld [vmem:[%s12396_s4 + $0x38] sm:$0xff]  ;;  %v8839_v15 = vld [vmem:[%s12396_s4 + $0x30] sm:$0xff] }
  0x15   : > { %v509_v4 = vsel %vm507_vm0, 4294967295, %v9253_v3  ;;  %v8856_v13 = vld [vmem:[%s12396_s4 + $0xb8] sm:$0xff]  ;;  %1108 = vmatpush.bf16.msra.mxu2 %v8840_v12  ;;  %v8855_v16 = vld [vmem:[%s12396_s4 + $0xb0] sm:$0xff]  ;;  %v8838_v17 = vld [vmem:[%s12396_s4 + $0x28] sm:$0xff]  ;;  %v12402_v31 = vmov 0.0   ;;  %v9255_v39 = vmov 0.0|0.0  }
  0x16   : > { %v510_v5 = vsel %vm508_vm1, %v509_v4, 0  ;;  %s326_s25 = scalar_select %p325_p10, %s9328_s13, 1  ;;  %v8848_v14 = vld [vmem:[%s12396_s4 + $0x78] sm:$0xff]  ;;  %1310 = vmatpush.bf16.msra.mxu3 %v8856_v13  ;;  %v8847_v18 = vld [vmem:[%s12396_s4 + $0x70] sm:$0xff]  ;;  %v8854_v19 = vld [vmem:[%s12396_s4 + $0xa8] sm:$0xff]  ;;  %707 = vst [vmem:[#allocation2] sm:$0xff] %v12402_v31 }
  0x17   : > { %v512_v6 = vand.u32 %v7014_v2, %v510_v5  ;;  %971 = vmatpush.bf16.msra.mxu1 %v8848_v14  ;;  %v8837_v20 = vld [vmem:[%s12396_s4 + $0x20] sm:$0xff]  ;;  %v8846_v22 = vld [vmem:[%s12396_s4 + $0x68] sm:$0xff]  ;;  %v8836_v24 = vld [vmem:[%s12396_s4 + $0x18] sm:$0xff]  ;;  %708 = vst [vmem:[#allocation2 + $0x8] sm:$0xff] %v12402_v31  ;;  %vm3534_vm3 = vcmask 1041409   ;;  %vm3536_vm4 = vcmask 1042434  }
  0x18   : > { %s8814_s26 = sshll.u32 %s326_s25, 7  ;;  %v8853_v23 = vld [vmem:[%s12396_s4 + $0xa0] sm:$0xff]  ;;  %v8852_v26 = vld [vmem:[%s12396_s4 + $0x98] sm:$0xff]  ;;  %v8835_v27 = vld [vmem:[%s12396_s4 + $0x10] sm:$0xff]  ;;  %709 = vst [vmem:[#allocation2 + $0x10] sm:$0x3] %v12402_v31  ;;  %s6878_s25 = scalar_lea.hbm %s12401_s9, %s9328_s13 }
  0x19   : > { %520 = vmatpush.bf16.msra.mxu0 %v512_v6  ;;  %s9369_s16 = scalar_lea.vmem %s12392_s0, %s8814_s26  ;;  %1109 = vmatpush.bf16.msra.mxu2 %v8839_v15  ;;  %v8845_v25 = vld [vmem:[%s12396_s4 + $0x60] sm:$0xff]  ;;  %v8844_v28 = vld [vmem:[%s12396_s4 + $0x58] sm:$0xff]  ;;  %v8851_v29 = vld [vmem:[%s12396_s4 + $0x90] sm:$0xff]  ;;  %710 = vst [vmem:[#allocation2 + $0x18] sm:$0xff] %v12402_v31  ;;  %vm3538_vm5 = vcmask 1043459   ;;  %vm3540_vm6 = vcmask 1044484  }
  0x1a   : > { %v8815_v8 = vld [vmem:[%s9369_s16] sm:$0xff]  ;;  %v8816_v9 = vld [vmem:[%s9369_s16 + $0x8] sm:$0xff]  ;;  %v8817_v10 = vld [vmem:[%s9369_s16 + $0x10] sm:$0xff]  ;;  %1311 = vmatpush.bf16.msra.mxu3 %v8855_v16  ;;  %711 = vst [vmem:[#allocation2 + $0x20] sm:$0xff] %v12402_v31  ;;  %vm3542_vm7 = vcmask 1045509   ;;  %vm3544_vm8 = vcmask 1046534  }
  0x1b   : > { %v8818_v11 = vld [vmem:[%s9369_s16 + $0x18] sm:$0xff]  ;;  %972 = vmatpush.bf16.msra.mxu1 %v8847_v18  ;;  %v8819_v21 = vld [vmem:[%s9369_s16 + $0x20] sm:$0xff]  ;;  %v8834_v30 = vld [vmem:[%s12396_s4 + $0x8] sm:$0xff]  ;;  %712 = vst [vmem:[#allocation2 + $0x28] sm:$0x3] %v12402_v31  ;;  %vm3546_vm9 = vcmask 1047559  }
  0x1c   : > { %v8843_v32 = vld [vmem:[%s12396_s4 + $0x50] sm:$0xff]  ;;  %v8850_v33 = vld [vmem:[%s12396_s4 + $0x88] sm:$0xff]  ;;  %v8833_v34 = vld [vmem:[%s12396_s4] sm:$0xff]  ;;  %713 = vst [vmem:[#allocation2 + $0x30] sm:$0xff] %v12402_v31  ;;  %vm5868_vm10 = vcmask 1041408   ;;  %vm5870_vm11 = vcmask 1043458  }
  0x1d   : > { %521 = vmatpush.bf16.msra.mxu0 %v8831_v7  ;;  %1110 = vmatpush.bf16.msra.mxu2 %v8838_v17  ;;  %v8820_v35 = vld [vmem:[%s9369_s16 + $0x28] sm:$0xff]  ;;  %v8849_v37 = vld [vmem:[%s12396_s4 + $0x80] sm:$0xff]  ;;  %714 = vst [vmem:[#allocation2 + $0x38] sm:$0xff] %v12402_v31  ;;  %v8821_v46 = vld [vmem:[%s9369_s16 + $0x30] sm:$0xff]  ;;  %s323_s22 = sand.u32 1, %s9243_s10   ;;  %s6882_s14 = sshll.u32 %s6878_s25, 4  ;;  %s6883_s14 = int_to_ptr.hbm [resolvable:$true] %s6882_s14 }
  0x1e   : > { %1312 = vmatpush.bf16.msra.mxu3 %v8854_v19  ;;  %v8842_v36 = vld [vmem:[%s12396_s4 + $0x48] sm:$0xff]  ;;  %715 = vst [vmem:[#allocation2 + $0x40] sm:$0x3] %v12402_v31  ;;  %v8841_v42 = vld [vmem:[%s12396_s4 + $0x40] sm:$0xff]  ;;  %v8864_v47 = vld [vmem:[%s12396_s4 + $0xf8] sm:$0xff]  ;;  %s324_s28 = scalar_lea.vmem [#allocation3], %s323_s22 }
  0x1f   : > { %973 = vmatpush.bf16.msra.mxu1 %v8846_v22  ;;  %v858_v38 = vld [vmem:[#allocation2 + $0x1] sm:$0xff]  ;;  %v1198_v41 = vld [vmem:[#allocation2 + $0xa] sm:$0xff]  ;;  %716 = vst [vmem:[#allocation2 + $0x48] sm:$0xff] %v12402_v31  ;;  %v9519_v50 = vld [vmem:[%s12394_s2] ss:$0 sm:$0xff]  ;;  %s6880_s29 = sshll.u32 %s324_s28, 4  ;;  %s6881_s29 = int_to_ptr.vmem [resolvable:$true] %s6880_s29 }
  0x20   : > { %7015 = vmatmul.msk.bf16.vlgmr.msra.gmra.mxu0 %vm458_vm2, %v8815_v8  ;;  %v1197_v40 = vld [vmem:[#allocation2 + $0x2] sm:$0xff]  ;;  %717 = vst [vmem:[#allocation2 + $0x50] sm:$0xff] %v12402_v31  ;;  %v8822_v48 = vld [vmem:[%s9369_s16 + $0x38] sm:$0xff]  ;;  %v9526_v51 = vld [vmem:[%s12395_s3] ss:$0 sm:$0xff]  ;;  %s6870_s17 = scalar_lea.sflag [#allocation4], %s323_s22 }
  0x21   : > { %1111 = vmatpush.bf16.msra.mxu2 %v8837_v20  ;;  %3352 = vst [vmem:[#allocation2] sm:$0xff] %v12402_v31  ;;  %v1229_v43 = vpack.c.bf16 %v1198_v41, %v1197_v40  ;;  %v859_v44 = vld [vmem:[#allocation2 + $0x9] sm:$0xff]  ;;  %1544 = vmatpush.bf16.msrb.mxu0 %v8864_v47  ;;  %v8823_v52 = vld [vmem:[%s9369_s16 + $0x40] sm:$0xff]  ;;  %v8824_v62 = vld [vmem:[%s9369_s16 + $0x48] sm:$0xff]  ;;  %s9209_s24 = scalar_lea.hbm %s12401_s9, 2 }
  0x22   : > { %1313 = vmatpush.bf16.msra.mxu3 %v8853_v23  ;;  %718 = vst [vmem:[#allocation2 + $0x58] sm:$0x3] %v12402_v31  ;;  %v890_v45 = vpack.c.bf16 %v859_v44, %v858_v38  ;;  %v8872_v49 = vld [vmem:[%s12396_s4 + $0x138] sm:$0xff]  ;;  %v8863_v57 = vld [vmem:[%s12396_s4 + $0xf0] sm:$0xff]  ;;  %v8870_v47 = vld [vmem:[%s12396_s4 + $0x128] sm:$0xff] }
  0x23   : > { %974 = vmatpush.bf16.msra.mxu1 %v8845_v25  ;;  %719 = vst [vmem:[#allocation2 + $0x60] sm:$0xff] %v12402_v31  ;;  %v8871_v0 = vld [vmem:[%s12396_s4 + $0x130] sm:$0xff] }
  0x24   : > { %720 = vst [vmem:[#allocation2 + $0x68] sm:$0xff] %v12402_v31  ;;  %v8825_v18 = vld [vmem:[%s9369_s16 + $0x50] sm:$0xff] }
  0x25   : > { %1112 = vmatpush.bf16.msra.mxu2 %v8836_v24  ;;  %721 = vst [vmem:[#allocation2 + $0x70] sm:$0x3] %v12402_v31  ;;  %1545 = vmatpush.bf16.msrb.mxu0 %v8863_v57 }
  0x26   : > { %1314 = vmatpush.bf16.msra.mxu3 %v8852_v26  ;;  %722 = vst [vmem:[#allocation2 + $0x78] sm:$0xff] %v12402_v31 }
  0x27   : > { %975 = vmatpush.bf16.msra.mxu1 %v8844_v28  ;;  %723 = vst [vmem:[#allocation2 + $0x80] sm:$0xff] %v12402_v31 }
  0x28   : > { %724 = vst [vmem:[#allocation2 + $0x88] sm:$0x3] %v12402_v31 }
  0x29   : > { %1113 = vmatpush.bf16.msra.mxu2 %v8835_v27  ;;  %725 = vst [vmem:[#allocation2 + $0x90] sm:$0xff] %v12402_v31 }
  0x2a   : > { %1315 = vmatpush.bf16.msra.mxu3 %v8851_v29  ;;  %726 = vst [vmem:[#allocation2 + $0x98] sm:$0xff] %v12402_v31 }
  0x2b   : > { %976 = vmatpush.bf16.msra.mxu1 %v8843_v32  ;;  %727 = vst [vmem:[#allocation2 + $0xa0] sm:$0x3] %v12402_v31 }
  0x2c   : > { %728 = vst [vmem:[#allocation2 + $0xa8] sm:$0xff] %v12402_v31 }
  0x2d   : > { %1114 = vmatpush.bf16.msra.mxu2 %v8834_v30  ;;  %729 = vst [vmem:[#allocation2 + $0xb0] sm:$0xff] %v12402_v31  ;;  %v8862_v30 = vld [vmem:[%s12396_s4 + $0xe8] sm:$0xff] }
  0x2e   : > { %1316 = vmatpush.bf16.msra.mxu3 %v8850_v33  ;;  %730 = vst [vmem:[#allocation2 + $0xb8] sm:$0x3] %v12402_v31  ;;  %1546 = vmatpush.bf16.msrb.mxu0 %v8862_v30 }
  0x2f   : > { %977 = vmatpush.bf16.msra.mxu1 %v8842_v36  ;;  %731 = vst [vmem:[#allocation2 + $0xc0] sm:$0xff] %v12402_v31 }
  0x30   : > { %7016 = vmatmul.msk.bf16.gmra.mxu0 %vm458_vm2, %v8816_v9  ;;  %732 = vst [vmem:[#allocation2 + $0xc8] sm:$0xff] %v12402_v31 }
  0x31   : > { %1115 = vmatpush.bf16.msra.mxu2 %v8833_v34  ;;  %733 = vst [vmem:[#allocation2 + $0xd0] sm:$0x3] %v12402_v31 }
  0x32   : > { %1317 = vmatpush.bf16.msra.mxu3 %v8849_v37  ;;  %734 = vst [vmem:[#allocation2 + $0xd8] sm:$0xff] %v12402_v31 }
  0x33   : > { %978 = vmatpush.bf16.msra.mxu1 %v8841_v42  ;;  %735 = vst [vmem:[#allocation2 + $0xe0] sm:$0xff] %v12402_v31 }
  0x34   : > { %1116 = vmatmul.bf16.vlgmr.msra.gmra.mxu2 %v9255_v39  ;;  %736 = vst [vmem:[#allocation2 + $0xe8] sm:$0x3] %v12402_v31 }
  0x35   : > { %1318 = vmatmul.bf16.vlgmr.msra.gmra.mxu3 %v1229_v43  ;;  %737 = vst [vmem:[#allocation2 + $0xf0] sm:$0xff] %v12402_v31 }
  0x36   : > { %979 = vmatmul.bf16.vlgmr.msra.gmra.mxu1 %v890_v45  ;;  %738 = vst [vmem:[#allocation2 + $0xf8] sm:$0xff] %v12402_v31  ;;  %v8826_v45 = vld [vmem:[%s9369_s16 + $0x58] sm:$0xff] }
  0x37   : > { %739 = vst [vmem:[#allocation2 + $0x100] sm:$0x3] %v12402_v31  ;;  %1778 = vmatpush.bf16.msrb.mxu1 %v8872_v49 }
  0x38   : > { %740 = vst [vmem:[#allocation2 + $0x108] sm:$0xff] %v12402_v31 }
  0x39   : > { %741 = vst [vmem:[#allocation2 + $0x110] sm:$0xff] %v12402_v31 }
  0x3a   : > { %742 = vst [vmem:[#allocation2 + $0x118] sm:$0x3] %v12402_v31 }
  0x3b   : > { %743 = vst [vmem:[#allocation2 + $0x120] sm:$0xff] %v12402_v31  ;;  %1779 = vmatpush.bf16.msrb.mxu1 %v8871_v0 }
  0x3c   : > { %744 = vst [vmem:[#allocation2 + $0x128] sm:$0xff] %v12402_v31 }
  0x3d   : > { %745 = vst [vmem:[#allocation2 + $0x130] sm:$0x3] %v12402_v31 }
  0x3e   : > { %746 = vst [vmem:[#allocation2 + $0x138] sm:$0xff] %v12402_v31 }
  0x3f   : > { %747 = vst [vmem:[#allocation2 + $0x140] sm:$0xff] %v12402_v31  ;;  %1780 = vmatpush.bf16.msrb.mxu1 %v8870_v47 }
  0x40   : > { %7017 = vmatmul.msk.bf16.gmra.mxu0 %vm458_vm2, %v8817_v10  ;;  %748 = vst [vmem:[#allocation2 + $0x148] sm:$0x3] %v12402_v31 }
  0x41   : > { %749 = vst [vmem:[#allocation2 + $0x150] sm:$0xff] %v12402_v31 }
  0x42   : > { %750 = vst [vmem:[#allocation2 + $0x158] sm:$0xff] %v12402_v31 }
  0x43   : > { %751 = vst [vmem:[#allocation2 + $0x160] sm:$0x3] %v12402_v31 }
  0x44   : > { %752 = vst [vmem:[#allocation2 + $0x168] sm:$0xff] %v12402_v31 }
  0x45   : > { %753 = vst [vmem:[#allocation2 + $0x170] sm:$0xff] %v12402_v31 }
  0x46   : > { %754 = vst [vmem:[#allocation2 + $0x178] sm:$0x3] %v12402_v31 }
  0x47   : > { %755 = vst [vmem:[#allocation2 + $0x180] sm:$0xff] %v12402_v31 }
  0x48   : > { %756 = vst [vmem:[#allocation2 + $0x188] sm:$0xff] %v12402_v31 }
  0x49   : > { %757 = vst [vmem:[#allocation2 + $0x190] sm:$0x3] %v12402_v31 }
  0x4a   : > { %758 = vst [vmem:[#allocation2 + $0x198] sm:$0xff] %v12402_v31 }
  0x4b   : > { %759 = vst [vmem:[#allocation2 + $0x1a0] sm:$0xff] %v12402_v31 }
  0x4c   : > { %760 = vst [vmem:[#allocation2 + $0x1a8] sm:$0x3] %v12402_v31 }
  0x4d   : > { %3353 = vst [vmem:[#allocation2 + $0x8] sm:$0xff] %v12402_v31 }
  0x4e   : > { %3354 = vst [vmem:[#allocation2 + $0x10] sm:$0x3] %v12402_v31 }
  0x4f   : > { %4748 = vst [vmem:[#allocation2 + $0x10] sm:$0x3] %v12402_v31 }
  0x50   : > { %7018 = vmatmul.msk.bf16.gmra.mxu0 %vm458_vm2, %v8818_v11  ;;  %5898 = vst [vmem:[#allocation2 + $0x10] sm:$0x3] %v12402_v31 }
  0x60   : > { %7019 = vmatmul.msk.bf16.gmra.mxu0 %vm458_vm2, %v8819_v21 }
  0x70   : > { %7020 = vmatmul.msk.bf16.gmra.mxu0 %vm458_vm2, %v8820_v35 }
  0x80   : > { %7021 = vmatmul.msk.bf16.gmra.mxu0 %vm458_vm2, %v8821_v46 }
  0x90   : > { %7022 = vmatmul.msk.bf16.gmra.mxu0 %vm458_vm2, %v8822_v48 }
  0x9d   : > { %v523_v53 = vpop.f32.mrf.mxu0 }
  0x9e   : > { %v607_v54 = vmul.f32 %v9519_v50, %v523_v53 }
  0xa0   : > { %v643_v55 = vadd.f32 %v9526_v51, %v607_v54  ;;  %7023 = vmatmul.msk.bf16.gmra.mxu0 %vm458_vm2, %v8823_v52 }
  0xa2   : > { %v9537_v56 = vmax.f32 %v643_v55, 0.0 }
  0xa4   : > { %12499 = vst [vmem:[#allocation6_spill] sm:$0xff] %v9537_v56 }
  0xa5   : > { %762 = vst [vmem:[#allocation2 + $0x19] sm:$0xff] %v9537_v56  ;;  %v525_v58 = vpop.f32.mrf.mxu0 }
  0xa6   : > { %v608_v59 = vmul.f32 %v9519_v50, %v525_v58 }
  0xa8   : > { %v644_v60 = vadd.f32 %v9526_v51, %v608_v59 }
  0xaa   : > { %v9546_v61 = vmax.f32 %v644_v60, 0.0 }
  0xac   : > { %12500 = vst [vmem:[#allocation7_spill] sm:$0xff] %v9546_v61  ;;  %v891_v63 = vpack.c.bf16 %v9546_v61, %v9537_v56  ;;  %v796_v5 = vld [vmem:[#allocation2 + $0x18] sm:$0xff] }
  0xad   : > { %763 = vst [vmem:[#allocation2 + $0x21] sm:$0xff] %v9546_v61  ;;  %v528_v1 = vpop.f32.mrf.mxu0  ;;  %v9566_v11 = vld [vmem:[#allocation2 + $0x19] sm:$0xff] }
  0xae   : > { %v609_v2 = vmul.f32 %v9519_v50, %v528_v1  ;;  %984 = vmatmul.bf16.gmra.mxu1 %v891_v63 }
  0xb0   : > { %v645_v3 = vadd.f32 %v9526_v51, %v609_v2  ;;  %7024 = vmatmul.msk.bf16.gmra.mxu0 %vm458_vm2, %v8824_v62 }
  0xb2   : > { %v9558_v4 = vmax.f32 %v645_v3, 0.0 }
  0xb4   : > { %12501 = vst [vmem:[#allocation8_spill] sm:$0xff] %v9558_v4  ;;  %v9560_v6 = vld [vmem:[#allocation2 + $0x1a] sm:$0xff]  ;;  %v1200_v8 = vld [vmem:[#allocation2 + $0x22] sm:$0xff] }
  0xb5   : > { %v797_v7 = vld [vmem:[#allocation2 + $0x20] sm:$0xff]  ;;  %764 = vst [vmem:[#allocation2 + $0x31] sm:$0xff] %v9558_v4  ;;  %v1230_v10 = vpack.c.bf16 %v1200_v8, %v9560_v6  ;;  %v530_v12 = vpop.f32.mrf.mxu0 }
  0xb6   : > { %v9563_v9 = vpack.c.bf16 %v797_v7, %v796_v5  ;;  %v9568_v13 = vld [vmem:[#allocation2 + $0x21] sm:$0xff]  ;;  %3355 = vst [vmem:[#allocation2 + $0x18] sm:$0xff] %v12402_v31  ;;  %v610_v15 = vmul.f32 %v9519_v50, %v530_v12 }
  0xb7   : > { %v9571_v14 = vld [vmem:[#allocation2 + $0x22] sm:$0xff]  ;;  %1323 = vmatmul.bf16.gmra.mxu3 %v1230_v10 }
  0xb8   : > { %1121 = vmatmul.bf16.gmra.mxu2 %v9563_v9  ;;  %3357 = vst [vmem:[#allocation2 + $0x28] sm:$0x3] %v12402_v31  ;;  %v646_v16 = vadd.f32 %v9526_v51, %v610_v15  ;;  %v1319_v35 = vpop.f32.mrf.mxu3 }
  0xb9   : > { %4751 = vst [vmem:[#allocation2 + $0x28] sm:$0x3] %v12402_v31 }
  0xba   : > { %5901 = vst [vmem:[#allocation2 + $0x28] sm:$0x3] %v12402_v31  ;;  %v9580_v17 = vmax.f32 %v646_v16, 0.0 }
  0xbb   : > { %3356 = vst [vmem:[#allocation2 + $0x20] sm:$0xff] %v12402_v31 }
  0xbc   : > { %12502 = vst [vmem:[#allocation9_spill] sm:$0xff] %v9580_v17  ;;  %v892_v19 = vpack.c.bf16 %v9580_v17, %v9558_v4  ;;  %v798_v24 = vld [vmem:[#allocation2 + $0x30] sm:$0xff] }
  0xbd   : > { %765 = vst [vmem:[#allocation2 + $0x39] sm:$0xff] %v9580_v17  ;;  %v533_v20 = vpop.f32.mrf.mxu0  ;;  %v9597_v32 = vld [vmem:[#allocation2 + $0x30] sm:$0xff] }
  0xbe   : > { %v611_v21 = vmul.f32 %v9519_v50, %v533_v20  ;;  %989 = vmatmul.bf16.gmra.mxu1 %v892_v19  ;;  %v9603_v36 = vld [vmem:[#allocation2 + $0x31] sm:$0xff] }
  0xc0   : > { %v647_v22 = vadd.f32 %v9526_v51, %v611_v21  ;;  %7025 = vmatmul.msk.bf16.gmra.mxu0 %vm458_vm2, %v8825_v18  ;;  %v8827_v18 = vld [vmem:[%s9369_s16 + $0x60] sm:$0xff] }
  0xc2   : > { %v9589_v23 = vmax.f32 %v647_v22, 0.0 }
  0xc4   : > { %12503 = vst [vmem:[#allocation10_spill] sm:$0xff] %v9589_v23  ;;  %v799_v25 = vld [vmem:[#allocation2 + $0x38] sm:$0xff] }
  0xc5   : > { %v1201_v26 = vld [vmem:[#allocation2 + $0x32] sm:$0xff]  ;;  %v1202_v27 = vld [vmem:[#allocation2 + $0x3a] sm:$0xff]  ;;  %766 = vst [vmem:[#allocation2 + $0x49] sm:$0xff] %v9589_v23  ;;  %v9592_v28 = vpack.c.bf16 %v799_v25, %v798_v24  ;;  %v535_v34 = vpop.f32.mrf.mxu0 }
  0xc6   : > { %v1231_v29 = vpack.c.bf16 %v1202_v27, %v1201_v26  ;;  %v9599_v33 = vld [vmem:[#allocation2 + $0x38] sm:$0xff]  ;;  %v612_v39 = vmul.f32 %v9519_v50, %v535_v34 }
  0xc7   : > { %v9605_v37 = vld [vmem:[#allocation2 + $0x32] sm:$0xff]  ;;  %v9613_v41 = vld [vmem:[#allocation2 + $0x3a] sm:$0xff] }
  0xc8   : > { %v9607_v38 = vld [vmem:[#allocation2 + $0x32] sm:$0xff]  ;;  %1126 = vmatmul.bf16.gmra.mxu2 %v9592_v28  ;;  %1328 = vmatmul.bf16.gmra.mxu3 %v1231_v29  ;;  %v9615_v42 = vld [vmem:[#allocation2 + $0x3a] sm:$0xff]  ;;  %v648_v43 = vadd.f32 %v9526_v51, %v612_v39 }
  0xc9   : > { %12504 = vst [vmem:[#allocation11_spill] sm:$0xff] %v9607_v38  ;;  %v9611_v40 = vld [vmem:[#allocation2 + $0x39] sm:$0xff] }
  0xca   : > { %12505 = vst [vmem:[#allocation12_spill] sm:$0xff] %v9615_v42  ;;  %v9622_v44 = vmax.f32 %v648_v43, 0.0  ;;  %v8861_v39 = vld [vmem:[%s12396_s4 + $0xe0] sm:$0xff] }
  0xcb   : > { %3358 = vst [vmem:[#allocation2 + $0x30] sm:$0xff] %v12402_v31  ;;  %1547 = vmatpush.bf16.msrb.mxu0 %v8861_v39 }
  0xcc   : > { %3360 = vst [vmem:[#allocation2 + $0x40] sm:$0x3] %v12402_v31  ;;  %v893_v46 = vpack.c.bf16 %v9622_v44, %v9589_v23  ;;  %v800_v54 = vld [vmem:[#allocation2 + $0x48] sm:$0xff] }
  0xcd   : > { %4754 = vst [vmem:[#allocation2 + $0x40] sm:$0x3] %v12402_v31  ;;  %v538_v48 = vpop.f32.mrf.mxu0  ;;  %v9640_v62 = vld [vmem:[#allocation2 + $0x48] sm:$0xff] }
  0xce   : > { %5904 = vst [vmem:[#allocation2 + $0x40] sm:$0x3] %v12402_v31  ;;  %v613_v49 = vmul.f32 %v9519_v50, %v538_v48  ;;  %994 = vmatmul.bf16.gmra.mxu1 %v893_v46  ;;  %v9646_v2 = vld [vmem:[#allocation2 + $0x49] sm:$0xff] }
  0xcf   : > { %12506 = vst [vmem:[#allocation13_spill] sm:$0xff] %v9622_v44 }
  0xd0   : > { %3359 = vst [vmem:[#allocation2 + $0x38] sm:$0xff] %v12402_v31  ;;  %v649_v52 = vadd.f32 %v9526_v51, %v613_v49  ;;  %7026 = vmatmul.msk.bf16.gmra.mxu0 %vm458_vm2, %v8826_v45 }
  0xd1   : > { %767 = vst [vmem:[#allocation2 + $0x51] sm:$0xff] %v9622_v44 }
  0xd2   : > { %v9635_v53 = vmax.f32 %v649_v52, 0.0 }
  0xd4   : > { %12507 = vst [vmem:[#allocation14_spill] sm:$0xff] %v9635_v53 }
  0xd5   : > { %768 = vst [vmem:[#allocation2 + $0x61] sm:$0xff] %v9635_v53  ;;  %v540_v0 = vpop.f32.mrf.mxu0 }
  0xd6   : > { %v614_v7 = vmul.f32 %v9519_v50, %v540_v0 }
  0xd8   : > { %v801_v55 = vld [vmem:[#allocation2 + $0x50] sm:$0xff]  ;;  %v650_v15 = vadd.f32 %v9526_v51, %v614_v7  ;;  %v8828_v7 = vld [vmem:[%s9369_s16 + $0x68] sm:$0xff] }
  0xd9   : > { %v1203_v57 = vld [vmem:[#allocation2 + $0x4a] sm:$0xff]  ;;  %v1204_v58 = vld [vmem:[#allocation2 + $0x52] sm:$0xff]  ;;  %v9638_v59 = vpack.c.bf16 %v801_v55, %v800_v54 }
  0xda   : > { %v1232_v60 = vpack.c.bf16 %v1204_v58, %v1203_v57  ;;  %v9642_v63 = vld [vmem:[#allocation2 + $0x50] sm:$0xff]  ;;  %v9665_v16 = vmax.f32 %v650_v15, 0.0 }
  0xdb   : > { %v9648_v3 = vld [vmem:[#allocation2 + $0x4a] sm:$0xff]  ;;  %1131 = vmatmul.bf16.gmra.mxu2 %v9638_v59  ;;  %v9656_v10 = vld [vmem:[#allocation2 + $0x52] sm:$0xff] }
  0xdc   : > { %v9650_v5 = vld [vmem:[#allocation2 + $0x4a] sm:$0xff]  ;;  %1333 = vmatmul.bf16.gmra.mxu3 %v1232_v60  ;;  %v9658_v12 = vld [vmem:[#allocation2 + $0x52] sm:$0xff]  ;;  %12510 = vst [vmem:[#allocation17_spill] sm:$0xff] %v9665_v16  ;;  %v894_v19 = vpack.c.bf16 %v9665_v16, %v9635_v53  ;;  %v802_v25 = vld [vmem:[#allocation2 + $0x60] sm:$0xff] }
  0xdd   : > { %12508 = vst [vmem:[#allocation15_spill] sm:$0xff] %v9650_v5  ;;  %v9654_v8 = vld [vmem:[#allocation2 + $0x51] sm:$0xff]  ;;  %v543_v20 = vpop.f32.mrf.mxu0  ;;  %v9683_v43 = vld [vmem:[#allocation2 + $0x60] sm:$0xff] }
  0xde   : > { %12509 = vst [vmem:[#allocation16_spill] sm:$0xff] %v9658_v12  ;;  %v615_v21 = vmul.f32 %v9519_v50, %v543_v20  ;;  %999 = vmatmul.bf16.gmra.mxu1 %v894_v19  ;;  %v9689_v48 = vld [vmem:[#allocation2 + $0x61] sm:$0xff] }
  0xdf   : > { %3361 = vst [vmem:[#allocation2 + $0x48] sm:$0xff] %v12402_v31 }
  0xe0   : > { %3363 = vst [vmem:[#allocation2 + $0x58] sm:$0x3] %v12402_v31  ;;  %v651_v22 = vadd.f32 %v9526_v51, %v615_v21  ;;  %7027 = vmatmul.msk.bf16.gmra.mxu0 %vm458_vm2, %v8827_v18  ;;  %v8869_v18 = vld [vmem:[%s12396_s4 + $0x120] sm:$0xff]  ;;  %v8860_v21 = vld [vmem:[%s12396_s4 + $0xd8] sm:$0xff] }
  0xe1   : > { %4757 = vst [vmem:[#allocation2 + $0x58] sm:$0x3] %v12402_v31  ;;  %1781 = vmatpush.bf16.msrb.mxu1 %v8869_v18  ;;  %1548 = vmatpush.bf16.msrb.mxu0 %v8860_v21  ;;  %v8829_v18 = vld [vmem:[%s9369_s16 + $0x70] sm:$0xff] }
  0xe2   : > { %5907 = vst [vmem:[#allocation2 + $0x58] sm:$0x3] %v12402_v31  ;;  %v9675_v24 = vmax.f32 %v651_v22, 0.0 }
  0xe3   : > { %3362 = vst [vmem:[#allocation2 + $0x50] sm:$0xff] %v12402_v31 }
  0xe4   : > { %769 = vst [vmem:[#allocation2 + $0x69] sm:$0xff] %v9665_v16 }
  0xe5   : > { %12511 = vst [vmem:[#allocation18_spill] sm:$0xff] %v9675_v24  ;;  %v545_v46 = vpop.f32.mrf.mxu0 }
  0xe6   : > { %770 = vst [vmem:[#allocation2 + $0x79] sm:$0xff] %v9675_v24  ;;  %v616_v54 = vmul.f32 %v9519_v50, %v545_v46 }
  0xe8   : > { %v652_v60 = vadd.f32 %v9526_v51, %v616_v54  ;;  %v8859_v54 = vld [vmem:[%s12396_s4 + $0xd0] sm:$0xff] }
  0xe9   : > { %1549 = vmatpush.bf16.msrb.mxu0 %v8859_v54  ;;  %v8857_v54 = vld [vmem:[%s12396_s4 + $0xc0] sm:$0xff] }
  0xea   : > { %v9708_v0 = vmax.f32 %v652_v60, 0.0 }
  0xeb   : > { %v803_v26 = vld [vmem:[#allocation2 + $0x68] sm:$0xff] }
  0xec   : > { %v1205_v27 = vld [vmem:[#allocation2 + $0x62] sm:$0xff]  ;;  %v1206_v29 = vld [vmem:[#allocation2 + $0x6a] sm:$0xff]  ;;  %v9678_v30 = vpack.c.bf16 %v803_v26, %v802_v25  ;;  %12514 = vst [vmem:[#allocation21_spill] sm:$0xff] %v9708_v0  ;;  %v895_v15 = vpack.c.bf16 %v9708_v0, %v9675_v24 }
  0xed   : > { %v1233_v34 = vpack.c.bf16 %v1206_v29, %v1205_v27  ;;  %v9685_v45 = vld [vmem:[#allocation2 + $0x68] sm:$0xff]  ;;  %771 = vst [vmem:[#allocation2 + $0x81] sm:$0xff] %v9708_v0  ;;  %v548_v19 = vpop.f32.mrf.mxu0  ;;  %v804_v26 = vld [vmem:[#allocation2 + $0x78] sm:$0xff] }
  0xee   : > { %v9691_v49 = vld [vmem:[#allocation2 + $0x62] sm:$0xff]  ;;  %1136 = vmatmul.bf16.gmra.mxu2 %v9678_v30  ;;  %v9699_v57 = vld [vmem:[#allocation2 + $0x6a] sm:$0xff]  ;;  %v617_v20 = vmul.f32 %v9519_v50, %v548_v19  ;;  %1004 = vmatmul.bf16.gmra.mxu1 %v895_v15  ;;  %v9732_v60 = vld [vmem:[#allocation2 + $0x78] sm:$0xff] }
  0xef   : > { %v9693_v52 = vld [vmem:[#allocation2 + $0x62] sm:$0xff]  ;;  %1338 = vmatmul.bf16.gmra.mxu3 %v1233_v34  ;;  %v9701_v58 = vld [vmem:[#allocation2 + $0x6a] sm:$0xff]  ;;  %v9738_v19 = vld [vmem:[#allocation2 + $0x79] sm:$0xff] }
  0xf0   : > { %12512 = vst [vmem:[#allocation19_spill] sm:$0xff] %v9693_v52  ;;  %v9697_v55 = vld [vmem:[#allocation2 + $0x69] sm:$0xff]  ;;  %v653_v22 = vadd.f32 %v9526_v51, %v617_v20  ;;  %7028 = vmatmul.msk.bf16.gmra.mxu0 %vm458_vm2, %v8828_v7 }
  0xf1   : > { %12513 = vst [vmem:[#allocation20_spill] sm:$0xff] %v9701_v58 }
  0xf2   : > { %3364 = vst [vmem:[#allocation2 + $0x60] sm:$0xff] %v12402_v31  ;;  %v9724_v25 = vmax.f32 %v653_v22, 0.0 }
  0xf3   : > { %3366 = vst [vmem:[#allocation2 + $0x70] sm:$0x3] %v12402_v31 }
  0xf4   : > { %4760 = vst [vmem:[#allocation2 + $0x70] sm:$0x3] %v12402_v31  ;;  %v805_v27 = vld [vmem:[#allocation2 + $0x80] sm:$0xff] }
  0xf5   : > { %5910 = vst [vmem:[#allocation2 + $0x70] sm:$0x3] %v12402_v31  ;;  %v1207_v29 = vld [vmem:[#allocation2 + $0x7a] sm:$0xff]  ;;  %v1208_v34 = vld [vmem:[#allocation2 + $0x82] sm:$0xff]  ;;  %v9727_v39 = vpack.c.bf16 %v805_v27, %v804_v26  ;;  %v550_v7 = vpop.f32.mrf.mxu0 }
  0xf6   : > { %3365 = vst [vmem:[#allocation2 + $0x68] sm:$0xff] %v12402_v31  ;;  %v1234_v46 = vpack.c.bf16 %v1208_v34, %v1207_v29  ;;  %v9734_v15 = vld [vmem:[#allocation2 + $0x80] sm:$0xff]  ;;  %v618_v21 = vmul.f32 %v9519_v50, %v550_v7  ;;  %v1117_v7 = vpop.f32.mrf.mxu2 }
  0xf7   : > { %12515 = vst [vmem:[#allocation22_spill] sm:$0xff] %v9724_v25  ;;  %v9740_v20 = vld [vmem:[#allocation2 + $0x7a] sm:$0xff]  ;;  %v9746_v26 = vld [vmem:[#allocation2 + $0x82] sm:$0xff] }
  0xf8   : > { %772 = vst [vmem:[#allocation2 + $0x91] sm:$0xff] %v9724_v25  ;;  %v9744_v22 = vld [vmem:[#allocation2 + $0x81] sm:$0xff]  ;;  %v654_v29 = vadd.f32 %v9526_v51, %v618_v21 }
  0xf9   : > { %12516 = vst [vmem:[#allocation23_spill] sm:$0xff] %v9740_v20  ;;  %v8858_v27 = vld [vmem:[%s12396_s4 + $0xc8] sm:$0xff]  ;;  %v8876_v20 = vld [vmem:[%s12396_s4 + $0x158] sm:$0xff] }
  0xfa   : > { %12517 = vst [vmem:[#allocation24_spill] sm:$0xff] %v9746_v26  ;;  %v9756_v34 = vmax.f32 %v654_v29, 0.0  ;;  %1550 = vmatpush.bf16.msrb.mxu0 %v8858_v27 }
  0xfb   : > { %3367 = vst [vmem:[#allocation2 + $0x78] sm:$0xff] %v12402_v31 }
  0xfc   : > { %3369 = vst [vmem:[#allocation2 + $0x88] sm:$0x3] %v12402_v31  ;;  %v896_v21 = vpack.c.bf16 %v9756_v34, %v9724_v25  ;;  %v12526_v25 = vmov 0.0  }
  0xfd   : > { %4763 = vst [vmem:[#allocation2 + $0x88] sm:$0x3] %v12402_v31  ;;  %v553_v1 = vpop.f32.mrf.mxu0 }
  0xfe   : > { %1141 = vmatmul.bf16.gmra.mxu2 %v9727_v39  ;;  %5913 = vst [vmem:[#allocation2 + $0x88] sm:$0x3] %v12402_v31  ;;  %v619_v29 = vmul.f32 %v9519_v50, %v553_v1  ;;  %1009 = vmatmul.bf16.gmra.mxu1 %v896_v21 }
  0xff   : > { %1343 = vmatmul.bf16.gmra.mxu3 %v1234_v46  ;;  %12518 = vst [vmem:[#allocation25_spill] sm:$0xff] %v9756_v34  ;;  %v980_v46 = vpop.f32.mrf.mxu1  ;;  %1551 = vmatpush.bf16.msrb.mxu0 %v8857_v54  ;;  %v806_v24 = vld [vmem:[#allocation2 + $0x90] sm:$0xff] }
 0x100   : > { %3368 = vst [vmem:[#allocation2 + $0x80] sm:$0xff] %v12402_v31  ;;  %v1118_v47 = vadd.f32 %v1117_v7, %v980_v46  ;;  %v655_v27 = vadd.f32 %v9526_v51, %v619_v29  ;;  %7029 = vmatmul.msk.bf16.gmra.mxu0 %vm458_vm2, %v8829_v18  ;;  %v9773_v16 = vld [vmem:[#allocation2 + $0x90] sm:$0xff] }
 0x101   : > { %773 = vst [vmem:[#allocation2 + $0x99] sm:$0xff] %v9756_v34 }
 0x102   : > { %v9767_v31 = vadd.f32 %v1319_v35, %v1118_v47  ;;  %v9771_v0 = vmax.f32 %v655_v27, 0.0  ;;  %12520 = vst [vmem:[#allocation27_spill] sm:$0xff] %v9773_v16  ;;  %v9780_v47 = vld [vmem:[#allocation2 + $0x91] sm:$0xff] }
 0x103   : > { %12522 = vst [vmem:[#allocation29_spill] sm:$0xff] %v9780_v47 }
 0x104   : > { %12519 = vst [vmem:[#allocation26_spill] sm:$0xff] %v9771_v0 }
 0x105   : > { %774 = vst [vmem:[#allocation2 + $0xa9] sm:$0xff] %v9771_v0  ;;  %v555_v18 = vpop.f32.mrf.mxu0 }
 0x108   : > { %v807_v44 = vld [vmem:[#allocation2 + $0x98] sm:$0xff] }
 0x109   : > { %v1209_v34 = vld [vmem:[#allocation2 + $0x92] sm:$0xff]  ;;  %v1210_v46 = vld [vmem:[#allocation2 + $0x9a] sm:$0xff]  ;;  %v9776_v7 = vpack.c.bf16 %v807_v44, %v806_v24  ;;  %v620_v44 = vmul.f32 %v9519_v50, %v555_v18 }
 0x10a   : > { %v1235_v1 = vpack.c.bf16 %v1210_v46, %v1209_v34  ;;  %v9778_v35 = vld [vmem:[#allocation2 + $0x98] sm:$0xff]  ;;  %v8830_v46 = vld [vmem:[%s9369_s16 + $0x78] sm:$0xff]  ;;  %s9203_s16 = sshra.s32 %s6883_s14, 4  ;;  %s9204_s16 = int_to_ptr.hbm [resolvable:$true] %s9203_s16 }
 0x10b   : > { %12521 = vst [vmem:[#allocation28_spill] sm:$0xff] %v9778_v35  ;;  %v9782_v54 = vld [vmem:[#allocation2 + $0x92] sm:$0xff]  ;;  %v9788_v27 = vld [vmem:[#allocation2 + $0x9a] sm:$0xff]  ;;  %v656_v24 = vadd.f32 %v9526_v51, %v620_v44  ;;  %s9205_s21 = scalar_lea.hbm %s9204_s16, 1  ;;  %p9210_p0 = scmp.lt.s32.totalorder %s9204_s16, %s12401_s9 }
 0x10c   : > { %12523 = vst [vmem:[#allocation30_spill] sm:$0xff] %v9782_v54  ;;  %v9786_v29 = vld [vmem:[#allocation2 + $0x99] sm:$0xff]  ;;  %v808_v23 = vld [vmem:[#allocation2 + $0xa8] sm:$0xff]  ;;  %p9206_p11 = scmp.ne.s32.totalorder %s9204_s16, %s9205_s21  ;;  %p9211_p1 = scmp.lt.s32.totalorder %s9209_s24, %s9205_s21 }
 0x10d   : > { %12524 = vst [vmem:[#allocation31_spill] sm:$0xff] %v9786_v29  ;;  %v9798_v34 = vmax.f32 %v656_v24, 0.0  ;;  %v558_v21 = vpop.f32.mrf.mxu0  ;;  %v9812_v17 = vld [vmem:[#allocation2 + $0xa8] sm:$0xff] }
 0x10e   : > { %12525 = vst [vmem:[#allocation32_spill] sm:$0xff] %v9788_v27  ;;  %1146 = vmatmul.bf16.gmra.mxu2 %v9776_v7  ;;  %v621_v53 = vmul.f32 %v9519_v50, %v558_v21  ;;  %p9207_p12 = pnand %p9206_p11, %p9345_p5  ;;  %p9212_p2 = por %p9211_p1, %p9210_p0 }
 0x10f   : > { %3370 = vst [vmem:[#allocation2 + $0x90] sm:$0xff] %v12526_v25  ;;  %1348 = vmatmul.bf16.gmra.mxu3 %v1235_v1  ;;  %v897_v18 = vpack.c.bf16 %v9798_v34, %v9771_v0  ;;  %v8868_v1 = vld [vmem:[%s12396_s4 + $0x118] sm:$0xff] }
 0x110   : > { %3372 = vst [vmem:[#allocation2 + $0xa0] sm:$0x3] %v12526_v25  ;;  %1782 = vmatpush.bf16.msrb.mxu1 %v8868_v1  ;;  %v657_v44 = vadd.f32 %v9526_v51, %v621_v53  ;;  %7030 = vmatmul.msk.bf16.gmra.mxu0 %vm458_vm2, %v8830_v46  ;;  %p9208_p13 = pneg %p9207_p12 }
 0x111   : > { %4766 = vst [vmem:[#allocation2 + $0xa0] sm:$0x3] %v12526_v25  ;;  %1014 = vmatmul.bf16.gmra.mxu1 %v897_v18  ;;  %v9819_v18 = vld [vmem:[#allocation2 + $0xa9] sm:$0xff] }
 0x112   : > { %5916 = vst [vmem:[#allocation2 + $0xa0] sm:$0x3] %v12526_v25  ;;  %v9810_v24 = vmax.f32 %v657_v44, 0.0  ;;  %p9213_p3 = pnand %p9212_p2, %p9208_p13 }
 0x113   : > { %3371 = vst [vmem:[#allocation2 + $0x98] sm:$0xff] %v12526_v25 }
 0x114   : > { %12527 = vst [vmem:[#allocation33_spill] sm:$0xff] %v9798_v34 }
 0x115   : > { %775 = vst [vmem:[#allocation2 + $0xb1] sm:$0xff] %v9798_v34  ;;  %v560_v46 = vpop.f32.mrf.mxu0 }
 0x116   : > { %12528 = vst [vmem:[#allocation34_spill] sm:$0xff] %v9810_v24 }
 0x117   : > { %12529 = vst [vmem:[#allocation35_spill] sm:$0xff] %v9812_v17 }
 0x118   : > { %776 = vst [vmem:[#allocation2 + $0xc1] sm:$0xff] %v9810_v24 }
 0x119   : > { %12531 = vst [vmem:[#allocation37_spill] sm:$0xff] %v9819_v18 }
 0x11c   : > { %v809_v61 = vld [vmem:[#allocation2 + $0xb0] sm:$0xff] }
 0x11d   : > { %v1211_v34 = vld [vmem:[#allocation2 + $0xaa] sm:$0xff]  ;;  %v1212_v0 = vld [vmem:[#allocation2 + $0xb2] sm:$0xff]  ;;  %v9815_v4 = vpack.c.bf16 %v809_v61, %v808_v23  ;;  %v622_v61 = vmul.f32 %v9519_v50, %v560_v46  ;;  %v563_v46 = vpop.f32.mrf.mxu0 }
 0x11e   : > { %v1236_v56 = vpack.c.bf16 %v1212_v0, %v1211_v34  ;;  %v9817_v21 = vld [vmem:[#allocation2 + $0xb0] sm:$0xff] }
 0x11f   : > { %12530 = vst [vmem:[#allocation36_spill] sm:$0xff] %v9817_v21  ;;  %v9821_v53 = vld [vmem:[#allocation2 + $0xaa] sm:$0xff]  ;;  %v9827_v58 = vld [vmem:[#allocation2 + $0xb2] sm:$0xff]  ;;  %1151 = vmatmul.bf16.gmra.mxu2 %v9815_v4  ;;  %v658_v23 = vadd.f32 %v9526_v51, %v622_v61  ;;  %v810_v52 = vld [vmem:[#allocation2 + $0xc0] sm:$0xff] }
 0x120   : > { %12532 = vst [vmem:[#allocation38_spill] sm:$0xff] %v9821_v53  ;;  %v9825_v44 = vld [vmem:[#allocation2 + $0xb1] sm:$0xff]  ;;  %1353 = vmatmul.bf16.gmra.mxu3 %v1236_v56  ;;  %v623_v56 = vmul.f32 %v9519_v50, %v563_v46  ;;  %1552 = vmatmul.bf16.vlgmr.msrb.gmra.mxu0 %v9563_v9  ;;  %v9847_v12 = vld [vmem:[#allocation2 + $0xc0] sm:$0xff] }
 0x121   : > { %12533 = vst [vmem:[#allocation39_spill] sm:$0xff] %v9825_v44  ;;  %v9837_v0 = vmax.f32 %v658_v23, 0.0  ;;  %v9849_v23 = vpop.f32.mrf.mxu1 }
 0x122   : > { %12534 = vst [vmem:[#allocation40_spill] sm:$0xff] %v9827_v58  ;;  %v659_v1 = vadd.f32 %v9526_v51, %v623_v56  ;;  %v9856_v56 = vld [vmem:[#allocation2 + $0xc1] sm:$0xff] }
 0x123   : > { %3373 = vst [vmem:[#allocation2 + $0xa8] sm:$0xff] %v12526_v25  ;;  %v898_v34 = vpack.c.bf16 %v9837_v0, %v9810_v24 }
 0x124   : > { %3375 = vst [vmem:[#allocation2 + $0xb8] sm:$0x3] %v12526_v25  ;;  %v9845_v61 = vmax.f32 %v659_v1, 0.0 }
 0x125   : > { %4769 = vst [vmem:[#allocation2 + $0xb8] sm:$0x3] %v12526_v25  ;;  %1019 = vmatmul.bf16.gmra.mxu1 %v898_v34  ;;  %v565_v1 = vpop.f32.mrf.mxu0 }
 0x126   : > { %5919 = vst [vmem:[#allocation2 + $0xb8] sm:$0x3] %v12526_v25 }
 0x127   : > { %3374 = vst [vmem:[#allocation2 + $0xb0] sm:$0xff] %v12526_v25 }
 0x128   : > { %12535 = vst [vmem:[#allocation41_spill] sm:$0xff] %v9837_v0 }
 0x129   : > { %777 = vst [vmem:[#allocation2 + $0xc9] sm:$0xff] %v9837_v0 }
 0x12a   : > { %12536 = vst [vmem:[#allocation42_spill] sm:$0xff] %v9845_v61 }
 0x12b   : > { %12537 = vst [vmem:[#allocation43_spill] sm:$0xff] %v9847_v12 }
 0x12c   : > { %12538 = vst [vmem:[#allocation44_spill] sm:$0xff] %v9849_v23 }
 0x12d   : > { %778 = vst [vmem:[#allocation2 + $0xd9] sm:$0xff] %v9845_v61  ;;  %v568_v24 = vpop.f32.mrf.mxu0 }
 0x12e   : > { %12540 = vst [vmem:[#allocation46_spill] sm:$0xff] %v9856_v56 }
 0x130   : > { %v811_v5 = vld [vmem:[#allocation2 + $0xc8] sm:$0xff]  ;;  %1557 = vmatmul.bf16.gmra.mxu0 %v9592_v28 }
 0x131   : > { %v1213_v42 = vld [vmem:[#allocation2 + $0xc2] sm:$0xff]  ;;  %v1214_v38 = vld [vmem:[#allocation2 + $0xca] sm:$0xff]  ;;  %v9852_v0 = vpack.c.bf16 %v811_v5, %v810_v52  ;;  %v624_v5 = vmul.f32 %v9519_v50, %v565_v1  ;;  %v985_v52 = vpop.f32.mrf.mxu1 }
 0x132   : > { %v1237_v46 = vpack.c.bf16 %v1214_v38, %v1213_v42  ;;  %v9854_v34 = vld [vmem:[#allocation2 + $0xc8] sm:$0xff] }
 0x133   : > { %12539 = vst [vmem:[#allocation45_spill] sm:$0xff] %v9854_v34  ;;  %v9858_v9 = vld [vmem:[#allocation2 + $0xc2] sm:$0xff]  ;;  %v9864_v23 = vld [vmem:[#allocation2 + $0xca] sm:$0xff]  ;;  %1156 = vmatmul.bf16.gmra.mxu2 %v9852_v0  ;;  %v660_v38 = vadd.f32 %v9526_v51, %v624_v5 }
 0x134   : > { %12541 = vst [vmem:[#allocation47_spill] sm:$0xff] %v9858_v9  ;;  %v9862_v58 = vld [vmem:[#allocation2 + $0xc9] sm:$0xff]  ;;  %1358 = vmatmul.bf16.gmra.mxu3 %v1237_v46  ;;  %v9887_v9 = vpop.f32.mrf.mxu3  ;;  %v9898_v28 = vld [vmem:[#allocation2 + $0xd9] sm:$0xff] }
 0x135   : > { %12542 = vst [vmem:[#allocation48_spill] sm:$0xff] %v9862_v58  ;;  %v9874_v42 = vmax.f32 %v660_v38, 0.0  ;;  %v8867_v46 = vld [vmem:[%s12396_s4 + $0x110] sm:$0xff]  ;;  %v9885_v38 = vpop.f32.mrf.mxu2 }
 0x136   : > { %12543 = vst [vmem:[#allocation49_spill] sm:$0xff] %v9864_v23  ;;  %v625_v23 = vmul.f32 %v9519_v50, %v568_v24  ;;  %1783 = vmatpush.bf16.msrb.mxu1 %v8867_v46 }
 0x137   : > { %3376 = vst [vmem:[#allocation2 + $0xc0] sm:$0xff] %v12526_v25  ;;  %v899_v1 = vpack.c.bf16 %v9874_v42, %v9845_v61  ;;  %v9891_v61 = vld [vmem:[#allocation2 + $0xd8] sm:$0xff] }
 0x138   : > { %3378 = vst [vmem:[#allocation2 + $0xd0] sm:$0x3] %v12526_v25  ;;  %v661_v5 = vadd.f32 %v9526_v51, %v625_v23 }
 0x139   : > { %4772 = vst [vmem:[#allocation2 + $0xd0] sm:$0x3] %v12526_v25  ;;  %1024 = vmatmul.bf16.gmra.mxu1 %v899_v1  ;;  %v987_v53 = vpop.f32.mrf.mxu1 }
 0x13a   : > { %5922 = vst [vmem:[#allocation2 + $0xd0] sm:$0x3] %v12526_v25  ;;  %v9889_v58 = vmax.f32 %v661_v5, 0.0  ;;  %v570_v5 = vpop.f32.mrf.mxu0 }
 0x13b   : > { %3377 = vst [vmem:[#allocation2 + $0xc8] sm:$0xff] %v12526_v25 }
 0x13c   : > { %12544 = vst [vmem:[#allocation50_spill] sm:$0xff] %v9874_v42 }
 0x13d   : > { %779 = vst [vmem:[#allocation2 + $0xe1] sm:$0xff] %v9874_v42  ;;  %v812_v42 = vld [vmem:[#allocation2 + $0xd8] sm:$0xff] }
 0x13e   : > { %12545 = vst [vmem:[#allocation51_spill] sm:$0xff] %v9885_v38 }
 0x13f   : > { %12546 = vst [vmem:[#allocation52_spill] sm:$0xff] %v9887_v9 }
 0x140   : > { %12547 = vst [vmem:[#allocation53_spill] sm:$0xff] %v9889_v58  ;;  %1562 = vmatmul.bf16.gmra.mxu0 %v9638_v59 }
 0x141   : > { %12548 = vst [vmem:[#allocation54_spill] sm:$0xff] %v9891_v61 }
 0x142   : > { %780 = vst [vmem:[#allocation2 + $0xf1] sm:$0xff] %v9889_v58 }
 0x143   : > { %12550 = vst [vmem:[#allocation56_spill] sm:$0xff] %v9898_v28 }
 0x144   : > { %v813_v56 = vld [vmem:[#allocation2 + $0xe0] sm:$0xff] }
 0x145   : > { %v1215_v12 = vld [vmem:[#allocation2 + $0xda] sm:$0xff]  ;;  %v1216_v34 = vld [vmem:[#allocation2 + $0xe2] sm:$0xff]  ;;  %v9894_v24 = vpack.c.bf16 %v813_v56, %v812_v42  ;;  %v626_v56 = vmul.f32 %v9519_v50, %v570_v5  ;;  %v1324_v42 = vpop.f32.mrf.mxu3 }
 0x146   : > { %v1238_v23 = vpack.c.bf16 %v1216_v34, %v1215_v12  ;;  %v9896_v1 = vld [vmem:[#allocation2 + $0xe0] sm:$0xff]  ;;  %v1122_v34 = vpop.f32.mrf.mxu2 }
 0x147   : > { %12549 = vst [vmem:[#allocation55_spill] sm:$0xff] %v9896_v1  ;;  %v9900_v46 = vld [vmem:[#allocation2 + $0xda] sm:$0xff]  ;;  %v9906_v44 = vld [vmem:[#allocation2 + $0xe2] sm:$0xff]  ;;  %1161 = vmatmul.bf16.gmra.mxu2 %v9894_v24  ;;  %v662_v12 = vadd.f32 %v9526_v51, %v626_v56 }
 0x148   : > { %12551 = vst [vmem:[#allocation57_spill] sm:$0xff] %v9900_v46  ;;  %v9904_v38 = vld [vmem:[#allocation2 + $0xe1] sm:$0xff]  ;;  %1363 = vmatmul.bf16.gmra.mxu3 %v1238_v23  ;;  %v990_v46 = vpop.f32.mrf.mxu1 }
 0x149   : > { %12552 = vst [vmem:[#allocation58_spill] sm:$0xff] %v9904_v38  ;;  %v9916_v9 = vmax.f32 %v662_v12, 0.0  ;;  %v573_v38 = vpop.f32.mrf.mxu0  ;;  %v9928_v18 = vld [vmem:[#allocation2 + $0xf0] sm:$0xff] }
 0x14a   : > { %12553 = vst [vmem:[#allocation59_spill] sm:$0xff] %v9906_v44  ;;  %v1123_v44 = vadd.f32 %v1122_v34, %v985_v52  ;;  %v627_v56 = vmul.f32 %v9519_v50, %v573_v38  ;;  %v814_v34 = vld [vmem:[#allocation2 + $0xf0] sm:$0xff] }
 0x14b   : > { %3379 = vst [vmem:[#allocation2 + $0xd8] sm:$0xff] %v12526_v25  ;;  %v900_v23 = vpack.c.bf16 %v9916_v9, %v9889_v58 }
 0x14c   : > { %3381 = vst [vmem:[#allocation2 + $0xe8] sm:$0x3] %v12526_v25  ;;  %v9919_v5 = vadd.f32 %v1324_v42, %v1123_v44  ;;  %v663_v28 = vadd.f32 %v9526_v51, %v627_v56  ;;  %v1683_v44 = vld [vmem:[#allocation2 + $0xf1] sm:$0xff] }
 0x14d   : > { %4775 = vst [vmem:[#allocation2 + $0xe8] sm:$0x3] %v12526_v25  ;;  %1029 = vmatmul.bf16.gmra.mxu1 %v900_v23  ;;  %v1326_v12 = vpop.f32.mrf.mxu3 }
 0x14e   : > { %5925 = vst [vmem:[#allocation2 + $0xe8] sm:$0x3] %v12526_v25  ;;  %v1124_v61 = vpop.f32.mrf.mxu2  ;;  %v9926_v1 = vmax.f32 %v663_v28, 0.0 }
 0x14f   : > { %3380 = vst [vmem:[#allocation2 + $0xe0] sm:$0xff] %v12526_v25  ;;  %v1125_v52 = vadd.f32 %v1124_v61, %v987_v53 }
 0x150   : > { %12554 = vst [vmem:[#allocation60_spill] sm:$0xff] %v9916_v9  ;;  %v992_v58 = vpop.f32.mrf.mxu1  ;;  %1567 = vmatmul.bf16.gmra.mxu0 %v9678_v30 }
 0x151   : > { %781 = vst [vmem:[#allocation2 + $0xf9] sm:$0xff] %v9916_v9  ;;  %v9931_v38 = vadd.f32 %v1326_v12, %v1125_v52  ;;  %v575_v53 = vpop.f32.mrf.mxu0 }
 0x152   : > { %12555 = vst [vmem:[#allocation61_spill] sm:$0xff] %v9926_v1  ;;  %v628_v29 = vmul.f32 %v9519_v50, %v575_v53 }
 0x153   : > { %12556 = vst [vmem:[#allocation62_spill] sm:$0xff] %v9928_v18 }
 0x154   : > { %782 = vst [vmem:[#allocation2 + $0x109] sm:$0xff] %v9926_v1 }
 0x155   : > { %v1329_v52 = vpop.f32.mrf.mxu3 }
 0x158   : > { %v815_v42 = vld [vmem:[#allocation2 + $0xf8] sm:$0xff] }
 0x159   : > { %v1217_v17 = vld [vmem:[#allocation2 + $0xf2] sm:$0xff]  ;;  %v1218_v9 = vld [vmem:[#allocation2 + $0xfa] sm:$0xff]  ;;  %v9933_v23 = vpack.c.bf16 %v815_v42, %v814_v34  ;;  %v995_v42 = vpop.f32.mrf.mxu1 }
 0x15a   : > { %v1239_v59 = vpack.c.bf16 %v1218_v9, %v1217_v17  ;;  %v9935_v56 = vld [vmem:[#allocation2 + $0xf8] sm:$0xff]  ;;  %v664_v17 = vadd.f32 %v9526_v51, %v628_v29  ;;  %v1127_v9 = vpop.f32.mrf.mxu2  ;;  %v8866_v29 = vld [vmem:[%s12396_s4 + $0x108] sm:$0xff] }
 0x15b   : > { %12557 = vst [vmem:[#allocation63_spill] sm:$0xff] %v9935_v56  ;;  %v1684_v28 = vld [vmem:[#allocation2 + $0xf9] sm:$0xff]  ;;  %1166 = vmatmul.bf16.gmra.mxu2 %v9933_v23  ;;  %1784 = vmatpush.bf16.msrb.mxu1 %v8866_v29  ;;  %v9966_v61 = vld [vmem:[#allocation2 + $0x108] sm:$0xff] }
 0x15c   : > { %v1917_v21 = vld [vmem:[#allocation2 + $0xf2] sm:$0xff]  ;;  %v9939_v27 = vpack.c.bf16 %v1684_v28, %v1683_v44  ;;  %v1918_v54 = vld [vmem:[#allocation2 + $0xfa] sm:$0xff]  ;;  %1368 = vmatmul.bf16.gmra.mxu3 %v1239_v59  ;;  %v9951_v34 = vmax.f32 %v664_v17, 0.0  ;;  %v1128_v44 = vadd.f32 %v1127_v9, %v990_v46  ;;  %v578_v59 = vpop.f32.mrf.mxu0  ;;  %12562 = vst [vmem:[#allocation68_spill] sm:$0xff] %v9966_v61 }
 0x15d   : > { %5926 = vst [vmem:[#allocation2 + $0xf0] sm:$0xff] %v12526_v25  ;;  %v9944_v12 = vpack.c.bf16 %v1918_v54, %v1917_v21  ;;  %v629_v28 = vmul.f32 %v9519_v50, %v578_v59  ;;  %v1331_v17 = vpop.f32.mrf.mxu3 }
 0x15e   : > { %12558 = vst [vmem:[#allocation64_spill] sm:$0xff] %v9939_v27  ;;  %v9954_v54 = vadd.f32 %v1329_v52, %v1128_v44  ;;  %v901_v21 = vpack.c.bf16 %v9951_v34, %v9926_v1  ;;  %v816_v44 = vld [vmem:[#allocation2 + $0x108] sm:$0xff] }
 0x15f   : > { %12559 = vst [vmem:[#allocation65_spill] sm:$0xff] %v9944_v12  ;;  %v665_v53 = vadd.f32 %v9526_v51, %v629_v28 }
 0x160   : > { %3384 = vst [vmem:[#allocation2 + $0x100] sm:$0x3] %v12526_v25  ;;  %1034 = vmatmul.bf16.gmra.mxu1 %v901_v21  ;;  %1572 = vmatmul.bf16.gmra.mxu0 %v9727_v39 }
 0x161   : > { %4778 = vst [vmem:[#allocation2 + $0x100] sm:$0x3] %v12526_v25  ;;  %v9964_v9 = vmax.f32 %v665_v53, 0.0  ;;  %v997_v18 = vpop.f32.mrf.mxu1 }
 0x162   : > { %5927 = vst [vmem:[#allocation2 + $0xf8] sm:$0xff] %v12526_v25  ;;  %v1129_v46 = vpop.f32.mrf.mxu2 }
 0x163   : > { %5928 = vst [vmem:[#allocation2 + $0x100] sm:$0x3] %v12526_v25  ;;  %v1130_v52 = vadd.f32 %v1129_v46, %v992_v58 }
 0x164   : > { %12560 = vst [vmem:[#allocation66_spill] sm:$0xff] %v9951_v34  ;;  %v580_v58 = vpop.f32.mrf.mxu0 }
 0x165   : > { %783 = vst [vmem:[#allocation2 + $0x111] sm:$0xff] %v9951_v34  ;;  %v1685_v34 = vld [vmem:[#allocation2 + $0x109] sm:$0xff]  ;;  %v9969_v21 = vadd.f32 %v1331_v17, %v1130_v52 }
 0x166   : > { %12561 = vst [vmem:[#allocation67_spill] sm:$0xff] %v9964_v9 }
 0x167   : > { %784 = vst [vmem:[#allocation2 + $0x121] sm:$0xff] %v9964_v9 }
 0x16a   : > { %v1132_v52 = vpop.f32.mrf.mxu2 }
 0x16c   : > { %v817_v1 = vld [vmem:[#allocation2 + $0x110] sm:$0xff] }
 0x16d   : > { %v1219_v12 = vld [vmem:[#allocation2 + $0x10a] sm:$0xff]  ;;  %v1220_v27 = vld [vmem:[#allocation2 + $0x112] sm:$0xff]  ;;  %v9971_v29 = vpack.c.bf16 %v817_v1, %v816_v44  ;;  %v630_v1 = vmul.f32 %v9519_v50, %v580_v58  ;;  %v1334_v44 = vpop.f32.mrf.mxu3  ;;  %v1133_v58 = vadd.f32 %v1132_v52, %v995_v42 }
 0x16e   : > { %v1240_v30 = vpack.c.bf16 %v1220_v27, %v1219_v12  ;;  %v9973_v59 = vld [vmem:[#allocation2 + $0x110] sm:$0xff]  ;;  %v1000_v12 = vpop.f32.mrf.mxu1 }
 0x16f   : > { %12563 = vst [vmem:[#allocation69_spill] sm:$0xff] %v9973_v59  ;;  %v1686_v28 = vld [vmem:[#allocation2 + $0x111] sm:$0xff]  ;;  %1171 = vmatmul.bf16.gmra.mxu2 %v9971_v29  ;;  %v10004_v27 = vadd.f32 %v1334_v44, %v1133_v58  ;;  %v1687_v44 = vld [vmem:[#allocation2 + $0x121] sm:$0xff] }
 0x170   : > { %v9975_v53 = vld [vmem:[#allocation2 + $0x10a] sm:$0xff]  ;;  %v9979_v56 = vpack.c.bf16 %v1686_v28, %v1685_v34  ;;  %v9981_v47 = vld [vmem:[#allocation2 + $0x112] sm:$0xff]  ;;  %1373 = vmatmul.bf16.gmra.mxu3 %v1240_v30  ;;  %v666_v34 = vadd.f32 %v9526_v51, %v630_v1  ;;  %v9997_v28 = vld [vmem:[#allocation2] sm:$0xff]  ;;  %1577 = vmatmul.bf16.gmra.mxu0 %v9776_v7 }
 0x171   : > { %12564 = vst [vmem:[#allocation70_spill] sm:$0xff] %v9975_v53  ;;  %v9983_v16 = vld [vmem:[#allocation2 + $0x10a] sm:$0xff]  ;;  %v9985_v17 = vld [vmem:[#allocation2 + $0x112] sm:$0xff]  ;;  %v818_v53 = vld [vmem:[#allocation2 + $0x120] sm:$0xff] }
 0x172   : > { %12565 = vst [vmem:[#allocation71_spill] sm:$0xff] %v9979_v56  ;;  %v10000_v30 = vmax.f32 %v666_v34, 0.0  ;;  %v1134_v34 = vpop.f32.mrf.mxu2  ;;  %v8888_v59 = vld [vmem:[%s12396_s4 + $0x1b8] sm:$0xff] }
 0x173   : > { %12566 = vst [vmem:[#allocation72_spill] sm:$0xff] %v9981_v47  ;;  %v10013_v47 = vld [vmem:[#allocation2 + $0x120] sm:$0xff]  ;;  %2247 = vmatpush.bf16.msrb.mxu3 %v8888_v59 }
 0x174   : > { %12567 = vst [vmem:[#allocation73_spill] sm:$0xff] %v9983_v16  ;;  %v902_v1 = vpack.c.bf16 %v10000_v30, %v9964_v9 }
 0x175   : > { %12568 = vst [vmem:[#allocation74_spill] sm:$0xff] %v9985_v17  ;;  %v1336_v42 = vpop.f32.mrf.mxu3  ;;  %v1135_v17 = vadd.f32 %v1134_v34, %v997_v18  ;;  %v8880_v34 = vld [vmem:[%s12396_s4 + $0x178] sm:$0xff] }
 0x176   : > { %3387 = vst [vmem:[#allocation2 + $0x118] sm:$0x3] %v12526_v25  ;;  %1039 = vmatmul.bf16.gmra.mxu1 %v902_v1  ;;  %v1002_v9 = vpop.f32.mrf.mxu1  ;;  %2012 = vmatpush.bf16.msrb.mxu2 %v8880_v34  ;;  %v8887_v34 = vld [vmem:[%s12396_s4 + $0x1b0] sm:$0xff] }
 0x177   : > { %4781 = vst [vmem:[#allocation2 + $0x118] sm:$0x3] %v12526_v25  ;;  %v10016_v1 = vadd.f32 %v1336_v42, %v1135_v17  ;;  %2248 = vmatpush.bf16.msrb.mxu3 %v8887_v34  ;;  %v10085_v34 = vld [vmem:[%s12395_s3] ss:$0 sm:$0xff] }
 0x178   : > { %5929 = vst [vmem:[#allocation2 + $0x108] sm:$0xff] %v12526_v25  ;;  %v583_v25 = vpop.f32.mrf.mxu0 }
 0x179   : > { %5930 = vst [vmem:[#allocation2 + $0x110] sm:$0xff] %v9997_v28  ;;  %v631_v46 = vmul.f32 %v9519_v50, %v583_v25 }
 0x17a   : > { %12569 = vst [vmem:[#allocation75_spill] sm:$0xff] %v10000_v30 }
 0x17b   : > { %5931 = vst [vmem:[#allocation2 + $0x118] sm:$0x3] %v9997_v28  ;;  %v667_v16 = vadd.f32 %v9526_v51, %v631_v46 }
 0x17c   : > { %785 = vst [vmem:[#allocation2 + $0x129] sm:$0xff] %v10000_v30 }
 0x17d   : > { %v10011_v52 = vmax.f32 %v667_v16, 0.0  ;;  %12571 = vst [vmem:[#allocation77_spill] sm:$0xff] %v10013_v47 }
 0x17f   : > { %12570 = vst [vmem:[#allocation76_spill] sm:$0xff] %v10011_v52 }
 0x180   : > { %786 = vst [vmem:[#allocation2 + $0x139] sm:$0xff] %v10011_v52  ;;  %v585_v18 = vpop.f32.mrf.mxu0  ;;  %1582 = vmatmul.bf16.gmra.mxu0 %v9815_v4 }
 0x183   : > { %v819_v58 = vld [vmem:[#allocation2 + $0x128] sm:$0xff] }
 0x184   : > { %v1221_v56 = vld [vmem:[#allocation2 + $0x122] sm:$0xff]  ;;  %v1222_v30 = vld [vmem:[#allocation2 + $0x12a] sm:$0xff]  ;;  %v10018_v46 = vpack.c.bf16 %v819_v58, %v818_v53 }
 0x185   : > { %v1241_v39 = vpack.c.bf16 %v1222_v30, %v1221_v56  ;;  %v10020_v25 = vld [vmem:[#allocation2 + $0x128] sm:$0xff]  ;;  %v632_v30 = vmul.f32 %v9519_v50, %v585_v18  ;;  %v1137_v50 = vpop.f32.mrf.mxu2 }
 0x186   : > { %12572 = vst [vmem:[#allocation78_spill] sm:$0xff] %v10020_v25  ;;  %v1688_v16 = vld [vmem:[#allocation2 + $0x129] sm:$0xff]  ;;  %1176 = vmatmul.bf16.gmra.mxu2 %v10018_v46 }
 0x187   : > { %v10022_v61 = vld [vmem:[#allocation2 + $0x122] sm:$0xff]  ;;  %v10032_v53 = vpack.c.bf16 %v1688_v16, %v1687_v44  ;;  %v10034_v56 = vld [vmem:[#allocation2 + $0x12a] sm:$0xff]  ;;  %1378 = vmatmul.bf16.gmra.mxu3 %v1241_v39  ;;  %v668_v16 = vadd.f32 %v9526_v51, %v632_v30  ;;  %v1339_v39 = vpop.f32.mrf.mxu3  ;;  %v1138_v44 = vadd.f32 %v1137_v50, %v1000_v12  ;;  %v10059_v51 = vpop.f32.mrf.mxu1 }
 0x188   : > { %12573 = vst [vmem:[#allocation79_spill] sm:$0xff] %v10022_v61  ;;  %v10040_v58 = vld [vmem:[#allocation2 + $0x122] sm:$0xff]  ;;  %v10042_v35 = vld [vmem:[#allocation2 + $0x12a] sm:$0xff]  ;;  %v588_v12 = vpop.f32.mrf.mxu0 }
 0x189   : > { %12574 = vst [vmem:[#allocation80_spill] sm:$0xff] %v10032_v53  ;;  %v8879_v18 = vld [vmem:[%s12396_s4 + $0x170] sm:$0xff]  ;;  %v10056_v59 = vmax.f32 %v668_v16, 0.0  ;;  %v10063_v30 = vadd.f32 %v1339_v39, %v1138_v44  ;;  %v8865_v16 = vld [vmem:[%s12396_s4 + $0x100] sm:$0xff]  ;;  %v8878_v50 = vld [vmem:[%s12396_s4 + $0x168] sm:$0xff] }
 0x18a   : > { %12575 = vst [vmem:[#allocation81_spill] sm:$0xff] %v10034_v56  ;;  %2013 = vmatpush.bf16.msrb.mxu2 %v8879_v18  ;;  %v8886_v18 = vld [vmem:[%s12396_s4 + $0x1a8] sm:$0xff]  ;;  %v10079_v44 = vld [vmem:[%s12394_s2] ss:$0 sm:$0xff]  ;;  %1785 = vmatpush.bf16.msrb.mxu1 %v8865_v16 }
 0x18b   : > { %12576 = vst [vmem:[#allocation82_spill] sm:$0xff] %v10040_v58  ;;  %v903_v42 = vpack.c.bf16 %v10056_v59, %v10011_v52  ;;  %v633_v39 = vmul.f32 %v10079_v44, %v588_v12  ;;  %2249 = vmatpush.bf16.msrb.mxu3 %v8886_v18  ;;  %v8877_v58 = vld [vmem:[%s12396_s4 + $0x160] sm:$0xff] }
 0x18c   : > { %12577 = vst [vmem:[#allocation83_spill] sm:$0xff] %v10042_v35  ;;  %v10097_v35 = vld [vmem:[#allocation2 + $0x138] sm:$0xff] }
 0x18d   : > { %3390 = vst [vmem:[#allocation2 + $0x130] sm:$0x3] %v9997_v28  ;;  %1044 = vmatmul.bf16.gmra.mxu1 %v903_v42  ;;  %v669_v17 = vadd.f32 %v10085_v34, %v633_v39  ;;  %v8885_v42 = vld [vmem:[%s12396_s4 + $0x1a0] sm:$0xff] }
 0x18e   : > { %4784 = vst [vmem:[#allocation2 + $0x130] sm:$0x3] %v9997_v28  ;;  %2014 = vmatpush.bf16.msrb.mxu2 %v8878_v50  ;;  %v820_v50 = vld [vmem:[#allocation2 + $0x138] sm:$0xff] }
 0x18f   : > { %5932 = vst [vmem:[#allocation2 + $0x120] sm:$0xff] %v9997_v28  ;;  %v1341_v52 = vpop.f32.mrf.mxu3  ;;  %v10095_v16 = vmax.f32 %v669_v17, 0.0  ;;  %v1689_v39 = vld [vmem:[#allocation2 + $0x139] sm:$0xff]  ;;  %v1007_v56 = vpop.f32.mrf.mxu1  ;;  %2250 = vmatpush.bf16.msrb.mxu3 %v8885_v42 }
 0x190   : > { %12578 = vst [vmem:[#allocation84_spill] sm:$0xff] %v10056_v59  ;;  %v590_v26 = vpop.f32.mrf.mxu0  ;;  %1587 = vmatmul.bf16.gmra.mxu0 %v9852_v0 }
 0x191   : > { %5933 = vst [vmem:[#allocation2 + $0x128] sm:$0xff] %v9997_v28 }
 0x192   : > { %5934 = vst [vmem:[#allocation2 + $0x130] sm:$0x3] %v9997_v28  ;;  %2015 = vmatpush.bf16.msrb.mxu2 %v8877_v58  ;;  %v8884_v58 = vld [vmem:[%s12396_s4 + $0x198] sm:$0xff] }
 0x193   : > { %787 = vst [vmem:[#allocation2 + $0x141] sm:$0xff] %v10056_v59  ;;  %v1139_v59 = vpop.f32.mrf.mxu2  ;;  %2251 = vmatpush.bf16.msrb.mxu3 %v8884_v58 }
 0x194   : > { %12579 = vst [vmem:[#allocation85_spill] sm:$0xff] %v10095_v16  ;;  %v1140_v12 = vadd.f32 %v1139_v59, %v1002_v9 }
 0x195   : > { %12580 = vst [vmem:[#allocation86_spill] sm:$0xff] %v10097_v35 }
 0x196   : > { %788 = vst [vmem:[#allocation2 + $0x151] sm:$0xff] %v10095_v16  ;;  %v10100_v53 = vadd.f32 %v1341_v52, %v1140_v12  ;;  %v634_v12 = vmul.f32 %v10079_v44, %v590_v26  ;;  %2016 = vmatpush.bf16.msrb.mxu2 %v8876_v20  ;;  %v8883_v20 = vld [vmem:[%s12396_s4 + $0x190] sm:$0xff] }
 0x197   : > { %v1010_v58 = vpop.f32.mrf.mxu1  ;;  %2252 = vmatpush.bf16.msrb.mxu3 %v8883_v20  ;;  %v8873_v20 = vld [vmem:[%s12396_s4 + $0x140] sm:$0xff] }
 0x198   : > { %12581 = vst [vmem:[#allocation87_spill] sm:$0xff] %v10100_v53 }
 0x19a   : > { %v821_v61 = vld [vmem:[#allocation2 + $0x140] sm:$0xff] }
 0x19b   : > { %v1223_v7 = vld [vmem:[#allocation2 + $0x13a] sm:$0xff]  ;;  %v1224_v18 = vld [vmem:[#allocation2 + $0x142] sm:$0xff]  ;;  %v10102_v47 = vpack.c.bf16 %v821_v61, %v820_v50  ;;  %v1142_v26 = vpop.f32.mrf.mxu2 }
 0x19c   : > { %v1242_v25 = vpack.c.bf16 %v1224_v18, %v1223_v7  ;;  %v10104_v17 = vld [vmem:[#allocation2 + $0x140] sm:$0xff]  ;;  %v1143_v50 = vadd.f32 %v1142_v26, %v10059_v51 }
 0x19d   : > { %12582 = vst [vmem:[#allocation88_spill] sm:$0xff] %v10102_v47  ;;  %v1690_v9 = vld [vmem:[#allocation2 + $0x141] sm:$0xff]  ;;  %1181 = vmatmul.bf16.gmra.mxu2 %v10102_v47 }
 0x19e   : > { %12583 = vst [vmem:[#allocation89_spill] sm:$0xff] %v10104_v17  ;;  %v10106_v59 = vld [vmem:[#allocation2 + $0x13a] sm:$0xff]  ;;  %v10116_v52 = vpack.c.bf16 %v1690_v9, %v1689_v39  ;;  %v10118_v42 = vld [vmem:[#allocation2 + $0x142] sm:$0xff]  ;;  %1383 = vmatmul.bf16.gmra.mxu3 %v1242_v25  ;;  %v670_v39 = vadd.f32 %v10085_v34, %v634_v12  ;;  %v1344_v25 = vpop.f32.mrf.mxu3 }
 0x19f   : > { %12584 = vst [vmem:[#allocation90_spill] sm:$0xff] %v10106_v59  ;;  %v10124_v7 = vld [vmem:[#allocation2 + $0x13a] sm:$0xff]  ;;  %v10126_v18 = vld [vmem:[#allocation2 + $0x142] sm:$0xff]  ;;  %v10146_v12 = vadd.f32 %v1344_v25, %v1143_v50 }
 0x1a0   : > { %12585 = vst [vmem:[#allocation91_spill] sm:$0xff] %v10116_v52  ;;  %v8875_v9 = vld [vmem:[%s12396_s4 + $0x150] sm:$0xff]  ;;  %v10140_v61 = vmax.f32 %v670_v39, 0.0  ;;  %v8874_v39 = vld [vmem:[%s12396_s4 + $0x148] sm:$0xff]  ;;  %1592 = vmatmul.bf16.gmra.mxu0 %v9894_v24 }
 0x1a1   : > { %12586 = vst [vmem:[#allocation92_spill] sm:$0xff] %v10118_v42  ;;  %2017 = vmatpush.bf16.msrb.mxu2 %v8875_v9  ;;  %v8882_v51 = vld [vmem:[%s12396_s4 + $0x188] sm:$0xff]  ;;  %v1012_v42 = vpop.f32.mrf.mxu1  ;;  %v8903_v24 = vld [vmem:[%s12396_s4 + $0x230] sm:$0xff] }
 0x1a2   : > { %12587 = vst [vmem:[#allocation93_spill] sm:$0xff] %v10124_v7  ;;  %v904_v7 = vpack.c.bf16 %v10140_v61, %v10095_v16  ;;  %2253 = vmatpush.bf16.msrb.mxu3 %v8882_v51 }
 0x1a3   : > { %12588 = vst [vmem:[#allocation94_spill] sm:$0xff] %v10126_v18  ;;  %v593_v18 = vpop.f32.mrf.mxu0  ;;  %v1144_v25 = vpop.f32.mrf.mxu2 }
 0x1a4   : > { %3393 = vst [vmem:[#allocation2 + $0x148] sm:$0x3] %v9997_v28  ;;  %v635_v26 = vmul.f32 %v10079_v44, %v593_v18  ;;  %1049 = vmatmul.bf16.gmra.mxu1 %v904_v7  ;;  %v1145_v18 = vadd.f32 %v1144_v25, %v1007_v56  ;;  %v822_v7 = vld [vmem:[#allocation2 + $0x150] sm:$0xff] }
 0x1a5   : > { %4787 = vst [vmem:[#allocation2 + $0x148] sm:$0x3] %v9997_v28  ;;  %2018 = vmatpush.bf16.msrb.mxu2 %v8874_v39  ;;  %v10167_v39 = vld [vmem:[#allocation2 + $0x150] sm:$0xff] }
 0x1a6   : > { %5935 = vst [vmem:[#allocation2 + $0x138] sm:$0xff] %v9997_v28  ;;  %v671_v50 = vadd.f32 %v10085_v34, %v635_v26  ;;  %v1346_v9 = vpop.f32.mrf.mxu3  ;;  %v1691_v26 = vld [vmem:[#allocation2 + $0x151] sm:$0xff] }
 0x1a7   : > { %12589 = vst [vmem:[#allocation95_spill] sm:$0xff] %v10140_v61  ;;  %v10170_v52 = vadd.f32 %v1346_v9, %v1145_v18  ;;  %v8896_v56 = vld [vmem:[%s12396_s4 + $0x1f8] sm:$0xff] }
 0x1a8   : > { %5936 = vst [vmem:[#allocation2 + $0x140] sm:$0xff] %v9997_v28  ;;  %v10165_v16 = vmax.f32 %v671_v50, 0.0  ;;  %v8904_v18 = vld [vmem:[%s12396_s4 + $0x238] sm:$0xff]  ;;  %2481 = vmatpush.bf16.msra.mxu0 %v8896_v56 }
 0x1a9   : > { %5937 = vst [vmem:[#allocation2 + $0x148] sm:$0x3] %v9997_v28  ;;  %2019 = vmatpush.bf16.msrb.mxu2 %v8873_v20  ;;  %2715 = vmatpush.bf16.msra.mxu1 %v8904_v18  ;;  %v1015_v56 = vpop.f32.mrf.mxu1 }
 0x1aa   : > { %789 = vst [vmem:[#allocation2 + $0x159] sm:$0xff] %v10140_v61  ;;  %v8881_v61 = vld [vmem:[%s12396_s4 + $0x180] sm:$0xff] }
 0x1ab   : > { %12590 = vst [vmem:[#allocation96_spill] sm:$0xff] %v10146_v12  ;;  %2254 = vmatpush.bf16.msrb.mxu3 %v8881_v61  ;;  %v595_v12 = vpop.f32.mrf.mxu0 }
 0x1ac   : > { %12591 = vst [vmem:[#allocation97_spill] sm:$0xff] %v10165_v16  ;;  %v636_v61 = vmul.f32 %v10079_v44, %v595_v12 }
 0x1ad   : > { %12592 = vst [vmem:[#allocation98_spill] sm:$0xff] %v10167_v39  ;;  %2716 = vmatpush.bf16.msra.mxu1 %v8903_v24 }
 0x1ae   : > { %790 = vst [vmem:[#allocation2 + $0x169] sm:$0xff] %v10165_v16  ;;  %v672_v12 = vadd.f32 %v10085_v34, %v636_v61 }
 0x1af   : > { %12593 = vst [vmem:[#allocation99_spill] sm:$0xff] %v10170_v52 }
 0x1b0   : > { %1597 = vmatmul.bf16.gmra.mxu0 %v9933_v23 }
 0x1b1   : > { %v823_v59 = vld [vmem:[#allocation2 + $0x158] sm:$0xff] }
 0x1b2   : > { %v1225_v4 = vld [vmem:[#allocation2 + $0x152] sm:$0xff]  ;;  %v1226_v51 = vld [vmem:[#allocation2 + $0x15a] sm:$0xff]  ;;  %v10172_v35 = vpack.c.bf16 %v823_v59, %v822_v7 }
 0x1b3   : > { %v1243_v17 = vpack.c.bf16 %v1226_v51, %v1225_v4  ;;  %v10177_v50 = vld [vmem:[#allocation2 + $0x158] sm:$0xff]  ;;  %v1349_v51 = vpop.f32.mrf.mxu3  ;;  %v598_v18 = vpop.f32.mrf.mxu0 }
 0x1b4   : > { %12594 = vst [vmem:[#allocation100_spill] sm:$0xff] %v10177_v50  ;;  %v1692_v25 = vld [vmem:[#allocation2 + $0x159] sm:$0xff]  ;;  %1186 = vmatmul.bf16.gmra.mxu2 %v10172_v35  ;;  %v637_v53 = vmul.f32 %v10079_v44, %v598_v18 }
 0x1b5   : > { %v10181_v20 = vpack.c.bf16 %v1692_v25, %v1691_v26  ;;  %v10183_v47 = vld [vmem:[#allocation2 + $0x152] sm:$0xff]  ;;  %v10185_v9 = vld [vmem:[#allocation2 + $0x15a] sm:$0xff]  ;;  %1388 = vmatmul.bf16.gmra.mxu3 %v1243_v17  ;;  %v1147_v17 = vpop.f32.mrf.mxu2  ;;  %v10205_v25 = vmax.f32 %v672_v12, 0.0 }
 0x1b6   : > { %12596 = vst [vmem:[#allocation102_spill] sm:$0xff] %v10183_v47  ;;  %v10187_v59 = vld [vmem:[#allocation2 + $0x152] sm:$0xff]  ;;  %v10196_v26 = vld [vmem:[#allocation2 + $0x15a] sm:$0xff]  ;;  %v1148_v7 = vadd.f32 %v1147_v17, %v1010_v58  ;;  %v824_v47 = vld [vmem:[#allocation2 + $0x168] sm:$0xff] }
 0x1b7   : > { %12595 = vst [vmem:[#allocation101_spill] sm:$0xff] %v10181_v20  ;;  %v905_v61 = vpack.c.bf16 %v10205_v25, %v10165_v16  ;;  %v1017_v20 = vpop.f32.mrf.mxu1 }
 0x1b8   : > { %12597 = vst [vmem:[#allocation103_spill] sm:$0xff] %v10185_v9  ;;  %v10209_v4 = vadd.f32 %v1349_v51, %v1148_v7  ;;  %v10219_v7 = vld [vmem:[#allocation2 + $0x168] sm:$0xff] }
 0x1b9   : > { %12598 = vst [vmem:[#allocation104_spill] sm:$0xff] %v10187_v59  ;;  %1054 = vmatmul.bf16.gmra.mxu1 %v905_v61  ;;  %v10215_v59 = vadd.f32 %v10085_v34, %v637_v53  ;;  %v1693_v51 = vld [vmem:[#allocation2 + $0x169] sm:$0xff] }
 0x1ba   : > { %12599 = vst [vmem:[#allocation105_spill] sm:$0xff] %v10196_v26 }
 0x1bb   : > { %5938 = vst [vmem:[#allocation2 + $0x150] sm:$0xff] %v9997_v28  ;;  %v1351_v12 = vpop.f32.mrf.mxu3  ;;  %v12476_v17 = vmax.f32 %v10215_v59, 0.0 }
 0x1bc   : > { %3396 = vst [vmem:[#allocation2 + $0x160] sm:$0x3] %v9997_v28 }
 0x1bd   : > { %4790 = vst [vmem:[#allocation2 + $0x160] sm:$0x3] %v9997_v28  ;;  %v1149_v58 = vpop.f32.mrf.mxu2 }
 0x1be   : > { %5939 = vst [vmem:[#allocation2 + $0x158] sm:$0xff] %v9997_v28  ;;  %v1150_v26 = vadd.f32 %v1149_v58, %v1012_v42  ;;  %v600_v58 = vpop.f32.mrf.mxu0 }
 0x1bf   : > { %12600 = vst [vmem:[#allocation106_spill] sm:$0xff] %v10205_v25 }
 0x1c0   : > { %5940 = vst [vmem:[#allocation2 + $0x160] sm:$0x3] %v9997_v28  ;;  %v10223_v53 = vadd.f32 %v1351_v12, %v1150_v26  ;;  %1602 = vmatmul.bf16.gmra.mxu0 %v9971_v29  ;;  %v12608_v29 = vpack.c.bf16 %v9685_v45, %v9683_v43 }
 0x1c1   : > { %791 = vst [vmem:[#allocation2 + $0x171] sm:$0xff] %v10205_v25 }
 0x1c2   : > { %12601 = vst [vmem:[#allocation107_spill] sm:$0xff] %v10209_v4 }
 0x1c3   : > { %12602 = vst [vmem:[#allocation108_spill] sm:$0xff] %v10215_v59 }
 0x1c4   : > { %792 = vst [vmem:[#allocation2 + $0x181] sm:$0xff] %v12476_v17 }
 0x1c8   : > { %v825_v9 = vld [vmem:[#allocation2 + $0x170] sm:$0xff] }
 0x1c9   : > { %v1227_v25 = vld [vmem:[#allocation2 + $0x16a] sm:$0xff]  ;;  %v1228_v16 = vld [vmem:[#allocation2 + $0x172] sm:$0xff]  ;;  %v10225_v61 = vpack.c.bf16 %v825_v9, %v824_v47  ;;  %v638_v47 = vmul.f32 %v10079_v44, %v600_v58  ;;  %v1354_v44 = vpop.f32.mrf.mxu3 }
 0x1ca   : > { %v1244_v0 = vpack.c.bf16 %v1228_v16, %v1227_v25  ;;  %v10227_v18 = vld [vmem:[#allocation2 + $0x170] sm:$0xff]  ;;  %v1152_v25 = vpop.f32.mrf.mxu2 }
 0x1cb   : > { %v1694_v39 = vld [vmem:[#allocation2 + $0x171] sm:$0xff]  ;;  %1191 = vmatmul.bf16.gmra.mxu2 %v10225_v61 }
 0x1cc   : > { %v10229_v42 = vld [vmem:[#allocation2 + $0x16a] sm:$0xff]  ;;  %v10233_v4 = vpack.c.bf16 %v1694_v39, %v1693_v51  ;;  %v10235_v52 = vld [vmem:[#allocation2 + $0x172] sm:$0xff]  ;;  %1393 = vmatmul.bf16.gmra.mxu3 %v1244_v0  ;;  %v10250_v39 = vadd.f32 %v10085_v34, %v638_v47  ;;  %v1153_v51 = vadd.f32 %v1152_v25, %v1015_v56  ;;  %v1020_v0 = vpop.f32.mrf.mxu1  ;;  %v1697_v34 = vpack.c.bf16 %v9568_v13, %v9566_v11  ;;  %v1553_v47 = vpop.f32.mrf.mxu0 }
 0x1cd   : > { %v10237_v59 = vld [vmem:[#allocation2 + $0x16a] sm:$0xff]  ;;  %v10239_v26 = vld [vmem:[#allocation2 + $0x172] sm:$0xff]  ;;  %v10263_v17 = vadd.f32 %v1553_v47, %v9767_v31  ;;  %v12606_v31 = vpack.c.bf16 %v9599_v33, %v9597_v32 }
 0x1ce   : > { %12603 = vst [vmem:[#allocation109_spill] sm:$0xff] %v10237_v59  ;;  %v12477_v12 = vmax.f32 %v10250_v39, 0.0  ;;  %v10258_v58 = vadd.f32 %v1354_v44, %v1153_v51  ;;  %1786 = vmatmul.bf16.vlgmr.msrb.gmra.mxu1 %v1697_v34  ;;  %v1931_v44 = vpack.c.bf16 %v9571_v14, %v9560_v6  ;;  %v8895_v11 = vld [vmem:[%s12396_s4 + $0x1f0] sm:$0xff]  ;;  %v10285_v34 = vpack.c.bf16 %v9611_v40, %v9603_v36 }
 0x1cf   : > { %12604 = vst [vmem:[#allocation110_spill] sm:$0xff] %v10239_v26  ;;  %2482 = vmatpush.bf16.msra.mxu0 %v8895_v11  ;;  %v1932_v11 = vpack.c.bf16 %v9613_v41, %v9605_v37  ;;  %v12607_v40 = vpack.c.bf16 %v9642_v63, %v9640_v62 }
 0x1d0   : > { %3399 = vst [vmem:[#allocation2 + $0x178] sm:$0x3] %v9997_v28  ;;  %1607 = vmatmul.bf16.gmra.mxu0 %v10018_v46 }
 0x1d1   : > { %4793 = vst [vmem:[#allocation2 + $0x178] sm:$0x3] %v9997_v28  ;;  %v1356_v56 = vpop.f32.mrf.mxu3 }
 0x1d2   : > { %12605 = vst [vmem:[#allocation111_spill] sm:$0xff] %v10250_v39  ;;  %v1154_v9 = vpop.f32.mrf.mxu2 }
 0x1d3   : > { %5941 = vst [vmem:[#allocation2 + $0x168] sm:$0xff] %v9997_v28  ;;  %v1155_v25 = vadd.f32 %v1154_v9, %v1017_v20 }
 0x1d4   : > { %5942 = vst [vmem:[#allocation2 + $0x170] sm:$0xff] %v9997_v28  ;;  %v1022_v16 = vpop.f32.mrf.mxu1  ;;  %v10273_v13 = vpop.f32.mrf.mxu0 }
 0x1d5   : > { %5943 = vst [vmem:[#allocation2 + $0x178] sm:$0x3] %v9997_v28  ;;  %v10266_v50 = vadd.f32 %v1356_v56, %v1155_v25 }
 0x1d6   : > { %793 = vst [vmem:[#allocation2 + $0x189] sm:$0xff] %v12477_v12 }
 0x1d9   : > { %v1359_v9 = vpop.f32.mrf.mxu3 }
 0x1da   : > { %v1157_v20 = vpop.f32.mrf.mxu2 }
 0x1db   : > { %2020 = vmatmul.bf16.vlgmr.msrb.gmra.mxu2 %v1931_v44  ;;  %v1158_v6 = vadd.f32 %v1157_v20, %v1020_v0 }
 0x1dc   : > { %2255 = vmatmul.bf16.vlgmr.msrb.gmra.mxu3 %v12606_v31  ;;  %v1025_v14 = vpop.f32.mrf.mxu1  ;;  %v1558_v47 = vpop.f32.mrf.mxu0 }
 0x1dd   : > { %v10281_v51 = vadd.f32 %v1359_v9, %v1158_v6  ;;  %v10288_v32 = vadd.f32 %v1558_v47, %v9919_v5  ;;  %v10306_v9 = vpack.c.bf16 %v9654_v8, %v9646_v2  ;;  %v1933_v47 = vpack.c.bf16 %v9656_v10, %v9648_v3  ;;  %v8894_v2 = vld [vmem:[%s12396_s4 + $0x1e8] sm:$0xff] }
 0x1de   : > { %1791 = vmatmul.bf16.gmra.mxu1 %v10285_v34  ;;  %2483 = vmatpush.bf16.msra.mxu0 %v8894_v2 }
 0x1e1   : > { %v1361_v56 = vpop.f32.mrf.mxu3 }
 0x1e2   : > { %v1159_v33 = vpop.f32.mrf.mxu2 }
 0x1e3   : > { %v1160_v25 = vadd.f32 %v1159_v33, %v1022_v16  ;;  %v8902_v33 = vld [vmem:[%s12396_s4 + $0x228] sm:$0xff] }
 0x1e4   : > { %v1027_v44 = vpop.f32.mrf.mxu1  ;;  %v1560_v31 = vpop.f32.mrf.mxu0  ;;  %2717 = vmatpush.bf16.msra.mxu1 %v8902_v33 }
 0x1e5   : > { %v10292_v0 = vadd.f32 %v1361_v56, %v1160_v25  ;;  %v10297_v36 = vadd.f32 %v1560_v31, %v9931_v38 }
 0x1e9   : > { %v1364_v23 = vpop.f32.mrf.mxu3 }
 0x1ea   : > { %v1162_v5 = vpop.f32.mrf.mxu2 }
 0x1eb   : > { %2025 = vmatmul.bf16.gmra.mxu2 %v1932_v11  ;;  %v1163_v24 = vadd.f32 %v1162_v5, %v1025_v14 }
 0x1ec   : > { %2260 = vmatmul.bf16.gmra.mxu3 %v12607_v40  ;;  %v1030_v20 = vpop.f32.mrf.mxu1  ;;  %v1563_v37 = vpop.f32.mrf.mxu0 }
 0x1ed   : > { %v10302_v16 = vadd.f32 %v1364_v23, %v1163_v24  ;;  %v10309_v41 = vadd.f32 %v1563_v37, %v9954_v54  ;;  %v1934_v24 = vpack.c.bf16 %v9699_v57, %v9691_v49 }
 0x1ee   : > { %1796 = vmatmul.bf16.gmra.mxu1 %v10306_v9 }
 0x1f1   : > { %v1366_v63 = vpop.f32.mrf.mxu3 }
 0x1f2   : > { %v1164_v62 = vpop.f32.mrf.mxu2 }
 0x1f3   : > { %v1165_v38 = vadd.f32 %v1164_v62, %v1027_v44 }
 0x1f4   : > { %v1032_v6 = vpop.f32.mrf.mxu1  ;;  %v1565_v8 = vpop.f32.mrf.mxu0 }
 0x1f5   : > { %v10313_v14 = vadd.f32 %v1366_v63, %v1165_v38  ;;  %v10321_v54 = vadd.f32 %v1565_v8, %v9969_v21  ;;  %v10333_v21 = vpack.c.bf16 %v9697_v55, %v9689_v48  ;;  %v12609_v55 = vpack.c.bf16 %v9734_v15, %v9732_v60  ;;  %v12611_v8 = vld [vmem:[#allocation23_spill] sm:$0xff] }
 0x1f6   : > { %v10354_v38 = vpack.c.bf16 %v9744_v22, %v9738_v19  ;;  %v8893_v19 = vld [vmem:[%s12396_s4 + $0x1e0] sm:$0xff] }
 0x1f7   : > { %2484 = vmatpush.bf16.msra.mxu0 %v8893_v19  ;;  %v12622_v19 = vld [vmem:[#allocation32_spill] sm:$0xff] }
 0x1f9   : > { %v1369_v10 = vpop.f32.mrf.mxu3 }
 0x1fa   : > { %v1167_v3 = vpop.f32.mrf.mxu2 }
 0x1fb   : > { %2030 = vmatmul.bf16.gmra.mxu2 %v1933_v47  ;;  %v1168_v56 = vadd.f32 %v1167_v3, %v1030_v20 }
 0x1fc   : > { %2265 = vmatmul.bf16.gmra.mxu3 %v12608_v29  ;;  %v1035_v25 = vpop.f32.mrf.mxu1  ;;  %v1568_v11 = vpop.f32.mrf.mxu0  ;;  %v12612_v29 = vld [vmem:[#allocation24_spill] sm:$0xff] }
 0x1fd   : > { %v10329_v44 = vadd.f32 %v1369_v10, %v1168_v56  ;;  %v10336_v43 = vadd.f32 %v1568_v11, %v10004_v27  ;;  %v10365_v33 = vpack.c.bf16 %v12612_v29, %v12611_v8  ;;  %v12615_v10 = vld [vmem:[#allocation28_spill] sm:$0xff]  ;;  %v12616_v56 = vld [vmem:[#allocation27_spill] sm:$0xff]  ;;  %v12621_v29 = vld [vmem:[#allocation30_spill] sm:$0xff] }
 0x1fe   : > { %1801 = vmatmul.bf16.gmra.mxu1 %v10333_v21  ;;  %v8901_v11 = vld [vmem:[%s12396_s4 + $0x220] sm:$0xff] }
 0x1ff   : > { %2718 = vmatpush.bf16.msra.mxu1 %v8901_v11 }
 0x201   : > { %v1371_v31 = vpop.f32.mrf.mxu3 }
 0x202   : > { %v1169_v45 = vpop.f32.mrf.mxu2 }
 0x203   : > { %v1170_v40 = vadd.f32 %v1169_v45, %v1032_v6 }
 0x204   : > { %v1037_v5 = vpop.f32.mrf.mxu1  ;;  %v1570_v20 = vpop.f32.mrf.mxu0 }
 0x205   : > { %v10340_v23 = vadd.f32 %v1371_v31, %v1170_v40  ;;  %v10345_v48 = vadd.f32 %v1570_v20, %v10016_v1  ;;  %v12610_v1 = vld [vmem:[#allocation88_spill] sm:$0xff]  ;;  %v12618_v20 = vld [vmem:[#allocation29_spill] sm:$0xff] }
 0x206   : > { %1612 = vmatmul.bf16.gmra.mxu0 %v12610_v1  ;;  %12613 = vst [vmem:[#allocation88_spill] sm:$0xff] %v10365_v33 }
 0x209   : > { %v1374_v46 = vpop.f32.mrf.mxu3 }
 0x20a   : > { %v1172_v27 = vpop.f32.mrf.mxu2 }
 0x20b   : > { %2035 = vmatmul.bf16.gmra.mxu2 %v1934_v24  ;;  %v1173_v37 = vadd.f32 %v1172_v27, %v1035_v25  ;;  %v12617_v25 = vpack.c.bf16 %v12615_v10, %v12616_v56  ;;  %v12624_v10 = vld [vmem:[#allocation99_spill] sm:$0xff] }
 0x20c   : > { %2270 = vmatmul.bf16.gmra.mxu3 %v12609_v55  ;;  %v1040_v62 = vpop.f32.mrf.mxu1  ;;  %v1573_v49 = vpop.f32.mrf.mxu0  ;;  %v12619_v55 = vld [vmem:[#allocation31_spill] sm:$0xff] }
 0x20d   : > { %v10350_v63 = vadd.f32 %v1374_v46, %v1173_v37  ;;  %v10357_v57 = vadd.f32 %v1573_v49, %v10063_v30  ;;  %v12614_v30 = vld [vmem:[#allocation87_spill] sm:$0xff]  ;;  %v10384_v27 = vpack.c.bf16 %v12619_v55, %v12618_v20  ;;  %v12620_v37 = vld [vmem:[#allocation96_spill] sm:$0xff] }
 0x20e   : > { %1806 = vmatmul.bf16.gmra.mxu1 %v10354_v38  ;;  %v8890_v20 = vld [vmem:[%s12396_s4 + $0x1c8] sm:$0xff] }
 0x20f   : > { %v1695_v55 = vld [vmem:[#allocation2 + $0x181] sm:$0xff] }
 0x211   : > { %v1376_v15 = vpop.f32.mrf.mxu3 }
 0x212   : > { %v1174_v60 = vpop.f32.mrf.mxu2 }
 0x213   : > { %v1175_v6 = vadd.f32 %v1174_v60, %v1037_v5 }
 0x214   : > { %v1042_v47 = vpop.f32.mrf.mxu1  ;;  %v1575_v22 = vpop.f32.mrf.mxu0 }
 0x215   : > { %v10361_v2 = vadd.f32 %v1376_v15, %v1175_v6  ;;  %v10371_v3 = vadd.f32 %v1575_v22, %v12614_v30  ;;  %v10398_v22 = vpack.c.bf16 %v12622_v19, %v12621_v29  ;;  %v12635_v19 = vld [vmem:[#allocation40_spill] sm:$0xff] }
 0x216   : > { %1617 = vmatmul.bf16.gmra.mxu0 %v10172_v35  ;;  %v8891_v35 = vld [vmem:[%s12396_s4 + $0x1d0] sm:$0xff] }
 0x217   : > { %12623 = vst [vmem:[#allocation23_spill] sm:$0xff] %v10398_v22 }
 0x219   : > { %v1379_v31 = vpop.f32.mrf.mxu3 }
 0x21a   : > { %v1177_v45 = vpop.f32.mrf.mxu2 }
 0x21b   : > { %2040 = vmatmul.bf16.gmra.mxu2 %v10365_v33  ;;  %v1178_v40 = vadd.f32 %v1177_v45, %v1040_v62  ;;  %v8892_v62 = vld [vmem:[%s12396_s4 + $0x1d8] sm:$0xff]  ;;  %v1461_v45 = vld [vmem:[#allocation2 + $0x180] sm:$0xff] }
 0x21c   : > { %2275 = vmatmul.bf16.gmra.mxu3 %v12617_v25  ;;  %v1045_v5 = vpop.f32.mrf.mxu1  ;;  %v1578_v46 = vpop.f32.mrf.mxu0  ;;  %2485 = vmatpush.bf16.msra.mxu0 %v8892_v62  ;;  %v12625_v25 = vld [vmem:[#allocation36_spill] sm:$0xff]  ;;  %v10417_v62 = vld [vmem:[#allocation2 + $0x18a] sm:$0xff] }
 0x21d   : > { %v10380_v24 = vadd.f32 %v1379_v31, %v1178_v40  ;;  %v10387_v49 = vadd.f32 %v1578_v46, %v12620_v37  ;;  %v1696_v46 = vld [vmem:[#allocation2 + $0x189] sm:$0xff] }
 0x21e   : > { %1811 = vmatmul.bf16.gmra.mxu1 %v10384_v27 }
 0x220   : > { %2486 = vmatpush.bf16.msra.mxu0 %v8891_v35 }
 0x221   : > { %v1381_v60 = vpop.f32.mrf.mxu3 }
 0x222   : > { %v1179_v1 = vpop.f32.mrf.mxu2 }
 0x223   : > { %v1180_v15 = vadd.f32 %v1179_v1, %v1042_v47  ;;  %v12626_v47 = vld [vmem:[#allocation35_spill] sm:$0xff]  ;;  %v10413_v1 = vpack.c.bf16 %v1696_v46, %v1695_v55 }
 0x224   : > { %v1047_v6 = vpop.f32.mrf.mxu1  ;;  %v1580_v30 = vpop.f32.mrf.mxu0  ;;  %v12627_v11 = vpack.c.bf16 %v12625_v25, %v12626_v47  ;;  %2487 = vmatpush.bf16.msra.mxu0 %v8890_v20  ;;  %v8889_v20 = vld [vmem:[%s12396_s4 + $0x1c0] sm:$0xff] }
 0x225   : > { %v10394_v8 = vadd.f32 %v1381_v60, %v1180_v15  ;;  %v10404_v56 = vadd.f32 %v1580_v30, %v12624_v10  ;;  %v10415_v60 = vld [vmem:[#allocation2 + $0x182] sm:$0xff]  ;;  %v10423_v30 = vld [vmem:[#allocation2 + $0x18a] sm:$0xff]  ;;  %v12632_v10 = vld [vmem:[#allocation39_spill] sm:$0xff] }
 0x226   : > { %12628 = vst [vmem:[#allocation24_spill] sm:$0xff] %v10415_v60  ;;  %v10419_v15 = vld [vmem:[#allocation2 + $0x182] sm:$0xff]  ;;  %v12633_v55 = vld [vmem:[#allocation107_spill] sm:$0xff]  ;;  %1622 = vmatmul.bf16.gmra.mxu0 %v10225_v61  ;;  %v12634_v47 = vld [vmem:[#allocation38_spill] sm:$0xff] }
 0x227   : > { %12629 = vst [vmem:[#allocation87_spill] sm:$0xff] %v10419_v15  ;;  %v10450_v39 = vpack.c.bf16 %v12635_v19, %v12634_v47  ;;  %v8900_v61 = vld [vmem:[%s12396_s4 + $0x218] sm:$0xff] }
 0x228   : > { %12630 = vst [vmem:[#allocation28_spill] sm:$0xff] %v10423_v30  ;;  %2488 = vmatpush.bf16.msra.mxu0 %v8889_v20  ;;  %v12637_v20 = vld [vmem:[#allocation45_spill] sm:$0xff]  ;;  %2719 = vmatpush.bf16.msra.mxu1 %v8900_v61 }
 0x229   : > { %v1384_v40 = vpop.f32.mrf.mxu3  ;;  %5944 = vst [vmem:[#allocation2 + $0x180] sm:$0xff] %v9997_v28 }
 0x22a   : > { %v1182_v31 = vpop.f32.mrf.mxu2  ;;  %3402 = vst [vmem:[#allocation2 + $0x190] sm:$0x3] %v9997_v28 }
 0x22b   : > { %2045 = vmatmul.bf16.gmra.mxu2 %v10398_v22  ;;  %v1183_v37 = vadd.f32 %v1182_v31, %v1045_v5  ;;  %v12631_v5 = vld [vmem:[#allocation37_spill] sm:$0xff]  ;;  %4796 = vst [vmem:[#allocation2 + $0x190] sm:$0x3] %v9997_v28 }
 0x22c   : > { %2280 = vmatmul.bf16.gmra.mxu3 %v12627_v11  ;;  %v1050_v29 = vpop.f32.mrf.mxu1  ;;  %v10430_v25 = vpack.c.bf16 %v12632_v10, %v12631_v5  ;;  %v1583_v11 = vpop.f32.mrf.mxu0  ;;  %v1462_v31 = vld [vmem:[#allocation2 + $0x188] sm:$0xff]  ;;  %5946 = vst [vmem:[#allocation2 + $0x190] sm:$0x3] %v9997_v28 }
 0x22d   : > { %v10426_v35 = vadd.f32 %v1384_v40, %v1183_v37  ;;  %v10440_v40 = vadd.f32 %v1583_v11, %v12633_v55  ;;  %5945 = vst [vmem:[#allocation2 + $0x188] sm:$0xff] %v9997_v28  ;;  %v12638_v28 = vld [vmem:[#allocation43_spill] sm:$0xff] }
 0x22e   : > { %1816 = vmatmul.bf16.gmra.mxu1 %v10430_v25  ;;  %12636 = vst [vmem:[#allocation27_spill] sm:$0xff] %v10450_v39  ;;  %v12639_v15 = vpack.c.bf16 %v12637_v20, %v12638_v28 }
 0x231   : > { %v1386_v37 = vpop.f32.mrf.mxu3 }
 0x232   : > { %v1184_v46 = vpop.f32.mrf.mxu2 }
 0x233   : > { %v1185_v5 = vadd.f32 %v1184_v46, %v1047_v6 }
 0x234   : > { %v1052_v10 = vpop.f32.mrf.mxu1  ;;  %v1585_v11 = vpop.f32.mrf.mxu0 }
 0x235   : > { %v10446_v12 = vadd.f32 %v1386_v37, %v1185_v5  ;;  %v10453_v55 = vadd.f32 %v1585_v11, %v10223_v53  ;;  %v10464_v5 = vpack.c.bf16 %v1462_v31, %v1461_v45  ;;  %v12640_v53 = vld [vmem:[#allocation46_spill] sm:$0xff]  ;;  %v12641_v11 = vld [vmem:[#allocation48_spill] sm:$0xff]  ;;  %v12642_v45 = vld [vmem:[#allocation47_spill] sm:$0xff] }
 0x236   : > { %v10468_v30 = vpack.c.bf16 %v12641_v11, %v12640_v53  ;;  %v12643_v31 = vld [vmem:[#allocation49_spill] sm:$0xff] }
 0x237   : > { %1627 = vmatmul.bf16.gmra.mxu0 %v10464_v5 }
 0x239   : > { %v1389_v46 = vpop.f32.mrf.mxu3 }
 0x23a   : > { %v1187_v6 = vpop.f32.mrf.mxu2 }
 0x23b   : > { %2050 = vmatmul.bf16.gmra.mxu2 %v10450_v39  ;;  %v1188_v37 = vadd.f32 %v1187_v6, %v1050_v29 }
 0x23c   : > { %2285 = vmatmul.bf16.gmra.mxu3 %v12639_v15  ;;  %v1055_v19 = vpop.f32.mrf.mxu1  ;;  %v1588_v59 = vpop.f32.mrf.mxu0 }
 0x23d   : > { %v10462_v47 = vadd.f32 %v1389_v46, %v1188_v37  ;;  %v10471_v15 = vadd.f32 %v1588_v59, %v10258_v58  ;;  %v10479_v46 = vpack.c.bf16 %v12643_v31, %v12642_v45  ;;  %v12645_v59 = vld [vmem:[#allocation55_spill] sm:$0xff]  ;;  %v12646_v58 = vld [vmem:[#allocation54_spill] sm:$0xff]  ;;  %v12650_v31 = vld [vmem:[#allocation56_spill] sm:$0xff] }
 0x23e   : > { %1821 = vmatmul.bf16.gmra.mxu1 %v10468_v30  ;;  %v12647_v11 = vpack.c.bf16 %v12645_v59, %v12646_v58  ;;  %v12652_v59 = vld [vmem:[#allocation52_spill] sm:$0xff] }
 0x23f   : > { %12644 = vst [vmem:[#allocation29_spill] sm:$0xff] %v10479_v46 }
 0x241   : > { %v1391_v28 = vpop.f32.mrf.mxu3 }
 0x242   : > { %v1189_v20 = vpop.f32.mrf.mxu2 }
 0x243   : > { %v1190_v29 = vadd.f32 %v1189_v20, %v1052_v10 }
 0x244   : > { %v1057_v61 = vpop.f32.mrf.mxu1  ;;  %v1590_v37 = vpop.f32.mrf.mxu0 }
 0x245   : > { %v10475_v6 = vadd.f32 %v1391_v28, %v1190_v29  ;;  %v10482_v53 = vadd.f32 %v1590_v37, %v10266_v50  ;;  %v12648_v28 = vld [vmem:[#allocation44_spill] sm:$0xff]  ;;  %v12649_v29 = vld [vmem:[#allocation51_spill] sm:$0xff]  ;;  %v12651_v50 = vld [vmem:[#allocation58_spill] sm:$0xff] }
 0x246   : > { %v1120_v22 = vadd.f32 %v12649_v29, %v12648_v28  ;;  %v10495_v37 = vpack.c.bf16 %v12651_v50, %v12650_v31  ;;  %v12654_v28 = vld [vmem:[#allocation59_spill] sm:$0xff] }
 0x247   : > { %2489 = vmatmul.bf16.vlgmr.msra.gmra.mxu0 %v10285_v34  ;;  %v12655_v34 = vld [vmem:[#allocation63_spill] sm:$0xff] }
 0x24b   : > { %2055 = vmatmul.bf16.gmra.mxu2 %v10479_v46 }
 0x24c   : > { %2290 = vmatmul.bf16.gmra.mxu3 %v12647_v11  ;;  %v1787_v20 = vpop.f32.mrf.mxu1  ;;  %v1593_v46 = vpop.f32.mrf.mxu0 }
 0x24d   : > { %v1867_v45 = vadd.f32 %v1787_v20, %v10263_v17  ;;  %v10498_v60 = vadd.f32 %v1593_v46, %v10281_v51  ;;  %v12653_v20 = vld [vmem:[#allocation57_spill] sm:$0xff] }
 0x24e   : > { %v1192_v26 = vpop.f32.mrf.mxu2  ;;  %1826 = vmatmul.bf16.gmra.mxu1 %v10495_v37  ;;  %v10508_v29 = vpack.c.bf16 %v12654_v28, %v12653_v20 }
 0x24f   : > { %v1394_v39 = vpop.f32.mrf.mxu3  ;;  %v1193_v10 = vadd.f32 %v1192_v26, %v1055_v19  ;;  %v1400_v26 = vadd.f32 %v12652_v59, %v1120_v22  ;;  %v12656_v22 = vld [vmem:[#allocation62_spill] sm:$0xff] }
 0x250   : > { %v12657_v50 = vpack.c.bf16 %v12655_v34, %v12656_v22 }
 0x251   : > { %v10490_v33 = vadd.f32 %v1394_v39, %v1193_v10  ;;  %v1634_v39 = vadd.f32 %v10273_v13, %v1400_v26  ;;  %v8899_v13 = vld [vmem:[%s12396_s4 + $0x210] sm:$0xff] }
 0x252   : > { %2720 = vmatpush.bf16.msra.mxu1 %v8899_v13 }
 0x254   : > { %v1789_v17 = vpop.f32.mrf.mxu1  ;;  %v1595_v46 = vpop.f32.mrf.mxu0 }
 0x255   : > { %v1868_v51 = vadd.f32 %v1789_v17, %v1634_v39  ;;  %v10511_v31 = vadd.f32 %v1595_v46, %v10292_v0  ;;  %v12658_v17 = vld [vmem:[#allocation64_spill] sm:$0xff] }
 0x256   : > { %v1194_v19 = vpop.f32.mrf.mxu2 }
 0x257   : > { %v1396_v58 = vpop.f32.mrf.mxu3  ;;  %v1195_v11 = vadd.f32 %v1194_v19, %v1057_v61  ;;  %2494 = vmatmul.bf16.gmra.mxu0 %v10306_v9 }
 0x259   : > { %v10504_v10 = vadd.f32 %v1396_v58, %v1195_v11 }
 0x25b   : > { %2060 = vmatmul.bf16.gmra.mxu2 %v10508_v29 }
 0x25c   : > { %2295 = vmatmul.bf16.gmra.mxu3 %v12657_v50  ;;  %v1792_v19 = vpop.f32.mrf.mxu1  ;;  %v1598_v39 = vpop.f32.mrf.mxu0 }
 0x25d   : > { %v1869_v0 = vadd.f32 %v1792_v19, %v10288_v32  ;;  %v10524_v11 = vadd.f32 %v1598_v39, %v10302_v16  ;;  %v12659_v32 = vld [vmem:[#allocation65_spill] sm:$0xff] }
 0x25e   : > { %v2021_v61 = vpop.f32.mrf.mxu2  ;;  %1831 = vmatmul.bf16.gmra.mxu1 %v12658_v17  ;;  %v12660_v16 = vld [vmem:[#allocation69_spill] sm:$0xff] }
 0x25f   : > { %v2256_v59 = vpop.f32.mrf.mxu3  ;;  %v2101_v26 = vadd.f32 %v2021_v61, %v1867_v45  ;;  %v12661_v61 = vld [vmem:[#allocation68_spill] sm:$0xff] }
 0x261   : > { %v10520_v58 = vadd.f32 %v2256_v59, %v2101_v26  ;;  %v12662_v59 = vpack.c.bf16 %v12660_v16, %v12661_v61 }
 0x264   : > { %v1794_v34 = vpop.f32.mrf.mxu1  ;;  %v1600_v50 = vpop.f32.mrf.mxu0 }
 0x265   : > { %v1870_v45 = vadd.f32 %v1794_v34, %v10297_v36  ;;  %v10532_v13 = vadd.f32 %v1600_v50, %v10313_v14  ;;  %v12663_v14 = vld [vmem:[#allocation71_spill] sm:$0xff] }
 0x266   : > { %v2023_v20 = vpop.f32.mrf.mxu2 }
 0x267   : > { %v2258_v28 = vpop.f32.mrf.mxu3  ;;  %v2102_v46 = vadd.f32 %v2023_v20, %v1868_v51  ;;  %2499 = vmatmul.bf16.gmra.mxu0 %v10333_v21  ;;  %v8898_v21 = vld [vmem:[%s12396_s4 + $0x208] sm:$0xff] }
 0x268   : > { %2721 = vmatpush.bf16.msra.mxu1 %v8898_v21 }
 0x269   : > { %v10528_v22 = vadd.f32 %v2258_v28, %v2102_v46 }
 0x26b   : > { %2065 = vmatmul.bf16.gmra.mxu2 %v12659_v32 }
 0x26c   : > { %2300 = vmatmul.bf16.gmra.mxu3 %v12662_v59  ;;  %v1797_v39 = vpop.f32.mrf.mxu1  ;;  %v1603_v28 = vpop.f32.mrf.mxu0 }
 0x26d   : > { %v1871_v20 = vadd.f32 %v1797_v39, %v10309_v41  ;;  %v10542_v36 = vadd.f32 %v1603_v28, %v10329_v44  ;;  %v12664_v41 = vld [vmem:[#allocation72_spill] sm:$0xff]  ;;  %v12668_v39 = vld [vmem:[#allocation77_spill] sm:$0xff] }
 0x26e   : > { %v2026_v26 = vpop.f32.mrf.mxu2  ;;  %1836 = vmatmul.bf16.gmra.mxu1 %v12663_v14 }
 0x26f   : > { %v2261_v9 = vpop.f32.mrf.mxu3  ;;  %v2103_v19 = vadd.f32 %v2026_v26, %v1869_v0 }
 0x271   : > { %v10538_v51 = vadd.f32 %v2261_v9, %v2103_v19  ;;  %v12665_v9 = vld [vmem:[#allocation70_spill] sm:$0xff] }
 0x272   : > { %v12666_v44 = vpack.c.bf16 %v12664_v41, %v12665_v9  ;;  %v12667_v19 = vld [vmem:[#allocation78_spill] sm:$0xff]  ;;  %v12670_v41 = vld [vmem:[#allocation80_spill] sm:$0xff] }
 0x273   : > { %v12669_v28 = vpack.c.bf16 %v12667_v19, %v12668_v39 }
 0x274   : > { %v1799_v16 = vpop.f32.mrf.mxu1  ;;  %v1605_v59 = vpop.f32.mrf.mxu0 }
 0x275   : > { %v1872_v0 = vadd.f32 %v1799_v16, %v10321_v54  ;;  %v10550_v26 = vadd.f32 %v1605_v59, %v10340_v23 }
 0x276   : > { %v2028_v46 = vpop.f32.mrf.mxu2 }
 0x277   : > { %v2263_v34 = vpop.f32.mrf.mxu3  ;;  %v2104_v50 = vadd.f32 %v2028_v46, %v1870_v45  ;;  %2504 = vmatmul.bf16.gmra.mxu0 %v10354_v38 }
 0x279   : > { %v10546_v61 = vadd.f32 %v2263_v34, %v2104_v50 }
 0x27b   : > { %2070 = vmatmul.bf16.gmra.mxu2 %v12666_v44 }
 0x27c   : > { %2305 = vmatmul.bf16.gmra.mxu3 %v12669_v28  ;;  %v1802_v34 = vpop.f32.mrf.mxu1  ;;  %v1608_v16 = vpop.f32.mrf.mxu0 }
 0x27d   : > { %v1873_v23 = vadd.f32 %v1802_v34, %v10336_v43  ;;  %v10565_v59 = vadd.f32 %v1608_v16, %v10350_v63  ;;  %v12671_v43 = vld [vmem:[#allocation81_spill] sm:$0xff]  ;;  %v12675_v34 = vld [vmem:[#allocation86_spill] sm:$0xff] }
 0x27e   : > { %v2031_v45 = vpop.f32.mrf.mxu2  ;;  %1841 = vmatmul.bf16.gmra.mxu1 %v12670_v41 }
 0x27f   : > { %v2266_v46 = vpop.f32.mrf.mxu3  ;;  %v2105_v54 = vadd.f32 %v2031_v45, %v1871_v20 }
 0x281   : > { %v10561_v50 = vadd.f32 %v2266_v46, %v2105_v54  ;;  %v12672_v46 = vld [vmem:[#allocation79_spill] sm:$0xff]  ;;  %v12674_v54 = vld [vmem:[#allocation89_spill] sm:$0xff] }
 0x282   : > { %v12673_v63 = vpack.c.bf16 %v12671_v43, %v12672_v46  ;;  %v12676_v16 = vpack.c.bf16 %v12674_v54, %v12675_v34  ;;  %v12678_v34 = vld [vmem:[#allocation92_spill] sm:$0xff] }
 0x284   : > { %v1804_v39 = vpop.f32.mrf.mxu1  ;;  %v1610_v21 = vpop.f32.mrf.mxu0 }
 0x285   : > { %v1874_v20 = vadd.f32 %v1804_v39, %v10345_v48  ;;  %v10573_v45 = vadd.f32 %v1610_v21, %v10361_v2  ;;  %v12677_v39 = vld [vmem:[#allocation91_spill] sm:$0xff] }
 0x286   : > { %v2033_v9 = vpop.f32.mrf.mxu2 }
 0x287   : > { %v2268_v44 = vpop.f32.mrf.mxu3  ;;  %v2106_v19 = vadd.f32 %v2033_v9, %v1872_v0  ;;  %2509 = vmatmul.bf16.gmra.mxu0 %v10384_v27 }
 0x289   : > { %v10569_v28 = vadd.f32 %v2268_v44, %v2106_v19 }
 0x28b   : > { %2075 = vmatmul.bf16.gmra.mxu2 %v12673_v63 }
 0x28c   : > { %2310 = vmatmul.bf16.gmra.mxu3 %v12676_v16  ;;  %v1807_v9 = vpop.f32.mrf.mxu1  ;;  %v1613_v19 = vpop.f32.mrf.mxu0 }
 0x28d   : > { %v10584_v48 = vadd.f32 %v1807_v9, %v10357_v57  ;;  %v10587_v2 = vadd.f32 %v1613_v19, %v10380_v24  ;;  %v12679_v24 = vld [vmem:[#allocation90_spill] sm:$0xff] }
 0x28e   : > { %v2036_v38 = vpop.f32.mrf.mxu2  ;;  %1846 = vmatmul.bf16.gmra.mxu1 %v12677_v39  ;;  %v12680_v16 = vpack.c.bf16 %v12678_v34, %v12679_v24  ;;  %v12685_v34 = vld [vmem:[#allocation103_spill] sm:$0xff]  ;;  %v12686_v24 = vld [vmem:[#allocation102_spill] sm:$0xff] }
 0x28f   : > { %v2271_v32 = vpop.f32.mrf.mxu3  ;;  %v2107_v0 = vadd.f32 %v2036_v38, %v1873_v23  ;;  %v12681_v38 = vld [vmem:[#allocation100_spill] sm:$0xff] }
 0x291   : > { %v10581_v44 = vadd.f32 %v2271_v32, %v2107_v0  ;;  %v12682_v0 = vld [vmem:[#allocation98_spill] sm:$0xff] }
 0x292   : > { %v12683_v27 = vpack.c.bf16 %v12681_v38, %v12682_v0  ;;  %v10630_v38 = vld [vmem:[#allocation2 + $0x19a] sm:$0xff] }
 0x294   : > { %v1809_v63 = vpop.f32.mrf.mxu1  ;;  %v1615_v23 = vpop.f32.mrf.mxu0 }
 0x295   : > { %v10594_v32 = vadd.f32 %v1809_v63, %v10371_v3  ;;  %v10597_v57 = vadd.f32 %v1615_v23, %v10394_v8 }
 0x296   : > { %v2038_v21 = vpop.f32.mrf.mxu2 }
 0x297   : > { %v2108_v43 = vadd.f32 %v2038_v21, %v1874_v20  ;;  %v2273_v46 = vpop.f32.mrf.mxu3  ;;  %v8897_v20 = vld [vmem:[%s12396_s4 + $0x200] sm:$0xff]  ;;  %v12684_v21 = vld [vmem:[#allocation101_spill] sm:$0xff]  ;;  %2514 = vmatmul.bf16.gmra.mxu0 %v10430_v25  ;;  %v10632_v25 = vld [vmem:[#allocation2] sm:$0xff] }
 0x298   : > { %2722 = vmatpush.bf16.msra.mxu1 %v8897_v20 }
 0x299   : > { %v10591_v54 = vadd.f32 %v2273_v46, %v2108_v43 }
 0x29b   : > { %2080 = vmatmul.bf16.gmra.mxu2 %v12680_v16  ;;  %v10628_v16 = vld [vmem:[#allocation2 + $0x199] sm:$0xff] }
 0x29c   : > { %2315 = vmatmul.bf16.gmra.mxu3 %v12683_v27  ;;  %v1812_v9 = vpop.f32.mrf.mxu1  ;;  %v1618_v19 = vpop.f32.mrf.mxu0  ;;  %5947 = vst [vmem:[#allocation2 + $0x198] sm:$0xff] %v10632_v25 }
 0x29d   : > { %v10609_v3 = vadd.f32 %v1812_v9, %v10387_v49  ;;  %v10612_v8 = vadd.f32 %v1618_v19, %v10426_v35  ;;  %v12687_v49 = vpack.c.bf16 %v12685_v34, %v12686_v24  ;;  %v12688_v35 = vpack.c.bf16 %v10227_v18, %v10219_v7  ;;  %v12693_v24 = vld [vmem:[#allocation12_spill] sm:$0xff] }
 0x29e   : > { %1851 = vmatmul.bf16.gmra.mxu1 %v12684_v21 }
 0x2a4   : > { %v1814_v43 = vpop.f32.mrf.mxu1  ;;  %v1620_v63 = vpop.f32.mrf.mxu0 }
 0x2a5   : > { %v10617_v46 = vadd.f32 %v1814_v43, %v10404_v56  ;;  %v10620_v23 = vadd.f32 %v1620_v63, %v10446_v12 }
 0x2a7   : > { %2519 = vmatmul.bf16.gmra.mxu0 %v10468_v30 }
 0x2ab   : > { %2085 = vmatmul.bf16.gmra.mxu2 %v12687_v49 }
 0x2ac   : > { %2320 = vmatmul.bf16.gmra.mxu3 %v12688_v35  ;;  %v1817_v56 = vpop.f32.mrf.mxu1  ;;  %v1623_v0 = vpop.f32.mrf.mxu0 }
 0x2ad   : > { %v10636_v12 = vadd.f32 %v1817_v56, %v10440_v40  ;;  %v10639_v27 = vadd.f32 %v1623_v0, %v10462_v47  ;;  %v12689_v40 = vpack.c.bf16 %v10235_v52, %v10229_v42 }
 0x2ae   : > { %1856 = vmatmul.bf16.gmra.mxu1 %v10233_v4 }
 0x2b4   : > { %v1819_v7 = vpop.f32.mrf.mxu1  ;;  %v1625_v20 = vpop.f32.mrf.mxu0 }
 0x2b5   : > { %v10644_v18 = vadd.f32 %v1819_v7, %v10453_v55  ;;  %v10647_v9 = vadd.f32 %v1625_v20, %v10475_v6  ;;  %v2181_v55 = vpack.c.bf16 %v10632_v25, %v10632_v25  ;;  %v12696_v20 = vld [vmem:[#allocation15_spill] sm:$0xff] }
 0x2b7   : > { %2524 = vmatmul.bf16.gmra.mxu0 %v10495_v37  ;;  %v12692_v37 = vld [vmem:[#allocation11_spill] sm:$0xff] }
 0x2b8   : > { %v2634_v49 = vpack.c.bf16 %v12693_v24, %v12692_v37 }
 0x2bb   : > { %2090 = vmatmul.bf16.gmra.mxu2 %v12689_v40  ;;  %v12697_v40 = vld [vmem:[#allocation16_spill] sm:$0xff] }
 0x2bc   : > { %2325 = vmatmul.bf16.gmra.mxu3 %v10464_v5  ;;  %v1822_v47 = vpop.f32.mrf.mxu1  ;;  %v1628_v43 = vpop.f32.mrf.mxu0 }
 0x2bd   : > { %v10654_v19 = vadd.f32 %v1822_v47, %v10471_v15  ;;  %v10657_v30 = vadd.f32 %v1628_v43, %v10490_v33  ;;  %v12690_v15 = vld [vmem:[#allocation24_spill] sm:$0xff]  ;;  %v2635_v47 = vpack.c.bf16 %v12697_v40, %v12696_v20  ;;  %v12707_v20 = vld [vmem:[#allocation23_spill] sm:$0xff] }
 0x2be   : > { %1861 = vmatmul.bf16.gmra.mxu1 %v10413_v1  ;;  %v12691_v63 = vpack.c.bf16 %v10417_v62, %v12690_v15  ;;  %v12701_v15 = vld [vmem:[#allocation20_spill] sm:$0xff] }
 0x2c4   : > { %v1824_v6 = vpop.f32.mrf.mxu1  ;;  %v1630_v42 = vpop.f32.mrf.mxu0 }
 0x2c5   : > { %v10664_v52 = vadd.f32 %v1824_v6, %v10482_v53  ;;  %v10667_v5 = vadd.f32 %v1630_v42, %v10504_v10  ;;  %v12700_v42 = vld [vmem:[#allocation19_spill] sm:$0xff] }
 0x2c7   : > { %2529 = vmatmul.bf16.gmra.mxu0 %v12658_v17 }
 0x2cb   : > { %2095 = vmatmul.bf16.gmra.mxu2 %v12691_v63  ;;  %v2636_v63 = vpack.c.bf16 %v12701_v15, %v12700_v42 }
 0x2cc   : > { %2330 = vmatmul.bf16.gmra.mxu3 %v2181_v55  ;;  %v1827_v33 = vpop.f32.mrf.mxu1  ;;  %v2490_v35 = vpop.f32.mrf.mxu0 }
 0x2cd   : > { %v10673_v34 = vadd.f32 %v1827_v33, %v10498_v60  ;;  %v10678_v53 = vadd.f32 %v2490_v35, %v10520_v58 }
 0x2ce   : > { %2723 = vmatmul.bf16.vlgmr.msra.gmra.mxu1 %v2634_v49 }
 0x2d4   : > { %v1829_v10 = vpop.f32.mrf.mxu1  ;;  %v2492_v62 = vpop.f32.mrf.mxu0 }
 0x2d5   : > { %v10682_v56 = vadd.f32 %v1829_v10, %v10511_v31  ;;  %v10685_v0 = vadd.f32 %v2492_v62, %v10528_v22 }
 0x2d7   : > { %12694 = vst [vmem:[#allocation31_spill] sm:$0xff] %v10682_v56  ;;  %2534 = vmatmul.bf16.gmra.mxu0 %v12663_v14 }
 0x2dc   : > { %v1832_v60 = vpop.f32.mrf.mxu1  ;;  %v2495_v58 = vpop.f32.mrf.mxu0 }
 0x2dd   : > { %v10688_v7 = vadd.f32 %v1832_v60, %v10524_v11  ;;  %v10693_v43 = vadd.f32 %v2495_v58, %v10538_v51  ;;  %v10745_v58 = vpop.f32.mrf.mxu2 }
 0x2de   : > { %2728 = vmatmul.bf16.gmra.mxu1 %v2635_v47 }
 0x2df   : > { %12695 = vst [vmem:[#allocation96_spill] sm:$0xff] %v10688_v7 }
 0x2e4   : > { %v1834_v31 = vpop.f32.mrf.mxu1  ;;  %v2497_v22 = vpop.f32.mrf.mxu0 }
 0x2e5   : > { %v10697_v17 = vadd.f32 %v1834_v31, %v10532_v13  ;;  %v10700_v55 = vadd.f32 %v2497_v22, %v10546_v61  ;;  %v12710_v31 = vld [vmem:[#allocation27_spill] sm:$0xff] }
 0x2e7   : > { %12698 = vst [vmem:[#allocation30_spill] sm:$0xff] %v10697_v17  ;;  %2539 = vmatmul.bf16.gmra.mxu0 %v12670_v41  ;;  %v8920_v41 = vld [vmem:[%s12396_s4 + $0x78] sm:$0xff] }
 0x2e8   : > { %3717 = vmatpush.bf16.msra.mxu2 %v8920_v41 }
 0x2ec   : > { %v1837_v11 = vpop.f32.mrf.mxu1  ;;  %v2500_v51 = vpop.f32.mrf.mxu0 }
 0x2ed   : > { %v10703_v6 = vadd.f32 %v1837_v11, %v10542_v36  ;;  %v10708_v33 = vadd.f32 %v2500_v51, %v10561_v50  ;;  %v12704_v50 = vld [vmem:[#allocation88_spill] sm:$0xff] }
 0x2ee   : > { %2733 = vmatmul.bf16.gmra.mxu1 %v2636_v63  ;;  %v12713_v63 = vld [vmem:[#allocation29_spill] sm:$0xff] }
 0x2ef   : > { %12699 = vst [vmem:[#allocation32_spill] sm:$0xff] %v10703_v6 }
 0x2f4   : > { %v1839_v13 = vpop.f32.mrf.mxu1  ;;  %v2502_v61 = vpop.f32.mrf.mxu0 }
 0x2f5   : > { %v10712_v14 = vadd.f32 %v1839_v13, %v10550_v26  ;;  %v10715_v37 = vadd.f32 %v2502_v61, %v10569_v28  ;;  %v8912_v26 = vld [vmem:[%s12396_s4 + $0x38] sm:$0xff]  ;;  %v2399_v61 = vld [vmem:[#allocation2 + $0x1a1] sm:$0xff] }
 0x2f6   : > { %3794 = vmatpush.bf16.msra.mxu3 %v8912_v26 }
 0x2f7   : > { %12702 = vst [vmem:[#allocation99_spill] sm:$0xff] %v10712_v14  ;;  %2544 = vmatmul.bf16.gmra.mxu0 %v12677_v39 }
 0x2fc   : > { %v1842_v36 = vpop.f32.mrf.mxu1  ;;  %v2505_v49 = vpop.f32.mrf.mxu0 }
 0x2fd   : > { %v10718_v24 = vadd.f32 %v1842_v36, %v10565_v59  ;;  %v10721_v35 = vadd.f32 %v2505_v49, %v10581_v44 }
 0x2fe   : > { %2738 = vmatmul.bf16.gmra.mxu1 %v12704_v50 }
 0x2ff   : > { %12703 = vst [vmem:[#allocation36_spill] sm:$0xff] %v10718_v24 }
 0x304   : > { %v1844_v59 = vpop.f32.mrf.mxu1  ;;  %v2507_v44 = vpop.f32.mrf.mxu0 }
 0x305   : > { %v10732_v28 = vadd.f32 %v1844_v59, %v10573_v45  ;;  %v10735_v10 = vadd.f32 %v2507_v44, %v10591_v54  ;;  %v10747_v45 = vpop.f32.mrf.mxu3  ;;  %v8917_v44 = vld [vmem:[%s12396_s4 + $0x60] sm:$0xff] }
 0x307   : > { %12705 = vst [vmem:[#allocation35_spill] sm:$0xff] %v10732_v28  ;;  %2549 = vmatmul.bf16.gmra.mxu0 %v12684_v21  ;;  %v8911_v21 = vld [vmem:[%s12396_s4 + $0x30] sm:$0xff] }
 0x308   : > { %3795 = vmatpush.bf16.msra.mxu3 %v8911_v21 }
 0x30c   : > { %v1847_v62 = vpop.f32.mrf.mxu1 }
 0x30d   : > { %v10738_v60 = vadd.f32 %v1847_v62, %v10587_v2  ;;  %v8919_v2 = vld [vmem:[%s12396_s4 + $0x70] sm:$0xff]  ;;  %v10765_v11 = vpop.f32.mrf.mxu3 }
 0x30e   : > { %2743 = vmatmul.bf16.gmra.mxu1 %v12707_v20  ;;  %3718 = vmatpush.bf16.msra.mxu2 %v8919_v2  ;;  %v8915_v2 = vld [vmem:[%s12396_s4 + $0x50] sm:$0xff] }
 0x30f   : > { %12706 = vst [vmem:[#allocation37_spill] sm:$0xff] %v10738_v60 }
 0x314   : > { %v1849_v40 = vpop.f32.mrf.mxu1 }
 0x315   : > { %v10743_v39 = vadd.f32 %v1849_v40, %v10597_v57  ;;  %v10773_v13 = vpop.f32.mrf.mxu3  ;;  %v12717_v40 = vld [vmem:[#allocation65_spill] sm:$0xff] }
 0x317   : > { %12708 = vst [vmem:[#allocation39_spill] sm:$0xff] %v10743_v39  ;;  %2554 = vmatmul.bf16.gmra.mxu0 %v10233_v4 }
 0x31c   : > { %v1852_v47 = vpop.f32.mrf.mxu1 }
 0x31d   : > { %v10750_v54 = vadd.f32 %v1852_v47, %v10612_v8  ;;  %v10763_v8 = vpop.f32.mrf.mxu2  ;;  %v10781_v49 = vpop.f32.mrf.mxu3  ;;  %v8916_v47 = vld [vmem:[%s12396_s4 + $0x58] sm:$0xff] }
 0x31e   : > { %2748 = vmatmul.bf16.gmra.mxu1 %v12710_v31 }
 0x31f   : > { %12709 = vst [vmem:[#allocation107_spill] sm:$0xff] %v10750_v54 }
 0x324   : > { %v1854_v57 = vpop.f32.mrf.mxu1 }
 0x325   : > { %v10761_v22 = vadd.f32 %v1854_v57, %v10620_v23  ;;  %v10771_v51 = vpop.f32.mrf.mxu2  ;;  %v10822_v57 = vld [vmem:[%s12397_s5] ss:$0 sm:$0xff] }
 0x327   : > { %12711 = vst [vmem:[#allocation38_spill] sm:$0xff] %v10761_v22  ;;  %2559 = vmatmul.bf16.gmra.mxu0 %v10413_v1  ;;  %v8918_v1 = vld [vmem:[%s12396_s4 + $0x68] sm:$0xff]  ;;  %v12725_v22 = vld [vmem:[#allocation9_spill] sm:$0xff] }
 0x328   : > { %3719 = vmatpush.bf16.msra.mxu2 %v8918_v1 }
 0x32c   : > { %v1857_v42 = vpop.f32.mrf.mxu1  ;;  %3720 = vmatpush.bf16.msra.mxu2 %v8917_v44 }
 0x32d   : > { %v10768_v15 = vadd.f32 %v1857_v42, %v10639_v27  ;;  %v10779_v36 = vpop.f32.mrf.mxu2  ;;  %v2415_v27 = vpack.c.bf16 %v2399_v61, %v10628_v16  ;;  %v10796_v16 = vpop.f32.mrf.mxu3  ;;  %v8908_v42 = vld [vmem:[%s12396_s4 + $0x18] sm:$0xff] }
 0x32e   : > { %2753 = vmatmul.bf16.gmra.mxu1 %v12713_v63  ;;  %v8914_v63 = vld [vmem:[%s12396_s4 + $0x48] sm:$0xff] }
 0x32f   : > { %12712 = vst [vmem:[#allocation40_spill] sm:$0xff] %v10768_v15 }
 0x330   : > { %3721 = vmatpush.bf16.msra.mxu2 %v8916_v47 }
 0x334   : > { %v1859_v4 = vpop.f32.mrf.mxu1  ;;  %3722 = vmatpush.bf16.msra.mxu2 %v8915_v2  ;;  %v12719_v2 = vld [vmem:[#allocation73_spill] sm:$0xff] }
 0x335   : > { %v10777_v23 = vadd.f32 %v1859_v4, %v10647_v9  ;;  %v8910_v9 = vld [vmem:[%s12396_s4 + $0x28] sm:$0xff]  ;;  %v10794_v59 = vpop.f32.mrf.mxu2  ;;  %v10806_v20 = vpop.f32.mrf.mxu3 }
 0x336   : > { %3796 = vmatpush.bf16.msra.mxu3 %v8910_v9  ;;  %v8907_v9 = vld [vmem:[%s12396_s4 + $0x10] sm:$0xff] }
 0x337   : > { %12714 = vst [vmem:[#allocation45_spill] sm:$0xff] %v10777_v23  ;;  %2564 = vmatmul.bf16.gmra.mxu0 %v2415_v27  ;;  %v10840_v27 = vpop.f32.mrf.mxu0  ;;  %v12724_v23 = vld [vmem:[#allocation7_spill] sm:$0xff] }
 0x338   : > { %3723 = vmatpush.bf16.msra.mxu2 %v8914_v63  ;;  %v12721_v63 = vld [vmem:[#allocation6_spill] sm:$0xff] }
 0x33c   : > { %v1862_v50 = vpop.f32.mrf.mxu1 }
 0x33d   : > { %v10785_v41 = vadd.f32 %v1862_v50, %v10657_v30  ;;  %v10804_v62 = vpop.f32.mrf.mxu2  ;;  %v10832_v61 = vpop.f32.mrf.mxu3  ;;  %v10838_v50 = vld [vmem:[%s12398_s6] ss:$0 sm:$0xff] }
 0x33e   : > { %2758 = vmatmul.bf16.gmra.mxu1 %v10508_v29 }
 0x33f   : > { %12715 = vst [vmem:[#allocation43_spill] sm:$0xff] %v10785_v41 }
 0x344   : > { %v1864_v26 = vpop.f32.mrf.mxu1 }
 0x345   : > { %v10799_v30 = vadd.f32 %v1864_v26, %v10667_v5  ;;  %v8909_v5 = vld [vmem:[%s12396_s4 + $0x20] sm:$0xff]  ;;  %v10830_v4 = vpop.f32.mrf.mxu2 }
 0x346   : > { %3797 = vmatpush.bf16.msra.mxu3 %v8909_v5  ;;  %v8913_v26 = vld [vmem:[%s12396_s4 + $0x40] sm:$0xff] }
 0x347   : > { %12716 = vst [vmem:[#allocation46_spill] sm:$0xff] %v10799_v30  ;;  %3724 = vmatpush.bf16.msra.mxu2 %v8913_v26  ;;  %v12718_v5 = vld [vmem:[#allocation74_spill] sm:$0xff]  ;;  %v10866_v26 = vpop.f32.mrf.mxu0 }
 0x34a   : > { %3798 = vmatpush.bf16.msra.mxu3 %v8908_v42  ;;  %v8906_v42 = vld [vmem:[%s12396_s4 + $0x8] sm:$0xff] }
 0x34c   : > { %v2724_v29 = vpop.f32.mrf.mxu1 }
 0x34d   : > { %v2804_v21 = vadd.f32 %v2724_v29, %v10678_v53 }
 0x34e   : > { %2763 = vmatmul.bf16.gmra.mxu1 %v12717_v40  ;;  %3799 = vmatpush.bf16.msra.mxu3 %v8907_v9 }
 0x34f   : > { %v2838_v53 = vmul.f32 %v10822_v57, %v2804_v21  ;;  %v12720_v21 = vpack.c.bf16 %v12718_v5, %v12719_v2  ;;  %v8905_v5 = vld [vmem:[%s12396_s4] sm:$0xff]  ;;  %v10887_v28 = vpop.f32.mrf.mxu0 }
 0x351   : > { %v2872_v29 = vadd.f32 %v10838_v50, %v2838_v53 }
 0x352   : > { %3800 = vmatpush.bf16.msra.mxu3 %v8906_v42  ;;  %v10875_v42 = vld [vmem:[#allocation2 + $0x2] sm:$0xff] }
 0x353   : > { %v2904_v30 = vadd.f32 %v2872_v29, %v12721_v63  ;;  %12723 = vst [vmem:[#allocation48_spill] sm:$0xff] %v10875_v42 }
 0x354   : > { %v2726_v31 = vpop.f32.mrf.mxu1 }
 0x355   : > { %v2805_v40 = vadd.f32 %v2726_v31, %v10685_v0  ;;  %v10861_v0 = vpop.f32.mrf.mxu2  ;;  %v10863_v31 = vpop.f32.mrf.mxu3  ;;  %v2936_v2 = vmax.f32 %v2904_v30, 0.0 }
 0x356   : > { %3801 = vmatpush.bf16.msra.mxu3 %v8905_v5 }
 0x35c   : > { %v2729_v1 = vpop.f32.mrf.mxu1 }
 0x35d   : > { %v2806_v44 = vadd.f32 %v2729_v1, %v10693_v43  ;;  %v2839_v43 = vmul.f32 %v10822_v57, %v2805_v40  ;;  %v12722_v1 = vld [vmem:[#allocation8_spill] sm:$0xff] }
 0x35e   : > { %2768 = vmatmul.bf16.gmra.mxu1 %v12720_v21  ;;  %v10873_v21 = vld [vmem:[#allocation2 + $0x1] sm:$0xff] }
 0x35f   : > { %v2840_v47 = vmul.f32 %v10822_v57, %v2806_v44  ;;  %v2873_v40 = vadd.f32 %v10838_v50, %v2839_v43  ;;  %4746 = vst [vmem:[#allocation2] sm:$0xff] %v10632_v25 }
 0x360   : > { %5897 = vst [vmem:[#allocation2 + $0x8] sm:$0xff] %v10632_v25 }
 0x361   : > { %v2874_v53 = vadd.f32 %v10838_v50, %v2840_v47 }
 0x363   : > { %v2906_v9 = vadd.f32 %v2874_v53, %v12722_v1 }
 0x364   : > { %v2731_v44 = vpop.f32.mrf.mxu1 }
 0x365   : > { %v2938_v29 = vmax.f32 %v2906_v9, 0.0  ;;  %v2807_v47 = vadd.f32 %v2731_v44, %v10700_v55  ;;  %v2905_v55 = vadd.f32 %v2873_v40, %v12724_v23  ;;  %v12727_v40 = vld [vmem:[#allocation83_spill] sm:$0xff] }
 0x367   : > { %v2968_v63 = vmax.f32 %v2936_v2, %v2938_v29  ;;  %v2841_v53 = vmul.f32 %v10822_v57, %v2807_v47  ;;  %v10883_v29 = vpop.f32.mrf.mxu2  ;;  %v10885_v47 = vpop.f32.mrf.mxu3  ;;  %v2937_v24 = vmax.f32 %v2905_v55, 0.0 }
 0x368   : > { %12726 = vst [vmem:[#allocation47_spill] sm:$0xff] %v10885_v47 }
 0x369   : > { %v3000_v1 = vrot.slane %v2968_v63, 2  ;;  %v3001_v41 = vrot.slane %v2968_v63, 4  ;;  %v3002_v30 = vrot.slane %v2968_v63, 6  ;;  %v7447_v9 = vrot.slane %v2968_v63, 9 }
 0x36a   : > { %v2875_v43 = vadd.f32 %v10838_v50, %v2841_v53  ;;  %v12728_v53 = vld [vmem:[#allocation82_spill] sm:$0xff] }
 0x36b   : > { %v7448_v44 = vrot.slane %v3000_v1, 9  ;;  %v7449_v5 = vrot.slane %v3001_v41, 9  ;;  %v3288_v15 = vmax.f32 %v2968_v63, %v7447_v9  ;;  %v7450_v54 = vrot.slane %v3002_v30, 9 }
 0x36c   : > { %v2907_v42 = vadd.f32 %v2875_v43, %v12725_v22  ;;  %v2734_v2 = vpop.f32.mrf.mxu1  ;;  %v12729_v6 = vpack.c.bf16 %v12727_v40, %v12728_v53  ;;  %v10899_v53 = vpop.f32.mrf.mxu0 }
 0x36d   : > { %v3289_v39 = vmax.f32 %v3000_v1, %v7448_v44  ;;  %v3290_v60 = vmax.f32 %v3001_v41, %v7449_v5  ;;  %v3470_v63 = vperm.slane %v3288_v15, 0  ;;  %v3291_v9 = vmax.f32 %v3002_v30, %v7450_v54 }
 0x36e   : > { %v2939_v14 = vmax.f32 %v2907_v42, 0.0  ;;  %2773 = vmatmul.bf16.gmra.mxu1 %v12729_v6  ;;  %v2808_v6 = vadd.f32 %v2734_v2, %v10708_v33 }
 0x36f   : > { %v3471_v23 = vperm.slane %v3289_v39, 0  ;;  %v3472_v43 = vperm.slane %v3290_v60, 0  ;;  %v10895_v15 = vpop.f32.mrf.mxu2  ;;  %v10897_v30 = vpop.f32.mrf.mxu3 }
 0x370   : > { %v2969_v22 = vmax.f32 %v2937_v24, %v2939_v14  ;;  %v3473_v14 = vperm.slane %v3291_v9, 0  ;;  %12730 = vst [vmem:[#allocation49_spill] sm:$0xff] %v10897_v30 }
 0x371   : > { %v3535_v17 = vsel %vm3534_vm3, %v3471_v23, %v3470_v63 }
 0x372   : > { %v3003_v7 = vrot.slane %v2969_v22, 2  ;;  %v3004_v1 = vrot.slane %v2969_v22, 4  ;;  %v3005_v41 = vrot.slane %v2969_v22, 6  ;;  %v7451_v44 = vrot.slane %v2969_v22, 9 }
 0x373   : > { %v3537_v56 = vsel %vm3536_vm4, %v3472_v43, %v3535_v17 }
 0x374   : > { %v7452_v55 = vrot.slane %v3003_v7, 9  ;;  %v7453_v42 = vrot.slane %v3004_v1, 9  ;;  %v7454_v39 = vrot.slane %v3005_v41, 9  ;;  %v2736_v5 = vpop.f32.mrf.mxu1  ;;  %v3292_v40 = vmax.f32 %v2969_v22, %v7451_v44 }
 0x375   : > { %v3539_v63 = vsel %vm3538_vm5, %v3473_v14, %v3537_v56 }
 0x376   : > { %v3293_v24 = vmax.f32 %v3003_v7, %v7452_v55  ;;  %v3294_v60 = vmax.f32 %v3004_v1, %v7453_v42  ;;  %v3295_v54 = vmax.f32 %v3005_v41, %v7454_v39  ;;  %v3474_v23 = vperm.slane %v3292_v40, 0  ;;  %v12733_v39 = vld [vmem:[#allocation93_spill] sm:$0xff] }
 0x377   : > { %v2842_v7 = vmul.f32 %v10822_v57, %v2808_v6  ;;  %v2809_v55 = vadd.f32 %v2736_v5, %v10715_v37  ;;  %v10919_v6 = vpop.f32.mrf.mxu2  ;;  %v10921_v14 = vpop.f32.mrf.mxu3  ;;  %v12736_v37 = vld [vmem:[#allocation14_spill] sm:$0xff] }
 0x378   : > { %v3475_v47 = vperm.slane %v3293_v24, 0  ;;  %v3476_v17 = vperm.slane %v3294_v60, 0  ;;  %v3541_v22 = vsel %vm3540_vm6, %v3474_v23, %v3539_v63  ;;  %v3477_v33 = vperm.slane %v3295_v54, 0  ;;  %v12735_v24 = vld [vmem:[#allocation10_spill] sm:$0xff]  ;;  %v10925_v54 = vpop.f32.mrf.mxu0 }
 0x379   : > { %v2876_v56 = vadd.f32 %v10838_v50, %v2842_v7 }
 0x37a   : > { %v3543_v2 = vsel %vm3542_vm7, %v3475_v47, %v3541_v22  ;;  %v12732_v47 = vld [vmem:[#allocation94_spill] sm:$0xff] }
 0x37b   : > { %v3545_v9 = vsel %vm3544_vm8, %v3476_v17, %v3543_v2  ;;  %v12734_v40 = vpack.c.bf16 %v12732_v47, %v12733_v39  ;;  %v2908_v60 = vadd.f32 %v2876_v56, %v12735_v24 }
 0x37c   : > { %v10907_v43 = vsel %vm3546_vm9, %v3477_v33, %v3545_v9  ;;  %v2739_v1 = vpop.f32.mrf.mxu1 }
 0x37d   : > { %12731 = vst [vmem:[#allocation55_spill] sm:$0xff] %v10907_v43  ;;  %v2810_v41 = vadd.f32 %v2739_v1, %v10721_v35  ;;  %v3649_v44 = vpack.c.bf16 %v10907_v43, %v10873_v21  ;;  %v2843_v21 = vmul.f32 %v10822_v57, %v2809_v55  ;;  %v2940_v17 = vmax.f32 %v2908_v60, 0.0 }
 0x37e   : > { %3605 = vst [vmem:[#allocation2 + $0x19] sm:$0xff] %v10907_v43  ;;  %2778 = vmatmul.bf16.gmra.mxu1 %v12734_v40  ;;  %v12739_v40 = vld [vmem:[#allocation13_spill] sm:$0xff] }
 0x37f   : > { %v2844_v42 = vmul.f32 %v10822_v57, %v2810_v41  ;;  %3725 = vmatmul.bf16.vlgmr.msra.gmra.mxu2 %v3649_v44  ;;  %v2877_v56 = vadd.f32 %v10838_v50, %v2843_v21  ;;  %v10948_v21 = vpop.f32.mrf.mxu3 }
 0x380   : > { %12741 = vst [vmem:[#allocation56_spill] sm:$0xff] %v10948_v21  ;;  %v12743_v21 = vld [vmem:[#allocation105_spill] sm:$0xff] }
 0x381   : > { %v2878_v35 = vadd.f32 %v10838_v50, %v2844_v42  ;;  %v2909_v24 = vadd.f32 %v2877_v56, %v12739_v40  ;;  %v2109_v56 = vadd.f32 %v10745_v58, %v10584_v48 }
 0x383   : > { %v2910_v5 = vadd.f32 %v2878_v35, %v12736_v37  ;;  %v10946_v35 = vpop.f32.mrf.mxu2  ;;  %v2941_v43 = vmax.f32 %v2909_v24, 0.0  ;;  %v2344_v30 = vadd.f32 %v10747_v45, %v2109_v56  ;;  %v8973_v45 = vld [vmem:[%s12396_s4 + $0x220] sm:$0xff] }
 0x384   : > { %v2741_v23 = vpop.f32.mrf.mxu1  ;;  %12740 = vst [vmem:[#allocation51_spill] sm:$0xff] %v10946_v35  ;;  %v12744_v35 = vld [vmem:[#allocation104_spill] sm:$0xff] }
 0x385   : > { %v3614_v63 = vld [vmem:[#allocation2 + $0x18] sm:$0xff]  ;;  %v2942_v22 = vmax.f32 %v2910_v5, 0.0  ;;  %v2811_v7 = vadd.f32 %v2741_v23, %v10735_v10  ;;  %v8976_v10 = vld [vmem:[%s12396_s4 + $0x238] sm:$0xff]  ;;  %v10950_v23 = vpop.f32.mrf.mxu0 }
 0x386   : > { %v3621_v33 = vpack.c.bf16 %v3614_v63, %v10632_v25  ;;  %v10931_v2 = vld [vmem:[#allocation2 + $0x1a] sm:$0xff]  ;;  %4577 = vmatpush.bf16.msrb.mxu0 %v8976_v10 }
 0x387   : > { %12737 = vst [vmem:[#allocation54_spill] sm:$0xff] %v10931_v2  ;;  %v10933_v9 = vld [vmem:[#allocation2 + $0x18] sm:$0xff]  ;;  %v2970_v41 = vmax.f32 %v2940_v17, %v2942_v22  ;;  %v2845_v44 = vmul.f32 %v10822_v57, %v2811_v7  ;;  %v12742_v17 = vld [vmem:[#allocation17_spill] sm:$0xff] }
 0x388   : > { %v10935_v1 = vld [vmem:[#allocation2 + $0x19] sm:$0xff]  ;;  %3802 = vmatmul.bf16.vlgmr.msra.gmra.mxu3 %v3621_v33  ;;  %v8975_v33 = vld [vmem:[%s12396_s4 + $0x230] sm:$0xff] }
 0x389   : > { %12738 = vst [vmem:[#allocation44_spill] sm:$0xff] %v10935_v1  ;;  %v3006_v55 = vrot.slane %v2970_v41, 2  ;;  %v3007_v42 = vrot.slane %v2970_v41, 4  ;;  %v3008_v47 = vrot.slane %v2970_v41, 6  ;;  %v7455_v39 = vrot.slane %v2970_v41, 9 }
 0x38a   : > { %4749 = vst [vmem:[#allocation2 + $0x18] sm:$0xff] %v10632_v25  ;;  %v2879_v60 = vadd.f32 %v10838_v50, %v2845_v44  ;;  %4578 = vmatpush.bf16.msrb.mxu0 %v8975_v33  ;;  %v10976_v33 = vpop.f32.mrf.mxu3 }
 0x38b   : > { %5900 = vst [vmem:[#allocation2 + $0x20] sm:$0xff] %v10632_v25  ;;  %v7456_v37 = vrot.slane %v3006_v55, 9  ;;  %v7457_v5 = vrot.slane %v3007_v42, 9  ;;  %v3296_v63 = vmax.f32 %v2970_v41, %v7455_v39  ;;  %v7458_v44 = vrot.slane %v3008_v47, 9 }
 0x38c   : > { %v2911_v22 = vadd.f32 %v2879_v60, %v12742_v17  ;;  %v2744_v7 = vpop.f32.mrf.mxu1  ;;  %v12745_v41 = vpack.c.bf16 %v12743_v21, %v12744_v35  ;;  %v8974_v17 = vld [vmem:[%s12396_s4 + $0x228] sm:$0xff] }
 0x38d   : > { %v3297_v10 = vmax.f32 %v3006_v55, %v7456_v37  ;;  %v3298_v40 = vmax.f32 %v3007_v42, %v7457_v5  ;;  %v3478_v39 = vperm.slane %v3296_v63, 0  ;;  %v3299_v48 = vmax.f32 %v3008_v47, %v7458_v44  ;;  %v10974_v47 = vpop.f32.mrf.mxu2 }
 0x38e   : > { %v2943_v1 = vmax.f32 %v2911_v22, 0.0  ;;  %2783 = vmatmul.bf16.gmra.mxu1 %v12745_v41  ;;  %4579 = vmatpush.bf16.msrb.mxu0 %v8974_v17  ;;  %v2578_v5 = vadd.f32 %v10840_v27, %v2344_v30 }
 0x38f   : > { %v3479_v2 = vperm.slane %v3297_v10, 0  ;;  %v3480_v58 = vperm.slane %v3298_v40, 0 }
 0x390   : > { %v2971_v60 = vmax.f32 %v2941_v43, %v2943_v1  ;;  %v2110_v43 = vadd.f32 %v10763_v8, %v10594_v32  ;;  %v2812_v56 = vadd.f32 %v2744_v7, %v2578_v5  ;;  %v10979_v32 = vpop.f32.mrf.mxu0  ;;  %v3481_v8 = vperm.slane %v3299_v48, 0 }
 0x391   : > { %v3548_v55 = vsel %vm3534_vm3, %v3479_v2, %v3478_v39  ;;  %v2111_v2 = vadd.f32 %v10771_v51, %v10609_v3  ;;  %v8972_v51 = vld [vmem:[%s12396_s4 + $0x218] sm:$0xff] }
 0x392   : > { %v3009_v42 = vrot.slane %v2971_v60, 2  ;;  %v3010_v24 = vrot.slane %v2971_v60, 4  ;;  %v3011_v37 = vrot.slane %v2971_v60, 6  ;;  %v7459_v35 = vrot.slane %v2971_v60, 9  ;;  %4580 = vmatpush.bf16.msrb.mxu0 %v8973_v45 }
 0x393   : > { %v3549_v27 = vsel %vm3536_vm4, %v3480_v58, %v3548_v55  ;;  %v2346_v58 = vadd.f32 %v10773_v13, %v2111_v2  ;;  %v2345_v48 = vadd.f32 %v10765_v11, %v2110_v43  ;;  %v2112_v11 = vadd.f32 %v10779_v36, %v10617_v46  ;;  %v12747_v2 = vld [vmem:[#allocation110_spill] sm:$0xff]  ;;  %v8970_v36 = vld [vmem:[%s12396_s4 + $0x208] sm:$0xff] }
 0x394   : > { %v7460_v1 = vrot.slane %v3009_v42, 9  ;;  %v7461_v21 = vrot.slane %v3010_v24, 9  ;;  %v7462_v63 = vrot.slane %v3011_v37, 9  ;;  %v2746_v22 = vpop.f32.mrf.mxu1  ;;  %v3300_v30 = vmax.f32 %v2971_v60, %v7459_v35 }
 0x395   : > { %v3550_v39 = vsel %vm3538_vm5, %v3481_v8, %v3549_v27  ;;  %v2846_v60 = vmul.f32 %v10822_v57, %v2812_v56  ;;  %v2579_v5 = vadd.f32 %v10866_v26, %v2345_v48  ;;  %v11005_v26 = vpop.f32.mrf.mxu3  ;;  %v12748_v27 = vld [vmem:[#allocation109_spill] sm:$0xff]  ;;  %v11011_v56 = vld [vmem:[#allocation2 + $0x1a2] sm:$0xff]  ;;  %v12750_v8 = vld [vmem:[#allocation18_spill] sm:$0xff] }
 0x396   : > { %v3301_v44 = vmax.f32 %v3009_v42, %v7460_v1  ;;  %v3302_v10 = vmax.f32 %v3010_v24, %v7461_v21  ;;  %v3303_v40 = vmax.f32 %v3011_v37, %v7462_v63  ;;  %v3482_v41 = vperm.slane %v3300_v30, 0  ;;  %4581 = vmatpush.bf16.msrb.mxu0 %v8972_v51  ;;  %v8971_v1 = vld [vmem:[%s12396_s4 + $0x210] sm:$0xff]  ;;  %v11003_v63 = vpop.f32.mrf.mxu2  ;;  %3405 = vst [vmem:[#allocation2 + $0x1a8] sm:$0x3] %v10632_v25 }
 0x397   : > { %v2580_v24 = vadd.f32 %v10887_v28, %v2346_v58  ;;  %v2880_v43 = vadd.f32 %v10838_v50, %v2846_v60  ;;  %v2813_v21 = vadd.f32 %v2746_v22, %v2579_v5  ;;  %v12749_v30 = vpack.c.bf16 %v12747_v2, %v12748_v27  ;;  %4799 = vst [vmem:[#allocation2 + $0x1a8] sm:$0x3] %v10632_v25  ;;  %v12754_v2 = vld [vmem:[#allocation21_spill] sm:$0xff] }
 0x398   : > { %v3483_v17 = vperm.slane %v3301_v44, 0  ;;  %v3484_v3 = vperm.slane %v3302_v10, 0  ;;  %v3551_v7 = vsel %vm3540_vm6, %v3482_v41, %v3550_v39  ;;  %v3485_v55 = vperm.slane %v3303_v40, 0  ;;  %v11013_v46 = vpop.f32.mrf.mxu0  ;;  %5948 = vst [vmem:[#allocation2 + $0x1a0] sm:$0xff] %v10632_v25  ;;  %v12751_v39 = vld [vmem:[#allocation22_spill] sm:$0xff] }
 0x399   : > { %v2347_v22 = vadd.f32 %v10781_v49, %v2112_v11  ;;  %v2912_v44 = vadd.f32 %v2880_v43, %v12750_v8  ;;  %v2847_v40 = vmul.f32 %v10822_v57, %v2813_v21  ;;  %5949 = vst [vmem:[#allocation2 + $0x1a8] sm:$0x3] %v10632_v25  ;;  %v8969_v49 = vld [vmem:[%s12396_s4 + $0x200] sm:$0xff] }
 0x39a   : > { %v3552_v42 = vsel %vm3542_vm7, %v3483_v17, %v3551_v7  ;;  %4582 = vmatpush.bf16.msrb.mxu0 %v8971_v1 }
 0x39b   : > { %v3553_v37 = vsel %vm3544_vm8, %v3484_v3, %v3552_v42  ;;  %v2581_v41 = vadd.f32 %v10899_v53, %v2347_v22  ;;  %v2944_v58 = vmax.f32 %v2912_v44, 0.0 }
 0x39c   : > { %v10994_v35 = vsel %vm3546_vm9, %v3485_v55, %v3553_v37  ;;  %v2749_v13 = vpop.f32.mrf.mxu1 }
 0x39d   : > { %12746 = vst [vmem:[#allocation58_spill] sm:$0xff] %v10994_v35  ;;  %v2814_v28 = vadd.f32 %v2749_v13, %v2580_v24  ;;  %v2881_v24 = vadd.f32 %v10838_v50, %v2847_v40  ;;  %v11047_v1 = vpop.f32.mrf.mxu3 }
 0x39e   : > { %3606 = vst [vmem:[#allocation2 + $0x31] sm:$0xff] %v10994_v35  ;;  %2788 = vmatmul.bf16.gmra.mxu1 %v12749_v30  ;;  %4583 = vmatpush.bf16.msrb.mxu0 %v8970_v36  ;;  %v11045_v13 = vpop.f32.mrf.mxu2  ;;  %v2113_v36 = vadd.f32 %v10794_v59, %v10636_v12 }
 0x39f   : > { %v2848_v45 = vmul.f32 %v10822_v57, %v2814_v28  ;;  %v2913_v27 = vadd.f32 %v2881_v24, %v12754_v2  ;;  %v12756_v24 = vld [vmem:[#allocation28_spill] sm:$0xff]  ;;  %v12757_v2 = vld [vmem:[#allocation87_spill] sm:$0xff] }
 0x3a1   : > { %v2882_v10 = vadd.f32 %v10838_v50, %v2848_v45  ;;  %v11049_v45 = vpop.f32.mrf.mxu0 }
 0x3a2   : > { %4584 = vmatpush.bf16.msrb.mxu0 %v8969_v49  ;;  %v2945_v49 = vmax.f32 %v2913_v27, 0.0 }
 0x3a3   : > { %v2914_v17 = vadd.f32 %v2882_v10, %v12751_v39  ;;  %v12755_v10 = vld [vmem:[#allocation25_spill] sm:$0xff] }
 0x3a4   : > { %v2751_v3 = vpop.f32.mrf.mxu1 }
 0x3a5   : > { %v11031_v51 = vld [vmem:[#allocation2 + $0x30] sm:$0xff]  ;;  %v2946_v7 = vmax.f32 %v2914_v17, 0.0  ;;  %v2815_v60 = vadd.f32 %v2751_v3, %v2581_v41 }
 0x3a6   : > { %v11033_v48 = vld [vmem:[#allocation2 + $0x32] sm:$0xff]  ;;  %v11062_v27 = vpop.f32.mrf.mxu2 }
 0x3a7   : > { %v11037_v53 = vld [vmem:[#allocation2 + $0x31] sm:$0xff]  ;;  %v2972_v37 = vmax.f32 %v2944_v58, %v2946_v7  ;;  %v2849_v5 = vmul.f32 %v10822_v57, %v2815_v60  ;;  %v2348_v7 = vadd.f32 %v10796_v16, %v2113_v36 }
 0x3a8   : > { %12752 = vst [vmem:[#allocation52_spill] sm:$0xff] %v11037_v53  ;;  %v11039_v42 = vld [vmem:[#allocation2 + $0x30] sm:$0xff] }
 0x3a9   : > { %12753 = vst [vmem:[#allocation57_spill] sm:$0xff] %v11039_v42  ;;  %v3012_v11 = vrot.slane %v2972_v37, 2  ;;  %v3013_v43 = vrot.slane %v2972_v37, 4  ;;  %v3014_v28 = vrot.slane %v2972_v37, 6  ;;  %v7463_v21 = vrot.slane %v2972_v37, 9  ;;  %v11066_v36 = vpop.f32.mrf.mxu0 }
 0x3aa   : > { %4752 = vst [vmem:[#allocation2 + $0x30] sm:$0xff] %v10632_v25  ;;  %v2883_v30 = vadd.f32 %v10838_v50, %v2849_v5  ;;  %v12758_v5 = vpack.c.bf16 %v12756_v24, %v12757_v2  ;;  %v2582_v59 = vadd.f32 %v10925_v54, %v2348_v7  ;;  %v2114_v54 = vadd.f32 %v10804_v62, %v10644_v18 }
 0x3ab   : > { %5903 = vst [vmem:[#allocation2 + $0x38] sm:$0xff] %v10632_v25  ;;  %v7464_v22 = vrot.slane %v3012_v11, 9  ;;  %v7465_v8 = vrot.slane %v3013_v43, 9  ;;  %v3304_v44 = vmax.f32 %v2972_v37, %v7463_v21  ;;  %v7466_v39 = vrot.slane %v3014_v28, 9 }
 0x3ac   : > { %v2915_v40 = vadd.f32 %v2883_v30, %v12755_v10  ;;  %v2754_v41 = vpop.f32.mrf.mxu1 }
 0x3ad   : > { %v3305_v17 = vmax.f32 %v3012_v11, %v7464_v22  ;;  %v3306_v3 = vmax.f32 %v3013_v43, %v7465_v8  ;;  %v3486_v55 = vperm.slane %v3304_v44, 0  ;;  %v3307_v37 = vmax.f32 %v3014_v28, %v7466_v39  ;;  %v11064_v22 = vpop.f32.mrf.mxu3 }
 0x3ae   : > { %v2947_v58 = vmax.f32 %v2915_v40, 0.0  ;;  %2793 = vmatmul.bf16.gmra.mxu1 %v12758_v5 }
 0x3af   : > { %v3487_v60 = vperm.slane %v3305_v17, 0  ;;  %v3488_v21 = vperm.slane %v3306_v3, 0  ;;  %v2816_v17 = vadd.f32 %v2754_v41, %v2582_v59  ;;  %v3489_v3 = vperm.slane %v3307_v37, 0 }
 0x3b0   : > { %v2973_v12 = vmax.f32 %v2945_v49, %v2947_v58 }
 0x3b1   : > { %v3555_v30 = vsel %vm3534_vm3, %v3487_v60, %v3486_v55  ;;  %v2115_v55 = vadd.f32 %v10830_v4, %v10654_v19  ;;  %v2850_v41 = vmul.f32 %v10822_v57, %v2816_v17  ;;  %v2349_v19 = vadd.f32 %v10806_v20, %v2114_v54  ;;  %v12761_v54 = vld [vmem:[#allocation34_spill] sm:$0xff] }
 0x3b2   : > { %v3015_v10 = vrot.slane %v2973_v12, 2  ;;  %v3016_v11 = vrot.slane %v2973_v12, 4  ;;  %v3017_v43 = vrot.slane %v2973_v12, 6  ;;  %v7467_v16 = vrot.slane %v2973_v12, 9 }
 0x3b3   : > { %v3556_v28 = vsel %vm3536_vm4, %v3488_v21, %v3555_v30  ;;  %v2350_v59 = vadd.f32 %v10832_v61, %v2115_v55  ;;  %v2649_v21 = vpack.c.bf16 %v11011_v56, %v10630_v38  ;;  %v2583_v30 = vadd.f32 %v10950_v23, %v2349_v19  ;;  %v11097_v23 = vpop.f32.mrf.mxu0 }
 0x3b4   : > { %v7468_v8 = vrot.slane %v3015_v10, 9  ;;  %v7469_v40 = vrot.slane %v3016_v11, 9  ;;  %v7470_v44 = vrot.slane %v3017_v43, 9  ;;  %v2756_v49 = vpop.f32.mrf.mxu1  ;;  %v3308_v39 = vmax.f32 %v2973_v12, %v7467_v16 }
 0x3b5   : > { %v3557_v2 = vsel %vm3538_vm5, %v3489_v3, %v3556_v28  ;;  %v2584_v12 = vadd.f32 %v10979_v32, %v2350_v59  ;;  %v2884_v61 = vadd.f32 %v10838_v50, %v2850_v41  ;;  %v2116_v20 = vadd.f32 %v10861_v0, %v10664_v52  ;;  %v11092_v16 = vpop.f32.mrf.mxu3 }
 0x3b6   : > { %v3309_v58 = vmax.f32 %v3015_v10, %v7468_v8  ;;  %v3310_v7 = vmax.f32 %v3016_v11, %v7469_v40  ;;  %v3311_v60 = vmax.f32 %v3017_v43, %v7470_v44  ;;  %v3490_v24 = vperm.slane %v3308_v39, 0  ;;  %v11090_v43 = vpop.f32.mrf.mxu2  ;;  %v12760_v8 = vld [vmem:[#allocation26_spill] sm:$0xff] }
 0x3b7   : > { %v2817_v56 = vadd.f32 %v2756_v49, %v2583_v30  ;;  %v2916_v40 = vadd.f32 %v2884_v61, %v12760_v8  ;;  %v2351_v52 = vadd.f32 %v10863_v31, %v2116_v20  ;;  %v12763_v30 = vld [vmem:[#allocation33_spill] sm:$0xff]  ;;  %v2117_v8 = vadd.f32 %v10883_v29, %v10673_v34 }
 0x3b8   : > { %v3491_v5 = vperm.slane %v3309_v58, 0  ;;  %v3492_v53 = vperm.slane %v3310_v7, 0  ;;  %v3558_v18 = vsel %vm3540_vm6, %v3490_v24, %v3557_v2  ;;  %v3493_v62 = vperm.slane %v3311_v60, 0 }
 0x3b9   : > { %v2851_v44 = vmul.f32 %v10822_v57, %v2817_v56  ;;  %v2585_v17 = vadd.f32 %v11013_v46, %v2351_v52  ;;  %v2948_v28 = vmax.f32 %v2916_v40, 0.0 }
 0x3ba   : > { %v3559_v4 = vsel %vm3542_vm7, %v3491_v5, %v3558_v18 }
 0x3bb   : > { %v3560_v37 = vsel %vm3544_vm8, %v3492_v53, %v3559_v4  ;;  %v2885_v2 = vadd.f32 %v10838_v50, %v2851_v44 }
 0x3bc   : > { %v11085_v10 = vsel %vm3546_vm9, %v3493_v62, %v3560_v37  ;;  %v2759_v11 = vpop.f32.mrf.mxu1  ;;  %v11131_v62 = vpop.f32.mrf.mxu0 }
 0x3bd   : > { %12759 = vst [vmem:[#allocation59_spill] sm:$0xff] %v11085_v10  ;;  %v2818_v32 = vadd.f32 %v2759_v11, %v2584_v12  ;;  %v3650_v38 = vpack.c.bf16 %v11085_v10, %v10994_v35  ;;  %v11127_v59 = vpop.f32.mrf.mxu3  ;;  %v2917_v61 = vadd.f32 %v2885_v2, %v12763_v30 }
 0x3be   : > { %3607 = vst [vmem:[#allocation2 + $0x49] sm:$0xff] %v11085_v10  ;;  %2798 = vmatmul.bf16.gmra.mxu1 %v2649_v21  ;;  %v11125_v41 = vpop.f32.mrf.mxu2  ;;  %v12778_v10 = vld [vmem:[#allocation99_spill] sm:$0xff] }
 0x3bf   : > { %v2852_v53 = vmul.f32 %v10822_v57, %v2818_v32  ;;  %3730 = vmatmul.bf16.gmra.mxu2 %v3650_v38  ;;  %v12764_v38 = vld [vmem:[#allocation41_spill] sm:$0xff]  ;;  %v2949_v44 = vmax.f32 %v2917_v61, 0.0  ;;  %v12766_v61 = vld [vmem:[#allocation31_spill] sm:$0xff]  ;;  %v2122_v35 = vadd.f32 %v11003_v63, %v12778_v10 }
 0x3c1   : > { %v2886_v0 = vadd.f32 %v10838_v50, %v2852_v53 }
 0x3c3   : > { %v2918_v55 = vadd.f32 %v2886_v0, %v12761_v54 }
 0x3c4   : > { %v2761_v39 = vpop.f32.mrf.mxu1 }
 0x3c5   : > { %v11106_v3 = vld [vmem:[#allocation2 + $0x48] sm:$0xff]  ;;  %v2950_v7 = vmax.f32 %v2918_v55, 0.0  ;;  %v2819_v60 = vadd.f32 %v2761_v39, %v2585_v17  ;;  %v12765_v39 = vld [vmem:[#allocation47_spill] sm:$0xff] }
 0x3c6   : > { %v11108_v49 = vld [vmem:[#allocation2 + $0x4a] sm:$0xff]  ;;  %v3622_v31 = vpack.c.bf16 %v11106_v3, %v11031_v51 }
 0x3c7   : > { %v11110_v58 = vld [vmem:[#allocation2 + $0x49] sm:$0xff]  ;;  %v11116_v24 = vpack.c.bf16 %v11108_v49, %v11033_v48  ;;  %v2974_v18 = vmax.f32 %v2948_v28, %v2950_v7  ;;  %v2853_v19 = vmul.f32 %v10822_v57, %v2819_v60  ;;  %v2352_v7 = vadd.f32 %v12765_v39, %v2117_v8  ;;  %v11139_v60 = vpop.f32.mrf.mxu2 }
 0x3c8   : > { %v11118_v46 = vld [vmem:[#allocation2 + $0x48] sm:$0xff]  ;;  %5906 = vst [vmem:[#allocation2 + $0x50] sm:$0xff] %v10632_v25  ;;  %3807 = vmatmul.bf16.gmra.mxu3 %v3622_v31  ;;  %v11141_v31 = vpop.f32.mrf.mxu3 }
 0x3c9   : > { %12762 = vst [vmem:[#allocation63_spill] sm:$0xff] %v11118_v46  ;;  %4585 = vmatmul.bf16.vlgmr.msrb.gmra.mxu0 %v11116_v24  ;;  %v3018_v4 = vrot.slane %v2974_v18, 2  ;;  %v3019_v12 = vrot.slane %v2974_v18, 4  ;;  %v3020_v37 = vrot.slane %v2974_v18, 6  ;;  %v7471_v21 = vrot.slane %v2974_v18, 9 }
 0x3ca   : > { %4755 = vst [vmem:[#allocation2 + $0x48] sm:$0xff] %v10632_v25  ;;  %v2887_v25 = vadd.f32 %v10838_v50, %v2853_v19  ;;  %v11143_v19 = vpop.f32.mrf.mxu0 }
 0x3cb   : > { %v7472_v11 = vrot.slane %v3018_v4, 9  ;;  %v7473_v20 = vrot.slane %v3019_v12, 9  ;;  %v3312_v32 = vmax.f32 %v2974_v18, %v7471_v21  ;;  %v7474_v40 = vrot.slane %v3020_v37, 9 }
 0x3cc   : > { %v2919_v56 = vadd.f32 %v2887_v25, %v12764_v38  ;;  %v2764_v53 = vpop.f32.mrf.mxu1  ;;  %v2586_v21 = vadd.f32 %v11049_v45, %v2352_v7  ;;  %v2118_v25 = vadd.f32 %v10895_v15, %v12766_v61 }
 0x3cd   : > { %v3313_v52 = vmax.f32 %v3018_v4, %v7472_v11  ;;  %v3314_v0 = vmax.f32 %v3019_v12, %v7473_v20  ;;  %v3494_v55 = vperm.slane %v3312_v32, 0  ;;  %v3315_v2 = vmax.f32 %v3020_v37, %v7474_v40 }
 0x3ce   : > { %v2951_v17 = vmax.f32 %v2919_v56, 0.0  ;;  %v12767_v56 = vld [vmem:[#allocation96_spill] sm:$0xff] }
 0x3cf   : > { %v3495_v54 = vperm.slane %v3313_v52, 0  ;;  %v3496_v18 = vperm.slane %v3314_v0, 0  ;;  %v2119_v37 = vadd.f32 %v10919_v6, %v12767_v56  ;;  %v2820_v52 = vadd.f32 %v2764_v53, %v2586_v21  ;;  %v12768_v6 = vld [vmem:[#allocation49_spill] sm:$0xff] }
 0x3d0   : > { %v2975_v28 = vmax.f32 %v2949_v44, %v2951_v17  ;;  %v3497_v0 = vperm.slane %v3315_v2, 0  ;;  %v2353_v56 = vadd.f32 %v12768_v6, %v2118_v25  ;;  %v11160_v2 = vpop.f32.mrf.mxu3  ;;  %v12771_v25 = vld [vmem:[#allocation51_spill] sm:$0xff] }
 0x3d1   : > { %v3562_v34 = vsel %vm3534_vm3, %v3495_v54, %v3494_v55  ;;  %v2354_v7 = vadd.f32 %v10921_v14, %v2119_v37  ;;  %v2854_v5 = vmul.f32 %v10822_v57, %v2820_v52 }
 0x3d2   : > { %v3021_v29 = vrot.slane %v2975_v28, 2  ;;  %v3022_v4 = vrot.slane %v2975_v28, 4  ;;  %v3023_v12 = vrot.slane %v2975_v28, 6  ;;  %v7475_v30 = vrot.slane %v2975_v28, 9  ;;  %v11165_v14 = vpop.f32.mrf.mxu0 }
 0x3d3   : > { %v3563_v8 = vsel %vm3536_vm4, %v3496_v18, %v3562_v34  ;;  %v2588_v34 = vadd.f32 %v11097_v23, %v2354_v7 }
 0x3d4   : > { %v7476_v11 = vrot.slane %v3021_v29, 9  ;;  %v7477_v20 = vrot.slane %v3022_v4, 9  ;;  %v7478_v32 = vrot.slane %v3023_v12, 9  ;;  %v2766_v38 = vpop.f32.mrf.mxu1  ;;  %v3316_v40 = vmax.f32 %v2975_v28, %v7475_v30  ;;  %v11158_v28 = vpop.f32.mrf.mxu2  ;;  %v12770_v30 = vld [vmem:[#allocation30_spill] sm:$0xff] }
 0x3d5   : > { %v3564_v55 = vsel %vm3538_vm5, %v3497_v0, %v3563_v8  ;;  %v12772_v8 = vld [vmem:[#allocation56_spill] sm:$0xff] }
 0x3d6   : > { %v3317_v44 = vmax.f32 %v3021_v29, %v7476_v11  ;;  %v3318_v17 = vmax.f32 %v3022_v4, %v7477_v20  ;;  %v3319_v54 = vmax.f32 %v3023_v12, %v7478_v32  ;;  %v3498_v45 = vperm.slane %v3316_v40, 0 }
 0x3d7   : > { %v2587_v4 = vadd.f32 %v11066_v36, %v2353_v56  ;;  %v2120_v11 = vadd.f32 %v12771_v25, %v12770_v30  ;;  %v2888_v20 = vadd.f32 %v10838_v50, %v2854_v5  ;;  %v12773_v36 = vld [vmem:[#allocation42_spill] sm:$0xff] }
 0x3d8   : > { %v3499_v39 = vperm.slane %v3317_v44, 0  ;;  %v3500_v15 = vperm.slane %v3318_v17, 0  ;;  %v3565_v61 = vsel %vm3540_vm6, %v3498_v45, %v3564_v55  ;;  %v3501_v18 = vperm.slane %v3319_v54, 0  ;;  %v12774_v54 = vld [vmem:[#allocation53_spill] sm:$0xff] }
 0x3d9   : > { %v2821_v37 = vadd.f32 %v2766_v38, %v2587_v4  ;;  %v2355_v40 = vadd.f32 %v12772_v8, %v2120_v11  ;;  %v2920_v52 = vadd.f32 %v2888_v20, %v12773_v36  ;;  %v12775_v20 = vld [vmem:[#allocation50_spill] sm:$0xff] }
 0x3da   : > { %v3566_v53 = vsel %vm3542_vm7, %v3499_v39, %v3565_v61 }
 0x3db   : > { %v3567_v29 = vsel %vm3544_vm8, %v3500_v15, %v3566_v53  ;;  %v2855_v44 = vmul.f32 %v10822_v57, %v2821_v37  ;;  %v2589_v17 = vadd.f32 %v11131_v62, %v2355_v40  ;;  %v2952_v7 = vmax.f32 %v2920_v52, 0.0  ;;  %v11194_v62 = vpop.f32.mrf.mxu3  ;;  %v11196_v53 = vpop.f32.mrf.mxu0 }
 0x3dc   : > { %v11168_v12 = vsel %vm3546_vm9, %v3501_v18, %v3567_v29  ;;  %v2769_v21 = vpop.f32.mrf.mxu1  ;;  %v11187_v15 = vpop.f32.mrf.mxu2  ;;  %v11191_v18 = vld [vmem:[#allocation2 + $0x78] sm:$0xff] }
 0x3dd   : > { %12769 = vst [vmem:[#allocation62_spill] sm:$0xff] %v11168_v12  ;;  %v2822_v32 = vadd.f32 %v2769_v21, %v2588_v34  ;;  %v2889_v34 = vadd.f32 %v10838_v50, %v2855_v44 }
 0x3de   : > { %3608 = vst [vmem:[#allocation2 + $0x61] sm:$0xff] %v11168_v12 }
 0x3df   : > { %v2856_v23 = vmul.f32 %v10822_v57, %v2822_v32  ;;  %v2921_v32 = vadd.f32 %v2889_v34, %v12775_v20 }
 0x3e1   : > { %v2890_v0 = vadd.f32 %v10838_v50, %v2856_v23  ;;  %v12776_v23 = vld [vmem:[#allocation32_spill] sm:$0xff] }
 0x3e2   : > { %v2121_v8 = vadd.f32 %v10974_v47, %v12776_v23 }
 0x3e3   : > { %v2922_v45 = vadd.f32 %v2890_v0, %v12774_v54  ;;  %v12777_v0 = vld [vmem:[#allocation60_spill] sm:$0xff]  ;;  %v2547_v20 = vpop.f32.mrf.mxu0 }
 0x3e4   : > { %v2771_v55 = vpop.f32.mrf.mxu1  ;;  %v11207_v56 = vpop.f32.mrf.mxu2 }
 0x3e5   : > { %v11181_v39 = vld [vmem:[#allocation2 + $0x60] sm:$0xff]  ;;  %v2954_v61 = vmax.f32 %v2922_v45, 0.0  ;;  %v2823_v6 = vadd.f32 %v2771_v55, %v2589_v17 }
 0x3e6   : > { %v11183_v5 = vld [vmem:[#allocation2 + $0x62] sm:$0xff] }
 0x3e7   : > { %v11185_v38 = vld [vmem:[#allocation2 + $0x61] sm:$0xff]  ;;  %v2976_v29 = vmax.f32 %v2952_v7, %v2954_v61  ;;  %v2857_v4 = vmul.f32 %v10822_v57, %v2823_v6  ;;  %v2953_v7 = vmax.f32 %v2921_v32, 0.0  ;;  %v2356_v6 = vadd.f32 %v10976_v33, %v2121_v8 }
 0x3e8   : > { %4758 = vst [vmem:[#allocation2 + $0x60] sm:$0xff] %v11191_v18 }
 0x3e9   : > { %5909 = vst [vmem:[#allocation2 + $0x68] sm:$0xff] %v11191_v18  ;;  %v3024_v21 = vrot.slane %v2976_v29, 2  ;;  %v3025_v30 = vrot.slane %v2976_v29, 4  ;;  %v3026_v25 = vrot.slane %v2976_v29, 6  ;;  %v7479_v11 = vrot.slane %v2976_v29, 9 }
 0x3ea   : > { %v2891_v37 = vadd.f32 %v10838_v50, %v2857_v4  ;;  %v11209_v4 = vpop.f32.mrf.mxu3 }
 0x3eb   : > { %v7480_v40 = vrot.slane %v3024_v21, 9  ;;  %v7481_v36 = vrot.slane %v3025_v30, 9  ;;  %v3320_v52 = vmax.f32 %v2976_v29, %v7479_v11  ;;  %v7482_v54 = vrot.slane %v3026_v25, 9 }
 0x3ec   : > { %v2923_v44 = vadd.f32 %v2891_v37, %v12777_v0  ;;  %v2774_v17 = vpop.f32.mrf.mxu1  ;;  %v2590_v29 = vadd.f32 %v11143_v19, %v2356_v6  ;;  %v11223_v10 = vpop.f32.mrf.mxu2 }
 0x3ed   : > { %v3321_v45 = vmax.f32 %v3024_v21, %v7480_v40  ;;  %v3322_v55 = vmax.f32 %v3025_v30, %v7481_v36  ;;  %v3502_v47 = vperm.slane %v3320_v52, 0  ;;  %v3323_v11 = vmax.f32 %v3026_v25, %v7482_v54  ;;  %v12779_v52 = vld [vmem:[#allocation36_spill] sm:$0xff] }
 0x3ee   : > { %v2955_v61 = vmax.f32 %v2923_v44, 0.0  ;;  %v2824_v44 = vadd.f32 %v2774_v17, %v2590_v29 }
 0x3ef   : > { %v3503_v34 = vperm.slane %v3321_v45, 0  ;;  %v3504_v37 = vperm.slane %v3322_v55, 0  ;;  %v3505_v54 = vperm.slane %v3323_v11, 0  ;;  %v11227_v11 = vpop.f32.mrf.mxu0 }
 0x3f0   : > { %v2977_v23 = vmax.f32 %v2953_v7, %v2955_v61  ;;  %v2123_v7 = vadd.f32 %v11045_v13, %v12779_v52  ;;  %v2858_v46 = vmul.f32 %v10822_v57, %v2824_v44  ;;  %v11259_v52 = vld [vmem:[%s12398_s6] ss:$0 sm:$0xff] }
 0x3f1   : > { %v3569_v0 = vsel %vm3534_vm3, %v3503_v34, %v3502_v47 }
 0x3f2   : > { %v3027_v21 = vrot.slane %v2977_v23, 2  ;;  %v3028_v30 = vrot.slane %v2977_v23, 4  ;;  %v3029_v32 = vrot.slane %v2977_v23, 6  ;;  %v7483_v40 = vrot.slane %v2977_v23, 9  ;;  %v11218_v47 = vpop.f32.mrf.mxu3 }
 0x3f3   : > { %v3570_v19 = vsel %vm3536_vm4, %v3504_v37, %v3569_v0  ;;  %v2358_v63 = vadd.f32 %v11047_v1, %v2123_v7  ;;  %v2892_v1 = vadd.f32 %v10838_v50, %v2858_v46  ;;  %v11251_v50 = vld [vmem:[%s12397_s5] ss:$0 sm:$0xff]  ;;  %v12781_v46 = vld [vmem:[#allocation61_spill] sm:$0xff] }
 0x3f4   : > { %v7484_v36 = vrot.slane %v3027_v21, 9  ;;  %v7485_v33 = vrot.slane %v3028_v30, 9  ;;  %v7486_v8 = vrot.slane %v3029_v32, 9  ;;  %v2776_v45 = vpop.f32.mrf.mxu1  ;;  %v3324_v25 = vmax.f32 %v2977_v23, %v7483_v40 }
 0x3f5   : > { %v3571_v42 = vsel %vm3538_vm5, %v3505_v54, %v3570_v19  ;;  %v2357_v23 = vadd.f32 %v11005_v26, %v2122_v35 }
 0x3f6   : > { %v3325_v55 = vmax.f32 %v3027_v21, %v7484_v36  ;;  %v3326_v61 = vmax.f32 %v3028_v30, %v7485_v33  ;;  %v3327_v6 = vmax.f32 %v3029_v32, %v7486_v8  ;;  %v3506_v34 = vperm.slane %v3324_v25, 0  ;;  %v11265_v25 = vpop.f32.mrf.mxu2 }
 0x3f7   : > { %v2592_v21 = vadd.f32 %v11196_v53, %v2358_v63  ;;  %v2591_v32 = vadd.f32 %v11165_v14, %v2357_v23  ;;  %v8928_v53 = vld [vmem:[%s12396_s4 + $0xb8] sm:$0xff]  ;;  %v2924_v8 = vadd.f32 %v2892_v1, %v12781_v46 }
 0x3f8   : > { %v3507_v17 = vperm.slane %v3325_v55, 0  ;;  %v3508_v29 = vperm.slane %v3326_v61, 0  ;;  %v3572_v13 = vsel %vm3540_vm6, %v3506_v34, %v3571_v42  ;;  %v3509_v37 = vperm.slane %v3327_v6, 0  ;;  %v12780_v42 = vld [vmem:[#allocation35_spill] sm:$0xff]  ;;  %v8936_v14 = vld [vmem:[%s12396_s4 + $0xf8] sm:$0xff]  ;;  %3899 = vmatpush.bf16.msrb.mxu2 %v8928_v53  ;;  %v11268_v6 = vpop.f32.mrf.mxu0 }
 0x3f9   : > { %v2124_v35 = vadd.f32 %v11062_v27, %v12780_v42  ;;  %v2825_v33 = vadd.f32 %v2776_v45, %v2591_v32  ;;  %4012 = vmatpush.bf16.msrb.mxu3 %v8936_v14  ;;  %v12782_v55 = vld [vmem:[#allocation67_spill] sm:$0xff]  ;;  %v2956_v34 = vmax.f32 %v2924_v8, 0.0 }
 0x3fa   : > { %v3573_v0 = vsel %vm3542_vm7, %v3507_v17, %v3572_v13  ;;  %v11262_v7 = vpop.f32.mrf.mxu3  ;;  %v12786_v8 = vld [vmem:[#allocation75_spill] sm:$0xff] }
 0x3fb   : > { %v3574_v30 = vsel %vm3544_vm8, %v3508_v29, %v3573_v0  ;;  %v2359_v44 = vadd.f32 %v11064_v22, %v2124_v35  ;;  %v2859_v19 = vmul.f32 %v11251_v50, %v2825_v33  ;;  %v12785_v35 = vld [vmem:[#allocation66_spill] sm:$0xff] }
 0x3fc   : > { %v11234_v57 = vsel %vm3546_vm9, %v3509_v37, %v3574_v30  ;;  %v2779_v40 = vpop.f32.mrf.mxu1 }
 0x3fd   : > { %3609 = vst [vmem:[#allocation2 + $0x79] sm:$0xff] %v11234_v57  ;;  %v2826_v26 = vadd.f32 %v2779_v40, %v2592_v21  ;;  %v3651_v36 = vpack.c.bf16 %v11234_v57, %v11168_v12  ;;  %v2593_v54 = vadd.f32 %v2547_v20, %v2359_v44  ;;  %v2893_v0 = vadd.f32 %v11259_v52, %v2859_v19 }
 0x3ff   : > { %v2860_v27 = vmul.f32 %v11251_v50, %v2826_v26  ;;  %3735 = vmatmul.bf16.gmra.mxu2 %v3651_v36  ;;  %v2925_v26 = vadd.f32 %v2893_v0, %v12785_v35 }
 0x401   : > { %v2894_v45 = vadd.f32 %v11259_v52, %v2860_v27 }
 0x402   : > { %v3726_v27 = vpop.f32.mrf.mxu2 }
 0x403   : > { %v2926_v61 = vadd.f32 %v2894_v45, %v12782_v55 }
 0x404   : > { %v2781_v22 = vpop.f32.mrf.mxu1  ;;  %v11270_v17 = vld [vmem:[#allocation2 + $0x78] sm:$0xff] }
 0x405   : > { %v11272_v29 = vld [vmem:[#allocation2 + $0x7a] sm:$0xff]  ;;  %v2958_v13 = vmax.f32 %v2926_v61, 0.0  ;;  %v2827_v23 = vadd.f32 %v2781_v22, %v2593_v54  ;;  %v11278_v37 = vpack.c.bf16 %v11270_v17, %v11181_v39  ;;  %v12787_v54 = vld [vmem:[#allocation37_spill] sm:$0xff] }
 0x406   : > { %v11274_v63 = vld [vmem:[#allocation2 + $0x79] sm:$0xff]  ;;  %v11282_v20 = vpack.c.bf16 %v11272_v29, %v11183_v5  ;;  %v2125_v55 = vadd.f32 %v11090_v43, %v12787_v54 }
 0x407   : > { %12783 = vst [vmem:[#allocation64_spill] sm:$0xff] %v11274_v63  ;;  %v2978_v21 = vmax.f32 %v2956_v34, %v2958_v13  ;;  %v2861_v30 = vmul.f32 %v11251_v50, %v2827_v23  ;;  %3812 = vmatmul.bf16.gmra.mxu3 %v11278_v37  ;;  %v2555_v13 = vpop.f32.mrf.mxu0  ;;  %v2957_v23 = vmax.f32 %v2925_v26, 0.0  ;;  %v8927_v26 = vld [vmem:[%s12396_s4 + $0xb0] sm:$0xff] }
 0x408   : > { %12784 = vst [vmem:[#allocation69_spill] sm:$0xff] %v11278_v37  ;;  %4590 = vmatmul.bf16.gmra.mxu0 %v11282_v20  ;;  %v2360_v63 = vadd.f32 %v11092_v16, %v2125_v55  ;;  %v12788_v37 = vld [vmem:[#allocation39_spill] sm:$0xff]  ;;  %v8935_v16 = vld [vmem:[%s12396_s4 + $0xf0] sm:$0xff]  ;;  %3900 = vmatpush.bf16.msrb.mxu2 %v8927_v26 }
 0x409   : > { %4761 = vst [vmem:[#allocation2 + $0x78] sm:$0xff] %v11191_v18  ;;  %v3030_v32 = vrot.slane %v2978_v21, 2  ;;  %v3031_v1 = vrot.slane %v2978_v21, 4  ;;  %v3032_v40 = vrot.slane %v2978_v21, 6  ;;  %v7487_v42 = vrot.slane %v2978_v21, 9  ;;  %4013 = vmatpush.bf16.msrb.mxu3 %v8935_v16  ;;  %v12790_v16 = vld [vmem:[#allocation38_spill] sm:$0xff] }
 0x40a   : > { %5912 = vst [vmem:[#allocation2 + $0x80] sm:$0xff] %v11191_v18  ;;  %v2895_v36 = vadd.f32 %v11259_v52, %v2861_v30  ;;  %v2126_v43 = vadd.f32 %v11125_v41, %v12788_v37 }
 0x40b   : > { %v3803_v53 = vpop.f32.mrf.mxu3  ;;  %v7488_v14 = vrot.slane %v3030_v32, 9  ;;  %v7489_v33 = vrot.slane %v3031_v1, 9  ;;  %v3328_v46 = vmax.f32 %v2978_v21, %v7487_v42  ;;  %v7490_v61 = vrot.slane %v3032_v40, 9 }
 0x40c   : > { %v2927_v44 = vadd.f32 %v2895_v36, %v12786_v8  ;;  %v11293_v45 = vadd.f32 %v3803_v53, %v3726_v27  ;;  %v2784_v19 = vpop.f32.mrf.mxu1 }
 0x40d   : > { %v3329_v34 = vmax.f32 %v3030_v32, %v7488_v14  ;;  %v3330_v22 = vmax.f32 %v3031_v1, %v7489_v33  ;;  %v3510_v35 = vperm.slane %v3328_v46, 0  ;;  %v3331_v21 = vmax.f32 %v3032_v40, %v7490_v61  ;;  %v12789_v40 = vld [vmem:[#allocation107_spill] sm:$0xff] }
 0x40e   : > { %v2959_v0 = vmax.f32 %v2927_v44, 0.0  ;;  %v2594_v32 = vadd.f32 %v11227_v11, %v2360_v63  ;;  %v2127_v14 = vadd.f32 %v11139_v60, %v12789_v40 }
 0x40f   : > { %v3511_v30 = vperm.slane %v3329_v34, 0  ;;  %v3512_v42 = vperm.slane %v3330_v22, 0  ;;  %v3513_v63 = vperm.slane %v3331_v21, 0  ;;  %v2361_v21 = vadd.f32 %v11127_v59, %v2126_v43 }
 0x410   : > { %v2979_v12 = vmax.f32 %v2957_v23, %v2959_v0  ;;  %v2828_v11 = vadd.f32 %v2784_v19, %v2594_v32  ;;  %v2557_v23 = vpop.f32.mrf.mxu0  ;;  %v2128_v59 = vadd.f32 %v11158_v28, %v12790_v16  ;;  %v8933_v28 = vld [vmem:[%s12396_s4 + $0xe0] sm:$0xff] }
 0x411   : > { %v3576_v36 = vsel %vm3534_vm3, %v3511_v30, %v3510_v35  ;;  %v8926_v35 = vld [vmem:[%s12396_s4 + $0xa8] sm:$0xff]  ;;  %v2595_v32 = vadd.f32 %v11268_v6, %v2361_v21 }
 0x412   : > { %v3033_v53 = vrot.slane %v2979_v12, 2  ;;  %v3034_v27 = vrot.slane %v2979_v12, 4  ;;  %v3035_v8 = vrot.slane %v2979_v12, 6  ;;  %v7491_v1 = vrot.slane %v2979_v12, 9  ;;  %3901 = vmatpush.bf16.msrb.mxu2 %v8926_v35  ;;  %v8934_v6 = vld [vmem:[%s12396_s4 + $0xe8] sm:$0xff] }
 0x413   : > { %v3577_v41 = vsel %vm3536_vm4, %v3512_v42, %v3576_v36  ;;  %v2362_v42 = vadd.f32 %v11141_v31, %v2127_v14  ;;  %v2862_v19 = vmul.f32 %v11251_v50, %v2828_v11  ;;  %v8925_v31 = vld [vmem:[%s12396_s4 + $0xa0] sm:$0xff]  ;;  %v8924_v14 = vld [vmem:[%s12396_s4 + $0x98] sm:$0xff]  ;;  %4014 = vmatpush.bf16.msrb.mxu3 %v8934_v6 }
 0x414   : > { %v7492_v33 = vrot.slane %v3033_v53, 9  ;;  %v7493_v46 = vrot.slane %v3034_v27, 9  ;;  %v7494_v44 = vrot.slane %v3035_v8, 9  ;;  %v2786_v54 = vpop.f32.mrf.mxu1  ;;  %v3332_v37 = vmax.f32 %v2979_v12, %v7491_v1 }
 0x415   : > { %v3578_v0 = vsel %vm3538_vm5, %v3513_v63, %v3577_v41  ;;  %v2896_v43 = vadd.f32 %v11259_v52, %v2862_v19  ;;  %v2829_v40 = vadd.f32 %v2786_v54, %v2595_v32 }
 0x416   : > { %v3333_v55 = vmax.f32 %v3033_v53, %v7492_v33  ;;  %v3334_v61 = vmax.f32 %v3034_v27, %v7493_v46  ;;  %v3335_v34 = vmax.f32 %v3035_v8, %v7494_v44  ;;  %v3514_v22 = vperm.slane %v3332_v37, 0  ;;  %3902 = vmatpush.bf16.msrb.mxu2 %v8925_v31  ;;  %v12791_v44 = vld [vmem:[#allocation76_spill] sm:$0xff] }
 0x417   : > { %v2596_v27 = vadd.f32 %v2555_v13, %v2362_v42  ;;  %v2363_v46 = vadd.f32 %v11160_v2, %v2128_v59  ;;  %v2928_v41 = vadd.f32 %v2896_v43, %v12791_v44  ;;  %v2863_v54 = vmul.f32 %v11251_v50, %v2829_v40  ;;  %4015 = vmatpush.bf16.msrb.mxu3 %v8933_v28  ;;  %v8923_v2 = vld [vmem:[%s12396_s4 + $0x90] sm:$0xff]  ;;  %v12795_v28 = vld [vmem:[#allocation95_spill] sm:$0xff] }
 0x418   : > { %v3515_v30 = vperm.slane %v3333_v55, 0  ;;  %v3516_v60 = vperm.slane %v3334_v61, 0  ;;  %v3579_v12 = vsel %vm3540_vm6, %v3514_v22, %v3578_v0  ;;  %v3517_v36 = vperm.slane %v3335_v34, 0  ;;  %v2560_v11 = vpop.f32.mrf.mxu0  ;;  %v12792_v55 = vld [vmem:[#allocation85_spill] sm:$0xff]  ;;  %v12793_v31 = vld [vmem:[#allocation84_spill] sm:$0xff] }
 0x419   : > { %v2597_v63 = vadd.f32 %v2557_v23, %v2363_v46  ;;  %v8932_v34 = vld [vmem:[%s12396_s4 + $0xd8] sm:$0xff]  ;;  %v2897_v19 = vadd.f32 %v11259_v52, %v2863_v54  ;;  %v12794_v43 = vld [vmem:[#allocation40_spill] sm:$0xff] }
 0x41a   : > { %v3580_v53 = vsel %vm3542_vm7, %v3515_v30, %v3579_v12  ;;  %3903 = vmatpush.bf16.msrb.mxu2 %v8924_v14  ;;  %v2960_v30 = vmax.f32 %v2928_v41, 0.0  ;;  %v8931_v41 = vld [vmem:[%s12396_s4 + $0xd0] sm:$0xff] }
 0x41b   : > { %v3581_v8 = vsel %vm3544_vm8, %v3516_v60, %v3580_v53  ;;  %4016 = vmatpush.bf16.msrb.mxu3 %v8932_v34  ;;  %v8922_v53 = vld [vmem:[%s12396_s4 + $0x88] sm:$0xff]  ;;  %v2929_v16 = vadd.f32 %v2897_v19, %v12793_v31 }
 0x41c   : > { %v11323_v1 = vsel %vm3546_vm9, %v3517_v36, %v3581_v8  ;;  %v2789_v26 = vpop.f32.mrf.mxu1 }
 0x41d   : > { %3610 = vst [vmem:[#allocation2 + $0x91] sm:$0xff] %v11323_v1  ;;  %v2830_v13 = vadd.f32 %v2789_v26, %v2596_v27 }
 0x41e   : > { %3904 = vmatpush.bf16.msrb.mxu2 %v8923_v2 }
 0x41f   : > { %v2864_v33 = vmul.f32 %v11251_v50, %v2830_v13  ;;  %v2129_v13 = vadd.f32 %v11187_v15, %v12794_v43  ;;  %4017 = vmatpush.bf16.msrb.mxu3 %v8931_v41 }
 0x420   : > { %v2562_v14 = vpop.f32.mrf.mxu0 }
 0x421   : > { %v2898_v37 = vadd.f32 %v11259_v52, %v2864_v33  ;;  %v2364_v34 = vadd.f32 %v11194_v62, %v2129_v13  ;;  %v8929_v13 = vld [vmem:[%s12396_s4 + $0xc0] sm:$0xff] }
 0x422   : > { %3905 = vmatpush.bf16.msrb.mxu2 %v8922_v53 }
 0x423   : > { %v2930_v61 = vadd.f32 %v2898_v37, %v12792_v55  ;;  %v8921_v37 = vld [vmem:[%s12396_s4 + $0x80] sm:$0xff] }
 0x424   : > { %v2791_v22 = vpop.f32.mrf.mxu1  ;;  %v11353_v0 = vld [vmem:[#allocation2 + $0x90] sm:$0xff] }
 0x425   : > { %v2962_v60 = vmax.f32 %v2930_v61, 0.0  ;;  %v2831_v35 = vadd.f32 %v2791_v22, %v2597_v63  ;;  %v11355_v42 = vld [vmem:[#allocation2 + $0x92] sm:$0xff]  ;;  %v3946_v23 = vpack.c.bf16 %v11353_v0, %v11270_v17  ;;  %v2961_v61 = vmax.f32 %v2929_v16, 0.0 }
 0x426   : > { %v11359_v12 = vld [vmem:[#allocation2 + $0x91] sm:$0xff]  ;;  %3906 = vmatpush.bf16.msrb.mxu2 %v8921_v37 }
 0x427   : > { %5914 = vst [vmem:[#allocation2 + $0x90] sm:$0xff] %v11191_v18  ;;  %v2980_v21 = vmax.f32 %v2960_v30, %v2962_v60  ;;  %v2865_v36 = vmul.f32 %v11251_v50, %v2831_v35  ;;  %v8930_v60 = vld [vmem:[%s12396_s4 + $0xc8] sm:$0xff]  ;;  %v2598_v35 = vadd.f32 %v2560_v11, %v2364_v34 }
 0x428   : > { %5915 = vst [vmem:[#allocation2 + $0x98] sm:$0xff] %v11191_v18  ;;  %4018 = vmatpush.bf16.msrb.mxu3 %v8930_v60 }
 0x429   : > { %v3036_v27 = vrot.slane %v2980_v21, 2  ;;  %v3037_v8 = vrot.slane %v2980_v21, 4  ;;  %v3038_v32 = vrot.slane %v2980_v21, 6  ;;  %v7495_v26 = vrot.slane %v2980_v21, 9 }
 0x42a   : > { %v2899_v59 = vadd.f32 %v11259_v52, %v2865_v36 }
 0x42b   : > { %v7496_v6 = vrot.slane %v3036_v27, 9  ;;  %v7497_v40 = vrot.slane %v3037_v8, 9  ;;  %v3336_v33 = vmax.f32 %v2980_v21, %v7495_v26  ;;  %v7498_v54 = vrot.slane %v3038_v32, 9 }
 0x42c   : > { %v2931_v46 = vadd.f32 %v2899_v59, %v12795_v28  ;;  %v2794_v44 = vpop.f32.mrf.mxu1  ;;  %4019 = vmatpush.bf16.msrb.mxu3 %v8929_v13 }
 0x42d   : > { %v3337_v63 = vmax.f32 %v3036_v27, %v7496_v6  ;;  %v3338_v55 = vmax.f32 %v3037_v8, %v7497_v40  ;;  %v3518_v2 = vperm.slane %v3336_v33, 0  ;;  %v3339_v19 = vmax.f32 %v3038_v32, %v7498_v54  ;;  %v12796_v6 = vld [vmem:[#allocation45_spill] sm:$0xff]  ;;  %v12797_v32 = vld [vmem:[#allocation43_spill] sm:$0xff] }
 0x42e   : > { %v2963_v15 = vmax.f32 %v2931_v46, 0.0  ;;  %v2832_v59 = vadd.f32 %v2794_v44, %v2598_v35  ;;  %v2130_v11 = vadd.f32 %v11207_v56, %v12796_v6  ;;  %v2131_v40 = vadd.f32 %v11223_v10, %v12797_v32  ;;  %v2565_v46 = vpop.f32.mrf.mxu0  ;;  %v12799_v6 = vld [vmem:[#allocation97_spill] sm:$0xff] }
 0x42f   : > { %v3519_v22 = vperm.slane %v3337_v63, 0  ;;  %v3520_v21 = vperm.slane %v3338_v55, 0  ;;  %v3521_v41 = vperm.slane %v3339_v19, 0  ;;  %v8951_v32 = vld [vmem:[%s12396_s4 + $0x170] sm:$0xff] }
 0x430   : > { %v2981_v30 = vmax.f32 %v2961_v61, %v2963_v15  ;;  %v2866_v34 = vmul.f32 %v11251_v50, %v2832_v59  ;;  %v2366_v56 = vadd.f32 %v11218_v47, %v2131_v40 }
 0x431   : > { %v3583_v36 = vsel %vm3534_vm3, %v3519_v22, %v3518_v2  ;;  %v2365_v22 = vadd.f32 %v11209_v4, %v2130_v11 }
 0x432   : > { %v3039_v53 = vrot.slane %v2981_v30, 2  ;;  %v3040_v27 = vrot.slane %v2981_v30, 4  ;;  %v3041_v8 = vrot.slane %v2981_v30, 6  ;;  %v7499_v26 = vrot.slane %v2981_v30, 9 }
 0x433   : > { %v3584_v33 = vsel %vm3536_vm4, %v3520_v21, %v3583_v36  ;;  %v2600_v60 = vadd.f32 %v2565_v46, %v2366_v56  ;;  %v2599_v19 = vadd.f32 %v2562_v14, %v2365_v22  ;;  %v2900_v36 = vadd.f32 %v11259_v52, %v2866_v34  ;;  %v11410_v14 = vld [vmem:[#allocation2 + $0x2] sm:$0xf] }
 0x434   : > { %v7500_v31 = vrot.slane %v3039_v53, 9  ;;  %v7501_v16 = vrot.slane %v3040_v27, 9  ;;  %v7502_v62 = vrot.slane %v3041_v8, 9  ;;  %v2796_v43 = vpop.f32.mrf.mxu1  ;;  %v3340_v28 = vmax.f32 %v2981_v30, %v7499_v26  ;;  %v4852_v26 = vld [vmem:[#allocation2] sm:$0xf] }
 0x435   : > { %v3585_v55 = vsel %vm3538_vm5, %v3521_v41, %v3584_v33  ;;  %4860 = vst [vmem:[#allocation1] ss:$2 sm:$0xff] %v4852_v26  ;;  %v2932_v11 = vadd.f32 %v2900_v36, %v12799_v6  ;;  %v11458_v36 = vld [vmem:[#allocation2 + $0xda] sm:$0xff] }
 0x436   : > { %v3341_v37 = vmax.f32 %v3039_v53, %v7500_v31  ;;  %v3342_v54 = vmax.f32 %v3040_v27, %v7501_v16  ;;  %v3343_v63 = vmax.f32 %v3041_v8, %v7502_v62  ;;  %v3522_v44 = vperm.slane %v3340_v28, 0  ;;  %v12798_v27 = vld [vmem:[#allocation46_spill] sm:$0xff]  ;;  %v11408_v31 = vld [vmem:[#allocation2 + $0x1] sm:$0xf]  ;;  %v2567_v13 = vpop.f32.mrf.mxu0  ;;  %v11429_v28 = vpop.f32.mrf.mxu3 }
 0x437   : > { %v2132_v47 = vadd.f32 %v11265_v25, %v12798_v27  ;;  %v2833_v16 = vadd.f32 %v2796_v43, %v2599_v19  ;;  %v8944_v62 = vld [vmem:[%s12396_s4 + $0x138] sm:$0xff]  ;;  %5896 = vst [vmem:[#allocation2] sm:$0xff] %v11191_v18  ;;  %v8943_v43 = vld [vmem:[%s12396_s4 + $0x130] sm:$0xff]  ;;  %v8942_v19 = vld [vmem:[%s12396_s4 + $0x128] sm:$0xff] }
 0x438   : > { %v3523_v61 = vperm.slane %v3341_v37, 0  ;;  %v3524_v15 = vperm.slane %v3342_v54, 0  ;;  %v3586_v10 = vsel %vm3540_vm6, %v3522_v44, %v3585_v55  ;;  %v3525_v2 = vperm.slane %v3343_v63, 0  ;;  %v8952_v25 = vld [vmem:[%s12396_s4 + $0x178] sm:$0xff]  ;;  %4125 = vmatpush.bf16.msra.mxu2 %v8944_v62  ;;  %v11432_v37 = vpop.f32.mrf.mxu2  ;;  %v12800_v54 = vld [vmem:[#allocation108_spill] sm:$0xff]  ;;  %v8949_v26 = vld [vmem:[%s12396_s4 + $0x160] sm:$0xff] }
 0x439   : > { %4238 = vmatpush.bf16.msra.mxu3 %v8952_v25  ;;  %v2367_v40 = vadd.f32 %v11262_v7, %v2132_v47  ;;  %v2867_v46 = vmul.f32 %v11251_v50, %v2833_v16  ;;  %v12801_v63 = vmax.f32 %v12800_v54, 0.0  ;;  %v2964_v55 = vmax.f32 %v2932_v11, 0.0  ;;  %v12802_v16 = vld [vmem:[#allocation106_spill] sm:$0xff] }
 0x43a   : > { %v3587_v30 = vsel %vm3542_vm7, %v3523_v61, %v3586_v10 }
 0x43b   : > { %v3588_v35 = vsel %vm3544_vm8, %v3524_v15, %v3587_v30  ;;  %v2601_v41 = vadd.f32 %v2567_v13, %v2367_v40  ;;  %v11450_v30 = vld [vmem:[#allocation2 + $0xd9] sm:$0xff] }
 0x43c   : > { %v11400_v21 = vsel %vm3546_vm9, %v3525_v2, %v3588_v35  ;;  %v2799_v53 = vpop.f32.mrf.mxu1  ;;  %4126 = vmatpush.bf16.msra.mxu2 %v8943_v43  ;;  %v2901_v2 = vadd.f32 %v11259_v52, %v2867_v46  ;;  %5923 = vst [vmem:[#allocation2 + $0xd8] sm:$0xff] %v11191_v18 }
 0x43d   : > { %3611 = vst [vmem:[#allocation2 + $0xa9] sm:$0xff] %v11400_v21  ;;  %v2834_v8 = vadd.f32 %v2799_v53, %v2600_v60  ;;  %v3652_v4 = vpack.c.bf16 %v11400_v21, %v11323_v1  ;;  %4239 = vmatpush.bf16.msra.mxu3 %v8951_v32  ;;  %v8950_v53 = vld [vmem:[%s12396_s4 + $0x168] sm:$0xff] }
 0x43e   : > { %5924 = vst [vmem:[#allocation2 + $0xe0] sm:$0xff] %v11191_v18  ;;  %v2933_v62 = vadd.f32 %v2901_v2, %v12802_v16  ;;  %v12803_v32 = vld [vmem:[#allocation111_spill] sm:$0xff] }
 0x43f   : > { %v2868_v59 = vmul.f32 %v11251_v50, %v2834_v8  ;;  %3740 = vmatmul.bf16.gmra.mxu2 %v3652_v4  ;;  %v12804_v40 = vmax.f32 %v12803_v32, 0.0 }
 0x440   : > { %4127 = vmatpush.bf16.msra.mxu2 %v8942_v19 }
 0x441   : > { %v2902_v33 = vadd.f32 %v11259_v52, %v2868_v59  ;;  %4240 = vmatpush.bf16.msra.mxu3 %v8950_v53 }
 0x442   : > { %v3731_v11 = vpop.f32.mrf.mxu2 }
 0x443   : > { %v2934_v44 = vadd.f32 %v2902_v33, %v12801_v63 }
 0x444   : > { %v2801_v61 = vpop.f32.mrf.mxu1  ;;  %v11436_v15 = vld [vmem:[#allocation2 + $0xa8] sm:$0xff] }
 0x445   : > { %v11438_v34 = vld [vmem:[#allocation2 + $0xaa] sm:$0xff]  ;;  %v2966_v7 = vmax.f32 %v2934_v44, 0.0  ;;  %v2835_v56 = vadd.f32 %v2801_v61, %v2601_v41  ;;  %v11442_v10 = vpack.c.bf16 %v11436_v15, %v11353_v0  ;;  %v12805_v44 = vld [vmem:[#allocation48_spill] sm:$0xff]  ;;  %4241 = vmatpush.bf16.msra.mxu3 %v8949_v26 }
 0x446   : > { %v11446_v22 = vpack.c.bf16 %v11438_v34, %v11355_v42  ;;  %5917 = vst [vmem:[#allocation2 + $0xa8] sm:$0xff] %v11191_v18 }
 0x447   : > { %v2982_v60 = vmax.f32 %v2964_v55, %v2966_v7  ;;  %v2869_v35 = vmul.f32 %v11251_v50, %v2835_v56  ;;  %3817 = vmatmul.bf16.gmra.mxu3 %v11442_v10  ;;  %5918 = vst [vmem:[#allocation2 + $0xb0] sm:$0xff] %v11191_v18  ;;  %v8941_v50 = vld [vmem:[%s12396_s4 + $0x120] sm:$0xff]  ;;  %v2965_v7 = vmax.f32 %v2933_v62, 0.0 }
 0x448   : > { %4595 = vmatmul.bf16.gmra.mxu0 %v11446_v22  ;;  %v12806_v55 = vld [vmem:[#allocation54_spill] sm:$0xff]  ;;  %4128 = vmatpush.bf16.msra.mxu2 %v8941_v50 }
 0x449   : > { %v3042_v27 = vrot.slane %v2982_v60, 2  ;;  %v3043_v47 = vrot.slane %v2982_v60, 4  ;;  %v3044_v8 = vrot.slane %v2982_v60, 6  ;;  %v7503_v4 = vrot.slane %v2982_v60, 9 }
 0x44a   : > { %v2903_v25 = vadd.f32 %v11259_v52, %v2869_v35  ;;  %v3831_v61 = vpack.c.bf16 %v12806_v55, %v12805_v44  ;;  %v11548_v17 = vpop.f32.mrf.mxu2 }
 0x44b   : > { %v3808_v59 = vpop.f32.mrf.mxu3  ;;  %v7504_v13 = vrot.slane %v3042_v27, 9  ;;  %v7505_v6 = vrot.slane %v3043_v47, 9  ;;  %v3344_v43 = vmax.f32 %v2982_v60, %v7503_v4  ;;  %v7506_v41 = vrot.slane %v3044_v8, 9 }
 0x44c   : > { %v2935_v33 = vadd.f32 %v2903_v25, %v12804_v40  ;;  %v11476_v46 = vadd.f32 %v3808_v59, %v3731_v11  ;;  %v8940_v40 = vld [vmem:[%s12396_s4 + $0x118] sm:$0xff] }
 0x44d   : > { %v3345_v54 = vmax.f32 %v3042_v27, %v7504_v13  ;;  %v3346_v63 = vmax.f32 %v3043_v47, %v7505_v6  ;;  %v3526_v2 = vperm.slane %v3344_v43, 0  ;;  %v3347_v60 = vmax.f32 %v3044_v8, %v7506_v41  ;;  %4129 = vmatpush.bf16.msra.mxu2 %v8940_v40  ;;  %v8963_v40 = vld [vmem:[%s12396_s4 + $0x1d0] sm:$0xff] }
 0x44e   : > { %v2967_v52 = vmax.f32 %v2935_v33, 0.0  ;;  %v12807_v8 = vpack.c.bf16 %v11031_v51, %v10933_v9  ;;  %v8948_v33 = vld [vmem:[%s12396_s4 + $0x158] sm:$0xff]  ;;  %v8939_v9 = vld [vmem:[%s12396_s4 + $0x110] sm:$0xff] }
 0x44f   : > { %v3527_v56 = vperm.slane %v3345_v54, 0  ;;  %3907 = vmatmul.bf16.vlgmr.msrb.gmra.mxu2 %v3831_v61  ;;  %v3528_v19 = vperm.slane %v3346_v63, 0  ;;  %v3529_v62 = vperm.slane %v3347_v60, 0  ;;  %4242 = vmatpush.bf16.msra.mxu3 %v8948_v33  ;;  %v8947_v51 = vld [vmem:[%s12396_s4 + $0x150] sm:$0xff]  ;;  %v8954_v33 = vld [vmem:[%s12396_s4 + $0x188] sm:$0xff] }
 0x450   : > { %v2983_v35 = vmax.f32 %v2965_v7, %v2967_v52 }
 0x451   : > { %v3590_v53 = vsel %vm3534_vm3, %v3527_v56, %v3526_v2  ;;  %4130 = vmatpush.bf16.msra.mxu2 %v8939_v9 }
 0x452   : > { %v3045_v4 = vrot.slane %v2983_v35, 2  ;;  %v3046_v16 = vrot.slane %v2983_v35, 4  ;;  %v3047_v25 = vrot.slane %v2983_v35, 6  ;;  %v7507_v27 = vrot.slane %v2983_v35, 9 }
 0x453   : > { %v3591_v50 = vsel %vm3536_vm4, %v3528_v19, %v3590_v53  ;;  %4243 = vmatpush.bf16.msra.mxu3 %v8947_v51  ;;  %v12808_v53 = vpack.c.bf16 %v11181_v39, %v11106_v3  ;;  %v8945_v3 = vld [vmem:[%s12396_s4 + $0x140] sm:$0xff]  ;;  %v8960_v39 = vld [vmem:[%s12396_s4 + $0x1b8] sm:$0xff]  ;;  %v11550_v0 = vpop.f32.mrf.mxu3 }
 0x454   : > { %v7508_v47 = vrot.slane %v3045_v4, 9  ;;  %v7509_v59 = vrot.slane %v3046_v16, 9  ;;  %v7510_v13 = vrot.slane %v3047_v25, 9  ;;  %v3348_v26 = vmax.f32 %v2983_v35, %v7507_v27  ;;  %v8958_v27 = vld [vmem:[%s12396_s4 + $0x1a8] sm:$0xff] }
 0x455   : > { %v3592_v41 = vsel %vm3538_vm5, %v3529_v62, %v3591_v50  ;;  %v12810_v62 = vld [vmem:[#allocation52_spill] sm:$0xff] }
 0x456   : > { %v3349_v6 = vmax.f32 %v3045_v4, %v7508_v47  ;;  %v3350_v11 = vmax.f32 %v3046_v16, %v7509_v59  ;;  %v3351_v32 = vmax.f32 %v3047_v25, %v7510_v13  ;;  %v3530_v43 = vperm.slane %v3348_v26, 0  ;;  %v8937_v4 = vld [vmem:[%s12396_s4 + $0x100] sm:$0xff]  ;;  %v8968_v16 = vld [vmem:[%s12396_s4 + $0x1f8] sm:$0xff]  ;;  %v8959_v25 = vld [vmem:[%s12396_s4 + $0x1b0] sm:$0xff] }
 0x457   : > { %4020 = vmatmul.bf16.vlgmr.msrb.gmra.mxu3 %v12807_v8  ;;  %v8966_v47 = vld [vmem:[%s12396_s4 + $0x1e8] sm:$0xff]  ;;  %v8965_v59 = vld [vmem:[%s12396_s4 + $0x1e0] sm:$0xff]  ;;  %v8955_v8 = vld [vmem:[%s12396_s4 + $0x190] sm:$0xff] }
 0x458   : > { %v3531_v54 = vperm.slane %v3349_v6, 0  ;;  %v3532_v63 = vperm.slane %v3350_v11, 0  ;;  %v3593_v44 = vsel %vm3540_vm6, %v3530_v43, %v3592_v41  ;;  %v3533_v61 = vperm.slane %v3351_v32, 0  ;;  %v12809_v26 = vld [vmem:[#allocation44_spill] sm:$0xff]  ;;  %v8956_v32 = vld [vmem:[%s12396_s4 + $0x198] sm:$0xff] }
 0x459   : > { %v4057_v6 = vpack.c.bf16 %v12810_v62, %v12809_v26  ;;  %v4170_v11 = vpack.c.bf16 %v11033_v48, %v12806_v55  ;;  %v8964_v43 = vld [vmem:[%s12396_s4 + $0x1d8] sm:$0xff]  ;;  %v4058_v48 = vpack.c.bf16 %v11185_v38, %v11110_v58  ;;  %v4171_v55 = vpack.c.bf16 %v11183_v5, %v11108_v49  ;;  %v8962_v41 = vld [vmem:[%s12396_s4 + $0x1c8] sm:$0xff] }
 0x45a   : > { %v3594_v7 = vsel %vm3542_vm7, %v3531_v54, %v3593_v44  ;;  %v8953_v54 = vld [vmem:[%s12396_s4 + $0x180] sm:$0xff]  ;;  %v4059_v49 = vpack.c.bf16 %v11323_v1, %v11234_v57  ;;  %v8992_v5 = vld [vmem:[%s12396_s4 + $0x78] sm:$0xff]  ;;  %v4172_v44 = vpack.c.bf16 %v11355_v42, %v11272_v29 }
 0x45b   : > { %v3595_v52 = vsel %vm3544_vm8, %v3532_v63, %v3594_v7  ;;  %v8961_v63 = vld [vmem:[%s12396_s4 + $0x1c0] sm:$0xff]  ;;  %4972 = vmatpush.bf16.msrb.mxu1 %v8992_v5 }
 0x45c   : > { %v11502_v56 = vsel %vm3546_vm9, %v3533_v61, %v3595_v52  ;;  %v11616_v52 = vld [vmem:[#allocation2 + $0x78] sm:$0xf] }
 0x45d   : > { %3612 = vst [vmem:[#allocation2 + $0xc1] sm:$0xff] %v11502_v56  ;;  %v4060_v51 = vpack.c.bf16 %v11502_v56, %v11400_v21  ;;  %v11620_v29 = vld [vmem:[#allocation2 + $0x7a] sm:$0xf] }
 0x45f   : > { %3912 = vmatmul.bf16.gmra.mxu2 %v11116_v24  ;;  %v8938_v24 = vld [vmem:[%s12396_s4 + $0x108] sm:$0xff] }
 0x460   : > { %4131 = vmatpush.bf16.msra.mxu2 %v8938_v24 }
 0x464   : > { %v11506_v2 = vld [vmem:[#allocation2 + $0xc2] sm:$0xff]  ;;  %4132 = vmatpush.bf16.msra.mxu2 %v8937_v4  ;;  %v12812_v4 = vld [vmem:[#allocation57_spill] sm:$0xff] }
 0x465   : > { %v11508_v35 = vld [vmem:[#allocation2 + $0xc0] sm:$0xff]  ;;  %v4512_v60 = vpack.c.bf16 %v11458_v36, %v11506_v2  ;;  %v4173_v19 = vpack.c.bf16 %v11506_v2, %v11438_v34  ;;  %5921 = vst [vmem:[#allocation2 + $0xc8] sm:$0xff] %v11191_v18  ;;  %v8991_v2 = vld [vmem:[%s12396_s4 + $0x70] sm:$0xff] }
 0x466   : > { %5920 = vst [vmem:[#allocation2 + $0xc0] sm:$0xff] %v11191_v18  ;;  %v8946_v36 = vld [vmem:[%s12396_s4 + $0x148] sm:$0xff]  ;;  %4973 = vmatpush.bf16.msrb.mxu1 %v8991_v2 }
 0x467   : > { %4025 = vmatmul.bf16.gmra.mxu3 %v12808_v53  ;;  %4600 = vmatmul.bf16.gmra.mxu0 %v4512_v60  ;;  %v11618_v60 = vld [vmem:[#allocation2 + $0x79] sm:$0xf] }
 0x468   : > { %4244 = vmatpush.bf16.msra.mxu3 %v8946_v36  ;;  %4351 = vmatpush.bf16.msrb.mxu2 %v8960_v39  ;;  %5911 = vst [vmem:[#allocation2 + $0x78] sm:$0xff] %v11191_v18  ;;  %v12811_v36 = vld [vmem:[#allocation63_spill] sm:$0xff]  ;;  %v4396_v18 = vpack.c.bf16 %v11110_v58, %v12810_v62 }
 0x46c   : > { %4245 = vmatpush.bf16.msra.mxu3 %v8945_v3  ;;  %4352 = vmatpush.bf16.msrb.mxu2 %v8959_v25  ;;  %v12813_v3 = vpack.c.bf16 %v12811_v36, %v12812_v4 }
 0x46f   : > { %3917 = vmatmul.bf16.gmra.mxu2 %v11282_v20  ;;  %v8967_v20 = vld [vmem:[%s12396_s4 + $0x1f0] sm:$0xff] }
 0x470   : > { %4464 = vmatpush.bf16.msrb.mxu3 %v8968_v16  ;;  %4353 = vmatpush.bf16.msrb.mxu2 %v8958_v27  ;;  %v12814_v27 = vld [vmem:[#allocation69_spill] sm:$0xff] }
 0x474   : > { %4465 = vmatpush.bf16.msrb.mxu3 %v8967_v20 }
 0x477   : > { %4030 = vmatmul.bf16.gmra.mxu3 %v3946_v23  ;;  %v3947_v23 = vpack.c.bf16 %v11508_v35, %v11436_v15 }
 0x478   : > { %4466 = vmatpush.bf16.msrb.mxu3 %v8966_v47 }
 0x47c   : > { %4467 = vmatpush.bf16.msrb.mxu3 %v8965_v59  ;;  %v12815_v59 = vld [vmem:[#allocation64_spill] sm:$0xff] }
 0x47f   : > { %3922 = vmatmul.bf16.gmra.mxu2 %v11446_v22  ;;  %v8957_v22 = vld [vmem:[%s12396_s4 + $0x1a0] sm:$0xff] }
 0x480   : > { %4354 = vmatpush.bf16.msrb.mxu2 %v8957_v22  ;;  %4468 = vmatpush.bf16.msrb.mxu3 %v8964_v43 }
 0x482   : > { %v3736_v15 = vpop.f32.mrf.mxu2 }
 0x484   : > { %4355 = vmatpush.bf16.msrb.mxu2 %v8956_v32  ;;  %4469 = vmatpush.bf16.msrb.mxu3 %v8963_v40  ;;  %v8990_v32 = vld [vmem:[%s12396_s4 + $0x68] sm:$0xff]  ;;  %v11653_v40 = vld [vmem:[#allocation2 + $0xf0] sm:$0xff] }
 0x485   : > { %4974 = vmatpush.bf16.msrb.mxu1 %v8990_v32 }
 0x487   : > { %4035 = vmatmul.bf16.gmra.mxu3 %v3947_v23 }
 0x488   : > { %4356 = vmatpush.bf16.msrb.mxu2 %v8955_v8  ;;  %4470 = vmatpush.bf16.msrb.mxu3 %v8962_v41 }
 0x48a   : > { %v3813_v13 = vpop.f32.mrf.mxu3  ;;  %v11607_v9 = vpop.f32.mrf.mxu2 }
 0x48b   : > { %v11566_v50 = vadd.f32 %v3813_v13, %v3736_v15  ;;  %v4397_v15 = vpack.c.bf16 %v12815_v59, %v11185_v38 }
 0x48c   : > { %4357 = vmatpush.bf16.msrb.mxu2 %v8954_v33  ;;  %4471 = vmatpush.bf16.msrb.mxu3 %v8961_v63  ;;  %v4399_v33 = vpack.c.bf16 %v11450_v30, %v11502_v56 }
 0x48f   : > { %4133 = vmatmul.bf16.vlgmr.msra.gmra.mxu2 %v4057_v6 }
 0x490   : > { %4358 = vmatpush.bf16.msrb.mxu2 %v8953_v54 }
 0x492   : > { %v11611_v61 = vpop.f32.mrf.mxu3 }
 0x497   : > { %4246 = vmatmul.bf16.vlgmr.msra.gmra.mxu3 %v4170_v11 }
 0x49f   : > { %4138 = vmatmul.bf16.gmra.mxu2 %v4058_v48 }
 0x4a7   : > { %4251 = vmatmul.bf16.gmra.mxu3 %v4171_v55 }
 0x4af   : > { %4143 = vmatmul.bf16.gmra.mxu2 %v4059_v49 }
 0x4b7   : > { %4256 = vmatmul.bf16.gmra.mxu3 %v4172_v44  ;;  %v8989_v44 = vld [vmem:[%s12396_s4 + $0x60] sm:$0xff] }
 0x4b8   : > { %4975 = vmatpush.bf16.msrb.mxu1 %v8989_v44 }
 0x4bf   : > { %4148 = vmatmul.bf16.gmra.mxu2 %v4060_v51 }
 0x4c2   : > { %v3741_v7 = vpop.f32.mrf.mxu2 }
 0x4c7   : > { %4261 = vmatmul.bf16.gmra.mxu3 %v4173_v19 }
 0x4ca   : > { %v3818_v42 = vpop.f32.mrf.mxu3  ;;  %v3743_v53 = vpop.f32.mrf.mxu2 }
 0x4cb   : > { %v3819_v24 = vadd.f32 %v3818_v42, %v3741_v7 }
 0x4cf   : > { %4359 = vmatmul.bf16.vlgmr.msrb.gmra.mxu2 %v12813_v3 }
 0x4d2   : > { %v3820_v39 = vpop.f32.mrf.mxu3  ;;  %v3908_v16 = vpop.f32.mrf.mxu2 }
 0x4d3   : > { %v11626_v25 = vadd.f32 %v3820_v39, %v3743_v53  ;;  %v3928_v34 = vadd.f32 %v3908_v16, %v11293_v45 }
 0x4d7   : > { %4472 = vmatmul.bf16.vlgmr.msrb.gmra.mxu3 %v4396_v18 }
 0x4da   : > { %v4021_v19 = vpop.f32.mrf.mxu3  ;;  %v11634_v20 = vpop.f32.mrf.mxu2 }
 0x4db   : > { %v4041_v23 = vadd.f32 %v4021_v19, %v3928_v34  ;;  %v8988_v34 = vld [vmem:[%s12396_s4 + $0x58] sm:$0xff]  ;;  %v3816_v19 = vadd.f32 %v11611_v61, %v11607_v9 }
 0x4dc   : > { %4976 = vmatpush.bf16.msrb.mxu1 %v8988_v34 }
 0x4df   : > { %4364 = vmatmul.bf16.gmra.mxu2 %v12814_v27 }
 0x4e2   : > { %v11637_v47 = vpop.f32.mrf.mxu3  ;;  %v3913_v22 = vpop.f32.mrf.mxu2 }
 0x4e3   : > { %v3930_v45 = vadd.f32 %v3913_v22, %v11476_v46  ;;  %v4398_v46 = vpack.c.bf16 %v11400_v21, %v11359_v12 }
 0x4e7   : > { %4477 = vmatmul.bf16.gmra.mxu3 %v4397_v15 }
 0x4ea   : > { %v4026_v13 = vpop.f32.mrf.mxu3  ;;  %v11642_v26 = vpop.f32.mrf.mxu2 }
 0x4eb   : > { %v4043_v58 = vadd.f32 %v4026_v13, %v3930_v45 }
 0x4ef   : > { %4369 = vmatmul.bf16.gmra.mxu2 %v11442_v10  ;;  %v4286_v10 = vpack.c.bf16 %v11653_v40, %v11508_v35 }
 0x4f2   : > { %v11645_v62 = vpop.f32.mrf.mxu3  ;;  %v3918_v6 = vpop.f32.mrf.mxu2 }
 0x4f3   : > { %v3932_v11 = vadd.f32 %v3918_v6, %v11566_v50 }
 0x4f7   : > { %4482 = vmatmul.bf16.gmra.mxu3 %v4398_v46 }
 0x4fa   : > { %v4031_v38 = vpop.f32.mrf.mxu3  ;;  %v3920_v43 = vpop.f32.mrf.mxu2 }
 0x4fb   : > { %v4045_v8 = vadd.f32 %v4031_v38, %v3932_v11  ;;  %v3933_v27 = vadd.f32 %v3920_v43, %v3816_v19  ;;  %v4586_v43 = vpop.f32.mrf.mxu0 }
 0x4ff   : > { %4374 = vmatmul.bf16.gmra.mxu2 %v4286_v10 }
 0x502   : > { %v4033_v48 = vpop.f32.mrf.mxu3  ;;  %v3923_v50 = vpop.f32.mrf.mxu2 }
 0x503   : > { %v3934_v55 = vadd.f32 %v3923_v50, %v3819_v24  ;;  %v4046_v22 = vadd.f32 %v4033_v48, %v3933_v27  ;;  %v3806_v48 = vadd.f32 %v11429_v28, %v11432_v37  ;;  %v11691_v28 = vld [vmem:[%s12398_s6 + $0x1] ss:$0 sm:$0xff] }
 0x505   : > { %v3929_v50 = vadd.f32 %v11634_v20, %v3806_v48 }
 0x507   : > { %4487 = vmatmul.bf16.gmra.mxu3 %v4399_v33 }
 0x50a   : > { %v4036_v41 = vpop.f32.mrf.mxu3  ;;  %v3925_v12 = vpop.f32.mrf.mxu2 }
 0x50b   : > { %v4047_v54 = vadd.f32 %v4036_v41, %v3934_v55  ;;  %v3935_v6 = vadd.f32 %v3925_v12, %v11626_v25  ;;  %v4042_v25 = vadd.f32 %v11637_v47, %v3929_v50 }
 0x512   : > { %v4038_v63 = vpop.f32.mrf.mxu3  ;;  %v4134_v49 = vpop.f32.mrf.mxu2 }
 0x513   : > { %v4154_v5 = vadd.f32 %v4134_v49, %v4041_v23  ;;  %v4048_v11 = vadd.f32 %v4038_v63, %v3935_v6  ;;  %v11685_v49 = vld [vmem:[%s12397_s5 + $0x1] ss:$0 sm:$0xff] }
 0x51a   : > { %v4247_v35 = vpop.f32.mrf.mxu3  ;;  %v4136_v51 = vpop.f32.mrf.mxu2 }
 0x51b   : > { %v4267_v7 = vadd.f32 %v4247_v35, %v4154_v5  ;;  %v4588_v5 = vpop.f32.mrf.mxu0 }
 0x522   : > { %v4249_v42 = vpop.f32.mrf.mxu3  ;;  %v4139_v53 = vpop.f32.mrf.mxu2 }
 0x523   : > { %v4156_v24 = vadd.f32 %v4139_v53, %v4043_v58 }
 0x52a   : > { %v4252_v36 = vpop.f32.mrf.mxu3  ;;  %v4141_v30 = vpop.f32.mrf.mxu2 }
 0x52b   : > { %v4269_v4 = vadd.f32 %v4252_v36, %v4156_v24  ;;  %v4591_v24 = vpop.f32.mrf.mxu0 }
 0x532   : > { %v11662_v3 = vpop.f32.mrf.mxu3  ;;  %v4144_v39 = vpop.f32.mrf.mxu2 }
 0x533   : > { %v4158_v16 = vadd.f32 %v4144_v39, %v4045_v8  ;;  %v12816_v39 = vld [vmem:[#allocation55_spill] sm:$0xff] }
 0x53a   : > { %v4257_v2 = vpop.f32.mrf.mxu3  ;;  %v4146_v18 = vpop.f32.mrf.mxu2 }
 0x53b   : > { %v11669_v23 = vadd.f32 %v4257_v2, %v4158_v16  ;;  %v4159_v45 = vadd.f32 %v4146_v18, %v4046_v22  ;;  %v12817_v22 = vld [vmem:[#allocation58_spill] sm:$0xff] }
 0x542   : > { %v4259_v59 = vpop.f32.mrf.mxu3  ;;  %v4149_v15 = vpop.f32.mrf.mxu2 }
 0x543   : > { %v11671_v13 = vadd.f32 %v4259_v59, %v4159_v45  ;;  %v4160_v58 = vadd.f32 %v4149_v15, %v4047_v54  ;;  %v4155_v54 = vadd.f32 %v4136_v51, %v4042_v25 }
 0x545   : > { %v4268_v44 = vadd.f32 %v4249_v42, %v4155_v54  ;;  %v3811_v42 = vadd.f32 %v11550_v0, %v11548_v17 }
 0x547   : > { %v3931_v18 = vadd.f32 %v11642_v26, %v3811_v42 }
 0x549   : > { %v4044_v15 = vadd.f32 %v11645_v62, %v3931_v18 }
 0x54a   : > { %v4262_v32 = vpop.f32.mrf.mxu3  ;;  %v4151_v46 = vpop.f32.mrf.mxu2 }
 0x54b   : > { %v11674_v38 = vadd.f32 %v4262_v32, %v4160_v58  ;;  %v4161_v8 = vadd.f32 %v4151_v46, %v4048_v11  ;;  %v4157_v11 = vadd.f32 %v4141_v30, %v4044_v15  ;;  %v9256_v46 = vmov 572653568  }
 0x54c   : > { %v5763_v17 = vunpack.c.l.s4 %v9256_v46 }
 0x54e   : > { %v11704_v62 = vunpack.c.0.s8 %v5763_v17 }
 0x552   : > { %v4264_v10 = vpop.f32.mrf.mxu3  ;;  %v4360_v9 = vpop.f32.mrf.mxu2 }
 0x553   : > { %v11676_v61 = vadd.f32 %v4264_v10, %v4161_v8  ;;  %v4380_v55 = vadd.f32 %v4360_v9, %v4267_v7  ;;  %v4593_v8 = vpop.f32.mrf.mxu0  ;;  %v4270_v10 = vadd.f32 %v11662_v3, %v4157_v11  ;;  %v8984_v3 = vld [vmem:[%s12396_s4 + $0x38] sm:$0xff] }
 0x554   : > { %5034 = vmatpush.bf16.msra.mxu2 %v8984_v3 }
 0x55a   : > { %v4473_v33 = vpop.f32.mrf.mxu3  ;;  %v4362_v41 = vpop.f32.mrf.mxu2 }
 0x55b   : > { %v4493_v12 = vadd.f32 %v4473_v33, %v4380_v55  ;;  %v4381_v37 = vadd.f32 %v4362_v41, %v4268_v44 }
 0x55d   : > { %v4606_v63 = vadd.f32 %v4586_v43, %v4493_v12 }
 0x55f   : > { %v4616_v35 = vmul.f32 %v11685_v49, %v4606_v63 }
 0x561   : > { %v4626_v51 = vadd.f32 %v11691_v28, %v4616_v35 }
 0x562   : > { %v4475_v20 = vpop.f32.mrf.mxu3  ;;  %v4365_v47 = vpop.f32.mrf.mxu2 }
 0x563   : > { %v4494_v7 = vadd.f32 %v4475_v20, %v4381_v37  ;;  %v4634_v16 = vadd.f32 %v4626_v51, %v12816_v39  ;;  %v4382_v2 = vadd.f32 %v4365_v47, %v4269_v4 }
 0x565   : > { %v4607_v53 = vadd.f32 %v4588_v5, %v4494_v7  ;;  %v4642_v58 = vmax.f32 %v4634_v16, 0.0 }
 0x567   : > { %v4617_v36 = vmul.f32 %v11685_v49, %v4607_v53 }
 0x569   : > { %v4627_v34 = vadd.f32 %v11691_v28, %v4617_v36 }
 0x56a   : > { %v4478_v19 = vpop.f32.mrf.mxu3  ;;  %v4367_v27 = vpop.f32.mrf.mxu2 }
 0x56b   : > { %v4635_v45 = vadd.f32 %v4627_v34, %v12817_v22  ;;  %v4495_v59 = vadd.f32 %v4478_v19, %v4382_v2  ;;  %v4383_v50 = vadd.f32 %v4367_v27, %v4270_v10  ;;  %v12818_v19 = vld [vmem:[#allocation59_spill] sm:$0xff] }
 0x56d   : > { %v4643_v6 = vmax.f32 %v4635_v45, 0.0  ;;  %v4608_v32 = vadd.f32 %v4591_v24, %v4495_v59  ;;  %v4596_v24 = vpop.f32.mrf.mxu0 }
 0x56f   : > { %v4650_v0 = vmax.f32 %v4642_v58, %v4643_v6  ;;  %v4618_v48 = vmul.f32 %v11685_v49, %v4608_v32  ;;  %v12819_v32 = vld [vmem:[#allocation62_spill] sm:$0xff] }
 0x571   : > { %v4658_v4 = vrot.slane %v4650_v0, 2  ;;  %v4659_v9 = vrot.slane %v4650_v0, 4  ;;  %v4660_v26 = vrot.slane %v4650_v0, 6  ;;  %v7927_v43 = vrot.slane %v4650_v0, 9 }
 0x572   : > { %v4480_v55 = vpop.f32.mrf.mxu3  ;;  %v4370_v33 = vpop.f32.mrf.mxu2  ;;  %v4628_v37 = vadd.f32 %v11691_v28, %v4618_v48  ;;  %v8987_v48 = vld [vmem:[%s12396_s4 + $0x50] sm:$0xff] }
 0x573   : > { %v7928_v41 = vrot.slane %v4658_v4, 9  ;;  %v7929_v30 = vrot.slane %v4659_v9, 9  ;;  %v7930_v25 = vrot.slane %v4660_v26, 9  ;;  %v4730_v12 = vmax.f32 %v4650_v0, %v7927_v43  ;;  %4977 = vmatpush.bf16.msrb.mxu1 %v8987_v48 }
 0x574   : > { %v4496_v54 = vadd.f32 %v4480_v55, %v4383_v50  ;;  %v4384_v42 = vadd.f32 %v4370_v33, %v11669_v23  ;;  %v4636_v27 = vadd.f32 %v4628_v37, %v12818_v19 }
 0x575   : > { %v4731_v63 = vmax.f32 %v4658_v4, %v7928_v41  ;;  %v4732_v5 = vmax.f32 %v4659_v9, %v7929_v30  ;;  %v4733_v44 = vmax.f32 %v4660_v26, %v7930_v25  ;;  %v4816_v35 = vperm.slane %v4730_v12, 0  ;;  %v8983_v26 = vld [vmem:[%s12396_s4 + $0x30] sm:$0xff]  ;;  %v4598_v33 = vpop.f32.mrf.mxu0 }
 0x576   : > { %v4609_v20 = vadd.f32 %v4593_v8, %v4496_v54  ;;  %v5765_v51 = vperm.slane %v4730_v12, %v11704_v62  ;;  %v4644_v10 = vmax.f32 %v4636_v27, 0.0  ;;  %5035 = vmatpush.bf16.msra.mxu2 %v8983_v26 }
 0x577   : > { %v4817_v47 = vperm.slane %v4731_v63, 0  ;;  %v4818_v7 = vperm.slane %v4732_v5, 0  ;;  %v5769_v53 = vperm.slane %v4731_v63, %v11704_v62  ;;  %v4819_v39 = vperm.slane %v4733_v44, 0 }
 0x578   : > { %v4619_v36 = vmul.f32 %v11685_v49, %v4609_v20  ;;  %v5773_v34 = vperm.slane %v4732_v5, %v11704_v62  ;;  %v5777_v6 = vperm.slane %v4733_v44, %v11704_v62 }
 0x579   : > { %v4832_v16 = vsel %vm3534_vm3, %v4817_v47, %v4816_v35  ;;  %v5826_v2 = vsel %vm3534_vm3, %v5769_v53, %v5765_v51 }
 0x57a   : > { %v4833_v18 = vsel %vm3536_vm4, %v4818_v7, %v4832_v16  ;;  %v4629_v22 = vadd.f32 %v11691_v28, %v4619_v36  ;;  %v4483_v45 = vpop.f32.mrf.mxu3  ;;  %v4372_v59 = vpop.f32.mrf.mxu2  ;;  %v5827_v15 = vsel %vm3542_vm7, %v5769_v53, %v5826_v2 }
 0x57b   : > { %v4834_v58 = vsel %vm3538_vm5, %v4819_v39, %v4833_v18  ;;  %v4497_v23 = vadd.f32 %v4483_v45, %v4384_v42  ;;  %v5828_v11 = vsel %vm3536_vm4, %v5773_v34, %v5827_v15  ;;  %v4385_v55 = vadd.f32 %v4372_v59, %v11671_v13  ;;  %v8982_v42 = vld [vmem:[%s12396_s4 + $0x28] sm:$0xff]  ;;  %v9000_v39 = vld [vmem:[%s12396_s4 + $0xb8] sm:$0xff] }
 0x57c   : > { %4848 = vst [vmem:[#allocation2 + $0x19] sm:$0xf] %v4834_v58  ;;  %v4637_v46 = vadd.f32 %v4629_v22, %v12819_v32  ;;  %v5829_v17 = vsel %vm3544_vm8, %v5773_v34, %v5828_v11  ;;  %5036 = vmatpush.bf16.msra.mxu2 %v8982_v42  ;;  %5132 = vmatpush.bf16.msra.mxu3 %v9000_v39  ;;  %v8981_v22 = vld [vmem:[%s12396_s4 + $0x20] sm:$0xff] }
 0x57d   : > { %v4610_v0 = vadd.f32 %v4596_v24, %v4497_v23  ;;  %v5830_v8 = vsel %vm3538_vm5, %v5777_v6, %v5829_v17  ;;  %v4601_v23 = vpop.f32.mrf.mxu0  ;;  %v8985_v39 = vld [vmem:[%s12396_s4 + $0x40] sm:$0xff] }
 0x57e   : > { %v4645_v4 = vmax.f32 %v4637_v46, 0.0  ;;  %v11728_v9 = vsel %vm3546_vm9, %v5777_v6, %v5830_v8 }
 0x57f   : > { %v4620_v50 = vmul.f32 %v11685_v49, %v4610_v0 }
 0x580   : > { %v4651_v43 = vmax.f32 %v4644_v10, %v4645_v4  ;;  %5037 = vmatpush.bf16.msra.mxu2 %v8981_v22 }
 0x581   : > { %v4630_v24 = vadd.f32 %v11691_v28, %v4620_v50 }
 0x582   : > { %v4661_v41 = vrot.slane %v4651_v43, 2  ;;  %v4662_v30 = vrot.slane %v4651_v43, 4  ;;  %v4663_v25 = vrot.slane %v4651_v43, 6  ;;  %v7931_v12 = vrot.slane %v4651_v43, 9  ;;  %v4485_v54 = vpop.f32.mrf.mxu3  ;;  %v4375_v13 = vpop.f32.mrf.mxu2 }
 0x583   : > { %v4853_v63 = vld [vmem:[#allocation2 + $0x18] sm:$0xf]  ;;  %v4498_v3 = vadd.f32 %v4485_v54, %v4385_v55  ;;  %v4386_v27 = vadd.f32 %v4375_v13, %v11674_v38  ;;  %v4638_v11 = vadd.f32 %v4630_v24, %v11234_v57  ;;  %v8999_v38 = vld [vmem:[%s12396_s4 + $0xb0] sm:$0xff] }
 0x584   : > { %v4889_v5 = vld [vmem:[#allocation2 + $0x19] sm:$0xf]  ;;  %4862 = vst [vmem:[#allocation1 + $0x1] ss:$2 sm:$0xff] %v4853_v63  ;;  %v4734_v20 = vmax.f32 %v4651_v43, %v7931_v12  ;;  %v7932_v7 = vrot.slane %v4661_v41, 9  ;;  %v7933_v51 = vrot.slane %v4662_v30, 9  ;;  %5133 = vmatpush.bf16.msra.mxu3 %v8999_v38 }
 0x585   : > { %v11738_v44 = vld [vmem:[#allocation2 + $0x1a] sm:$0xf]  ;;  %v7934_v53 = vrot.slane %v4663_v25, 9  ;;  %v4611_v36 = vadd.f32 %v4598_v33, %v4498_v3  ;;  %v8980_v43 = vld [vmem:[%s12396_s4 + $0x18] sm:$0xff]  ;;  %v8998_v12 = vld [vmem:[%s12396_s4 + $0xa8] sm:$0xff] }
 0x586   : > { %v11740_v35 = vld [vmem:[#allocation2 + $0x18] sm:$0xf]  ;;  %v4735_v16 = vmax.f32 %v4661_v41, %v7932_v7  ;;  %v4736_v34 = vmax.f32 %v4662_v30, %v7933_v51  ;;  %v4820_v18 = vperm.slane %v4734_v20, 0  ;;  %v5781_v15 = vperm.slane %v4734_v20, %v11704_v62  ;;  %5038 = vmatpush.bf16.msra.mxu2 %v8980_v43  ;;  %v8979_v3 = vld [vmem:[%s12396_s4 + $0x10] sm:$0xff] }
 0x587   : > { %v11742_v37 = vld [vmem:[#allocation2 + $0x19] sm:$0xf]  ;;  %v4737_v2 = vmax.f32 %v4663_v25, %v7934_v53  ;;  %v4621_v19 = vmul.f32 %v11685_v49, %v4611_v36  ;;  %v4646_v41 = vmax.f32 %v4638_v11, 0.0  ;;  %v8986_v25 = vld [vmem:[%s12396_s4 + $0x48] sm:$0xff] }
 0x588   : > { %v11744_v47 = vld [vmem:[#allocation2 + $0x1a] sm:$0xf]  ;;  %v4821_v45 = vperm.slane %v4735_v16, 0  ;;  %v4822_v59 = vperm.slane %v4736_v34, 0  ;;  %v5785_v58 = vperm.slane %v4735_v16, %v11704_v62  ;;  %v5789_v10 = vperm.slane %v4736_v34, %v11704_v62  ;;  %4978 = vmatpush.bf16.msrb.mxu1 %v8986_v25  ;;  %5134 = vmatpush.bf16.msra.mxu3 %v8998_v12 }
 0x589   : > { %5899 = vst [vmem:[#allocation2 + $0x18] sm:$0xff] %v11653_v40  ;;  %v4823_v6 = vperm.slane %v4737_v2, 0  ;;  %v4631_v32 = vadd.f32 %v11691_v28, %v4621_v19  ;;  %v5793_v33 = vperm.slane %v4737_v2, %v11704_v62  ;;  %v8997_v16 = vld [vmem:[%s12396_s4 + $0xa0] sm:$0xff]  ;;  %v8978_v2 = vld [vmem:[%s12396_s4 + $0x8] sm:$0xff] }
 0x58a   : > { %v4488_v46 = vpop.f32.mrf.mxu3  ;;  %v4835_v0 = vsel %vm3534_vm3, %v4821_v45, %v4820_v18  ;;  %v5832_v4 = vsel %vm3534_vm3, %v5785_v58, %v5781_v15  ;;  %v4603_v18 = vpop.f32.mrf.mxu0  ;;  %5039 = vmatpush.bf16.msra.mxu2 %v8979_v3 }
 0x58b   : > { %v11766_v17 = vld.sshfl [vmem:[#allocation1] sm:$0xff pattern:$0x75316420]  ;;  %v4499_v8 = vadd.f32 %v4488_v46, %v4386_v27  ;;  %v4836_v57 = vsel %vm3536_vm4, %v4822_v59, %v4835_v0  ;;  %v4639_v26 = vadd.f32 %v4631_v32, %v11323_v1  ;;  %v5833_v48 = vsel %vm3542_vm7, %v5785_v58, %v5832_v4  ;;  %v4377_v1 = vpop.f32.mrf.mxu2 }
 0x58c   : > { %4896 = vst [vmem:[#allocation1] ss:$2 sm:$0xff] %v11408_v31  ;;  %v4837_v50 = vsel %vm3538_vm5, %v4823_v6, %v4836_v57  ;;  %v5834_v31 = vsel %vm3536_vm4, %v5789_v10, %v5833_v48  ;;  %v4387_v7 = vadd.f32 %v4377_v1, %v11676_v61  ;;  %v9008_v61 = vld [vmem:[%s12396_s4 + $0xf8] sm:$0xff]  ;;  %4979 = vmatpush.bf16.msrb.mxu1 %v8985_v39 }
 0x58d   : > { %4898 = vst [vmem:[#allocation1 + $0x1] ss:$2 sm:$0xff] %v4889_v5  ;;  %v4612_v55 = vadd.f32 %v4601_v23, %v4499_v8  ;;  %v4647_v30 = vmax.f32 %v4639_v26, 0.0  ;;  %v5835_v54 = vsel %vm3544_vm8, %v5789_v10, %v5834_v31  ;;  %5135 = vmatpush.bf16.msra.mxu3 %v8997_v16  ;;  %v8994_v16 = vld [vmem:[%s12396_s4 + $0x88] sm:$0xff] }
 0x58e   : > { %4849 = vst [vmem:[#allocation2 + $0x31] sm:$0xf] %v4837_v50  ;;  %v5836_v63 = vsel %vm3538_vm5, %v5793_v33, %v5835_v54  ;;  %5040 = vmatpush.bf16.msra.mxu2 %v8978_v2 }
 0x58f   : > { %v4652_v5 = vmax.f32 %v4646_v41, %v4647_v30  ;;  %v11793_v20 = vsel %vm3546_vm9, %v5793_v33, %v5836_v63  ;;  %v4622_v13 = vmul.f32 %v11685_v49, %v4612_v55  ;;  %v8977_v41 = vld [vmem:[%s12396_s4] sm:$0xff]  ;;  %v9007_v30 = vld [vmem:[%s12396_s4 + $0xf0] sm:$0xff] }
 0x590   : > { %5232 = vmatpush.bf16.msra.mxu1 %v9008_v61 }
 0x591   : > { %v4664_v51 = vrot.slane %v4652_v5, 2  ;;  %v4665_v53 = vrot.slane %v4652_v5, 4  ;;  %v4666_v24 = vrot.slane %v4652_v5, 6  ;;  %v7935_v36 = vrot.slane %v4652_v5, 9 }
 0x592   : > { %v4490_v42 = vpop.f32.mrf.mxu3  ;;  %v4632_v38 = vadd.f32 %v11691_v28, %v4622_v13  ;;  %5041 = vmatpush.bf16.msra.mxu2 %v8977_v41 }
 0x593   : > { %v4500_v34 = vadd.f32 %v4490_v42, %v4387_v7  ;;  %v7936_v27 = vrot.slane %v4664_v51, 9  ;;  %v7937_v22 = vrot.slane %v4665_v53, 9  ;;  %v7938_v45 = vrot.slane %v4666_v24, 9  ;;  %v9006_v7 = vld [vmem:[%s12396_s4 + $0xe8] sm:$0xff] }
 0x594   : > { %v11809_v19 = vld.sshfl [vmem:[#allocation1] sm:$0xff pattern:$0x75316420]  ;;  %v4738_v59 = vmax.f32 %v4652_v5, %v7935_v36  ;;  %v4640_v33 = vadd.f32 %v4632_v38, %v11400_v21  ;;  %v8995_v21 = vld [vmem:[%s12396_s4 + $0x90] sm:$0xff]  ;;  %5233 = vmatpush.bf16.msra.mxu1 %v9007_v30  ;;  %v9004_v38 = vld [vmem:[%s12396_s4 + $0xd8] sm:$0xff] }
 0x595   : > { %5056 = vst [vmem:[#allocation1] ss:$2 sm:$0xff] %v11410_v14  ;;  %v4854_v15 = vld [vmem:[#allocation2 + $0x30] sm:$0xf]  ;;  %v4613_v58 = vadd.f32 %v4603_v18, %v4500_v34  ;;  %v4739_v32 = vmax.f32 %v4664_v51, %v7936_v27  ;;  %v4740_v46 = vmax.f32 %v4665_v53, %v7937_v22  ;;  %v4741_v14 = vmax.f32 %v4666_v24, %v7938_v45  ;;  %v9015_v34 = vld [vmem:[%s12396_s4 + $0x130] sm:$0xff] }
 0x596   : > { %5058 = vst [vmem:[#allocation1 + $0x1] ss:$2 sm:$0xff] %v11738_v44  ;;  %v11813_v23 = vld [vmem:[#allocation2 + $0x31] sm:$0xf]  ;;  %v5797_v26 = vperm.slane %v4738_v59, %v11704_v62  ;;  %v4824_v48 = vperm.slane %v4738_v59, 0  ;;  %v4648_v42 = vmax.f32 %v4640_v33, 0.0 }
 0x597   : > { %v11815_v6 = vld [vmem:[#allocation2 + $0x32] sm:$0xf]  ;;  %4864 = vst [vmem:[#allocation1 + $0x10] ss:$2 sm:$0xff] %v4854_v15  ;;  %v4623_v10 = vmul.f32 %v11685_v49, %v4613_v58  ;;  %v5801_v43 = vperm.slane %v4739_v32, %v11704_v62  ;;  %v4825_v50 = vperm.slane %v4739_v32, 0  ;;  %v4826_v55 = vperm.slane %v4740_v46, 0 }
 0x598   : > { %v5149_v11 = vld [vmem:[#allocation2 + $0x30] sm:$0xf]  ;;  %v5805_v1 = vperm.slane %v4740_v46, %v11704_v62  ;;  %v4827_v12 = vperm.slane %v4741_v14, 0  ;;  %v5809_v63 = vperm.slane %v4741_v14, %v11704_v62  ;;  %5234 = vmatpush.bf16.msra.mxu1 %v9006_v7  ;;  %v8993_v59 = vld [vmem:[%s12396_s4 + $0x80] sm:$0xff]  ;;  %v9014_v15 = vld [vmem:[%s12396_s4 + $0x128] sm:$0xff] }
 0x599   : > { %v11818_v0 = vld [vmem:[#allocation2 + $0x31] sm:$0xf]  ;;  %v4633_v31 = vadd.f32 %v11691_v28, %v4623_v10  ;;  %v5838_v25 = vsel %vm3534_vm3, %v5801_v43, %v5797_v26  ;;  %v4838_v54 = vsel %vm3534_vm3, %v4825_v50, %v4824_v48  ;;  %v9013_v7 = vld [vmem:[%s12396_s4 + $0x120] sm:$0xff] }
 0x59a   : > { %v11820_v8 = vld [vmem:[#allocation2 + $0x32] sm:$0xf]  ;;  %v5839_v5 = vsel %vm3542_vm7, %v5801_v43, %v5838_v25  ;;  %v4839_v3 = vsel %vm3536_vm4, %v4826_v55, %v4838_v54 }
 0x59b   : > { %v11823_v4 = vld [vmem:[#allocation2 + $0x30] sm:$0xf]  ;;  %v4641_v13 = vadd.f32 %v4633_v31, %v11502_v56  ;;  %v5840_v51 = vsel %vm3536_vm4, %v5805_v1, %v5839_v5  ;;  %v4840_v24 = vsel %vm3538_vm5, %v4827_v12, %v4839_v3  ;;  %v9003_v3 = vld [vmem:[%s12396_s4 + $0xd0] sm:$0xff] }
 0x59c   : > { %v11825_v44 = vld [vmem:[#allocation2 + $0x31] sm:$0xf]  ;;  %v5841_v36 = vsel %vm3544_vm8, %v5805_v1, %v5840_v51  ;;  %4850 = vst [vmem:[#allocation2 + $0x49] sm:$0xf] %v4840_v24  ;;  %v9023_v51 = vld [vmem:[%s12396_s4 + $0x170] sm:$0xff] }
 0x59d   : > { %v11827_v57 = vld [vmem:[#allocation2 + $0x32] sm:$0xf]  ;;  %v11860_v53 = vld.sshfl [vmem:[#allocation1] sm:$0xff pattern:$0x75316420]  ;;  %v4649_v39 = vmax.f32 %v4641_v13, 0.0  ;;  %v5842_v56 = vsel %vm3538_vm5, %v5809_v63, %v5841_v36 }
 0x59e   : > { %5902 = vst [vmem:[#allocation2 + $0x30] sm:$0xff] %v11653_v40  ;;  %v8996_v49 = vld [vmem:[%s12396_s4 + $0x98] sm:$0xff]  ;;  %v11873_v2 = vsel %vm3546_vm9, %v5809_v63, %v5842_v56 }
 0x59f   : > { %5136 = vmatpush.bf16.msra.mxu3 %v8996_v49  ;;  %v9016_v28 = vld [vmem:[%s12396_s4 + $0x138] sm:$0xff]  ;;  %5156 = vst [vmem:[#allocation1] ss:$2 sm:$0xff] %v11740_v35  ;;  %v4653_v61 = vmax.f32 %v4648_v42, %v4649_v39  ;;  %v9005_v35 = vld [vmem:[%s12396_s4 + $0xe0] sm:$0xff]  ;;  %v9002_v39 = vld [vmem:[%s12396_s4 + $0xc8] sm:$0xff] }
 0x5a0   : > { %5332 = vmatpush.bf16.msrb.mxu2 %v9016_v28  ;;  %5158 = vst [vmem:[#allocation1 + $0x1] ss:$2 sm:$0xff] %v5149_v11  ;;  %5235 = vmatpush.bf16.msra.mxu1 %v9005_v35  ;;  %v9024_v14 = vld [vmem:[%s12396_s4 + $0x178] sm:$0xff] }
 0x5a1   : > { %v4667_v18 = vrot.slane %v4653_v61, 2  ;;  %v4668_v27 = vrot.slane %v4653_v61, 4  ;;  %v4669_v22 = vrot.slane %v4653_v61, 6  ;;  %v7939_v45 = vrot.slane %v4653_v61, 9  ;;  %v9032_v5 = vld [vmem:[%s12396_s4 + $0x1b8] sm:$0xff] }
 0x5a2   : > { %5532 = vmatpush.bf16.msra.mxu0 %v9032_v5  ;;  %v9017_v5 = vld [vmem:[%s12396_s4 + $0x140] sm:$0xff] }
 0x5a3   : > { %5137 = vmatpush.bf16.msra.mxu3 %v8995_v21  ;;  %v7940_v58 = vrot.slane %v4667_v18, 9  ;;  %v7941_v11 = vrot.slane %v4668_v27, 9  ;;  %v7942_v32 = vrot.slane %v4669_v22, 9  ;;  %v4742_v46 = vmax.f32 %v4653_v61, %v7939_v45  ;;  %v4855_v48 = vld [vmem:[#allocation2 + $0x48] sm:$0xf] }
 0x5a4   : > { %5333 = vmatpush.bf16.msrb.mxu2 %v9015_v34  ;;  %v4891_v50 = vld [vmem:[#allocation2 + $0x49] sm:$0xf]  ;;  %5236 = vmatpush.bf16.msra.mxu1 %v9004_v38  ;;  %4866 = vst [vmem:[#allocation1 + $0x11] ss:$2 sm:$0xff] %v4855_v48  ;;  %v9022_v34 = vld [vmem:[%s12396_s4 + $0x168] sm:$0xff]  ;;  %v9040_v38 = vld [vmem:[%s12396_s4 + $0x1f8] sm:$0xff] }
 0x5a5   : > { %v4743_v26 = vmax.f32 %v4667_v18, %v7940_v58  ;;  %v4744_v43 = vmax.f32 %v4668_v27, %v7941_v11  ;;  %v11894_v55 = vld [vmem:[#allocation2 + $0x4a] sm:$0xf]  ;;  %v4745_v33 = vmax.f32 %v4669_v22, %v7942_v32  ;;  %v5813_v31 = vperm.slane %v4742_v46, %v11704_v62  ;;  %v9001_v58 = vld [vmem:[%s12396_s4 + $0xc0] sm:$0xff]  ;;  %v9020_v11 = vld [vmem:[%s12396_s4 + $0x158] sm:$0xff] }
 0x5a6   : > { %v11896_v49 = vld [vmem:[#allocation2 + $0x48] sm:$0xf]  ;;  %v4828_v21 = vperm.slane %v4742_v46, 0  ;;  %v9029_v32 = vld [vmem:[%s12396_s4 + $0x1a0] sm:$0xff] }
 0x5a7   : > { %5138 = vmatpush.bf16.msra.mxu3 %v8994_v16  ;;  %v11890_v10 = vld.sshfl [vmem:[#allocation1] sm:$0xff pattern:$0x75316420]  ;;  %v5817_v41 = vperm.slane %v4743_v26, %v11704_v62  ;;  %v11900_v30 = vld [vmem:[#allocation2 + $0x49] sm:$0xf]  ;;  %v5821_v12 = vperm.slane %v4744_v43, %v11704_v62  ;;  %v4829_v28 = vperm.slane %v4743_v26, 0  ;;  %v5825_v24 = vperm.slane %v4745_v33, %v11704_v62 }
 0x5a8   : > { %5334 = vmatpush.bf16.msrb.mxu2 %v9014_v15  ;;  %5256 = vst [vmem:[#allocation1] ss:$2 sm:$0xff] %v11742_v37  ;;  %v11902_v37 = vld [vmem:[#allocation2 + $0x4a] sm:$0xf]  ;;  %v4830_v63 = vperm.slane %v4744_v43, 0  ;;  %5237 = vmatpush.bf16.msra.mxu1 %v9003_v3  ;;  %v9012_v62 = vld [vmem:[%s12396_s4 + $0x118] sm:$0xff] }
 0x5a9   : > { %5258 = vst [vmem:[#allocation1 + $0x1] ss:$2 sm:$0xff] %v11818_v0  ;;  %v5449_v1 = vld [vmem:[#allocation2 + $0x48] sm:$0xf]  ;;  %v5844_v54 = vsel %vm3534_vm3, %v5817_v41, %v5813_v31  ;;  %v4841_v42 = vsel %vm3534_vm3, %v4829_v28, %v4828_v21  ;;  %v4831_v18 = vperm.slane %v4745_v33, 0  ;;  %v9009_v26 = vld [vmem:[%s12396_s4 + $0x100] sm:$0xff] }
 0x5aa   : > { %v11904_v25 = vld [vmem:[#allocation2 + $0x49] sm:$0xf]  ;;  %v5845_v13 = vsel %vm3542_vm7, %v5817_v41, %v5844_v54  ;;  %v4842_v16 = vsel %vm3536_vm4, %v4830_v63, %v4841_v42  ;;  %v9038_v28 = vld [vmem:[%s12396_s4 + $0x1e8] sm:$0xff] }
 0x5ab   : > { %5139 = vmatpush.bf16.msra.mxu3 %v8993_v59  ;;  %v11906_v0 = vld [vmem:[#allocation2 + $0x4a] sm:$0xf]  ;;  %v5846_v36 = vsel %vm3536_vm4, %v5821_v12, %v5845_v13  ;;  %v4843_v59 = vsel %vm3538_vm5, %v4831_v18, %v4842_v16  ;;  %v9046_v13 = vld [vmem:[%s12396_s4 + $0x228] sm:$0xff]  ;;  %v9033_v16 = vld [vmem:[%s12396_s4 + $0x1c0] sm:$0xff] }
 0x5ac   : > { %5905 = vst [vmem:[#allocation2 + $0x48] sm:$0xff] %v11653_v40  ;;  %v5847_v56 = vsel %vm3544_vm8, %v5821_v12, %v5846_v36  ;;  %5335 = vmatpush.bf16.msrb.mxu2 %v9013_v7  ;;  %v9031_v27 = vld [vmem:[%s12396_s4 + $0x1b0] sm:$0xff]  ;;  %5238 = vmatpush.bf16.msra.mxu1 %v9002_v39  ;;  %v9018_v12 = vld [vmem:[%s12396_s4 + $0x148] sm:$0xff]  ;;  %v9044_v36 = vld [vmem:[%s12396_s4 + $0x218] sm:$0xff] }
 0x5ad   : > { %v5848_v61 = vsel %vm3538_vm5, %v5825_v24, %v5847_v56  ;;  %v4868_v45 = vld.sshfl [vmem:[#allocation1 + $0x10] sm:$0xff pattern:$0x75316420]  ;;  %5533 = vmatpush.bf16.msra.mxu0 %v9031_v27  ;;  %4851 = vst [vmem:[#allocation2 + $0x61] sm:$0xf] %v4843_v59 }
 0x5ae   : > { %v11945_v22 = vsel %vm3546_vm9, %v5825_v24, %v5848_v61  ;;  %v4871_v15 = vpack.c.bf16 %v4868_v45, %v11766_v17  ;;  %4900 = vst [vmem:[#allocation1 + $0x10] ss:$2 sm:$0xff] %v11813_v23  ;;  %v9030_v17 = vld [vmem:[%s12396_s4 + $0x1a8] sm:$0xff]  ;;  %v9047_v54 = vld [vmem:[%s12396_s4 + $0x230] sm:$0xff] }
 0x5af   : > { %5432 = vmatpush.bf16.msrb.mxu3 %v9024_v14  ;;  %4902 = vst [vmem:[#allocation1 + $0x11] ss:$2 sm:$0xff] %v4891_v50  ;;  %v9010_v23 = vld [vmem:[%s12396_s4 + $0x108] sm:$0xff]  ;;  %v9035_v39 = vld [vmem:[%s12396_s4 + $0x1d0] sm:$0xff] }
 0x5b0   : > { %v11939_v35 = vld.sshfl [vmem:[#allocation1] sm:$0xff pattern:$0x75316420]  ;;  %5336 = vmatpush.bf16.msrb.mxu2 %v9012_v62  ;;  %5239 = vmatpush.bf16.msra.mxu1 %v9001_v58  ;;  %v5964_v45 = vld [vmem:[#allocation2] sm:$0x3] }
 0x5b1   : > { %5356 = vst [vmem:[#allocation1] ss:$2 sm:$0xff] %v11744_v47  ;;  %v9011_v47 = vld [vmem:[%s12396_s4 + $0x110] sm:$0xff]  ;;  %5042 = vmatmul.bf16.vlgmr.msra.gmra.mxu2 %v4871_v15  ;;  %5534 = vmatpush.bf16.msra.mxu0 %v9030_v17  ;;  %v9041_v62 = vld [vmem:[%s12396_s4 + $0x200] sm:$0xff] }
 0x5b2   : > { %5358 = vst [vmem:[#allocation1 + $0x1] ss:$2 sm:$0xff] %v11820_v8  ;;  %v9021_v8 = vld [vmem:[%s12396_s4 + $0x160] sm:$0xff] }
 0x5b3   : > { %5433 = vmatpush.bf16.msrb.mxu3 %v9023_v51  ;;  %v9036_v51 = vld [vmem:[%s12396_s4 + $0x1d8] sm:$0xff] }
 0x5b4   : > { %5337 = vmatpush.bf16.msrb.mxu2 %v9011_v47  ;;  %v5151_v43 = vld [vmem:[#allocation2 + $0x60] sm:$0xf] }
 0x5b5   : > { %5535 = vmatpush.bf16.msra.mxu0 %v9029_v32  ;;  %v5251_v50 = vld [vmem:[#allocation2 + $0x61] sm:$0xf] }
 0x5b6   : > { %v4904_v14 = vld.sshfl [vmem:[#allocation1 + $0x10] sm:$0xff pattern:$0x75316420]  ;;  %v11988_v33 = vld [vmem:[#allocation2 + $0x62] sm:$0xf] }
 0x5b7   : > { %5434 = vmatpush.bf16.msrb.mxu3 %v9022_v34  ;;  %5060 = vst [vmem:[#allocation1 + $0x10] ss:$2 sm:$0xff] %v11815_v6  ;;  %v4907_v48 = vpack.c.bf16 %v4904_v14, %v11809_v19  ;;  %v11990_v31 = vld [vmem:[#allocation2 + $0x60] sm:$0xf]  ;;  %v9039_v19 = vld [vmem:[%s12396_s4 + $0x1f0] sm:$0xff]  ;;  %v9028_v6 = vld [vmem:[%s12396_s4 + $0x198] sm:$0xff] }
 0x5b8   : > { %5338 = vmatpush.bf16.msrb.mxu2 %v9010_v23  ;;  %5062 = vst [vmem:[#allocation1 + $0x11] ss:$2 sm:$0xff] %v11894_v55  ;;  %v11992_v41 = vld [vmem:[#allocation2 + $0x61] sm:$0xf]  ;;  %v9048_v55 = vld [vmem:[%s12396_s4 + $0x238] sm:$0xff] }
 0x5b9   : > { %v11973_v46 = vld.sshfl [vmem:[#allocation1] sm:$0xff pattern:$0x75316420]  ;;  %4980 = vmatmul.bf16.vlgmr.msrb.gmra.mxu1 %v4907_v48  ;;  %5536 = vmatpush.bf16.msra.mxu0 %v9028_v6 }
 0x5ba   : > { %5456 = vst [vmem:[#allocation1] ss:$2 sm:$0xff] %v11823_v4  ;;  %v9019_v4 = vld [vmem:[%s12396_s4 + $0x150] sm:$0xff]  ;;  %5632 = vmatpush.bf16.msrb.mxu1 %v9040_v38 }
 0x5bb   : > { %5435 = vmatpush.bf16.msrb.mxu3 %v9021_v8  ;;  %5458 = vst [vmem:[#allocation1 + $0x1] ss:$2 sm:$0xff] %v5449_v1  ;;  %v11994_v1 = vld [vmem:[#allocation2 + $0x62] sm:$0xf] }
 0x5bc   : > { %5908 = vst [vmem:[#allocation2 + $0x60] sm:$0xff] %v11653_v40  ;;  %5339 = vmatpush.bf16.msrb.mxu2 %v9009_v26  ;;  %v9027_v40 = vld [vmem:[%s12396_s4 + $0x190] sm:$0xff]  ;;  %v9064_v26 = vld [vmem:[%s12396_s4 + $0x78] sm:$0xff] }
 0x5bd   : > { %5537 = vmatpush.bf16.msra.mxu0 %v9027_v40  ;;  %v9062_v40 = vld [vmem:[%s12396_s4 + $0x68] sm:$0xff] }
 0x5be   : > { %5633 = vmatpush.bf16.msrb.mxu1 %v9039_v19 }
 0x5bf   : > { %5436 = vmatpush.bf16.msrb.mxu3 %v9020_v11  ;;  %v5064_v63 = vld.sshfl [vmem:[#allocation1 + $0x10] sm:$0xff pattern:$0x75316420] }
 0x5c0   : > { %5732 = vmatpush.bf16.msra.mxu2 %v9048_v55  ;;  %5160 = vst [vmem:[#allocation1 + $0x10] ss:$2 sm:$0xff] %v11896_v49  ;;  %v5067_v3 = vpack.c.bf16 %v5064_v63, %v11860_v53  ;;  %v9025_v53 = vld [vmem:[%s12396_s4 + $0x180] sm:$0xff] }
 0x5c1   : > { %5162 = vst [vmem:[#allocation1 + $0x11] ss:$2 sm:$0xff] %v5151_v43  ;;  %v9045_v49 = vld [vmem:[%s12396_s4 + $0x220] sm:$0xff]  ;;  %v9055_v43 = vld [vmem:[%s12396_s4 + $0x30] sm:$0xff] }
 0x5c2   : > { %v12015_v21 = vld.sshfl [vmem:[#allocation1] sm:$0xff pattern:$0x75316420]  ;;  %5140 = vmatmul.bf16.vlgmr.msra.gmra.mxu3 %v5067_v3  ;;  %5634 = vmatpush.bf16.msrb.mxu1 %v9038_v28 }
 0x5c3   : > { %5437 = vmatpush.bf16.msrb.mxu3 %v9019_v4  ;;  %5556 = vst [vmem:[#allocation1] ss:$2 sm:$0xff] %v11825_v44  ;;  %v9026_v44 = vld [vmem:[%s12396_s4 + $0x188] sm:$0xff] }
 0x5c4   : > { %5558 = vst [vmem:[#allocation1 + $0x1] ss:$2 sm:$0xff] %v11904_v25  ;;  %5733 = vmatpush.bf16.msra.mxu2 %v9047_v54  ;;  %v9037_v25 = vld [vmem:[%s12396_s4 + $0x1e0] sm:$0xff]  ;;  %5538 = vmatpush.bf16.msra.mxu0 %v9026_v44 }
 0x5c5   : > { %v9053_v54 = vld [vmem:[%s12396_s4 + $0x20] sm:$0xff] }
 0x5c6   : > { %5635 = vmatpush.bf16.msrb.mxu1 %v9037_v25  ;;  %v9052_v25 = vld [vmem:[%s12396_s4 + $0x18] sm:$0xff] }
 0x5c7   : > { %5438 = vmatpush.bf16.msrb.mxu3 %v9018_v12 }
 0x5c8   : > { %5734 = vmatpush.bf16.msra.mxu2 %v9046_v13  ;;  %v5164_v24 = vld.sshfl [vmem:[#allocation1 + $0x10] sm:$0xff pattern:$0x75316420]  ;;  %5539 = vmatpush.bf16.msra.mxu0 %v9025_v53  ;;  %v9177_v13 = vld [vmem:[%s12397_s5 + $0x2] ss:$0 sm:$0xff]  ;;  %v9072_v53 = vld [vmem:[%s12396_s4 + $0xb8] sm:$0xff] }
 0x5c9   : > { %5260 = vst [vmem:[#allocation1 + $0x10] ss:$2 sm:$0xff] %v11900_v30  ;;  %v5167_v42 = vpack.c.bf16 %v5164_v24, %v11890_v10  ;;  %v9042_v10 = vld [vmem:[%s12396_s4 + $0x208] sm:$0xff]  ;;  %v9178_v24 = vld [vmem:[%s12398_s6 + $0x2] ss:$0 sm:$0xff] }
 0x5ca   : > { %5262 = vst [vmem:[#allocation1 + $0x11] ss:$2 sm:$0xff] %v5251_v50  ;;  %5636 = vmatpush.bf16.msrb.mxu1 %v9036_v51  ;;  %v9063_v50 = vld [vmem:[%s12396_s4 + $0x70] sm:$0xff] }
 0x5cb   : > { %5439 = vmatpush.bf16.msrb.mxu3 %v9017_v5  ;;  %v5563_v7 = vld.sshfl [vmem:[#allocation1] sm:$0xff pattern:$0x75316420]  ;;  %5240 = vmatmul.bf16.vlgmr.msra.gmra.mxu1 %v5167_v42  ;;  %v9060_v42 = vld [vmem:[%s12396_s4 + $0x58] sm:$0xff] }
 0x5cc   : > { %5658 = vst [vmem:[#allocation1 + $0x1] ss:$2 sm:$0xff] %v11906_v0  ;;  %5735 = vmatpush.bf16.msra.mxu2 %v9045_v49  ;;  %v9034_v0 = vld [vmem:[%s12396_s4 + $0x1c8] sm:$0xff]  ;;  %v9061_v5 = vld [vmem:[%s12396_s4 + $0x60] sm:$0xff] }
 0x5cd   : > { %5656 = vst [vmem:[#allocation1] ss:$2 sm:$0xff] %v11827_v57  ;;  %v9043_v57 = vld [vmem:[%s12396_s4 + $0x210] sm:$0xff] }
 0x5ce   : > { %5637 = vmatpush.bf16.msrb.mxu1 %v9035_v39 }
 0x5cf   : > { %6064 = vmatpush.bf16.msra.mxu3 %v9064_v26 }
 0x5d0   : > { %5736 = vmatpush.bf16.msra.mxu2 %v9044_v36 }
 0x5d1   : > { %v5264_v30 = vld.sshfl [vmem:[#allocation1 + $0x10] sm:$0xff pattern:$0x75316420] }
 0x5d2   : > { %5360 = vst [vmem:[#allocation1 + $0x10] ss:$2 sm:$0xff] %v11902_v37  ;;  %v5267_v56 = vpack.c.bf16 %v5264_v30, %v11939_v35  ;;  %5638 = vmatpush.bf16.msrb.mxu1 %v9034_v0  ;;  %v9071_v0 = vld [vmem:[%s12396_s4 + $0xb0] sm:$0xff] }
 0x5d3   : > { %5362 = vst [vmem:[#allocation1 + $0x11] ss:$2 sm:$0xff] %v11988_v33  ;;  %6065 = vmatpush.bf16.msra.mxu3 %v9063_v50 }
 0x5d4   : > { %5737 = vmatpush.bf16.msra.mxu2 %v9043_v57  ;;  %v5663_v59 = vld.sshfl [vmem:[#allocation1] sm:$0xff pattern:$0x75316420]  ;;  %v9051_v57 = vld [vmem:[%s12396_s4 + $0x10] sm:$0xff] }
 0x5d5   : > { %5340 = vmatmul.bf16.vlgmr.msrb.gmra.mxu2 %v5267_v56 }
 0x5d6   : > { %5639 = vmatpush.bf16.msrb.mxu1 %v9033_v16  ;;  %v9059_v16 = vld [vmem:[%s12396_s4 + $0x50] sm:$0xff] }
 0x5d7   : > { %6066 = vmatpush.bf16.msra.mxu3 %v9062_v40 }
 0x5d8   : > { %5738 = vmatpush.bf16.msra.mxu2 %v9042_v10 }
 0x5da   : > { %v5364_v34 = vld.sshfl [vmem:[#allocation1 + $0x10] sm:$0xff pattern:$0x75316420]  ;;  %6212 = vmatpush.bf16.msra.mxu1 %v9072_v53 }
 0x5db   : > { %5460 = vst [vmem:[#allocation1 + $0x10] ss:$2 sm:$0xff] %v11990_v31  ;;  %v5367_v37 = vpack.c.bf16 %v5364_v34, %v11973_v46  ;;  %6067 = vmatpush.bf16.msra.mxu3 %v9061_v5  ;;  %v9066_v5 = vld [vmem:[%s12396_s4 + $0x88] sm:$0xff] }
 0x5dc   : > { %5739 = vmatpush.bf16.msra.mxu2 %v9041_v62  ;;  %5462 = vst [vmem:[#allocation1 + $0x11] ss:$2 sm:$0xff] %v11616_v52 }
 0x5dd   : > { %5440 = vmatmul.bf16.vlgmr.msrb.gmra.mxu3 %v5367_v37 }
 0x5de   : > { %6213 = vmatpush.bf16.msra.mxu1 %v9071_v0  ;;  %v9095_v0 = vld [vmem:[%s12396_s4 + $0x170] sm:$0xff] }
 0x5df   : > { %6068 = vmatpush.bf16.msra.mxu3 %v9060_v42 }
 0x5e3   : > { %v5464_v61 = vld.sshfl [vmem:[#allocation1 + $0x10] sm:$0xff pattern:$0x75316420]  ;;  %6069 = vmatpush.bf16.msra.mxu3 %v9059_v16 }
 0x5e4   : > { %5560 = vst [vmem:[#allocation1 + $0x10] ss:$2 sm:$0xff] %v11992_v41  ;;  %v5467_v35 = vpack.c.bf16 %v5464_v61, %v12015_v21  ;;  %v9054_v41 = vld [vmem:[%s12396_s4 + $0x28] sm:$0xff] }
 0x5e5   : > { %5562 = vst [vmem:[#allocation1 + $0x11] ss:$2 sm:$0xff] %v11618_v60  ;;  %v9050_v61 = vld [vmem:[%s12396_s4 + $0x8] sm:$0xff] }
 0x5e6   : > { %5540 = vmatmul.bf16.vlgmr.msra.gmra.mxu0 %v5467_v35  ;;  %v9070_v35 = vld [vmem:[%s12396_s4 + $0xa8] sm:$0xff] }
 0x5e7   : > { %6214 = vmatpush.bf16.msra.mxu1 %v9070_v35 }
 0x5ec   : > { %v5564_v18 = vld.sshfl [vmem:[#allocation1 + $0x10] sm:$0xff pattern:$0x75316420] }
 0x5ed   : > { %5660 = vst [vmem:[#allocation1 + $0x10] ss:$2 sm:$0xff] %v11994_v1  ;;  %v5567_v27 = vpack.c.bf16 %v5564_v18, %v5563_v7  ;;  %v9080_v18 = vld [vmem:[%s12396_s4 + $0xf8] sm:$0xff] }
 0x5ee   : > { %5662 = vst [vmem:[#allocation1 + $0x11] ss:$2 sm:$0xff] %v11620_v29  ;;  %v9056_v29 = vld [vmem:[%s12396_s4 + $0x38] sm:$0xff]  ;;  %6300 = vmatpush.bf16.msrb.mxu2 %v9080_v18 }
 0x5ef   : > { %5640 = vmatmul.bf16.vlgmr.msrb.gmra.mxu1 %v5567_v27  ;;  %6125 = vmatpush.bf16.msrb.mxu0 %v9056_v29  ;;  %v9068_v29 = vld [vmem:[%s12396_s4 + $0x98] sm:$0xff] }
 0x5f3   : > { %6126 = vmatpush.bf16.msrb.mxu0 %v9055_v43 }
 0x5f5   : > { %v5664_v15 = vld.sshfl [vmem:[#allocation1 + $0x10] sm:$0xff pattern:$0x75316420] }
 0x5f6   : > { %v5667_v52 = vpack.c.bf16 %v5664_v15, %v5663_v59  ;;  %5968 = vst [vmem:[#allocation1] ss:$4 sm:$0xff] %v5964_v45 }
 0x5f7   : > { %6127 = vmatpush.bf16.msrb.mxu0 %v9054_v41 }
 0x5f8   : > { %5740 = vmatmul.bf16.vlgmr.msra.gmra.mxu2 %v5667_v52 }
 0x5fb   : > { %6128 = vmatpush.bf16.msrb.mxu0 %v9053_v54 }
 0x5ff   : > { %6129 = vmatpush.bf16.msrb.mxu0 %v9052_v25 }
 0x603   : > { %6130 = vmatpush.bf16.msrb.mxu0 %v9051_v57  ;;  %v9085_v57 = vld [vmem:[%s12396_s4 + $0x120] sm:$0xff] }
 0x607   : > { %6131 = vmatpush.bf16.msrb.mxu0 %v9050_v61 }
 0x634   : > { %v5043_v47 = vpop.f32.mrf.mxu2 }
 0x636   : > { %v4981_v58 = vpop.f32.mrf.mxu1 }
 0x637   : > { %v5044_v46 = vadd.f32 %v5043_v47, %v4981_v58  ;;  %v9049_v47 = vld [vmem:[%s12396_s4] sm:$0xff] }
 0x638   : > { %6132 = vmatpush.bf16.msrb.mxu0 %v9049_v47  ;;  %v9083_v47 = vld [vmem:[%s12396_s4 + $0x110] sm:$0xff] }
 0x63c   : > { %v5045_v23 = vpop.f32.mrf.mxu2 }
 0x63e   : > { %v4983_v8 = vpop.f32.mrf.mxu1 }
 0x63f   : > { %v5046_v33 = vadd.f32 %v5045_v23, %v4983_v8  ;;  %v9069_v8 = vld [vmem:[%s12396_s4 + $0xa0] sm:$0xff] }
 0x640   : > { %6215 = vmatpush.bf16.msra.mxu1 %v9069_v8  ;;  %v9093_v8 = vld [vmem:[%s12396_s4 + $0x160] sm:$0xff] }
 0x644   : > { %6216 = vmatpush.bf16.msra.mxu1 %v9068_v29  ;;  %v9102_v29 = vld [vmem:[%s12396_s4 + $0x1a8] sm:$0xff] }
 0x645   : > { %v5141_v17 = vpop.f32.mrf.mxu3 }
 0x646   : > { %v5146_v38 = vadd.f32 %v5141_v17, %v5044_v46 }
 0x648   : > { %v5241_v60 = vpop.f32.mrf.mxu1 }
 0x649   : > { %v5246_v4 = vadd.f32 %v5241_v60, %v5146_v38  ;;  %v9057_v60 = vld [vmem:[%s12396_s4 + $0x40] sm:$0xff]  ;;  %v9078_v38 = vld [vmem:[%s12396_s4 + $0xe8] sm:$0xff] }
 0x64d   : > { %v5143_v11 = vpop.f32.mrf.mxu3 }
 0x64e   : > { %v5147_v6 = vadd.f32 %v5143_v11, %v5046_v33 }
 0x650   : > { %v5243_v14 = vpop.f32.mrf.mxu1 }
 0x651   : > { %v5247_v21 = vadd.f32 %v5243_v14, %v5147_v6  ;;  %v9088_v14 = vld [vmem:[%s12396_s4 + $0x138] sm:$0xff] }
 0x658   : > { %v5341_v32 = vpop.f32.mrf.mxu2 }
 0x659   : > { %v5346_v31 = vadd.f32 %v5341_v32, %v5246_v4  ;;  %v9087_v4 = vld [vmem:[%s12396_s4 + $0x130] sm:$0xff] }
 0x660   : > { %v5441_v48 = vpop.f32.mrf.mxu3  ;;  %v5343_v1 = vpop.f32.mrf.mxu2 }
 0x661   : > { %v5446_v55 = vadd.f32 %v5441_v48, %v5346_v31  ;;  %v5347_v3 = vadd.f32 %v5343_v1, %v5247_v21  ;;  %v9077_v31 = vld [vmem:[%s12396_s4 + $0xe0] sm:$0xff] }
 0x663   : > { %v5541_v19 = vpop.f32.mrf.mxu0 }
 0x664   : > { %v5546_v28 = vadd.f32 %v5541_v19, %v5446_v55 }
 0x668   : > { %v5443_v63 = vpop.f32.mrf.mxu3 }
 0x669   : > { %v5447_v7 = vadd.f32 %v5443_v63, %v5347_v3  ;;  %v9076_v3 = vld [vmem:[%s12396_s4 + $0xd8] sm:$0xff] }
 0x66b   : > { %v5543_v36 = vpop.f32.mrf.mxu0 }
 0x66c   : > { %v5641_v12 = vpop.f32.mrf.mxu1  ;;  %v5547_v10 = vadd.f32 %v5543_v36, %v5447_v7 }
 0x66d   : > { %v5646_v44 = vadd.f32 %v5641_v12, %v5546_v28 }
 0x674   : > { %v5643_v30 = vpop.f32.mrf.mxu1 }
 0x675   : > { %v5647_v62 = vadd.f32 %v5643_v30, %v5547_v10 }
 0x67b   : > { %v5741_v49 = vpop.f32.mrf.mxu2 }
 0x67c   : > { %v5746_v51 = vadd.f32 %v5741_v49, %v5646_v44  ;;  %v9086_v44 = vld [vmem:[%s12396_s4 + $0x128] sm:$0xff]  ;;  %v9096_v49 = vld [vmem:[%s12396_s4 + $0x178] sm:$0xff] }
 0x67d   : > { %6476 = vmatpush.bf16.msra.mxu0 %v9096_v49  ;;  %v9116_v49 = vld [vmem:[%s12396_s4 + $0x218] sm:$0xff] }
 0x67e   : > { %v5750_v39 = vmul.f32 %v9177_v13, %v5746_v51  ;;  %v9065_v51 = vld [vmem:[%s12396_s4 + $0x80] sm:$0xff] }
 0x680   : > { %v5754_v56 = vadd.f32 %v9178_v24, %v5750_v39 }
 0x681   : > { %6477 = vmatpush.bf16.msra.mxu0 %v9095_v0 }
 0x682   : > { %v5758_v34 = vrot.slane %v5754_v56, 4  ;;  %v5854_v37 = vadd.f32 %v11728_v9, %v5754_v56  ;;  %v9058_v9 = vld [vmem:[%s12396_s4 + $0x48] sm:$0xff] }
 0x683   : > { %v5743_v27 = vpop.f32.mrf.mxu2  ;;  %6070 = vmatpush.bf16.msra.mxu3 %v9058_v9 }
 0x684   : > { %v5855_v45 = vadd.f32 %v11793_v20, %v5758_v34  ;;  %v5747_v59 = vadd.f32 %v5743_v27, %v5647_v62  ;;  %v5858_v15 = vmax.f32 %v5854_v37, 0.0  ;;  %v9079_v20 = vld [vmem:[%s12396_s4 + $0xf0] sm:$0xff]  ;;  %v9074_v27 = vld [vmem:[%s12396_s4 + $0xc8] sm:$0xff] }
 0x685   : > { %6301 = vmatpush.bf16.msrb.mxu2 %v9079_v20  ;;  %v9103_v20 = vld [vmem:[%s12396_s4 + $0x1b0] sm:$0xff] }
 0x686   : > { %v5859_v52 = vmax.f32 %v5855_v45, 0.0  ;;  %v5751_v58 = vmul.f32 %v9177_v13, %v5747_v59  ;;  %v9084_v45 = vld [vmem:[%s12396_s4 + $0x118] sm:$0xff]  ;;  %v9094_v59 = vld [vmem:[%s12396_s4 + $0x168] sm:$0xff] }
 0x687   : > { %6071 = vmatpush.bf16.msra.mxu3 %v9057_v60  ;;  %6478 = vmatpush.bf16.msra.mxu0 %v9094_v59  ;;  %v9082_v60 = vld [vmem:[%s12396_s4 + $0x108] sm:$0xff] }
 0x688   : > { %v5862_v17 = vmax.f32 %v5858_v15, %v5859_v52  ;;  %v5755_v23 = vadd.f32 %v9178_v24, %v5751_v58  ;;  %v9075_v24 = vld [vmem:[%s12396_s4 + $0xd0] sm:$0xff]  ;;  %v9104_v15 = vld [vmem:[%s12396_s4 + $0x1b8] sm:$0xff]  ;;  %v9073_v58 = vld [vmem:[%s12396_s4 + $0xc0] sm:$0xff] }
 0x689   : > { %6302 = vmatpush.bf16.msrb.mxu2 %v9078_v38  ;;  %v9112_v38 = vld [vmem:[%s12396_s4 + $0x1f8] sm:$0xff] }
 0x68a   : > { %v5866_v11 = vrot.slane %v5862_v17, 2  ;;  %v5759_v32 = vrot.slane %v5755_v23, 4  ;;  %v5856_v46 = vadd.f32 %v11873_v2, %v5755_v23  ;;  %v9067_v2 = vld [vmem:[%s12396_s4 + $0x90] sm:$0xff] }
 0x68b   : > { %6388 = vmatpush.bf16.msrb.mxu3 %v9088_v14  ;;  %6217 = vmatpush.bf16.msra.mxu1 %v9067_v2  ;;  %v9081_v14 = vld [vmem:[%s12396_s4 + $0x100] sm:$0xff]  ;;  %v6138_v2 = vld [vmem:[#allocation2 + $0x2] sm:$0x3] }
 0x68c   : > { %v5869_v26 = vsel %vm5868_vm10, %v5862_v17, %v5866_v11  ;;  %v5871_v43 = vsel %vm5870_vm11, %v5862_v17, %v5866_v11  ;;  %v5857_v48 = vadd.f32 %v11945_v22, %v5759_v32  ;;  %v5860_v41 = vmax.f32 %v5856_v46, 0.0  ;;  %v5990_v17 = vld [vmem:[#allocation2 + $0x1] sm:$0x3]  ;;  %6479 = vmatpush.bf16.msra.mxu0 %v9093_v8  ;;  %v9092_v11 = vld [vmem:[%s12396_s4 + $0x158] sm:$0xff] }
 0x68d   : > { %v5872_v50 = vrot.slane %v5871_v43, 2  ;;  %v8359_v33 = vrot.slane %v5869_v26, 9  ;;  %6303 = vmatpush.bf16.msrb.mxu2 %v9077_v31  ;;  %v9101_v43 = vld [vmem:[%s12396_s4 + $0x1a0] sm:$0xff] }
 0x68e   : > { %v5861_v1 = vmax.f32 %v5857_v48, 0.0  ;;  %v9111_v48 = vld [vmem:[%s12396_s4 + $0x1f0] sm:$0xff] }
 0x68f   : > { %v8360_v22 = vrot.slane %v5872_v50, 9  ;;  %v5892_v19 = vmax.f32 %v5869_v26, %v8359_v33  ;;  %6389 = vmatpush.bf16.msrb.mxu3 %v9087_v4  ;;  %6218 = vmatpush.bf16.msra.mxu1 %v9066_v5  ;;  %v9091_v26 = vld [vmem:[%s12396_s4 + $0x150] sm:$0xff]  ;;  %v9090_v4 = vld [vmem:[%s12396_s4 + $0x148] sm:$0xff] }
 0x690   : > { %v5863_v6 = vmax.f32 %v5860_v41, %v5861_v1  ;;  %6480 = vmatpush.bf16.msra.mxu0 %v9092_v11  ;;  %v9110_v33 = vld [vmem:[%s12396_s4 + $0x1e8] sm:$0xff]  ;;  %v9120_v41 = vld [vmem:[%s12396_s4 + $0x238] sm:$0xff] }
 0x691   : > { %v5893_v55 = vmax.f32 %v5872_v50, %v8360_v22  ;;  %v5954_v40 = vperm.slane %v5892_v19, 0  ;;  %6304 = vmatpush.bf16.msrb.mxu2 %v9076_v3  ;;  %v9100_v50 = vld [vmem:[%s12396_s4 + $0x198] sm:$0xff] }
 0x692   : > { %v5867_v12 = vrot.slane %v5863_v6, 2 }
 0x693   : > { %v5955_v54 = vperm.slane %v5893_v55, 0  ;;  %v6765_v21 = vrot.slane %v5893_v55, 7  ;;  %6390 = vmatpush.bf16.msrb.mxu3 %v9086_v44  ;;  %6219 = vmatpush.bf16.msra.mxu1 %v9065_v51  ;;  %v9109_v55 = vld [vmem:[%s12396_s4 + $0x1e0] sm:$0xff] }
 0x694   : > { %v5873_v28 = vsel %vm5868_vm10, %v5863_v6, %v5867_v12  ;;  %v5874_v63 = vsel %vm5870_vm11, %v5863_v6, %v5867_v12  ;;  %6481 = vmatpush.bf16.msra.mxu0 %v9091_v26  ;;  %v9099_v6 = vld [vmem:[%s12396_s4 + $0x190] sm:$0xff]  ;;  %v9097_v44 = vld [vmem:[%s12396_s4 + $0x180] sm:$0xff]  ;;  %v9126_v26 = vld [vmem:[%s12399_s7 + $0x28] sm:$0xff] }
 0x695   : > { %v5958_v13 = vsel %vm3534_vm3, %v5955_v54, %v5954_v40  ;;  %v5875_v25 = vrot.slane %v5874_v63, 2  ;;  %v8361_v53 = vrot.slane %v5873_v28, 9  ;;  %v6766_v7 = vsel %vm3534_vm3, %v6765_v21, %v5892_v19  ;;  %6305 = vmatpush.bf16.msrb.mxu2 %v9075_v24  ;;  %v9089_v19 = vld [vmem:[%s12396_s4 + $0x140] sm:$0xff]  ;;  %v9119_v12 = vld [vmem:[%s12396_s4 + $0x230] sm:$0xff]  ;;  %v9098_v40 = vld [vmem:[%s12396_s4 + $0x188] sm:$0xff] }
 0x696   : > { %5962 = vst [vmem:[#allocation2 + $0x19] sm:$0x3] %v5958_v13  ;;  %v6767_v36 = vsel %vm3538_vm5, %v6765_v21, %v6766_v7  ;;  %v9108_v54 = vld [vmem:[%s12396_s4 + $0x1d8] sm:$0xff]  ;;  %v9107_v13 = vld [vmem:[%s12396_s4 + $0x1d0] sm:$0xff]  ;;  %v9105_v24 = vld [vmem:[%s12396_s4 + $0x1c0] sm:$0xff] }
 0x697   : > { %v8362_v42 = vrot.slane %v5875_v25, 9  ;;  %v5894_v39 = vmax.f32 %v5873_v28, %v8361_v53  ;;  %v6768_v30 = vsel %vm3542_vm7, %v6765_v21, %v6767_v36  ;;  %6391 = vmatpush.bf16.msrb.mxu3 %v9085_v57  ;;  %6564 = vmatpush.bf16.msrb.mxu1 %v9104_v15  ;;  %v9106_v53 = vld [vmem:[%s12396_s4 + $0x1c8] sm:$0xff] }
 0x698   : > { %v12208_v10 = vsel %vm3546_vm9, %v6765_v21, %v6768_v30  ;;  %6482 = vmatpush.bf16.msra.mxu0 %v9090_v4  ;;  %v9118_v21 = vld [vmem:[%s12396_s4 + $0x228] sm:$0xff]  ;;  %v9125_v4 = vld [vmem:[%s12399_s7 + $0x20] sm:$0xff] }
 0x699   : > { %v5895_v56 = vmax.f32 %v5875_v25, %v8362_v42  ;;  %v5956_v16 = vperm.slane %v5894_v39, 0  ;;  %6306 = vmatpush.bf16.msrb.mxu2 %v9074_v27  ;;  %v9117_v25 = vld [vmem:[%s12396_s4 + $0x220] sm:$0xff]  ;;  %v9114_v57 = vld [vmem:[%s12396_s4 + $0x208] sm:$0xff] }
 0x69b   : > { %v5957_v62 = vperm.slane %v5895_v56, 0  ;;  %v6772_v34 = vrot.slane %v5895_v56, 7  ;;  %6392 = vmatpush.bf16.msrb.mxu3 %v9084_v45  ;;  %6565 = vmatpush.bf16.msrb.mxu1 %v9103_v20 }
 0x69c   : > { %6483 = vmatpush.bf16.msra.mxu0 %v9089_v19 }
 0x69d   : > { %v5965_v37 = vld [vmem:[#allocation2 + $0x18] sm:$0x3]  ;;  %v5959_v61 = vsel %vm3534_vm3, %v5957_v62, %v5956_v16  ;;  %v6773_v35 = vsel %vm3534_vm3, %v6772_v34, %v5894_v39  ;;  %6307 = vmatpush.bf16.msrb.mxu2 %v9073_v58  ;;  %v6139_v1 = vld [vmem:[#allocation2 + $0x1a] sm:$0x3]  ;;  %v9115_v39 = vld [vmem:[%s12396_s4 + $0x210] sm:$0xff] }
 0x69e   : > { %v6774_v18 = vsel %vm3538_vm5, %v6772_v34, %v6773_v35  ;;  %5970 = vst [vmem:[#allocation1 + $0x1] ss:$4 sm:$0xff] %v5965_v37  ;;  %v5991_v46 = vld [vmem:[#allocation2 + $0x19] sm:$0x3] }
 0x69f   : > { %v6775_v9 = vsel %vm3542_vm7, %v6772_v34, %v6774_v18  ;;  %5963 = vst [vmem:[#allocation2 + $0x31] sm:$0x3] %v5959_v61  ;;  %6393 = vmatpush.bf16.msrb.mxu3 %v9083_v47  ;;  %6566 = vmatpush.bf16.msrb.mxu1 %v9102_v29  ;;  %v6226_v28 = vld [vmem:[#allocation2 + $0x18] sm:$0x3]  ;;  %v6402_v0 = vld [vmem:[#allocation2 + $0x1a] sm:$0x3] }
 0x6a0   : > { %v12227_v52 = vsel %vm3546_vm9, %v6772_v34, %v6775_v9  ;;  %v6314_v7 = vld [vmem:[#allocation2 + $0x19] sm:$0x3]  ;;  %v6491_v34 = vld [vmem:[#allocation2 + $0x48] sm:$0x3]  ;;  %v6667_v9 = vld [vmem:[#allocation2 + $0x4a] sm:$0x3] }
 0x6a1   : > { %6652 = vmatpush.bf16.msra.mxu2 %v9112_v38  ;;  %v9113_v62 = vld [vmem:[%s12396_s4 + $0x200] sm:$0xff]  ;;  %v6579_v18 = vld [vmem:[#allocation2 + $0x49] sm:$0x3]  ;;  %v9128_v29 = vld [vmem:[%s12399_s7 + $0x38] sm:$0xff] }
 0x6a3   : > { %6394 = vmatpush.bf16.msrb.mxu3 %v9082_v60  ;;  %6567 = vmatpush.bf16.msrb.mxu1 %v9101_v43 }
 0x6a5   : > { %v5971_v23 = vld.sshfl [vmem:[#allocation1] sm:$0xff pattern:$0x73625140]  ;;  %6653 = vmatpush.bf16.msra.mxu2 %v9111_v48 }
 0x6a6   : > { %v5973_v32 = vpack.c.bf16 %v5971_v23, %v5971_v23  ;;  %5994 = vst [vmem:[#allocation1] ss:$4 sm:$0xff] %v5990_v17  ;;  %v6227_v5 = vld [vmem:[#allocation2 + $0x30] sm:$0x3]  ;;  %v6403_v56 = vld [vmem:[#allocation2 + $0x32] sm:$0x3] }
 0x6a7   : > { %5996 = vst [vmem:[#allocation1 + $0x1] ss:$4 sm:$0xff] %v5991_v46  ;;  %6395 = vmatpush.bf16.msrb.mxu3 %v9081_v14  ;;  %6568 = vmatpush.bf16.msrb.mxu1 %v9100_v50  ;;  %v6315_v36 = vld [vmem:[#allocation2 + $0x31] sm:$0x3]  ;;  %v9127_v14 = vld [vmem:[%s12399_s7 + $0x30] sm:$0xff] }
 0x6a8   : > { %6133 = vmatmul.bf16.vlgmr.msrb.gmra.mxu0 %v5973_v32  ;;  %v6490_v37 = vld [vmem:[#allocation2 + $0x30] sm:$0x3]  ;;  %v6666_v15 = vld [vmem:[#allocation2 + $0x32] sm:$0x3] }
 0x6a9   : > { %6654 = vmatpush.bf16.msra.mxu2 %v9110_v33  ;;  %v6578_v27 = vld [vmem:[#allocation2 + $0x31] sm:$0x3]  ;;  %6855 = vmatpush.bf16.msrb.mxu0 %v9128_v29 }
 0x6aa   : > { %v9124_v33 = vld [vmem:[%s12399_s7 + $0x18] sm:$0xff] }
 0x6ab   : > { %6569 = vmatpush.bf16.msrb.mxu1 %v9099_v6 }
 0x6ad   : > { %6655 = vmatpush.bf16.msra.mxu2 %v9109_v55  ;;  %6856 = vmatpush.bf16.msrb.mxu0 %v9127_v14  ;;  %v9121_v55 = vld [vmem:[%s12399_s7] sm:$0xff] }
 0x6ae   : > { %v5997_v31 = vld.sshfl [vmem:[#allocation1] sm:$0xff pattern:$0x73625140] }
 0x6af   : > { %v5999_v22 = vpack.c.bf16 %v5997_v31, %v5997_v31  ;;  %6142 = vst [vmem:[#allocation1] ss:$4 sm:$0xff] %v6138_v2  ;;  %6570 = vmatpush.bf16.msrb.mxu1 %v9098_v40 }
 0x6b0   : > { %6144 = vst [vmem:[#allocation1 + $0x1] ss:$4 sm:$0xff] %v6139_v1  ;;  %v9123_v1 = vld [vmem:[%s12399_s7 + $0x10] sm:$0xff] }
 0x6b1   : > { %6072 = vmatmul.bf16.vlgmr.msra.gmra.mxu3 %v5999_v22  ;;  %6656 = vmatpush.bf16.msra.mxu2 %v9108_v54  ;;  %v9122_v22 = vld [vmem:[%s12399_s7 + $0x8] sm:$0xff] }
 0x6b2   : > { %6740 = vmatpush.bf16.msra.mxu3 %v9120_v41  ;;  %6857 = vmatpush.bf16.msrb.mxu0 %v9126_v26 }
 0x6b3   : > { %6571 = vmatpush.bf16.msrb.mxu1 %v9097_v44  ;;  %v9179_v44 = vld [vmem:[%s12397_s5 + $0x3] ss:$0 sm:$0xff] }
 0x6b5   : > { %6657 = vmatpush.bf16.msra.mxu2 %v9107_v13 }
 0x6b6   : > { %6741 = vmatpush.bf16.msra.mxu3 %v9119_v12  ;;  %6858 = vmatpush.bf16.msrb.mxu0 %v9125_v4 }
 0x6b7   : > { %v6145_v63 = vld.sshfl [vmem:[#allocation1] sm:$0xff pattern:$0x73625140] }
 0x6b8   : > { %v6147_v3 = vpack.c.bf16 %v6145_v63, %v6145_v63  ;;  %6230 = vst [vmem:[#allocation1] ss:$4 sm:$0xff] %v6226_v28 }
 0x6b9   : > { %6232 = vst [vmem:[#allocation1 + $0x1] ss:$4 sm:$0xff] %v6227_v5  ;;  %6658 = vmatpush.bf16.msra.mxu2 %v9106_v53  ;;  %v9180_v53 = vld [vmem:[%s12398_s6 + $0x3] ss:$0 sm:$0xff] }
 0x6ba   : > { %6220 = vmatmul.bf16.vlgmr.msra.gmra.mxu1 %v6147_v3  ;;  %6742 = vmatpush.bf16.msra.mxu3 %v9118_v21 }
 0x6bb   : > { %6859 = vmatpush.bf16.msrb.mxu0 %v9124_v33 }
 0x6bd   : > { %6659 = vmatpush.bf16.msra.mxu2 %v9105_v24 }
 0x6be   : > { %6743 = vmatpush.bf16.msra.mxu3 %v9117_v25 }
 0x6bf   : > { %6860 = vmatpush.bf16.msrb.mxu0 %v9123_v1 }
 0x6c0   : > { %v6233_v51 = vld.sshfl [vmem:[#allocation1] sm:$0xff pattern:$0x73625140] }
 0x6c1   : > { %v6235_v42 = vpack.c.bf16 %v6233_v51, %v6233_v51  ;;  %6318 = vst [vmem:[#allocation1] ss:$4 sm:$0xff] %v6314_v7 }
 0x6c2   : > { %6320 = vst [vmem:[#allocation1 + $0x1] ss:$4 sm:$0xff] %v6315_v36  ;;  %6744 = vmatpush.bf16.msra.mxu3 %v9116_v49 }
 0x6c3   : > { %6308 = vmatmul.bf16.vlgmr.msrb.gmra.mxu2 %v6235_v42  ;;  %6861 = vmatpush.bf16.msrb.mxu0 %v9122_v22 }
 0x6c6   : > { %6745 = vmatpush.bf16.msra.mxu3 %v9115_v39 }
 0x6c7   : > { %6862 = vmatpush.bf16.msrb.mxu0 %v9121_v55 }
 0x6c9   : > { %v6321_v30 = vld.sshfl [vmem:[#allocation1] sm:$0xff pattern:$0x73625140] }
 0x6ca   : > { %v6323_v16 = vpack.c.bf16 %v6321_v30, %v6321_v30  ;;  %6406 = vst [vmem:[#allocation1] ss:$4 sm:$0xff] %v6402_v0  ;;  %6746 = vmatpush.bf16.msra.mxu3 %v9114_v57 }
 0x6cb   : > { %6408 = vst [vmem:[#allocation1 + $0x1] ss:$4 sm:$0xff] %v6403_v56 }
 0x6cc   : > { %6396 = vmatmul.bf16.vlgmr.msrb.gmra.mxu3 %v6323_v16 }
 0x6ce   : > { %6747 = vmatpush.bf16.msra.mxu3 %v9113_v62 }
 0x6d2   : > { %v6409_v61 = vld.sshfl [vmem:[#allocation1] sm:$0xff pattern:$0x73625140] }
 0x6d3   : > { %v6411_v35 = vpack.c.bf16 %v6409_v61, %v6409_v61  ;;  %6494 = vst [vmem:[#allocation1] ss:$4 sm:$0xff] %v6490_v37 }
 0x6d4   : > { %6496 = vst [vmem:[#allocation1 + $0x1] ss:$4 sm:$0xff] %v6491_v34 }
 0x6d5   : > { %6484 = vmatmul.bf16.vlgmr.msra.gmra.mxu0 %v6411_v35 }
 0x6db   : > { %v6497_v45 = vld.sshfl [vmem:[#allocation1] sm:$0xff pattern:$0x73625140] }
 0x6dc   : > { %v6499_v59 = vpack.c.bf16 %v6497_v45, %v6497_v45  ;;  %6582 = vst [vmem:[#allocation1] ss:$4 sm:$0xff] %v6578_v27 }
 0x6dd   : > { %6584 = vst [vmem:[#allocation1 + $0x1] ss:$4 sm:$0xff] %v6579_v18 }
 0x6de   : > { %6572 = vmatmul.bf16.vlgmr.msrb.gmra.mxu1 %v6499_v59 }
 0x6e4   : > { %v6585_v58 = vld.sshfl [vmem:[#allocation1] sm:$0xff pattern:$0x73625140] }
 0x6e5   : > { %v6587_v47 = vpack.c.bf16 %v6585_v58, %v6585_v58  ;;  %6670 = vst [vmem:[#allocation1] ss:$4 sm:$0xff] %v6666_v15 }
 0x6e6   : > { %6672 = vst [vmem:[#allocation1 + $0x1] ss:$4 sm:$0xff] %v6667_v9 }
 0x6e7   : > { %6660 = vmatmul.bf16.vlgmr.msra.gmra.mxu2 %v6587_v47 }
 0x6ed   : > { %v6673_v8 = vld.sshfl [vmem:[#allocation1] sm:$0xff pattern:$0x73625140] }
 0x6ee   : > { %v6675_v20 = vpack.c.bf16 %v6673_v8, %v6673_v8 }
 0x6f0   : > { %6748 = vmatmul.bf16.vlgmr.msra.gmra.mxu3 %v6675_v20 }
 0x725   : > { %v6134_v17 = vpop.f32.mrf.mxu0 }
 0x72d   : > { %v6136_v23 = vpop.f32.mrf.mxu0 }
 0x734   : > { %v6073_v60 = vpop.f32.mrf.mxu3 }
 0x735   : > { %v6135_v19 = vadd.f32 %v6134_v17, %v6073_v60 }
 0x737   : > { %v6221_v11 = vpop.f32.mrf.mxu1 }
 0x738   : > { %v6225_v12 = vadd.f32 %v6221_v11, %v6135_v19 }
 0x73c   : > { %v6075_v32 = vpop.f32.mrf.mxu3 }
 0x73f   : > { %v6223_v46 = vpop.f32.mrf.mxu1 }
 0x746   : > { %v6309_v38 = vpop.f32.mrf.mxu2 }
 0x747   : > { %v6313_v40 = vadd.f32 %v6309_v38, %v6225_v12 }
 0x74e   : > { %v6311_v43 = vpop.f32.mrf.mxu2 }
 0x74f   : > { %v6397_v48 = vpop.f32.mrf.mxu3 }
 0x750   : > { %v6401_v54 = vadd.f32 %v6397_v48, %v6313_v40 }
 0x752   : > { %v6485_v2 = vpop.f32.mrf.mxu0 }
 0x753   : > { %v6489_v28 = vadd.f32 %v6485_v2, %v6401_v54 }
 0x757   : > { %v6399_v50 = vpop.f32.mrf.mxu3 }
 0x75a   : > { %v6487_v31 = vpop.f32.mrf.mxu0 }
 0x75b   : > { %v6573_v41 = vpop.f32.mrf.mxu1 }
 0x75c   : > { %v6577_v63 = vadd.f32 %v6573_v41, %v6489_v28 }
 0x763   : > { %v6575_v6 = vpop.f32.mrf.mxu1 }
 0x76a   : > { %v6661_v21 = vpop.f32.mrf.mxu2 }
 0x76b   : > { %v6665_v5 = vadd.f32 %v6661_v21, %v6577_v63 }
 0x772   : > { %v6663_v3 = vpop.f32.mrf.mxu2 }
 0x773   : > { %v6749_v13 = vpop.f32.mrf.mxu3 }
 0x774   : > { %v6753_v25 = vadd.f32 %v6749_v13, %v6665_v5 }
 0x776   : > { %v6756_v49 = vmul.f32 %v9179_v44, %v6753_v25 }
 0x778   : > { %v6759_v7 = vadd.f32 %v9180_v53, %v6756_v49 }
 0x77a   : > { %v6761_v51 = vrot.slane %v6759_v7, 2  ;;  %v6779_v24 = vadd.f32 %v12208_v10, %v6759_v7  ;;  %v6806_v10 = vld [vmem:[%s12400_s8] sm:$0x1] }
 0x77b   : > { %v6751_v36 = vpop.f32.mrf.mxu3 }
 0x77c   : > { %v6780_v42 = vadd.f32 %v12227_v52, %v6761_v51  ;;  %v6781_v39 = vmax.f32 %v6779_v24, 0.0 }
 0x77e   : > { %v6782_v57 = vmax.f32 %v6780_v42, 0.0 }
 0x780   : > { %v6783_v0 = vmax.f32 %v6781_v39, %v6782_v57 }
 0x782   : > { %v8779_v30 = vrot.slane %v6783_v0, 9 }
 0x784   : > { %v6788_v56 = vmax.f32 %v6783_v0, %v8779_v30 }
 0x786   : > { %v6789_v16 = vpack.c.bf16 %v6788_v56, %v6788_v56 }
 0x788   : > { %6863 = vmatmul.bf16.vlgmr.msrb.gmra.mxu0 %v6789_v16 }
 0x805   : > { %v6864_v52 = vpop.f32.mrf.mxu0 }
 0x806   : > { %v6865_v62 = vadd.f32 %v6864_v52, %v6806_v10 }
 0x808   : > { %6868 = vst [vmem:[%s324_s28] sm:$0x1] %v6865_v62 }
 0x809   : > { %9216 = shalt.err (!%p9213_p3)
}
 0x80a   : > { %9129 = dma.vmem_to_hbm [thread:$0]  (%p9345_p5), %s6881_s29, 16, %s6883_s14, %s6870_s17  }
 0x80d   : > { %v6866_v34 = vpop.f32.mrf.mxu0 }
 0x80e PF: > { %p9135_p4 = scmp.ge.s32.totalorder %s9251_s12, 2  ;;  %s6894_s22 = sand.u32 1, %s9239_s30  }
 0x80f   : > { %s6895_s25 = scalar_lea.sflag [#allocation4], %s6894_s22 }
 0x810   : > { %p9132_p7 = pnand %p9135_p4, %p9349_p6 }
 0x812   : > { %p9133_p8 = pneg %p9132_p7 }
 0x814   : > { %9234 = dma.done.wait (%p9133_p8), %s6895_s25, 16  }
 0x815   : > { %9236 = vsyncadd (%p9133_p8), %s6895_s25, 4294967280  ;;  %p19_p9 = scmp.ge.s32.totalorder %s9332_s15, 4   ;;  %s12820_s30 = smov %s9243_s10 }
 0x816   : > { %s12821_s10 = smov %s9247_s11  ;;  %s12822_s11 = smov %s9343_s18 }
 0x817   : > { %s12823_s12 = smov %s9332_s15  ;;  %21 = sbr.rel (!%p19_p9) target bundleno = 3 (0x3), region = 137 }
 0x81c   :  { %6900 = vsyncpa [#allocation4], 1 }
 0x81d   :  { %6902 = vsyncpa [#allocation4 + $0x1], 1 }

</bundles_post_ra>
